<compile_context>
chip_gen: v7x
topology: tpu7x:2x2x1
jax: 0.10.0
libtpu: 0.0.40
codegen_flags: <defaults>
</compile_context>

<pallas_src>
import math

import jax
import jax.numpy as jnp
from jax.experimental import pallas as pl
from jax.experimental.pallas import tpu as pltpu

HIDDEN = 3      # forced by ht.reshape(B, 3, 1)
SEQ_LEN = 12    # forced by fc1 in_features == 11 == T - 1


# ----------------------------------------------------------------------------
# Kernel.  Every activation is (features, batch_tile): batch lives on lanes.
# Gate rows are pre-ordered (i, f, o, g) so one sigmoid covers rows 0:9.
# ----------------------------------------------------------------------------
def tpa_kernel(x_ref,                        # (Din, T*TB)  bf16, columns (t, b)
               wih0_ref, b0_ref, whh0_ref,   # (4H,Din) bf16, (4H,1) f32, (4H,H) f32
               wih1_ref, b1_ref, whh1_ref,   # (4H,H) f32,  (4H,1) f32, (4H,H) f32
               wf1_ref, bf1_ref,             # (H*K,(T-1)*H) bf16, (H*K,1) f32
               wf2_ref, bf2_ref,             # (H*H,H*K)   bf16, (H*H,1) f32
               f3v_ref, f3h_ref, f3b_ref,    # (out,K) bf16, (out,H) bf16, (out,1) f32
               out_ref,                      # (out, TB)   f32
               h2s_ref):                     # scratch ((T-1)*H, TB) f32
    TB = out_ref.shape[1]
    H = whh0_ref.shape[1]           # 3
    G = whh0_ref.shape[0]           # 4*H = 12
    S = G - H                       # 9 sigmoid rows (i, f, o)
    T = x_ref.shape[1] // TB        # 12
    K = f3v_ref.shape[1]

    # ---- layer-0 input projections (+ bias) for ALL steps: one small MXU dot.
    g0_all = jnp.dot(wih0_ref[...], x_ref[...],
                     preferred_element_type=jnp.float32) + b0_ref[...]   # (G, T*TB)

    # ---- hoist lane-broadcasts of the tiny weight columns / bias out of the loop
    # (JAX does not CSE broadcast_in_dim; re-emitting them per step is costly).
    whh0_b = [jnp.broadcast_to(whh0_ref[:, j:j + 1], (G, TB)) for j in range(H)]
    whh1_b = [jnp.broadcast_to(whh1_ref[:, j:j + 1], (G, TB)) for j in range(H)]
    wih1_b = [jnp.broadcast_to(wih1_ref[:, j:j + 1], (G, TB)) for j in range(H)]
    b1b = jnp.broadcast_to(b1_ref[...], (G, TB))

    def mac(cols, h):
        # (G,H) @ (H,TB) as 3 f32 VPU broadcast-MACs (no MXU op on the chain).
        r = cols[0] * h[0:1, :]
        for j in range(1, H):
            r = r + cols[j] * h[j:j + 1, :]
        return r

    def cell(g, c):
        # rows ordered (i, f, o, g): one sigmoid over 9 rows, one tanh over 3.
        sg = jax.nn.sigmoid(g[:S, :])            # (9, TB)
        gg = jnp.tanh(g[S:, :])                  # (3, TB)
        ig = sg[0:H, :]
        fg = sg[H:2 * H, :]
        og = sg[2 * H:3 * H, :]
        c_new = fg * c + ig * gg
        h_new = og * jnp.tanh(c_new)
        return h_new, c_new

    zeros = jnp.zeros((H, TB), jnp.float32)
    h0, c0, h1, c1 = zeros, zeros, zeros, zeros
    ht = zeros

    # Software-pipelined recurrence: iteration t runs layer-0 step t and
    # layer-1 step t-1 (two independent EUP chains per iteration).
    for t in range(T + 1):
        if t >= 1:
            # layer-1 step t-1: input is h0 == layer-0 output at step t-1.
            g1 = b1b + mac(wih1_b, h0) + mac(whh1_b, h1)
            h1, c1 = cell(g1, c1)
            if t - 1 < T - 1:
                h2s_ref[(t - 1) * H:t * H, :] = h1    # store h1_{t-1}
            else:
                ht = h1                               # last hidden state
        if t < T:
            # layer-0 step t (uses the same pre-update h0 = h0_{t-1}).
            g0 = g0_all[:, t * TB:(t + 1) * TB] + mac(whh0_b, h0)
            h0, c0 = cell(g0, c0)

    # ---- temporal-pattern-attention head (vectorized over the H hidden units)
    hs = h2s_ref[...]                                                    # (33, TB)
    # hc[i*K + k, b] = sum_t fc1_w[k, t] * h1_t[i, b] + fc1_b[k]
    hc = jnp.dot(wf1_ref[...], hs.astype(jnp.bfloat16),
                 preferred_element_type=jnp.float32) + bf1_ref[...]      # (H*K, TB)
    # hn[i*H + j, b] = sum_k fc2_w[j, k] * hc[i*K + k, b] + fc2_b[j]
    hn = jnp.dot(wf2_ref[...], hc.astype(jnp.bfloat16),
                 preferred_element_type=jnp.float32) + bf2_ref[...]      # (H*H, TB)

    # a[i] = sigmoid(<Hn[i, :], ht>) ;  vt = sum_i a[i] * Hc[i, :]
    vt = jnp.zeros((K, TB), jnp.float32)
    for i in range(H):
        s = hn[i * H:i * H + 1, :] * ht[0:1, :]
        for j in range(1, H):
            s = s + hn[i * H + j:i * H + j + 1, :] * ht[j:j + 1, :]
        a = jax.nn.sigmoid(s)                                            # (1, TB)
        vt = vt + a * hc[i * K:(i + 1) * K, :]

    # y = [vt ; ht] @ fc3_w.T + fc3_b   (fc3 weight split in the wrapper)
    y = (jnp.dot(f3v_ref[...], vt.astype(jnp.bfloat16),
                 preferred_element_type=jnp.float32)
         + jnp.dot(f3h_ref[...], ht.astype(jnp.bfloat16),
                   preferred_element_type=jnp.float32)
         + f3b_ref[...])                                                 # (out, TB)
    out_ref[...] = y.astype(out_ref.dtype)


# ----------------------------------------------------------------------------
# Parameter construction / one-time layout transforms
# ----------------------------------------------------------------------------
def make_params(key, input_size, hidden_size, k, output_size):
    H = hidden_size

    def uniform(kk, shape, bound):
        return jax.random.uniform(kk, shape, jnp.float32, -bound, bound)

    keys = jax.random.split(key, 16)
    s = 1.0 / math.sqrt(H)
    p = {
        "w_ih0": uniform(keys[0], (4 * H, input_size), s),
        "w_hh0": uniform(keys[1], (4 * H, H), s),
        "b_ih0": uniform(keys[2], (4 * H,), s),
        "b_hh0": uniform(keys[3], (4 * H,), s),
        "w_ih1": uniform(keys[4], (4 * H, H), s),
        "w_hh1": uniform(keys[5], (4 * H, H), s),
        "b_ih1": uniform(keys[6], (4 * H,), s),
        "b_hh1": uniform(keys[7], (4 * H,), s),
    }
    s1 = 1.0 / math.sqrt(11)
    p["fc1_w"] = uniform(keys[8], (k, 11), s1)
    p["fc1_b"] = uniform(keys[9], (k,), s1)
    s2 = 1.0 / math.sqrt(k)
    p["fc2_w"] = uniform(keys[10], (3, k), s2)
    p["fc2_b"] = uniform(keys[11], (3,), s2)
    s3 = 1.0 / math.sqrt(k + 3)
    p["fc3_w"] = uniform(keys[12], (output_size, k + 3), s3)
    p["fc3_b"] = uniform(keys[13], (output_size,), s3)
    return p


def prepare_params(params):
    """One-time transform of PyTorch-layout parameters into the kernel layout."""
    f32, bf16 = jnp.float32, jnp.bfloat16
    H, T = HIDDEN, SEQ_LEN

    def reorder(a):
        # PyTorch gate row order (i, f, g, o) -> kernel order (i, f, o, g)
        return jnp.concatenate([a[:2 * H], a[3 * H:4 * H], a[2 * H:3 * H]], axis=0)

    wih0 = reorder(params["w_ih0"].astype(f32))                 # (4H, Din)
    whh0 = reorder(params["w_hh0"].astype(f32))                 # (4H, H)
    b0 = reorder((params["b_ih0"] + params["b_hh0"]).astype(f32))
    wih1 = reorder(params["w_ih1"].astype(f32))                 # (4H, H)
    whh1 = reorder(params["w_hh1"].astype(f32))                 # (4H, H)
    b1 = reorder((params["b_ih1"] + params["b_hh1"]).astype(f32))

    fc1_w = params["fc1_w"].astype(f32)                         # (K, T-1)
    fc2_w = params["fc2_w"].astype(f32)                         # (H, K)
    fc3_w = params["fc3_w"].astype(f32)                         # (out, K+H)
    K = fc1_w.shape[0]

    # wf1[i*K + k, t*H + j] = fc1_w[k, t] if j == i else 0  (fc1 over all H units)
    wf1 = jnp.zeros((H, K, T - 1, H), f32)
    for i in range(H):
        wf1 = wf1.at[i, :, :, i].set(fc1_w)
    wf1 = wf1.reshape(H * K, (T - 1) * H).astype(bf16)
    wf2 = jnp.kron(jnp.eye(H, dtype=f32), fc2_w).astype(bf16)   # (H*H, H*K)

    return dict(
        wih0=wih0.astype(bf16), b0=b0[:, None], whh0=whh0,
        wih1=wih1, b1=b1[:, None], whh1=whh1,
        wf1=wf1, bf1=jnp.tile(params["fc1_b"].astype(f32), H)[:, None],
        wf2=wf2, bf2=jnp.tile(params["fc2_b"].astype(f32), H)[:, None],
        fc3_wv=fc3_w[:, :K].astype(bf16),
        fc3_wh=fc3_w[:, K:].astype(bf16),
        fc3_b=params["fc3_b"].astype(f32)[:, None],
    )


def _round_up(a, m):
    return (a + m - 1) // m * m


def _default_num_tiles():
    """One tile on single-TensorCore chips; 2 balanced 'parallel' tiles on
    chips with 2 TensorCores per device (v7x / megacore) so both get work."""
    try:
        kind = jax.devices()[0].device_kind.lower()
    except Exception:
        return 1
    if any(tag in kind for tag in ("v7", "v4", "v5p")):
        return 2
    return 1


def tpa_forward(x, prep, output_size, batch_tile=None, num_tiles=None):
    B, T, Din = x.shape
    assert T == SEQ_LEN, "fc1 in_features=11 requires seq_len == 12"

    MAX_TB = 8192     # live VMEM ~1.5 KB per batch element -> well under limits
    if num_tiles is None:
        num_tiles = _default_num_tiles()
    if batch_tile is None:
        tb = min(MAX_TB, _round_up(-(-_round_up(B, 128) // num_tiles), 128))
    else:
        tb = _round_up(batch_tile, 128)
    Bp = _round_up(B, tb)
    nb = Bp // tb

    # Lane-major, batch-on-lanes layout: per tile (Din, T*tb), column = t*tb + b.
    xp = jnp.pad(x.astype(jnp.bfloat16), ((0, Bp - B), (0, 0), (0, 0)))
    x_lm = (xp.reshape(nb, tb, T, Din)
              .transpose(3, 0, 2, 1)            # (Din, nb, T, tb)
              .reshape(Din, nb * T * tb))

    weights = (prep["wih0"], prep["b0"], prep["whh0"],
               prep["wih1"], prep["b1"], prep["whh1"],
               prep["wf1"], prep["bf1"], prep["wf2"], prep["bf2"],
               prep["fc3_wv"], prep["fc3_wh"], prep["fc3_b"])
    out_dim = prep["fc3_b"].shape[0]
    assert out_dim == output_size

    in_specs = ([pl.BlockSpec((Din, T * tb), lambda b: (0, b))] +
                [pl.BlockSpec(w.shape, lambda b: (0, 0)) for w in weights])
    out_specs = pl.BlockSpec((out_dim, tb), lambda b: (0, b))

    yT = pl.pallas_call(
        tpa_kernel,
        out_shape=jax.ShapeDtypeStruct((out_dim, Bp), jnp.float32),
        grid=(nb,),
        in_specs=in_specs,
        out_specs=out_specs,
        scratch_shapes=[pltpu.VMEM(((T - 1) * HIDDEN, tb), jnp.float32)],
        compiler_params=pltpu.CompilerParams(
            dimension_semantics=("parallel",),        # megacore / v7x batch split
            vmem_limit_bytes=48 * 1024 * 1024),       # safe on v7x's 64 MiB VMEM
    )(x_lm, *weights)

    y = jnp.transpose(yT[:, :B])                      # (B, out)
    # torch.squeeze(dim=2): removes the trailing dim only when output_size == 1.
    return y if output_size == 1 else y[:, None, :]


# ----------------------------------------------------------------------------
# Pure-JAX replica of the PyTorch forward (validation only, float32)
# ----------------------------------------------------------------------------
def tpa_reference(x, params):
    B, T, _ = x.shape
    H = HIDDEN

    def lstm_layer(seq, w_ih, w_hh, b_ih, b_hh):
        h = jnp.zeros((B, H)); c = jnp.zeros((B, H))
        outs = []
        for t in range(T):
            g = seq[:, t, :] @ w_ih.T + h @ w_hh.T + b_ih + b_hh
            i = jax.nn.sigmoid(g[:, :H]); f = jax.nn.sigmoid(g[:, H:2 * H])
            gg = jnp.tanh(g[:, 2 * H:3 * H]); o = jax.nn.sigmoid(g[:, 3 * H:])
            c = f * c + i * gg
            h = o * jnp.tanh(c)
            outs.append(h)
        return jnp.stack(outs, axis=1)

    h1 = lstm_layer(x, params["w_ih0"], params["w_hh0"], params["b_ih0"], params["b_hh0"])
    h2 = lstm_layer(h1, params["w_ih1"], params["w_hh1"], params["b_ih1"], params["b_hh1"])
    ht = h2[:, -1, :]
    hw = jnp.transpose(h2[:, :-1, :], (0, 2, 1))                  # (B, 3, 11)
    Hc = hw @ params["fc1_w"].T + params["fc1_b"]                 # (B, 3, k)
    Hn = Hc @ params["fc2_w"].T + params["fc2_b"]                 # (B, 3, 3)
    a = jax.nn.sigmoid(Hn @ ht[:, :, None])                       # (B, 3, 1)
    a = jnp.transpose(a, (0, 2, 1))                               # (B, 1, 3)
    vt = a @ Hc                                                   # (B, 1, k)
    hx = jnp.concatenate([vt, ht[:, None, :]], axis=2)            # (B, 1, k+3)
    y = hx @ params["fc3_w"].T + params["fc3_b"]                  # (B, 1, out)
    return jnp.squeeze(y, axis=2) if y.shape[2] == 1 else y


if __name__ == "__main__":
    input_size, hidden_size, k, output_size = 7, HIDDEN, 8, 1
    B = 300                        # exercises batch padding (not a 128 multiple)

    key = jax.random.PRNGKey(0)
    kx, kp = jax.random.split(key)
    x = jax.random.normal(kx, (B, SEQ_LEN, input_size), jnp.float32)
    params = make_params(kp, input_size, hidden_size, k, output_size)
    prep = prepare_params(params)

    y_ref = tpa_reference(x, params)

    # Default tiling (single big tile on v5e/v6e, two balanced tiles on 2-TC chips).
    y = jax.block_until_ready(tpa_forward(x, prep, output_size))
    assert y.shape == y_ref.shape, (y.shape, y_ref.shape)
    # MXU operands are bf16 (f32 accumulation; the recurrence itself is f32 VPU),
    # so compare at a bf16-level tolerance against the f32 reference.
    assert jnp.allclose(y, y_ref, rtol=3e-2, atol=3e-2)

    # Explicit multi-tile grid (exercises grid > 1 and the padded-batch path).
    y2 = jax.block_until_ready(tpa_forward(x, prep, output_size, batch_tile=128))
    assert jnp.allclose(y2, y_ref, rtol=3e-2, atol=3e-2)

    print("KERNEL_OK")
</pallas_src>

<mosaic_0001>
module attributes {stable_mosaic.version = 11 : i64} {
  func.func @tpa_kernel(%arg0: i32, %arg1: memref<7x4608xbf16, #tpu.memory_space<vmem>>, %arg2: memref<12x7xbf16, #tpu.memory_space<vmem>>, %arg3: memref<12x1xf32, #tpu.memory_space<vmem>>, %arg4: memref<12x3xf32, #tpu.memory_space<vmem>>, %arg5: memref<12x3xf32, #tpu.memory_space<vmem>>, %arg6: memref<12x1xf32, #tpu.memory_space<vmem>>, %arg7: memref<12x3xf32, #tpu.memory_space<vmem>>, %arg8: memref<24x33xbf16, #tpu.memory_space<vmem>>, %arg9: memref<24x1xf32, #tpu.memory_space<vmem>>, %arg10: memref<9x24xbf16, #tpu.memory_space<vmem>>, %arg11: memref<9x1xf32, #tpu.memory_space<vmem>>, %arg12: memref<1x8xbf16, #tpu.memory_space<vmem>>, %arg13: memref<1x3xbf16, #tpu.memory_space<vmem>>, %arg14: memref<1x1xf32, #tpu.memory_space<vmem>>, %arg15: memref<1x384xf32, #tpu.memory_space<vmem>>, %arg16: memref<33x384xf32, #tpu.memory_space<vmem>>) attributes {dimension_semantics = [#tpu.dimension_semantics<parallel>], iteration_bounds = array<i64: 1>, scalar_prefetch = 0 : i64, scratch_operands = 1 : i64, tpu.core_type = #tpu.core_type<tc>, window_params = [{transform_indices = @transform_0, window_bounds = array<i64: 7, 4608>}, {pipeline_mode = #tpu.pipeline_mode<synchronous>, transform_indices = @transform_1, window_bounds = array<i64: 12, 7>}, {pipeline_mode = #tpu.pipeline_mode<synchronous>, transform_indices = @transform_2, window_bounds = array<i64: 12, 1>}, {pipeline_mode = #tpu.pipeline_mode<synchronous>, transform_indices = @transform_3, window_bounds = array<i64: 12, 3>}, {pipeline_mode = #tpu.pipeline_mode<synchronous>, transform_indices = @transform_4, window_bounds = array<i64: 12, 3>}, {pipeline_mode = #tpu.pipeline_mode<synchronous>, transform_indices = @transform_5, window_bounds = array<i64: 12, 1>}, {pipeline_mode = #tpu.pipeline_mode<synchronous>, transform_indices = @transform_6, window_bounds = array<i64: 12, 3>}, {pipeline_mode = #tpu.pipeline_mode<synchronous>, transform_indices = @transform_7, window_bounds = array<i64: 24, 33>}, {pipeline_mode = #tpu.pipeline_mode<synchronous>, transform_indices = @transform_8, window_bounds = array<i64: 24, 1>}, {pipeline_mode = #tpu.pipeline_mode<synchronous>, transform_indices = @transform_9, window_bounds = array<i64: 9, 24>}, {pipeline_mode = #tpu.pipeline_mode<synchronous>, transform_indices = @transform_10, window_bounds = array<i64: 9, 1>}, {pipeline_mode = #tpu.pipeline_mode<synchronous>, transform_indices = @transform_11, window_bounds = array<i64: 1, 8>}, {pipeline_mode = #tpu.pipeline_mode<synchronous>, transform_indices = @transform_12, window_bounds = array<i64: 1, 3>}, {pipeline_mode = #tpu.pipeline_mode<synchronous>, transform_indices = @transform_13, window_bounds = array<i64: 1, 1>}, {transform_indices = @transform_14, window_bounds = array<i64: 1, 384>}]} {
    %c0 = arith.constant 0 : index
    %c0_0 = arith.constant 0 : index
    %0 = vector.load %arg2[%c0, %c0_0] : memref<12x7xbf16, #tpu.memory_space<vmem>>, vector<12x7xbf16>
    %c0_1 = arith.constant 0 : index
    %c0_2 = arith.constant 0 : index
    %1 = vector.load %arg1[%c0_1, %c0_2] : memref<7x4608xbf16, #tpu.memory_space<vmem>>, vector<7x4608xbf16>
    %cst = arith.constant dense<0.000000e+00> : vector<12x4608xf32>
    %2 = tpu.matmul %0, %1, %cst {dimension_numbers = #tpu.dot_dimension_numbers<[1], [0], [0], [1], [0, 0, 1, 1], [], []>} : vector<12x7xbf16>, vector<7x4608xbf16>, vector<12x4608xf32> -> vector<12x4608xf32>
    %c0_3 = arith.constant 0 : index
    %c0_4 = arith.constant 0 : index
    %3 = vector.load %arg3[%c0_3, %c0_4] : memref<12x1xf32, #tpu.memory_space<vmem>>, vector<12x1xf32>
    %4 = vector.broadcast %3 : vector<12x1xf32> to vector<12x4608xf32>
    %5 = arith.addf %2, %4 : vector<12x4608xf32>
    %c0_5 = arith.constant 0 : index
    %c0_6 = arith.constant 0 : index
    %6 = vector.load %arg4[%c0_5, %c0_6] : memref<12x3xf32, #tpu.memory_space<vmem>>, vector<12x1xf32>
    %7 = vector.shape_cast %6 : vector<12x1xf32> to vector<12x1xf32>
    %8 = vector.broadcast %7 : vector<12x1xf32> to vector<12x384xf32>
    %c0_7 = arith.constant 0 : index
    %c1 = arith.constant 1 : index
    %9 = vector.load %arg4[%c0_7, %c1] : memref<12x3xf32, #tpu.memory_space<vmem>>, vector<12x1xf32>
    %10 = vector.shape_cast %9 : vector<12x1xf32> to vector<12x1xf32>
    %11 = vector.broadcast %10 : vector<12x1xf32> to vector<12x384xf32>
    %c0_8 = arith.constant 0 : index
    %c2 = arith.constant 2 : index
    %12 = vector.load %arg4[%c0_8, %c2] : memref<12x3xf32, #tpu.memory_space<vmem>>, vector<12x1xf32>
    %13 = vector.shape_cast %12 : vector<12x1xf32> to vector<12x1xf32>
    %14 = vector.broadcast %13 : vector<12x1xf32> to vector<12x384xf32>
    %c0_9 = arith.constant 0 : index
    %c0_10 = arith.constant 0 : index
    %15 = vector.load %arg7[%c0_9, %c0_10] : memref<12x3xf32, #tpu.memory_space<vmem>>, vector<12x1xf32>
    %16 = vector.shape_cast %15 : vector<12x1xf32> to vector<12x1xf32>
    %17 = vector.broadcast %16 : vector<12x1xf32> to vector<12x384xf32>
    %c0_11 = arith.constant 0 : index
    %c1_12 = arith.constant 1 : index
    %18 = vector.load %arg7[%c0_11, %c1_12] : memref<12x3xf32, #tpu.memory_space<vmem>>, vector<12x1xf32>
    %19 = vector.shape_cast %18 : vector<12x1xf32> to vector<12x1xf32>
    %20 = vector.broadcast %19 : vector<12x1xf32> to vector<12x384xf32>
    %c0_13 = arith.constant 0 : index
    %c2_14 = arith.constant 2 : index
    %21 = vector.load %arg7[%c0_13, %c2_14] : memref<12x3xf32, #tpu.memory_space<vmem>>, vector<12x1xf32>
    %22 = vector.shape_cast %21 : vector<12x1xf32> to vector<12x1xf32>
    %23 = vector.broadcast %22 : vector<12x1xf32> to vector<12x384xf32>
    %c0_15 = arith.constant 0 : index
    %c0_16 = arith.constant 0 : index
    %24 = vector.load %arg5[%c0_15, %c0_16] : memref<12x3xf32, #tpu.memory_space<vmem>>, vector<12x1xf32>
    %25 = vector.shape_cast %24 : vector<12x1xf32> to vector<12x1xf32>
    %26 = vector.broadcast %25 : vector<12x1xf32> to vector<12x384xf32>
    %c0_17 = arith.constant 0 : index
    %c1_18 = arith.constant 1 : index
    %27 = vector.load %arg5[%c0_17, %c1_18] : memref<12x3xf32, #tpu.memory_space<vmem>>, vector<12x1xf32>
    %28 = vector.shape_cast %27 : vector<12x1xf32> to vector<12x1xf32>
    %29 = vector.broadcast %28 : vector<12x1xf32> to vector<12x384xf32>
    %c0_19 = arith.constant 0 : index
    %c2_20 = arith.constant 2 : index
    %30 = vector.load %arg5[%c0_19, %c2_20] : memref<12x3xf32, #tpu.memory_space<vmem>>, vector<12x1xf32>
    %31 = vector.shape_cast %30 : vector<12x1xf32> to vector<12x1xf32>
    %32 = vector.broadcast %31 : vector<12x1xf32> to vector<12x384xf32>
    %c0_21 = arith.constant 0 : index
    %c0_22 = arith.constant 0 : index
    %33 = vector.load %arg6[%c0_21, %c0_22] : memref<12x1xf32, #tpu.memory_space<vmem>>, vector<12x1xf32>
    %34 = vector.shape_cast %33 : vector<12x1xf32> to vector<12x1xf32>
    %35 = vector.broadcast %34 : vector<12x1xf32> to vector<12x384xf32>
    %cst_23 = arith.constant 0.000000e+00 : f32
    %36 = vector.broadcast %cst_23 : f32 to vector<3x384xf32>
    %37 = vector.extract_strided_slice %5 {offsets = [0, 0], sizes = [12, 384], strides = [1, 1]} : vector<12x4608xf32> to vector<12x384xf32>
    %38 = vector.extract_strided_slice %36 {offsets = [0, 0], sizes = [1, 384], strides = [1, 1]} : vector<3x384xf32> to vector<1x384xf32>
    %39 = vector.broadcast %38 : vector<1x384xf32> to vector<12x384xf32>
    %40 = arith.mulf %8, %39 : vector<12x384xf32>
    %41 = vector.extract_strided_slice %36 {offsets = [1, 0], sizes = [1, 384], strides = [1, 1]} : vector<3x384xf32> to vector<1x384xf32>
    %42 = vector.broadcast %41 : vector<1x384xf32> to vector<12x384xf32>
    %43 = arith.mulf %11, %42 : vector<12x384xf32>
    %44 = arith.addf %40, %43 : vector<12x384xf32>
    %45 = vector.extract_strided_slice %36 {offsets = [2, 0], sizes = [1, 384], strides = [1, 1]} : vector<3x384xf32> to vector<1x384xf32>
    %46 = vector.broadcast %45 : vector<1x384xf32> to vector<12x384xf32>
    %47 = arith.mulf %14, %46 : vector<12x384xf32>
    %48 = arith.addf %44, %47 : vector<12x384xf32>
    %49 = arith.addf %37, %48 : vector<12x384xf32>
    %50 = vector.extract_strided_slice %49 {offsets = [0, 0], sizes = [9, 384], strides = [1, 1]} : vector<12x384xf32> to vector<9x384xf32>
    %51 = arith.negf %50 : vector<9x384xf32>
    %52 = math.exp %51 : vector<9x384xf32>
    %cst_24 = arith.constant 1.000000e+00 : f32
    %53 = vector.broadcast %cst_24 : f32 to vector<9x384xf32>
    %54 = arith.addf %53, %52 : vector<9x384xf32>
    %55 = arith.divf %53, %54 : vector<9x384xf32>
    %56 = vector.extract_strided_slice %49 {offsets = [9, 0], sizes = [3, 384], strides = [1, 1]} : vector<12x384xf32> to vector<3x384xf32>
    %57 = math.tanh %56 : vector<3x384xf32>
    %58 = vector.extract_strided_slice %55 {offsets = [0, 0], sizes = [3, 384], strides = [1, 1]} : vector<9x384xf32> to vector<3x384xf32>
    %59 = vector.extract_strided_slice %55 {offsets = [3, 0], sizes = [3, 384], strides = [1, 1]} : vector<9x384xf32> to vector<3x384xf32>
    %60 = vector.extract_strided_slice %55 {offsets = [6, 0], sizes = [3, 384], strides = [1, 1]} : vector<9x384xf32> to vector<3x384xf32>
    %61 = arith.mulf %59, %36 : vector<3x384xf32>
    %62 = arith.mulf %58, %57 : vector<3x384xf32>
    %63 = arith.addf %61, %62 : vector<3x384xf32>
    %64 = math.tanh %63 : vector<3x384xf32>
    %65 = arith.mulf %60, %64 : vector<3x384xf32>
    %66 = vector.extract_strided_slice %65 {offsets = [0, 0], sizes = [1, 384], strides = [1, 1]} : vector<3x384xf32> to vector<1x384xf32>
    %67 = vector.broadcast %66 : vector<1x384xf32> to vector<12x384xf32>
    %68 = arith.mulf %26, %67 : vector<12x384xf32>
    %69 = vector.extract_strided_slice %65 {offsets = [1, 0], sizes = [1, 384], strides = [1, 1]} : vector<3x384xf32> to vector<1x384xf32>
    %70 = vector.broadcast %69 : vector<1x384xf32> to vector<12x384xf32>
    %71 = arith.mulf %29, %70 : vector<12x384xf32>
    %72 = arith.addf %68, %71 : vector<12x384xf32>
    %73 = vector.extract_strided_slice %65 {offsets = [2, 0], sizes = [1, 384], strides = [1, 1]} : vector<3x384xf32> to vector<1x384xf32>
    %74 = vector.broadcast %73 : vector<1x384xf32> to vector<12x384xf32>
    %75 = arith.mulf %32, %74 : vector<12x384xf32>
    %76 = arith.addf %72, %75 : vector<12x384xf32>
    %77 = arith.addf %35, %76 : vector<12x384xf32>
    %78 = vector.extract_strided_slice %36 {offsets = [0, 0], sizes = [1, 384], strides = [1, 1]} : vector<3x384xf32> to vector<1x384xf32>
    %79 = vector.broadcast %78 : vector<1x384xf32> to vector<12x384xf32>
    %80 = arith.mulf %17, %79 : vector<12x384xf32>
    %81 = vector.extract_strided_slice %36 {offsets = [1, 0], sizes = [1, 384], strides = [1, 1]} : vector<3x384xf32> to vector<1x384xf32>
    %82 = vector.broadcast %81 : vector<1x384xf32> to vector<12x384xf32>
    %83 = arith.mulf %20, %82 : vector<12x384xf32>
    %84 = arith.addf %80, %83 : vector<12x384xf32>
    %85 = vector.extract_strided_slice %36 {offsets = [2, 0], sizes = [1, 384], strides = [1, 1]} : vector<3x384xf32> to vector<1x384xf32>
    %86 = vector.broadcast %85 : vector<1x384xf32> to vector<12x384xf32>
    %87 = arith.mulf %23, %86 : vector<12x384xf32>
    %88 = arith.addf %84, %87 : vector<12x384xf32>
    %89 = arith.addf %77, %88 : vector<12x384xf32>
    %90 = vector.extract_strided_slice %89 {offsets = [0, 0], sizes = [9, 384], strides = [1, 1]} : vector<12x384xf32> to vector<9x384xf32>
    %91 = arith.negf %90 : vector<9x384xf32>
    %92 = math.exp %91 : vector<9x384xf32>
    %cst_25 = arith.constant 1.000000e+00 : f32
    %93 = vector.broadcast %cst_25 : f32 to vector<9x384xf32>
    %94 = arith.addf %93, %92 : vector<9x384xf32>
    %95 = arith.divf %93, %94 : vector<9x384xf32>
    %96 = vector.extract_strided_slice %89 {offsets = [9, 0], sizes = [3, 384], strides = [1, 1]} : vector<12x384xf32> to vector<3x384xf32>
    %97 = math.tanh %96 : vector<3x384xf32>
    %98 = vector.extract_strided_slice %95 {offsets = [0, 0], sizes = [3, 384], strides = [1, 1]} : vector<9x384xf32> to vector<3x384xf32>
    %99 = vector.extract_strided_slice %95 {offsets = [3, 0], sizes = [3, 384], strides = [1, 1]} : vector<9x384xf32> to vector<3x384xf32>
    %100 = vector.extract_strided_slice %95 {offsets = [6, 0], sizes = [3, 384], strides = [1, 1]} : vector<9x384xf32> to vector<3x384xf32>
    %101 = arith.mulf %99, %36 : vector<3x384xf32>
    %102 = arith.mulf %98, %97 : vector<3x384xf32>
    %103 = arith.addf %101, %102 : vector<3x384xf32>
    %104 = math.tanh %103 : vector<3x384xf32>
    %105 = arith.mulf %100, %104 : vector<3x384xf32>
    %c0_26 = arith.constant 0 : index
    %c0_27 = arith.constant 0 : index
    %106 = vector.load %arg16[%c0_26, %c0_27] : memref<33x384xf32, #tpu.memory_space<vmem>>, vector<3x384xf32>
    tpu.vector_store %arg16[%c0_26, %c0_27], %105 {strides = array<i32>} : memref<33x384xf32, #tpu.memory_space<vmem>>, vector<3x384xf32>,
    %107 = vector.extract_strided_slice %5 {offsets = [0, 384], sizes = [12, 384], strides = [1, 1]} : vector<12x4608xf32> to vector<12x384xf32>
    %108 = vector.extract_strided_slice %65 {offsets = [0, 0], sizes = [1, 384], strides = [1, 1]} : vector<3x384xf32> to vector<1x384xf32>
    %109 = vector.broadcast %108 : vector<1x384xf32> to vector<12x384xf32>
    %110 = arith.mulf %8, %109 : vector<12x384xf32>
    %111 = vector.extract_strided_slice %65 {offsets = [1, 0], sizes = [1, 384], strides = [1, 1]} : vector<3x384xf32> to vector<1x384xf32>
    %112 = vector.broadcast %111 : vector<1x384xf32> to vector<12x384xf32>
    %113 = arith.mulf %11, %112 : vector<12x384xf32>
    %114 = arith.addf %110, %113 : vector<12x384xf32>
    %115 = vector.extract_strided_slice %65 {offsets = [2, 0], sizes = [1, 384], strides = [1, 1]} : vector<3x384xf32> to vector<1x384xf32>
    %116 = vector.broadcast %115 : vector<1x384xf32> to vector<12x384xf32>
    %117 = arith.mulf %14, %116 : vector<12x384xf32>
    %118 = arith.addf %114, %117 : vector<12x384xf32>
    %119 = arith.addf %107, %118 : vector<12x384xf32>
    %120 = vector.extract_strided_slice %119 {offsets = [0, 0], sizes = [9, 384], strides = [1, 1]} : vector<12x384xf32> to vector<9x384xf32>
    %121 = arith.negf %120 : vector<9x384xf32>
    %122 = math.exp %121 : vector<9x384xf32>
    %cst_28 = arith.constant 1.000000e+00 : f32
    %123 = vector.broadcast %cst_28 : f32 to vector<9x384xf32>
    %124 = arith.addf %123, %122 : vector<9x384xf32>
    %125 = arith.divf %123, %124 : vector<9x384xf32>
    %126 = vector.extract_strided_slice %119 {offsets = [9, 0], sizes = [3, 384], strides = [1, 1]} : vector<12x384xf32> to vector<3x384xf32>
    %127 = math.tanh %126 : vector<3x384xf32>
    %128 = vector.extract_strided_slice %125 {offsets = [0, 0], sizes = [3, 384], strides = [1, 1]} : vector<9x384xf32> to vector<3x384xf32>
    %129 = vector.extract_strided_slice %125 {offsets = [3, 0], sizes = [3, 384], strides = [1, 1]} : vector<9x384xf32> to vector<3x384xf32>
    %130 = vector.extract_strided_slice %125 {offsets = [6, 0], sizes = [3, 384], strides = [1, 1]} : vector<9x384xf32> to vector<3x384xf32>
    %131 = arith.mulf %129, %63 : vector<3x384xf32>
    %132 = arith.mulf %128, %127 : vector<3x384xf32>
    %133 = arith.addf %131, %132 : vector<3x384xf32>
    %134 = math.tanh %133 : vector<3x384xf32>
    %135 = arith.mulf %130, %134 : vector<3x384xf32>
    %136 = vector.extract_strided_slice %135 {offsets = [0, 0], sizes = [1, 384], strides = [1, 1]} : vector<3x384xf32> to vector<1x384xf32>
    %137 = vector.broadcast %136 : vector<1x384xf32> to vector<12x384xf32>
    %138 = arith.mulf %26, %137 : vector<12x384xf32>
    %139 = vector.extract_strided_slice %135 {offsets = [1, 0], sizes = [1, 384], strides = [1, 1]} : vector<3x384xf32> to vector<1x384xf32>
    %140 = vector.broadcast %139 : vector<1x384xf32> to vector<12x384xf32>
    %141 = arith.mulf %29, %140 : vector<12x384xf32>
    %142 = arith.addf %138, %141 : vector<12x384xf32>
    %143 = vector.extract_strided_slice %135 {offsets = [2, 0], sizes = [1, 384], strides = [1, 1]} : vector<3x384xf32> to vector<1x384xf32>
    %144 = vector.broadcast %143 : vector<1x384xf32> to vector<12x384xf32>
    %145 = arith.mulf %32, %144 : vector<12x384xf32>
    %146 = arith.addf %142, %145 : vector<12x384xf32>
    %147 = arith.addf %35, %146 : vector<12x384xf32>
    %148 = vector.extract_strided_slice %105 {offsets = [0, 0], sizes = [1, 384], strides = [1, 1]} : vector<3x384xf32> to vector<1x384xf32>
    %149 = vector.broadcast %148 : vector<1x384xf32> to vector<12x384xf32>
    %150 = arith.mulf %17, %149 : vector<12x384xf32>
    %151 = vector.extract_strided_slice %105 {offsets = [1, 0], sizes = [1, 384], strides = [1, 1]} : vector<3x384xf32> to vector<1x384xf32>
    %152 = vector.broadcast %151 : vector<1x384xf32> to vector<12x384xf32>
    %153 = arith.mulf %20, %152 : vector<12x384xf32>
    %154 = arith.addf %150, %153 : vector<12x384xf32>
    %155 = vector.extract_strided_slice %105 {offsets = [2, 0], sizes = [1, 384], strides = [1, 1]} : vector<3x384xf32> to vector<1x384xf32>
    %156 = vector.broadcast %155 : vector<1x384xf32> to vector<12x384xf32>
    %157 = arith.mulf %23, %156 : vector<12x384xf32>
    %158 = arith.addf %154, %157 : vector<12x384xf32>
    %159 = arith.addf %147, %158 : vector<12x384xf32>
    %160 = vector.extract_strided_slice %159 {offsets = [0, 0], sizes = [9, 384], strides = [1, 1]} : vector<12x384xf32> to vector<9x384xf32>
    %161 = arith.negf %160 : vector<9x384xf32>
    %162 = math.exp %161 : vector<9x384xf32>
    %cst_29 = arith.constant 1.000000e+00 : f32
    %163 = vector.broadcast %cst_29 : f32 to vector<9x384xf32>
    %164 = arith.addf %163, %162 : vector<9x384xf32>
    %165 = arith.divf %163, %164 : vector<9x384xf32>
    %166 = vector.extract_strided_slice %159 {offsets = [9, 0], sizes = [3, 384], strides = [1, 1]} : vector<12x384xf32> to vector<3x384xf32>
    %167 = math.tanh %166 : vector<3x384xf32>
    %168 = vector.extract_strided_slice %165 {offsets = [0, 0], sizes = [3, 384], strides = [1, 1]} : vector<9x384xf32> to vector<3x384xf32>
    %169 = vector.extract_strided_slice %165 {offsets = [3, 0], sizes = [3, 384], strides = [1, 1]} : vector<9x384xf32> to vector<3x384xf32>
    %170 = vector.extract_strided_slice %165 {offsets = [6, 0], sizes = [3, 384], strides = [1, 1]} : vector<9x384xf32> to vector<3x384xf32>
    %171 = arith.mulf %169, %103 : vector<3x384xf32>
    %172 = arith.mulf %168, %167 : vector<3x384xf32>
    %173 = arith.addf %171, %172 : vector<3x384xf32>
    %174 = math.tanh %173 : vector<3x384xf32>
    %175 = arith.mulf %170, %174 : vector<3x384xf32>
    %c3 = arith.constant 3 : index
    %c0_30 = arith.constant 0 : index
    %176 = vector.load %arg16[%c3, %c0_30] : memref<33x384xf32, #tpu.memory_space<vmem>>, vector<3x384xf32>
    tpu.vector_store %arg16[%c3, %c0_30], %175 {strides = array<i32>} : memref<33x384xf32, #tpu.memory_space<vmem>>, vector<3x384xf32>,
    %177 = vector.extract_strided_slice %5 {offsets = [0, 768], sizes = [12, 384], strides = [1, 1]} : vector<12x4608xf32> to vector<12x384xf32>
    %178 = vector.extract_strided_slice %135 {offsets = [0, 0], sizes = [1, 384], strides = [1, 1]} : vector<3x384xf32> to vector<1x384xf32>
    %179 = vector.broadcast %178 : vector<1x384xf32> to vector<12x384xf32>
    %180 = arith.mulf %8, %179 : vector<12x384xf32>
    %181 = vector.extract_strided_slice %135 {offsets = [1, 0], sizes = [1, 384], strides = [1, 1]} : vector<3x384xf32> to vector<1x384xf32>
    %182 = vector.broadcast %181 : vector<1x384xf32> to vector<12x384xf32>
    %183 = arith.mulf %11, %182 : vector<12x384xf32>
    %184 = arith.addf %180, %183 : vector<12x384xf32>
    %185 = vector.extract_strided_slice %135 {offsets = [2, 0], sizes = [1, 384], strides = [1, 1]} : vector<3x384xf32> to vector<1x384xf32>
    %186 = vector.broadcast %185 : vector<1x384xf32> to vector<12x384xf32>
    %187 = arith.mulf %14, %186 : vector<12x384xf32>
    %188 = arith.addf %184, %187 : vector<12x384xf32>
    %189 = arith.addf %177, %188 : vector<12x384xf32>
    %190 = vector.extract_strided_slice %189 {offsets = [0, 0], sizes = [9, 384], strides = [1, 1]} : vector<12x384xf32> to vector<9x384xf32>
    %191 = arith.negf %190 : vector<9x384xf32>
    %192 = math.exp %191 : vector<9x384xf32>
    %cst_31 = arith.constant 1.000000e+00 : f32
    %193 = vector.broadcast %cst_31 : f32 to vector<9x384xf32>
    %194 = arith.addf %193, %192 : vector<9x384xf32>
    %195 = arith.divf %193, %194 : vector<9x384xf32>
    %196 = vector.extract_strided_slice %189 {offsets = [9, 0], sizes = [3, 384], strides = [1, 1]} : vector<12x384xf32> to vector<3x384xf32>
    %197 = math.tanh %196 : vector<3x384xf32>
    %198 = vector.extract_strided_slice %195 {offsets = [0, 0], sizes = [3, 384], strides = [1, 1]} : vector<9x384xf32> to vector<3x384xf32>
    %199 = vector.extract_strided_slice %195 {offsets = [3, 0], sizes = [3, 384], strides = [1, 1]} : vector<9x384xf32> to vector<3x384xf32>
    %200 = vector.extract_strided_slice %195 {offsets = [6, 0], sizes = [3, 384], strides = [1, 1]} : vector<9x384xf32> to vector<3x384xf32>
    %201 = arith.mulf %199, %133 : vector<3x384xf32>
    %202 = arith.mulf %198, %197 : vector<3x384xf32>
    %203 = arith.addf %201, %202 : vector<3x384xf32>
    %204 = math.tanh %203 : vector<3x384xf32>
    %205 = arith.mulf %200, %204 : vector<3x384xf32>
    %206 = vector.extract_strided_slice %205 {offsets = [0, 0], sizes = [1, 384], strides = [1, 1]} : vector<3x384xf32> to vector<1x384xf32>
    %207 = vector.broadcast %206 : vector<1x384xf32> to vector<12x384xf32>
    %208 = arith.mulf %26, %207 : vector<12x384xf32>
    %209 = vector.extract_strided_slice %205 {offsets = [1, 0], sizes = [1, 384], strides = [1, 1]} : vector<3x384xf32> to vector<1x384xf32>
    %210 = vector.broadcast %209 : vector<1x384xf32> to vector<12x384xf32>
    %211 = arith.mulf %29, %210 : vector<12x384xf32>
    %212 = arith.addf %208, %211 : vector<12x384xf32>
    %213 = vector.extract_strided_slice %205 {offsets = [2, 0], sizes = [1, 384], strides = [1, 1]} : vector<3x384xf32> to vector<1x384xf32>
    %214 = vector.broadcast %213 : vector<1x384xf32> to vector<12x384xf32>
    %215 = arith.mulf %32, %214 : vector<12x384xf32>
    %216 = arith.addf %212, %215 : vector<12x384xf32>
    %217 = arith.addf %35, %216 : vector<12x384xf32>
    %218 = vector.extract_strided_slice %175 {offsets = [0, 0], sizes = [1, 384], strides = [1, 1]} : vector<3x384xf32> to vector<1x384xf32>
    %219 = vector.broadcast %218 : vector<1x384xf32> to vector<12x384xf32>
    %220 = arith.mulf %17, %219 : vector<12x384xf32>
    %221 = vector.extract_strided_slice %175 {offsets = [1, 0], sizes = [1, 384], strides = [1, 1]} : vector<3x384xf32> to vector<1x384xf32>
    %222 = vector.broadcast %221 : vector<1x384xf32> to vector<12x384xf32>
    %223 = arith.mulf %20, %222 : vector<12x384xf32>
    %224 = arith.addf %220, %223 : vector<12x384xf32>
    %225 = vector.extract_strided_slice %175 {offsets = [2, 0], sizes = [1, 384], strides = [1, 1]} : vector<3x384xf32> to vector<1x384xf32>
    %226 = vector.broadcast %225 : vector<1x384xf32> to vector<12x384xf32>
    %227 = arith.mulf %23, %226 : vector<12x384xf32>
    %228 = arith.addf %224, %227 : vector<12x384xf32>
    %229 = arith.addf %217, %228 : vector<12x384xf32>
    %230 = vector.extract_strided_slice %229 {offsets = [0, 0], sizes = [9, 384], strides = [1, 1]} : vector<12x384xf32> to vector<9x384xf32>
    %231 = arith.negf %230 : vector<9x384xf32>
    %232 = math.exp %231 : vector<9x384xf32>
    %cst_32 = arith.constant 1.000000e+00 : f32
    %233 = vector.broadcast %cst_32 : f32 to vector<9x384xf32>
    %234 = arith.addf %233, %232 : vector<9x384xf32>
    %235 = arith.divf %233, %234 : vector<9x384xf32>
    %236 = vector.extract_strided_slice %229 {offsets = [9, 0], sizes = [3, 384], strides = [1, 1]} : vector<12x384xf32> to vector<3x384xf32>
    %237 = math.tanh %236 : vector<3x384xf32>
    %238 = vector.extract_strided_slice %235 {offsets = [0, 0], sizes = [3, 384], strides = [1, 1]} : vector<9x384xf32> to vector<3x384xf32>
    %239 = vector.extract_strided_slice %235 {offsets = [3, 0], sizes = [3, 384], strides = [1, 1]} : vector<9x384xf32> to vector<3x384xf32>
    %240 = vector.extract_strided_slice %235 {offsets = [6, 0], sizes = [3, 384], strides = [1, 1]} : vector<9x384xf32> to vector<3x384xf32>
    %241 = arith.mulf %239, %173 : vector<3x384xf32>
    %242 = arith.mulf %238, %237 : vector<3x384xf32>
    %243 = arith.addf %241, %242 : vector<3x384xf32>
    %244 = math.tanh %243 : vector<3x384xf32>
    %245 = arith.mulf %240, %244 : vector<3x384xf32>
    %c6 = arith.constant 6 : index
    %c0_33 = arith.constant 0 : index
    %246 = vector.load %arg16[%c6, %c0_33] : memref<33x384xf32, #tpu.memory_space<vmem>>, vector<3x384xf32>
    tpu.vector_store %arg16[%c6, %c0_33], %245 {strides = array<i32>} : memref<33x384xf32, #tpu.memory_space<vmem>>, vector<3x384xf32>,
    %247 = vector.extract_strided_slice %5 {offsets = [0, 1152], sizes = [12, 384], strides = [1, 1]} : vector<12x4608xf32> to vector<12x384xf32>
    %248 = vector.extract_strided_slice %205 {offsets = [0, 0], sizes = [1, 384], strides = [1, 1]} : vector<3x384xf32> to vector<1x384xf32>
    %249 = vector.broadcast %248 : vector<1x384xf32> to vector<12x384xf32>
    %250 = arith.mulf %8, %249 : vector<12x384xf32>
    %251 = vector.extract_strided_slice %205 {offsets = [1, 0], sizes = [1, 384], strides = [1, 1]} : vector<3x384xf32> to vector<1x384xf32>
    %252 = vector.broadcast %251 : vector<1x384xf32> to vector<12x384xf32>
    %253 = arith.mulf %11, %252 : vector<12x384xf32>
    %254 = arith.addf %250, %253 : vector<12x384xf32>
    %255 = vector.extract_strided_slice %205 {offsets = [2, 0], sizes = [1, 384], strides = [1, 1]} : vector<3x384xf32> to vector<1x384xf32>
    %256 = vector.broadcast %255 : vector<1x384xf32> to vector<12x384xf32>
    %257 = arith.mulf %14, %256 : vector<12x384xf32>
    %258 = arith.addf %254, %257 : vector<12x384xf32>
    %259 = arith.addf %247, %258 : vector<12x384xf32>
    %260 = vector.extract_strided_slice %259 {offsets = [0, 0], sizes = [9, 384], strides = [1, 1]} : vector<12x384xf32> to vector<9x384xf32>
    %261 = arith.negf %260 : vector<9x384xf32>
    %262 = math.exp %261 : vector<9x384xf32>
    %cst_34 = arith.constant 1.000000e+00 : f32
    %263 = vector.broadcast %cst_34 : f32 to vector<9x384xf32>
    %264 = arith.addf %263, %262 : vector<9x384xf32>
    %265 = arith.divf %263, %264 : vector<9x384xf32>
    %266 = vector.extract_strided_slice %259 {offsets = [9, 0], sizes = [3, 384], strides = [1, 1]} : vector<12x384xf32> to vector<3x384xf32>
    %267 = math.tanh %266 : vector<3x384xf32>
    %268 = vector.extract_strided_slice %265 {offsets = [0, 0], sizes = [3, 384], strides = [1, 1]} : vector<9x384xf32> to vector<3x384xf32>
    %269 = vector.extract_strided_slice %265 {offsets = [3, 0], sizes = [3, 384], strides = [1, 1]} : vector<9x384xf32> to vector<3x384xf32>
    %270 = vector.extract_strided_slice %265 {offsets = [6, 0], sizes = [3, 384], strides = [1, 1]} : vector<9x384xf32> to vector<3x384xf32>
    %271 = arith.mulf %269, %203 : vector<3x384xf32>
    %272 = arith.mulf %268, %267 : vector<3x384xf32>
    %273 = arith.addf %271, %272 : vector<3x384xf32>
    %274 = math.tanh %273 : vector<3x384xf32>
    %275 = arith.mulf %270, %274 : vector<3x384xf32>
    %276 = vector.extract_strided_slice %275 {offsets = [0, 0], sizes = [1, 384], strides = [1, 1]} : vector<3x384xf32> to vector<1x384xf32>
    %277 = vector.broadcast %276 : vector<1x384xf32> to vector<12x384xf32>
    %278 = arith.mulf %26, %277 : vector<12x384xf32>
    %279 = vector.extract_strided_slice %275 {offsets = [1, 0], sizes = [1, 384], strides = [1, 1]} : vector<3x384xf32> to vector<1x384xf32>
    %280 = vector.broadcast %279 : vector<1x384xf32> to vector<12x384xf32>
    %281 = arith.mulf %29, %280 : vector<12x384xf32>
    %282 = arith.addf %278, %281 : vector<12x384xf32>
    %283 = vector.extract_strided_slice %275 {offsets = [2, 0], sizes = [1, 384], strides = [1, 1]} : vector<3x384xf32> to vector<1x384xf32>
    %284 = vector.broadcast %283 : vector<1x384xf32> to vector<12x384xf32>
    %285 = arith.mulf %32, %284 : vector<12x384xf32>
    %286 = arith.addf %282, %285 : vector<12x384xf32>
    %287 = arith.addf %35, %286 : vector<12x384xf32>
    %288 = vector.extract_strided_slice %245 {offsets = [0, 0], sizes = [1, 384], strides = [1, 1]} : vector<3x384xf32> to vector<1x384xf32>
    %289 = vector.broadcast %288 : vector<1x384xf32> to vector<12x384xf32>
    %290 = arith.mulf %17, %289 : vector<12x384xf32>
    %291 = vector.extract_strided_slice %245 {offsets = [1, 0], sizes = [1, 384], strides = [1, 1]} : vector<3x384xf32> to vector<1x384xf32>
    %292 = vector.broadcast %291 : vector<1x384xf32> to vector<12x384xf32>
    %293 = arith.mulf %20, %292 : vector<12x384xf32>
    %294 = arith.addf %290, %293 : vector<12x384xf32>
    %295 = vector.extract_strided_slice %245 {offsets = [2, 0], sizes = [1, 384], strides = [1, 1]} : vector<3x384xf32> to vector<1x384xf32>
    %296 = vector.broadcast %295 : vector<1x384xf32> to vector<12x384xf32>
    %297 = arith.mulf %23, %296 : vector<12x384xf32>
    %298 = arith.addf %294, %297 : vector<12x384xf32>
    %299 = arith.addf %287, %298 : vector<12x384xf32>
    %300 = vector.extract_strided_slice %299 {offsets = [0, 0], sizes = [9, 384], strides = [1, 1]} : vector<12x384xf32> to vector<9x384xf32>
    %301 = arith.negf %300 : vector<9x384xf32>
    %302 = math.exp %301 : vector<9x384xf32>
    %cst_35 = arith.constant 1.000000e+00 : f32
    %303 = vector.broadcast %cst_35 : f32 to vector<9x384xf32>
    %304 = arith.addf %303, %302 : vector<9x384xf32>
    %305 = arith.divf %303, %304 : vector<9x384xf32>
    %306 = vector.extract_strided_slice %299 {offsets = [9, 0], sizes = [3, 384], strides = [1, 1]} : vector<12x384xf32> to vector<3x384xf32>
    %307 = math.tanh %306 : vector<3x384xf32>
    %308 = vector.extract_strided_slice %305 {offsets = [0, 0], sizes = [3, 384], strides = [1, 1]} : vector<9x384xf32> to vector<3x384xf32>
    %309 = vector.extract_strided_slice %305 {offsets = [3, 0], sizes = [3, 384], strides = [1, 1]} : vector<9x384xf32> to vector<3x384xf32>
    %310 = vector.extract_strided_slice %305 {offsets = [6, 0], sizes = [3, 384], strides = [1, 1]} : vector<9x384xf32> to vector<3x384xf32>
    %311 = arith.mulf %309, %243 : vector<3x384xf32>
    %312 = arith.mulf %308, %307 : vector<3x384xf32>
    %313 = arith.addf %311, %312 : vector<3x384xf32>
    %314 = math.tanh %313 : vector<3x384xf32>
    %315 = arith.mulf %310, %314 : vector<3x384xf32>
    %c9 = arith.constant 9 : index
    %c0_36 = arith.constant 0 : index
    %316 = vector.load %arg16[%c9, %c0_36] : memref<33x384xf32, #tpu.memory_space<vmem>>, vector<3x384xf32>
    tpu.vector_store %arg16[%c9, %c0_36], %315 {strides = array<i32>} : memref<33x384xf32, #tpu.memory_space<vmem>>, vector<3x384xf32>,
    %317 = vector.extract_strided_slice %5 {offsets = [0, 1536], sizes = [12, 384], strides = [1, 1]} : vector<12x4608xf32> to vector<12x384xf32>
    %318 = vector.extract_strided_slice %275 {offsets = [0, 0], sizes = [1, 384], strides = [1, 1]} : vector<3x384xf32> to vector<1x384xf32>
    %319 = vector.broadcast %318 : vector<1x384xf32> to vector<12x384xf32>
    %320 = arith.mulf %8, %319 : vector<12x384xf32>
    %321 = vector.extract_strided_slice %275 {offsets = [1, 0], sizes = [1, 384], strides = [1, 1]} : vector<3x384xf32> to vector<1x384xf32>
    %322 = vector.broadcast %321 : vector<1x384xf32> to vector<12x384xf32>
    %323 = arith.mulf %11, %322 : vector<12x384xf32>
    %324 = arith.addf %320, %323 : vector<12x384xf32>
    %325 = vector.extract_strided_slice %275 {offsets = [2, 0], sizes = [1, 384], strides = [1, 1]} : vector<3x384xf32> to vector<1x384xf32>
    %326 = vector.broadcast %325 : vector<1x384xf32> to vector<12x384xf32>
    %327 = arith.mulf %14, %326 : vector<12x384xf32>
    %328 = arith.addf %324, %327 : vector<12x384xf32>
    %329 = arith.addf %317, %328 : vector<12x384xf32>
    %330 = vector.extract_strided_slice %329 {offsets = [0, 0], sizes = [9, 384], strides = [1, 1]} : vector<12x384xf32> to vector<9x384xf32>
    %331 = arith.negf %330 : vector<9x384xf32>
    %332 = math.exp %331 : vector<9x384xf32>
    %cst_37 = arith.constant 1.000000e+00 : f32
    %333 = vector.broadcast %cst_37 : f32 to vector<9x384xf32>
    %334 = arith.addf %333, %332 : vector<9x384xf32>
    %335 = arith.divf %333, %334 : vector<9x384xf32>
    %336 = vector.extract_strided_slice %329 {offsets = [9, 0], sizes = [3, 384], strides = [1, 1]} : vector<12x384xf32> to vector<3x384xf32>
    %337 = math.tanh %336 : vector<3x384xf32>
    %338 = vector.extract_strided_slice %335 {offsets = [0, 0], sizes = [3, 384], strides = [1, 1]} : vector<9x384xf32> to vector<3x384xf32>
    %339 = vector.extract_strided_slice %335 {offsets = [3, 0], sizes = [3, 384], strides = [1, 1]} : vector<9x384xf32> to vector<3x384xf32>
    %340 = vector.extract_strided_slice %335 {offsets = [6, 0], sizes = [3, 384], strides = [1, 1]} : vector<9x384xf32> to vector<3x384xf32>
    %341 = arith.mulf %339, %273 : vector<3x384xf32>
    %342 = arith.mulf %338, %337 : vector<3x384xf32>
    %343 = arith.addf %341, %342 : vector<3x384xf32>
    %344 = math.tanh %343 : vector<3x384xf32>
    %345 = arith.mulf %340, %344 : vector<3x384xf32>
    %346 = vector.extract_strided_slice %345 {offsets = [0, 0], sizes = [1, 384], strides = [1, 1]} : vector<3x384xf32> to vector<1x384xf32>
    %347 = vector.broadcast %346 : vector<1x384xf32> to vector<12x384xf32>
    %348 = arith.mulf %26, %347 : vector<12x384xf32>
    %349 = vector.extract_strided_slice %345 {offsets = [1, 0], sizes = [1, 384], strides = [1, 1]} : vector<3x384xf32> to vector<1x384xf32>
    %350 = vector.broadcast %349 : vector<1x384xf32> to vector<12x384xf32>
    %351 = arith.mulf %29, %350 : vector<12x384xf32>
    %352 = arith.addf %348, %351 : vector<12x384xf32>
    %353 = vector.extract_strided_slice %345 {offsets = [2, 0], sizes = [1, 384], strides = [1, 1]} : vector<3x384xf32> to vector<1x384xf32>
    %354 = vector.broadcast %353 : vector<1x384xf32> to vector<12x384xf32>
    %355 = arith.mulf %32, %354 : vector<12x384xf32>
    %356 = arith.addf %352, %355 : vector<12x384xf32>
    %357 = arith.addf %35, %356 : vector<12x384xf32>
    %358 = vector.extract_strided_slice %315 {offsets = [0, 0], sizes = [1, 384], strides = [1, 1]} : vector<3x384xf32> to vector<1x384xf32>
    %359 = vector.broadcast %358 : vector<1x384xf32> to vector<12x384xf32>
    %360 = arith.mulf %17, %359 : vector<12x384xf32>
    %361 = vector.extract_strided_slice %315 {offsets = [1, 0], sizes = [1, 384], strides = [1, 1]} : vector<3x384xf32> to vector<1x384xf32>
    %362 = vector.broadcast %361 : vector<1x384xf32> to vector<12x384xf32>
    %363 = arith.mulf %20, %362 : vector<12x384xf32>
    %364 = arith.addf %360, %363 : vector<12x384xf32>
    %365 = vector.extract_strided_slice %315 {offsets = [2, 0], sizes = [1, 384], strides = [1, 1]} : vector<3x384xf32> to vector<1x384xf32>
    %366 = vector.broadcast %365 : vector<1x384xf32> to vector<12x384xf32>
    %367 = arith.mulf %23, %366 : vector<12x384xf32>
    %368 = arith.addf %364, %367 : vector<12x384xf32>
    %369 = arith.addf %357, %368 : vector<12x384xf32>
    %370 = vector.extract_strided_slice %369 {offsets = [0, 0], sizes = [9, 384], strides = [1, 1]} : vector<12x384xf32> to vector<9x384xf32>
    %371 = arith.negf %370 : vector<9x384xf32>
    %372 = math.exp %371 : vector<9x384xf32>
    %cst_38 = arith.constant 1.000000e+00 : f32
    %373 = vector.broadcast %cst_38 : f32 to vector<9x384xf32>
    %374 = arith.addf %373, %372 : vector<9x384xf32>
    %375 = arith.divf %373, %374 : vector<9x384xf32>
    %376 = vector.extract_strided_slice %369 {offsets = [9, 0], sizes = [3, 384], strides = [1, 1]} : vector<12x384xf32> to vector<3x384xf32>
    %377 = math.tanh %376 : vector<3x384xf32>
    %378 = vector.extract_strided_slice %375 {offsets = [0, 0], sizes = [3, 384], strides = [1, 1]} : vector<9x384xf32> to vector<3x384xf32>
    %379 = vector.extract_strided_slice %375 {offsets = [3, 0], sizes = [3, 384], strides = [1, 1]} : vector<9x384xf32> to vector<3x384xf32>
    %380 = vector.extract_strided_slice %375 {offsets = [6, 0], sizes = [3, 384], strides = [1, 1]} : vector<9x384xf32> to vector<3x384xf32>
    %381 = arith.mulf %379, %313 : vector<3x384xf32>
    %382 = arith.mulf %378, %377 : vector<3x384xf32>
    %383 = arith.addf %381, %382 : vector<3x384xf32>
    %384 = math.tanh %383 : vector<3x384xf32>
    %385 = arith.mulf %380, %384 : vector<3x384xf32>
    %c12 = arith.constant 12 : index
    %c0_39 = arith.constant 0 : index
    %386 = vector.load %arg16[%c12, %c0_39] : memref<33x384xf32, #tpu.memory_space<vmem>>, vector<3x384xf32>
    tpu.vector_store %arg16[%c12, %c0_39], %385 {strides = array<i32>} : memref<33x384xf32, #tpu.memory_space<vmem>>, vector<3x384xf32>,
    %387 = vector.extract_strided_slice %5 {offsets = [0, 1920], sizes = [12, 384], strides = [1, 1]} : vector<12x4608xf32> to vector<12x384xf32>
    %388 = vector.extract_strided_slice %345 {offsets = [0, 0], sizes = [1, 384], strides = [1, 1]} : vector<3x384xf32> to vector<1x384xf32>
    %389 = vector.broadcast %388 : vector<1x384xf32> to vector<12x384xf32>
    %390 = arith.mulf %8, %389 : vector<12x384xf32>
    %391 = vector.extract_strided_slice %345 {offsets = [1, 0], sizes = [1, 384], strides = [1, 1]} : vector<3x384xf32> to vector<1x384xf32>
    %392 = vector.broadcast %391 : vector<1x384xf32> to vector<12x384xf32>
    %393 = arith.mulf %11, %392 : vector<12x384xf32>
    %394 = arith.addf %390, %393 : vector<12x384xf32>
    %395 = vector.extract_strided_slice %345 {offsets = [2, 0], sizes = [1, 384], strides = [1, 1]} : vector<3x384xf32> to vector<1x384xf32>
    %396 = vector.broadcast %395 : vector<1x384xf32> to vector<12x384xf32>
    %397 = arith.mulf %14, %396 : vector<12x384xf32>
    %398 = arith.addf %394, %397 : vector<12x384xf32>
    %399 = arith.addf %387, %398 : vector<12x384xf32>
    %400 = vector.extract_strided_slice %399 {offsets = [0, 0], sizes = [9, 384], strides = [1, 1]} : vector<12x384xf32> to vector<9x384xf32>
    %401 = arith.negf %400 : vector<9x384xf32>
    %402 = math.exp %401 : vector<9x384xf32>
    %cst_40 = arith.constant 1.000000e+00 : f32
    %403 = vector.broadcast %cst_40 : f32 to vector<9x384xf32>
    %404 = arith.addf %403, %402 : vector<9x384xf32>
    %405 = arith.divf %403, %404 : vector<9x384xf32>
    %406 = vector.extract_strided_slice %399 {offsets = [9, 0], sizes = [3, 384], strides = [1, 1]} : vector<12x384xf32> to vector<3x384xf32>
    %407 = math.tanh %406 : vector<3x384xf32>
    %408 = vector.extract_strided_slice %405 {offsets = [0, 0], sizes = [3, 384], strides = [1, 1]} : vector<9x384xf32> to vector<3x384xf32>
    %409 = vector.extract_strided_slice %405 {offsets = [3, 0], sizes = [3, 384], strides = [1, 1]} : vector<9x384xf32> to vector<3x384xf32>
    %410 = vector.extract_strided_slice %405 {offsets = [6, 0], sizes = [3, 384], strides = [1, 1]} : vector<9x384xf32> to vector<3x384xf32>
    %411 = arith.mulf %409, %343 : vector<3x384xf32>
    %412 = arith.mulf %408, %407 : vector<3x384xf32>
    %413 = arith.addf %411, %412 : vector<3x384xf32>
    %414 = math.tanh %413 : vector<3x384xf32>
    %415 = arith.mulf %410, %414 : vector<3x384xf32>
    %416 = vector.extract_strided_slice %415 {offsets = [0, 0], sizes = [1, 384], strides = [1, 1]} : vector<3x384xf32> to vector<1x384xf32>
    %417 = vector.broadcast %416 : vector<1x384xf32> to vector<12x384xf32>
    %418 = arith.mulf %26, %417 : vector<12x384xf32>
    %419 = vector.extract_strided_slice %415 {offsets = [1, 0], sizes = [1, 384], strides = [1, 1]} : vector<3x384xf32> to vector<1x384xf32>
    %420 = vector.broadcast %419 : vector<1x384xf32> to vector<12x384xf32>
    %421 = arith.mulf %29, %420 : vector<12x384xf32>
    %422 = arith.addf %418, %421 : vector<12x384xf32>
    %423 = vector.extract_strided_slice %415 {offsets = [2, 0], sizes = [1, 384], strides = [1, 1]} : vector<3x384xf32> to vector<1x384xf32>
    %424 = vector.broadcast %423 : vector<1x384xf32> to vector<12x384xf32>
    %425 = arith.mulf %32, %424 : vector<12x384xf32>
    %426 = arith.addf %422, %425 : vector<12x384xf32>
    %427 = arith.addf %35, %426 : vector<12x384xf32>
    %428 = vector.extract_strided_slice %385 {offsets = [0, 0], sizes = [1, 384], strides = [1, 1]} : vector<3x384xf32> to vector<1x384xf32>
    %429 = vector.broadcast %428 : vector<1x384xf32> to vector<12x384xf32>
    %430 = arith.mulf %17, %429 : vector<12x384xf32>
    %431 = vector.extract_strided_slice %385 {offsets = [1, 0], sizes = [1, 384], strides = [1, 1]} : vector<3x384xf32> to vector<1x384xf32>
    %432 = vector.broadcast %431 : vector<1x384xf32> to vector<12x384xf32>
    %433 = arith.mulf %20, %432 : vector<12x384xf32>
    %434 = arith.addf %430, %433 : vector<12x384xf32>
    %435 = vector.extract_strided_slice %385 {offsets = [2, 0], sizes = [1, 384], strides = [1, 1]} : vector<3x384xf32> to vector<1x384xf32>
    %436 = vector.broadcast %435 : vector<1x384xf32> to vector<12x384xf32>
    %437 = arith.mulf %23, %436 : vector<12x384xf32>
    %438 = arith.addf %434, %437 : vector<12x384xf32>
    %439 = arith.addf %427, %438 : vector<12x384xf32>
    %440 = vector.extract_strided_slice %439 {offsets = [0, 0], sizes = [9, 384], strides = [1, 1]} : vector<12x384xf32> to vector<9x384xf32>
    %441 = arith.negf %440 : vector<9x384xf32>
    %442 = math.exp %441 : vector<9x384xf32>
    %cst_41 = arith.constant 1.000000e+00 : f32
    %443 = vector.broadcast %cst_41 : f32 to vector<9x384xf32>
    %444 = arith.addf %443, %442 : vector<9x384xf32>
    %445 = arith.divf %443, %444 : vector<9x384xf32>
    %446 = vector.extract_strided_slice %439 {offsets = [9, 0], sizes = [3, 384], strides = [1, 1]} : vector<12x384xf32> to vector<3x384xf32>
    %447 = math.tanh %446 : vector<3x384xf32>
    %448 = vector.extract_strided_slice %445 {offsets = [0, 0], sizes = [3, 384], strides = [1, 1]} : vector<9x384xf32> to vector<3x384xf32>
    %449 = vector.extract_strided_slice %445 {offsets = [3, 0], sizes = [3, 384], strides = [1, 1]} : vector<9x384xf32> to vector<3x384xf32>
    %450 = vector.extract_strided_slice %445 {offsets = [6, 0], sizes = [3, 384], strides = [1, 1]} : vector<9x384xf32> to vector<3x384xf32>
    %451 = arith.mulf %449, %383 : vector<3x384xf32>
    %452 = arith.mulf %448, %447 : vector<3x384xf32>
    %453 = arith.addf %451, %452 : vector<3x384xf32>
    %454 = math.tanh %453 : vector<3x384xf32>
    %455 = arith.mulf %450, %454 : vector<3x384xf32>
    %c15 = arith.constant 15 : index
    %c0_42 = arith.constant 0 : index
    %456 = vector.load %arg16[%c15, %c0_42] : memref<33x384xf32, #tpu.memory_space<vmem>>, vector<3x384xf32>
    tpu.vector_store %arg16[%c15, %c0_42], %455 {strides = array<i32>} : memref<33x384xf32, #tpu.memory_space<vmem>>, vector<3x384xf32>,
    %457 = vector.extract_strided_slice %5 {offsets = [0, 2304], sizes = [12, 384], strides = [1, 1]} : vector<12x4608xf32> to vector<12x384xf32>
    %458 = vector.extract_strided_slice %415 {offsets = [0, 0], sizes = [1, 384], strides = [1, 1]} : vector<3x384xf32> to vector<1x384xf32>
    %459 = vector.broadcast %458 : vector<1x384xf32> to vector<12x384xf32>
    %460 = arith.mulf %8, %459 : vector<12x384xf32>
    %461 = vector.extract_strided_slice %415 {offsets = [1, 0], sizes = [1, 384], strides = [1, 1]} : vector<3x384xf32> to vector<1x384xf32>
    %462 = vector.broadcast %461 : vector<1x384xf32> to vector<12x384xf32>
    %463 = arith.mulf %11, %462 : vector<12x384xf32>
    %464 = arith.addf %460, %463 : vector<12x384xf32>
    %465 = vector.extract_strided_slice %415 {offsets = [2, 0], sizes = [1, 384], strides = [1, 1]} : vector<3x384xf32> to vector<1x384xf32>
    %466 = vector.broadcast %465 : vector<1x384xf32> to vector<12x384xf32>
    %467 = arith.mulf %14, %466 : vector<12x384xf32>
    %468 = arith.addf %464, %467 : vector<12x384xf32>
    %469 = arith.addf %457, %468 : vector<12x384xf32>
    %470 = vector.extract_strided_slice %469 {offsets = [0, 0], sizes = [9, 384], strides = [1, 1]} : vector<12x384xf32> to vector<9x384xf32>
    %471 = arith.negf %470 : vector<9x384xf32>
    %472 = math.exp %471 : vector<9x384xf32>
    %cst_43 = arith.constant 1.000000e+00 : f32
    %473 = vector.broadcast %cst_43 : f32 to vector<9x384xf32>
    %474 = arith.addf %473, %472 : vector<9x384xf32>
    %475 = arith.divf %473, %474 : vector<9x384xf32>
    %476 = vector.extract_strided_slice %469 {offsets = [9, 0], sizes = [3, 384], strides = [1, 1]} : vector<12x384xf32> to vector<3x384xf32>
    %477 = math.tanh %476 : vector<3x384xf32>
    %478 = vector.extract_strided_slice %475 {offsets = [0, 0], sizes = [3, 384], strides = [1, 1]} : vector<9x384xf32> to vector<3x384xf32>
    %479 = vector.extract_strided_slice %475 {offsets = [3, 0], sizes = [3, 384], strides = [1, 1]} : vector<9x384xf32> to vector<3x384xf32>
    %480 = vector.extract_strided_slice %475 {offsets = [6, 0], sizes = [3, 384], strides = [1, 1]} : vector<9x384xf32> to vector<3x384xf32>
    %481 = arith.mulf %479, %413 : vector<3x384xf32>
    %482 = arith.mulf %478, %477 : vector<3x384xf32>
    %483 = arith.addf %481, %482 : vector<3x384xf32>
    %484 = math.tanh %483 : vector<3x384xf32>
    %485 = arith.mulf %480, %484 : vector<3x384xf32>
    %486 = vector.extract_strided_slice %485 {offsets = [0, 0], sizes = [1, 384], strides = [1, 1]} : vector<3x384xf32> to vector<1x384xf32>
    %487 = vector.broadcast %486 : vector<1x384xf32> to vector<12x384xf32>
    %488 = arith.mulf %26, %487 : vector<12x384xf32>
    %489 = vector.extract_strided_slice %485 {offsets = [1, 0], sizes = [1, 384], strides = [1, 1]} : vector<3x384xf32> to vector<1x384xf32>
    %490 = vector.broadcast %489 : vector<1x384xf32> to vector<12x384xf32>
    %491 = arith.mulf %29, %490 : vector<12x384xf32>
    %492 = arith.addf %488, %491 : vector<12x384xf32>
    %493 = vector.extract_strided_slice %485 {offsets = [2, 0], sizes = [1, 384], strides = [1, 1]} : vector<3x384xf32> to vector<1x384xf32>
    %494 = vector.broadcast %493 : vector<1x384xf32> to vector<12x384xf32>
    %495 = arith.mulf %32, %494 : vector<12x384xf32>
    %496 = arith.addf %492, %495 : vector<12x384xf32>
    %497 = arith.addf %35, %496 : vector<12x384xf32>
    %498 = vector.extract_strided_slice %455 {offsets = [0, 0], sizes = [1, 384], strides = [1, 1]} : vector<3x384xf32> to vector<1x384xf32>
    %499 = vector.broadcast %498 : vector<1x384xf32> to vector<12x384xf32>
    %500 = arith.mulf %17, %499 : vector<12x384xf32>
    %501 = vector.extract_strided_slice %455 {offsets = [1, 0], sizes = [1, 384], strides = [1, 1]} : vector<3x384xf32> to vector<1x384xf32>
    %502 = vector.broadcast %501 : vector<1x384xf32> to vector<12x384xf32>
    %503 = arith.mulf %20, %502 : vector<12x384xf32>
    %504 = arith.addf %500, %503 : vector<12x384xf32>
    %505 = vector.extract_strided_slice %455 {offsets = [2, 0], sizes = [1, 384], strides = [1, 1]} : vector<3x384xf32> to vector<1x384xf32>
    %506 = vector.broadcast %505 : vector<1x384xf32> to vector<12x384xf32>
    %507 = arith.mulf %23, %506 : vector<12x384xf32>
    %508 = arith.addf %504, %507 : vector<12x384xf32>
    %509 = arith.addf %497, %508 : vector<12x384xf32>
    %510 = vector.extract_strided_slice %509 {offsets = [0, 0], sizes = [9, 384], strides = [1, 1]} : vector<12x384xf32> to vector<9x384xf32>
    %511 = arith.negf %510 : vector<9x384xf32>
    %512 = math.exp %511 : vector<9x384xf32>
    %cst_44 = arith.constant 1.000000e+00 : f32
    %513 = vector.broadcast %cst_44 : f32 to vector<9x384xf32>
    %514 = arith.addf %513, %512 : vector<9x384xf32>
    %515 = arith.divf %513, %514 : vector<9x384xf32>
    %516 = vector.extract_strided_slice %509 {offsets = [9, 0], sizes = [3, 384], strides = [1, 1]} : vector<12x384xf32> to vector<3x384xf32>
    %517 = math.tanh %516 : vector<3x384xf32>
    %518 = vector.extract_strided_slice %515 {offsets = [0, 0], sizes = [3, 384], strides = [1, 1]} : vector<9x384xf32> to vector<3x384xf32>
    %519 = vector.extract_strided_slice %515 {offsets = [3, 0], sizes = [3, 384], strides = [1, 1]} : vector<9x384xf32> to vector<3x384xf32>
    %520 = vector.extract_strided_slice %515 {offsets = [6, 0], sizes = [3, 384], strides = [1, 1]} : vector<9x384xf32> to vector<3x384xf32>
    %521 = arith.mulf %519, %453 : vector<3x384xf32>
    %522 = arith.mulf %518, %517 : vector<3x384xf32>
    %523 = arith.addf %521, %522 : vector<3x384xf32>
    %524 = math.tanh %523 : vector<3x384xf32>
    %525 = arith.mulf %520, %524 : vector<3x384xf32>
    %c18 = arith.constant 18 : index
    %c0_45 = arith.constant 0 : index
    %526 = vector.load %arg16[%c18, %c0_45] : memref<33x384xf32, #tpu.memory_space<vmem>>, vector<3x384xf32>
    tpu.vector_store %arg16[%c18, %c0_45], %525 {strides = array<i32>} : memref<33x384xf32, #tpu.memory_space<vmem>>, vector<3x384xf32>,
    %527 = vector.extract_strided_slice %5 {offsets = [0, 2688], sizes = [12, 384], strides = [1, 1]} : vector<12x4608xf32> to vector<12x384xf32>
    %528 = vector.extract_strided_slice %485 {offsets = [0, 0], sizes = [1, 384], strides = [1, 1]} : vector<3x384xf32> to vector<1x384xf32>
    %529 = vector.broadcast %528 : vector<1x384xf32> to vector<12x384xf32>
    %530 = arith.mulf %8, %529 : vector<12x384xf32>
    %531 = vector.extract_strided_slice %485 {offsets = [1, 0], sizes = [1, 384], strides = [1, 1]} : vector<3x384xf32> to vector<1x384xf32>
    %532 = vector.broadcast %531 : vector<1x384xf32> to vector<12x384xf32>
    %533 = arith.mulf %11, %532 : vector<12x384xf32>
    %534 = arith.addf %530, %533 : vector<12x384xf32>
    %535 = vector.extract_strided_slice %485 {offsets = [2, 0], sizes = [1, 384], strides = [1, 1]} : vector<3x384xf32> to vector<1x384xf32>
    %536 = vector.broadcast %535 : vector<1x384xf32> to vector<12x384xf32>
    %537 = arith.mulf %14, %536 : vector<12x384xf32>
    %538 = arith.addf %534, %537 : vector<12x384xf32>
    %539 = arith.addf %527, %538 : vector<12x384xf32>
    %540 = vector.extract_strided_slice %539 {offsets = [0, 0], sizes = [9, 384], strides = [1, 1]} : vector<12x384xf32> to vector<9x384xf32>
    %541 = arith.negf %540 : vector<9x384xf32>
    %542 = math.exp %541 : vector<9x384xf32>
    %cst_46 = arith.constant 1.000000e+00 : f32
    %543 = vector.broadcast %cst_46 : f32 to vector<9x384xf32>
    %544 = arith.addf %543, %542 : vector<9x384xf32>
    %545 = arith.divf %543, %544 : vector<9x384xf32>
    %546 = vector.extract_strided_slice %539 {offsets = [9, 0], sizes = [3, 384], strides = [1, 1]} : vector<12x384xf32> to vector<3x384xf32>
    %547 = math.tanh %546 : vector<3x384xf32>
    %548 = vector.extract_strided_slice %545 {offsets = [0, 0], sizes = [3, 384], strides = [1, 1]} : vector<9x384xf32> to vector<3x384xf32>
    %549 = vector.extract_strided_slice %545 {offsets = [3, 0], sizes = [3, 384], strides = [1, 1]} : vector<9x384xf32> to vector<3x384xf32>
    %550 = vector.extract_strided_slice %545 {offsets = [6, 0], sizes = [3, 384], strides = [1, 1]} : vector<9x384xf32> to vector<3x384xf32>
    %551 = arith.mulf %549, %483 : vector<3x384xf32>
    %552 = arith.mulf %548, %547 : vector<3x384xf32>
    %553 = arith.addf %551, %552 : vector<3x384xf32>
    %554 = math.tanh %553 : vector<3x384xf32>
    %555 = arith.mulf %550, %554 : vector<3x384xf32>
    %556 = vector.extract_strided_slice %555 {offsets = [0, 0], sizes = [1, 384], strides = [1, 1]} : vector<3x384xf32> to vector<1x384xf32>
    %557 = vector.broadcast %556 : vector<1x384xf32> to vector<12x384xf32>
    %558 = arith.mulf %26, %557 : vector<12x384xf32>
    %559 = vector.extract_strided_slice %555 {offsets = [1, 0], sizes = [1, 384], strides = [1, 1]} : vector<3x384xf32> to vector<1x384xf32>
    %560 = vector.broadcast %559 : vector<1x384xf32> to vector<12x384xf32>
    %561 = arith.mulf %29, %560 : vector<12x384xf32>
    %562 = arith.addf %558, %561 : vector<12x384xf32>
    %563 = vector.extract_strided_slice %555 {offsets = [2, 0], sizes = [1, 384], strides = [1, 1]} : vector<3x384xf32> to vector<1x384xf32>
    %564 = vector.broadcast %563 : vector<1x384xf32> to vector<12x384xf32>
    %565 = arith.mulf %32, %564 : vector<12x384xf32>
    %566 = arith.addf %562, %565 : vector<12x384xf32>
    %567 = arith.addf %35, %566 : vector<12x384xf32>
    %568 = vector.extract_strided_slice %525 {offsets = [0, 0], sizes = [1, 384], strides = [1, 1]} : vector<3x384xf32> to vector<1x384xf32>
    %569 = vector.broadcast %568 : vector<1x384xf32> to vector<12x384xf32>
    %570 = arith.mulf %17, %569 : vector<12x384xf32>
    %571 = vector.extract_strided_slice %525 {offsets = [1, 0], sizes = [1, 384], strides = [1, 1]} : vector<3x384xf32> to vector<1x384xf32>
    %572 = vector.broadcast %571 : vector<1x384xf32> to vector<12x384xf32>
    %573 = arith.mulf %20, %572 : vector<12x384xf32>
    %574 = arith.addf %570, %573 : vector<12x384xf32>
    %575 = vector.extract_strided_slice %525 {offsets = [2, 0], sizes = [1, 384], strides = [1, 1]} : vector<3x384xf32> to vector<1x384xf32>
    %576 = vector.broadcast %575 : vector<1x384xf32> to vector<12x384xf32>
    %577 = arith.mulf %23, %576 : vector<12x384xf32>
    %578 = arith.addf %574, %577 : vector<12x384xf32>
    %579 = arith.addf %567, %578 : vector<12x384xf32>
    %580 = vector.extract_strided_slice %579 {offsets = [0, 0], sizes = [9, 384], strides = [1, 1]} : vector<12x384xf32> to vector<9x384xf32>
    %581 = arith.negf %580 : vector<9x384xf32>
    %582 = math.exp %581 : vector<9x384xf32>
    %cst_47 = arith.constant 1.000000e+00 : f32
    %583 = vector.broadcast %cst_47 : f32 to vector<9x384xf32>
    %584 = arith.addf %583, %582 : vector<9x384xf32>
    %585 = arith.divf %583, %584 : vector<9x384xf32>
    %586 = vector.extract_strided_slice %579 {offsets = [9, 0], sizes = [3, 384], strides = [1, 1]} : vector<12x384xf32> to vector<3x384xf32>
    %587 = math.tanh %586 : vector<3x384xf32>
    %588 = vector.extract_strided_slice %585 {offsets = [0, 0], sizes = [3, 384], strides = [1, 1]} : vector<9x384xf32> to vector<3x384xf32>
    %589 = vector.extract_strided_slice %585 {offsets = [3, 0], sizes = [3, 384], strides = [1, 1]} : vector<9x384xf32> to vector<3x384xf32>
    %590 = vector.extract_strided_slice %585 {offsets = [6, 0], sizes = [3, 384], strides = [1, 1]} : vector<9x384xf32> to vector<3x384xf32>
    %591 = arith.mulf %589, %523 : vector<3x384xf32>
    %592 = arith.mulf %588, %587 : vector<3x384xf32>
    %593 = arith.addf %591, %592 : vector<3x384xf32>
    %594 = math.tanh %593 : vector<3x384xf32>
    %595 = arith.mulf %590, %594 : vector<3x384xf32>
    %c21 = arith.constant 21 : index
    %c0_48 = arith.constant 0 : index
    %596 = vector.load %arg16[%c21, %c0_48] : memref<33x384xf32, #tpu.memory_space<vmem>>, vector<3x384xf32>
    tpu.vector_store %arg16[%c21, %c0_48], %595 {strides = array<i32>} : memref<33x384xf32, #tpu.memory_space<vmem>>, vector<3x384xf32>,
    %597 = vector.extract_strided_slice %5 {offsets = [0, 3072], sizes = [12, 384], strides = [1, 1]} : vector<12x4608xf32> to vector<12x384xf32>
    %598 = vector.extract_strided_slice %555 {offsets = [0, 0], sizes = [1, 384], strides = [1, 1]} : vector<3x384xf32> to vector<1x384xf32>
    %599 = vector.broadcast %598 : vector<1x384xf32> to vector<12x384xf32>
    %600 = arith.mulf %8, %599 : vector<12x384xf32>
    %601 = vector.extract_strided_slice %555 {offsets = [1, 0], sizes = [1, 384], strides = [1, 1]} : vector<3x384xf32> to vector<1x384xf32>
    %602 = vector.broadcast %601 : vector<1x384xf32> to vector<12x384xf32>
    %603 = arith.mulf %11, %602 : vector<12x384xf32>
    %604 = arith.addf %600, %603 : vector<12x384xf32>
    %605 = vector.extract_strided_slice %555 {offsets = [2, 0], sizes = [1, 384], strides = [1, 1]} : vector<3x384xf32> to vector<1x384xf32>
    %606 = vector.broadcast %605 : vector<1x384xf32> to vector<12x384xf32>
    %607 = arith.mulf %14, %606 : vector<12x384xf32>
    %608 = arith.addf %604, %607 : vector<12x384xf32>
    %609 = arith.addf %597, %608 : vector<12x384xf32>
    %610 = vector.extract_strided_slice %609 {offsets = [0, 0], sizes = [9, 384], strides = [1, 1]} : vector<12x384xf32> to vector<9x384xf32>
    %611 = arith.negf %610 : vector<9x384xf32>
    %612 = math.exp %611 : vector<9x384xf32>
    %cst_49 = arith.constant 1.000000e+00 : f32
    %613 = vector.broadcast %cst_49 : f32 to vector<9x384xf32>
    %614 = arith.addf %613, %612 : vector<9x384xf32>
    %615 = arith.divf %613, %614 : vector<9x384xf32>
    %616 = vector.extract_strided_slice %609 {offsets = [9, 0], sizes = [3, 384], strides = [1, 1]} : vector<12x384xf32> to vector<3x384xf32>
    %617 = math.tanh %616 : vector<3x384xf32>
    %618 = vector.extract_strided_slice %615 {offsets = [0, 0], sizes = [3, 384], strides = [1, 1]} : vector<9x384xf32> to vector<3x384xf32>
    %619 = vector.extract_strided_slice %615 {offsets = [3, 0], sizes = [3, 384], strides = [1, 1]} : vector<9x384xf32> to vector<3x384xf32>
    %620 = vector.extract_strided_slice %615 {offsets = [6, 0], sizes = [3, 384], strides = [1, 1]} : vector<9x384xf32> to vector<3x384xf32>
    %621 = arith.mulf %619, %553 : vector<3x384xf32>
    %622 = arith.mulf %618, %617 : vector<3x384xf32>
    %623 = arith.addf %621, %622 : vector<3x384xf32>
    %624 = math.tanh %623 : vector<3x384xf32>
    %625 = arith.mulf %620, %624 : vector<3x384xf32>
    %626 = vector.extract_strided_slice %625 {offsets = [0, 0], sizes = [1, 384], strides = [1, 1]} : vector<3x384xf32> to vector<1x384xf32>
    %627 = vector.broadcast %626 : vector<1x384xf32> to vector<12x384xf32>
    %628 = arith.mulf %26, %627 : vector<12x384xf32>
    %629 = vector.extract_strided_slice %625 {offsets = [1, 0], sizes = [1, 384], strides = [1, 1]} : vector<3x384xf32> to vector<1x384xf32>
    %630 = vector.broadcast %629 : vector<1x384xf32> to vector<12x384xf32>
    %631 = arith.mulf %29, %630 : vector<12x384xf32>
    %632 = arith.addf %628, %631 : vector<12x384xf32>
    %633 = vector.extract_strided_slice %625 {offsets = [2, 0], sizes = [1, 384], strides = [1, 1]} : vector<3x384xf32> to vector<1x384xf32>
    %634 = vector.broadcast %633 : vector<1x384xf32> to vector<12x384xf32>
    %635 = arith.mulf %32, %634 : vector<12x384xf32>
    %636 = arith.addf %632, %635 : vector<12x384xf32>
    %637 = arith.addf %35, %636 : vector<12x384xf32>
    %638 = vector.extract_strided_slice %595 {offsets = [0, 0], sizes = [1, 384], strides = [1, 1]} : vector<3x384xf32> to vector<1x384xf32>
    %639 = vector.broadcast %638 : vector<1x384xf32> to vector<12x384xf32>
    %640 = arith.mulf %17, %639 : vector<12x384xf32>
    %641 = vector.extract_strided_slice %595 {offsets = [1, 0], sizes = [1, 384], strides = [1, 1]} : vector<3x384xf32> to vector<1x384xf32>
    %642 = vector.broadcast %641 : vector<1x384xf32> to vector<12x384xf32>
    %643 = arith.mulf %20, %642 : vector<12x384xf32>
    %644 = arith.addf %640, %643 : vector<12x384xf32>
    %645 = vector.extract_strided_slice %595 {offsets = [2, 0], sizes = [1, 384], strides = [1, 1]} : vector<3x384xf32> to vector<1x384xf32>
    %646 = vector.broadcast %645 : vector<1x384xf32> to vector<12x384xf32>
    %647 = arith.mulf %23, %646 : vector<12x384xf32>
    %648 = arith.addf %644, %647 : vector<12x384xf32>
    %649 = arith.addf %637, %648 : vector<12x384xf32>
    %650 = vector.extract_strided_slice %649 {offsets = [0, 0], sizes = [9, 384], strides = [1, 1]} : vector<12x384xf32> to vector<9x384xf32>
    %651 = arith.negf %650 : vector<9x384xf32>
    %652 = math.exp %651 : vector<9x384xf32>
    %cst_50 = arith.constant 1.000000e+00 : f32
    %653 = vector.broadcast %cst_50 : f32 to vector<9x384xf32>
    %654 = arith.addf %653, %652 : vector<9x384xf32>
    %655 = arith.divf %653, %654 : vector<9x384xf32>
    %656 = vector.extract_strided_slice %649 {offsets = [9, 0], sizes = [3, 384], strides = [1, 1]} : vector<12x384xf32> to vector<3x384xf32>
    %657 = math.tanh %656 : vector<3x384xf32>
    %658 = vector.extract_strided_slice %655 {offsets = [0, 0], sizes = [3, 384], strides = [1, 1]} : vector<9x384xf32> to vector<3x384xf32>
    %659 = vector.extract_strided_slice %655 {offsets = [3, 0], sizes = [3, 384], strides = [1, 1]} : vector<9x384xf32> to vector<3x384xf32>
    %660 = vector.extract_strided_slice %655 {offsets = [6, 0], sizes = [3, 384], strides = [1, 1]} : vector<9x384xf32> to vector<3x384xf32>
    %661 = arith.mulf %659, %593 : vector<3x384xf32>
    %662 = arith.mulf %658, %657 : vector<3x384xf32>
    %663 = arith.addf %661, %662 : vector<3x384xf32>
    %664 = math.tanh %663 : vector<3x384xf32>
    %665 = arith.mulf %660, %664 : vector<3x384xf32>
    %c24 = arith.constant 24 : index
    %c0_51 = arith.constant 0 : index
    %666 = vector.load %arg16[%c24, %c0_51] : memref<33x384xf32, #tpu.memory_space<vmem>>, vector<3x384xf32>
    tpu.vector_store %arg16[%c24, %c0_51], %665 {strides = array<i32>} : memref<33x384xf32, #tpu.memory_space<vmem>>, vector<3x384xf32>,
    %667 = vector.extract_strided_slice %5 {offsets = [0, 3456], sizes = [12, 384], strides = [1, 1]} : vector<12x4608xf32> to vector<12x384xf32>
    %668 = vector.extract_strided_slice %625 {offsets = [0, 0], sizes = [1, 384], strides = [1, 1]} : vector<3x384xf32> to vector<1x384xf32>
    %669 = vector.broadcast %668 : vector<1x384xf32> to vector<12x384xf32>
    %670 = arith.mulf %8, %669 : vector<12x384xf32>
    %671 = vector.extract_strided_slice %625 {offsets = [1, 0], sizes = [1, 384], strides = [1, 1]} : vector<3x384xf32> to vector<1x384xf32>
    %672 = vector.broadcast %671 : vector<1x384xf32> to vector<12x384xf32>
    %673 = arith.mulf %11, %672 : vector<12x384xf32>
    %674 = arith.addf %670, %673 : vector<12x384xf32>
    %675 = vector.extract_strided_slice %625 {offsets = [2, 0], sizes = [1, 384], strides = [1, 1]} : vector<3x384xf32> to vector<1x384xf32>
    %676 = vector.broadcast %675 : vector<1x384xf32> to vector<12x384xf32>
    %677 = arith.mulf %14, %676 : vector<12x384xf32>
    %678 = arith.addf %674, %677 : vector<12x384xf32>
    %679 = arith.addf %667, %678 : vector<12x384xf32>
    %680 = vector.extract_strided_slice %679 {offsets = [0, 0], sizes = [9, 384], strides = [1, 1]} : vector<12x384xf32> to vector<9x384xf32>
    %681 = arith.negf %680 : vector<9x384xf32>
    %682 = math.exp %681 : vector<9x384xf32>
    %cst_52 = arith.constant 1.000000e+00 : f32
    %683 = vector.broadcast %cst_52 : f32 to vector<9x384xf32>
    %684 = arith.addf %683, %682 : vector<9x384xf32>
    %685 = arith.divf %683, %684 : vector<9x384xf32>
    %686 = vector.extract_strided_slice %679 {offsets = [9, 0], sizes = [3, 384], strides = [1, 1]} : vector<12x384xf32> to vector<3x384xf32>
    %687 = math.tanh %686 : vector<3x384xf32>
    %688 = vector.extract_strided_slice %685 {offsets = [0, 0], sizes = [3, 384], strides = [1, 1]} : vector<9x384xf32> to vector<3x384xf32>
    %689 = vector.extract_strided_slice %685 {offsets = [3, 0], sizes = [3, 384], strides = [1, 1]} : vector<9x384xf32> to vector<3x384xf32>
    %690 = vector.extract_strided_slice %685 {offsets = [6, 0], sizes = [3, 384], strides = [1, 1]} : vector<9x384xf32> to vector<3x384xf32>
    %691 = arith.mulf %689, %623 : vector<3x384xf32>
    %692 = arith.mulf %688, %687 : vector<3x384xf32>
    %693 = arith.addf %691, %692 : vector<3x384xf32>
    %694 = math.tanh %693 : vector<3x384xf32>
    %695 = arith.mulf %690, %694 : vector<3x384xf32>
    %696 = vector.extract_strided_slice %695 {offsets = [0, 0], sizes = [1, 384], strides = [1, 1]} : vector<3x384xf32> to vector<1x384xf32>
    %697 = vector.broadcast %696 : vector<1x384xf32> to vector<12x384xf32>
    %698 = arith.mulf %26, %697 : vector<12x384xf32>
    %699 = vector.extract_strided_slice %695 {offsets = [1, 0], sizes = [1, 384], strides = [1, 1]} : vector<3x384xf32> to vector<1x384xf32>
    %700 = vector.broadcast %699 : vector<1x384xf32> to vector<12x384xf32>
    %701 = arith.mulf %29, %700 : vector<12x384xf32>
    %702 = arith.addf %698, %701 : vector<12x384xf32>
    %703 = vector.extract_strided_slice %695 {offsets = [2, 0], sizes = [1, 384], strides = [1, 1]} : vector<3x384xf32> to vector<1x384xf32>
    %704 = vector.broadcast %703 : vector<1x384xf32> to vector<12x384xf32>
    %705 = arith.mulf %32, %704 : vector<12x384xf32>
    %706 = arith.addf %702, %705 : vector<12x384xf32>
    %707 = arith.addf %35, %706 : vector<12x384xf32>
    %708 = vector.extract_strided_slice %665 {offsets = [0, 0], sizes = [1, 384], strides = [1, 1]} : vector<3x384xf32> to vector<1x384xf32>
    %709 = vector.broadcast %708 : vector<1x384xf32> to vector<12x384xf32>
    %710 = arith.mulf %17, %709 : vector<12x384xf32>
    %711 = vector.extract_strided_slice %665 {offsets = [1, 0], sizes = [1, 384], strides = [1, 1]} : vector<3x384xf32> to vector<1x384xf32>
    %712 = vector.broadcast %711 : vector<1x384xf32> to vector<12x384xf32>
    %713 = arith.mulf %20, %712 : vector<12x384xf32>
    %714 = arith.addf %710, %713 : vector<12x384xf32>
    %715 = vector.extract_strided_slice %665 {offsets = [2, 0], sizes = [1, 384], strides = [1, 1]} : vector<3x384xf32> to vector<1x384xf32>
    %716 = vector.broadcast %715 : vector<1x384xf32> to vector<12x384xf32>
    %717 = arith.mulf %23, %716 : vector<12x384xf32>
    %718 = arith.addf %714, %717 : vector<12x384xf32>
    %719 = arith.addf %707, %718 : vector<12x384xf32>
    %720 = vector.extract_strided_slice %719 {offsets = [0, 0], sizes = [9, 384], strides = [1, 1]} : vector<12x384xf32> to vector<9x384xf32>
    %721 = arith.negf %720 : vector<9x384xf32>
    %722 = math.exp %721 : vector<9x384xf32>
    %cst_53 = arith.constant 1.000000e+00 : f32
    %723 = vector.broadcast %cst_53 : f32 to vector<9x384xf32>
    %724 = arith.addf %723, %722 : vector<9x384xf32>
    %725 = arith.divf %723, %724 : vector<9x384xf32>
    %726 = vector.extract_strided_slice %719 {offsets = [9, 0], sizes = [3, 384], strides = [1, 1]} : vector<12x384xf32> to vector<3x384xf32>
    %727 = math.tanh %726 : vector<3x384xf32>
    %728 = vector.extract_strided_slice %725 {offsets = [0, 0], sizes = [3, 384], strides = [1, 1]} : vector<9x384xf32> to vector<3x384xf32>
    %729 = vector.extract_strided_slice %725 {offsets = [3, 0], sizes = [3, 384], strides = [1, 1]} : vector<9x384xf32> to vector<3x384xf32>
    %730 = vector.extract_strided_slice %725 {offsets = [6, 0], sizes = [3, 384], strides = [1, 1]} : vector<9x384xf32> to vector<3x384xf32>
    %731 = arith.mulf %729, %663 : vector<3x384xf32>
    %732 = arith.mulf %728, %727 : vector<3x384xf32>
    %733 = arith.addf %731, %732 : vector<3x384xf32>
    %734 = math.tanh %733 : vector<3x384xf32>
    %735 = arith.mulf %730, %734 : vector<3x384xf32>
    %c27 = arith.constant 27 : index
    %c0_54 = arith.constant 0 : index
    %736 = vector.load %arg16[%c27, %c0_54] : memref<33x384xf32, #tpu.memory_space<vmem>>, vector<3x384xf32>
    tpu.vector_store %arg16[%c27, %c0_54], %735 {strides = array<i32>} : memref<33x384xf32, #tpu.memory_space<vmem>>, vector<3x384xf32>,
    %737 = vector.extract_strided_slice %5 {offsets = [0, 3840], sizes = [12, 384], strides = [1, 1]} : vector<12x4608xf32> to vector<12x384xf32>
    %738 = vector.extract_strided_slice %695 {offsets = [0, 0], sizes = [1, 384], strides = [1, 1]} : vector<3x384xf32> to vector<1x384xf32>
    %739 = vector.broadcast %738 : vector<1x384xf32> to vector<12x384xf32>
    %740 = arith.mulf %8, %739 : vector<12x384xf32>
    %741 = vector.extract_strided_slice %695 {offsets = [1, 0], sizes = [1, 384], strides = [1, 1]} : vector<3x384xf32> to vector<1x384xf32>
    %742 = vector.broadcast %741 : vector<1x384xf32> to vector<12x384xf32>
    %743 = arith.mulf %11, %742 : vector<12x384xf32>
    %744 = arith.addf %740, %743 : vector<12x384xf32>
    %745 = vector.extract_strided_slice %695 {offsets = [2, 0], sizes = [1, 384], strides = [1, 1]} : vector<3x384xf32> to vector<1x384xf32>
    %746 = vector.broadcast %745 : vector<1x384xf32> to vector<12x384xf32>
    %747 = arith.mulf %14, %746 : vector<12x384xf32>
    %748 = arith.addf %744, %747 : vector<12x384xf32>
    %749 = arith.addf %737, %748 : vector<12x384xf32>
    %750 = vector.extract_strided_slice %749 {offsets = [0, 0], sizes = [9, 384], strides = [1, 1]} : vector<12x384xf32> to vector<9x384xf32>
    %751 = arith.negf %750 : vector<9x384xf32>
    %752 = math.exp %751 : vector<9x384xf32>
    %cst_55 = arith.constant 1.000000e+00 : f32
    %753 = vector.broadcast %cst_55 : f32 to vector<9x384xf32>
    %754 = arith.addf %753, %752 : vector<9x384xf32>
    %755 = arith.divf %753, %754 : vector<9x384xf32>
    %756 = vector.extract_strided_slice %749 {offsets = [9, 0], sizes = [3, 384], strides = [1, 1]} : vector<12x384xf32> to vector<3x384xf32>
    %757 = math.tanh %756 : vector<3x384xf32>
    %758 = vector.extract_strided_slice %755 {offsets = [0, 0], sizes = [3, 384], strides = [1, 1]} : vector<9x384xf32> to vector<3x384xf32>
    %759 = vector.extract_strided_slice %755 {offsets = [3, 0], sizes = [3, 384], strides = [1, 1]} : vector<9x384xf32> to vector<3x384xf32>
    %760 = vector.extract_strided_slice %755 {offsets = [6, 0], sizes = [3, 384], strides = [1, 1]} : vector<9x384xf32> to vector<3x384xf32>
    %761 = arith.mulf %759, %693 : vector<3x384xf32>
    %762 = arith.mulf %758, %757 : vector<3x384xf32>
    %763 = arith.addf %761, %762 : vector<3x384xf32>
    %764 = math.tanh %763 : vector<3x384xf32>
    %765 = arith.mulf %760, %764 : vector<3x384xf32>
    %766 = vector.extract_strided_slice %765 {offsets = [0, 0], sizes = [1, 384], strides = [1, 1]} : vector<3x384xf32> to vector<1x384xf32>
    %767 = vector.broadcast %766 : vector<1x384xf32> to vector<12x384xf32>
    %768 = arith.mulf %26, %767 : vector<12x384xf32>
    %769 = vector.extract_strided_slice %765 {offsets = [1, 0], sizes = [1, 384], strides = [1, 1]} : vector<3x384xf32> to vector<1x384xf32>
    %770 = vector.broadcast %769 : vector<1x384xf32> to vector<12x384xf32>
    %771 = arith.mulf %29, %770 : vector<12x384xf32>
    %772 = arith.addf %768, %771 : vector<12x384xf32>
    %773 = vector.extract_strided_slice %765 {offsets = [2, 0], sizes = [1, 384], strides = [1, 1]} : vector<3x384xf32> to vector<1x384xf32>
    %774 = vector.broadcast %773 : vector<1x384xf32> to vector<12x384xf32>
    %775 = arith.mulf %32, %774 : vector<12x384xf32>
    %776 = arith.addf %772, %775 : vector<12x384xf32>
    %777 = arith.addf %35, %776 : vector<12x384xf32>
    %778 = vector.extract_strided_slice %735 {offsets = [0, 0], sizes = [1, 384], strides = [1, 1]} : vector<3x384xf32> to vector<1x384xf32>
    %779 = vector.broadcast %778 : vector<1x384xf32> to vector<12x384xf32>
    %780 = arith.mulf %17, %779 : vector<12x384xf32>
    %781 = vector.extract_strided_slice %735 {offsets = [1, 0], sizes = [1, 384], strides = [1, 1]} : vector<3x384xf32> to vector<1x384xf32>
    %782 = vector.broadcast %781 : vector<1x384xf32> to vector<12x384xf32>
    %783 = arith.mulf %20, %782 : vector<12x384xf32>
    %784 = arith.addf %780, %783 : vector<12x384xf32>
    %785 = vector.extract_strided_slice %735 {offsets = [2, 0], sizes = [1, 384], strides = [1, 1]} : vector<3x384xf32> to vector<1x384xf32>
    %786 = vector.broadcast %785 : vector<1x384xf32> to vector<12x384xf32>
    %787 = arith.mulf %23, %786 : vector<12x384xf32>
    %788 = arith.addf %784, %787 : vector<12x384xf32>
    %789 = arith.addf %777, %788 : vector<12x384xf32>
    %790 = vector.extract_strided_slice %789 {offsets = [0, 0], sizes = [9, 384], strides = [1, 1]} : vector<12x384xf32> to vector<9x384xf32>
    %791 = arith.negf %790 : vector<9x384xf32>
    %792 = math.exp %791 : vector<9x384xf32>
    %cst_56 = arith.constant 1.000000e+00 : f32
    %793 = vector.broadcast %cst_56 : f32 to vector<9x384xf32>
    %794 = arith.addf %793, %792 : vector<9x384xf32>
    %795 = arith.divf %793, %794 : vector<9x384xf32>
    %796 = vector.extract_strided_slice %789 {offsets = [9, 0], sizes = [3, 384], strides = [1, 1]} : vector<12x384xf32> to vector<3x384xf32>
    %797 = math.tanh %796 : vector<3x384xf32>
    %798 = vector.extract_strided_slice %795 {offsets = [0, 0], sizes = [3, 384], strides = [1, 1]} : vector<9x384xf32> to vector<3x384xf32>
    %799 = vector.extract_strided_slice %795 {offsets = [3, 0], sizes = [3, 384], strides = [1, 1]} : vector<9x384xf32> to vector<3x384xf32>
    %800 = vector.extract_strided_slice %795 {offsets = [6, 0], sizes = [3, 384], strides = [1, 1]} : vector<9x384xf32> to vector<3x384xf32>
    %801 = arith.mulf %799, %733 : vector<3x384xf32>
    %802 = arith.mulf %798, %797 : vector<3x384xf32>
    %803 = arith.addf %801, %802 : vector<3x384xf32>
    %804 = math.tanh %803 : vector<3x384xf32>
    %805 = arith.mulf %800, %804 : vector<3x384xf32>
    %c30 = arith.constant 30 : index
    %c0_57 = arith.constant 0 : index
    %806 = vector.load %arg16[%c30, %c0_57] : memref<33x384xf32, #tpu.memory_space<vmem>>, vector<3x384xf32>
    tpu.vector_store %arg16[%c30, %c0_57], %805 {strides = array<i32>} : memref<33x384xf32, #tpu.memory_space<vmem>>, vector<3x384xf32>,
    %807 = vector.extract_strided_slice %5 {offsets = [0, 4224], sizes = [12, 384], strides = [1, 1]} : vector<12x4608xf32> to vector<12x384xf32>
    %808 = vector.extract_strided_slice %765 {offsets = [0, 0], sizes = [1, 384], strides = [1, 1]} : vector<3x384xf32> to vector<1x384xf32>
    %809 = vector.broadcast %808 : vector<1x384xf32> to vector<12x384xf32>
    %810 = arith.mulf %8, %809 : vector<12x384xf32>
    %811 = vector.extract_strided_slice %765 {offsets = [1, 0], sizes = [1, 384], strides = [1, 1]} : vector<3x384xf32> to vector<1x384xf32>
    %812 = vector.broadcast %811 : vector<1x384xf32> to vector<12x384xf32>
    %813 = arith.mulf %11, %812 : vector<12x384xf32>
    %814 = arith.addf %810, %813 : vector<12x384xf32>
    %815 = vector.extract_strided_slice %765 {offsets = [2, 0], sizes = [1, 384], strides = [1, 1]} : vector<3x384xf32> to vector<1x384xf32>
    %816 = vector.broadcast %815 : vector<1x384xf32> to vector<12x384xf32>
    %817 = arith.mulf %14, %816 : vector<12x384xf32>
    %818 = arith.addf %814, %817 : vector<12x384xf32>
    %819 = arith.addf %807, %818 : vector<12x384xf32>
    %820 = vector.extract_strided_slice %819 {offsets = [0, 0], sizes = [9, 384], strides = [1, 1]} : vector<12x384xf32> to vector<9x384xf32>
    %821 = arith.negf %820 : vector<9x384xf32>
    %822 = math.exp %821 : vector<9x384xf32>
    %cst_58 = arith.constant 1.000000e+00 : f32
    %823 = vector.broadcast %cst_58 : f32 to vector<9x384xf32>
    %824 = arith.addf %823, %822 : vector<9x384xf32>
    %825 = arith.divf %823, %824 : vector<9x384xf32>
    %826 = vector.extract_strided_slice %819 {offsets = [9, 0], sizes = [3, 384], strides = [1, 1]} : vector<12x384xf32> to vector<3x384xf32>
    %827 = math.tanh %826 : vector<3x384xf32>
    %828 = vector.extract_strided_slice %825 {offsets = [0, 0], sizes = [3, 384], strides = [1, 1]} : vector<9x384xf32> to vector<3x384xf32>
    %829 = vector.extract_strided_slice %825 {offsets = [3, 0], sizes = [3, 384], strides = [1, 1]} : vector<9x384xf32> to vector<3x384xf32>
    %830 = vector.extract_strided_slice %825 {offsets = [6, 0], sizes = [3, 384], strides = [1, 1]} : vector<9x384xf32> to vector<3x384xf32>
    %831 = arith.mulf %829, %763 : vector<3x384xf32>
    %832 = arith.mulf %828, %827 : vector<3x384xf32>
    %833 = arith.addf %831, %832 : vector<3x384xf32>
    %834 = math.tanh %833 : vector<3x384xf32>
    %835 = arith.mulf %830, %834 : vector<3x384xf32>
    %836 = vector.extract_strided_slice %835 {offsets = [0, 0], sizes = [1, 384], strides = [1, 1]} : vector<3x384xf32> to vector<1x384xf32>
    %837 = vector.broadcast %836 : vector<1x384xf32> to vector<12x384xf32>
    %838 = arith.mulf %26, %837 : vector<12x384xf32>
    %839 = vector.extract_strided_slice %835 {offsets = [1, 0], sizes = [1, 384], strides = [1, 1]} : vector<3x384xf32> to vector<1x384xf32>
    %840 = vector.broadcast %839 : vector<1x384xf32> to vector<12x384xf32>
    %841 = arith.mulf %29, %840 : vector<12x384xf32>
    %842 = arith.addf %838, %841 : vector<12x384xf32>
    %843 = vector.extract_strided_slice %835 {offsets = [2, 0], sizes = [1, 384], strides = [1, 1]} : vector<3x384xf32> to vector<1x384xf32>
    %844 = vector.broadcast %843 : vector<1x384xf32> to vector<12x384xf32>
    %845 = arith.mulf %32, %844 : vector<12x384xf32>
    %846 = arith.addf %842, %845 : vector<12x384xf32>
    %847 = arith.addf %35, %846 : vector<12x384xf32>
    %848 = vector.extract_strided_slice %805 {offsets = [0, 0], sizes = [1, 384], strides = [1, 1]} : vector<3x384xf32> to vector<1x384xf32>
    %849 = vector.broadcast %848 : vector<1x384xf32> to vector<12x384xf32>
    %850 = arith.mulf %17, %849 : vector<12x384xf32>
    %851 = vector.extract_strided_slice %805 {offsets = [1, 0], sizes = [1, 384], strides = [1, 1]} : vector<3x384xf32> to vector<1x384xf32>
    %852 = vector.broadcast %851 : vector<1x384xf32> to vector<12x384xf32>
    %853 = arith.mulf %20, %852 : vector<12x384xf32>
    %854 = arith.addf %850, %853 : vector<12x384xf32>
    %855 = vector.extract_strided_slice %805 {offsets = [2, 0], sizes = [1, 384], strides = [1, 1]} : vector<3x384xf32> to vector<1x384xf32>
    %856 = vector.broadcast %855 : vector<1x384xf32> to vector<12x384xf32>
    %857 = arith.mulf %23, %856 : vector<12x384xf32>
    %858 = arith.addf %854, %857 : vector<12x384xf32>
    %859 = arith.addf %847, %858 : vector<12x384xf32>
    %860 = vector.extract_strided_slice %859 {offsets = [0, 0], sizes = [9, 384], strides = [1, 1]} : vector<12x384xf32> to vector<9x384xf32>
    %861 = arith.negf %860 : vector<9x384xf32>
    %862 = math.exp %861 : vector<9x384xf32>
    %cst_59 = arith.constant 1.000000e+00 : f32
    %863 = vector.broadcast %cst_59 : f32 to vector<9x384xf32>
    %864 = arith.addf %863, %862 : vector<9x384xf32>
    %865 = arith.divf %863, %864 : vector<9x384xf32>
    %866 = vector.extract_strided_slice %859 {offsets = [9, 0], sizes = [3, 384], strides = [1, 1]} : vector<12x384xf32> to vector<3x384xf32>
    %867 = math.tanh %866 : vector<3x384xf32>
    %868 = vector.extract_strided_slice %865 {offsets = [0, 0], sizes = [3, 384], strides = [1, 1]} : vector<9x384xf32> to vector<3x384xf32>
    %869 = vector.extract_strided_slice %865 {offsets = [3, 0], sizes = [3, 384], strides = [1, 1]} : vector<9x384xf32> to vector<3x384xf32>
    %870 = vector.extract_strided_slice %865 {offsets = [6, 0], sizes = [3, 384], strides = [1, 1]} : vector<9x384xf32> to vector<3x384xf32>
    %871 = arith.mulf %869, %803 : vector<3x384xf32>
    %872 = arith.mulf %868, %867 : vector<3x384xf32>
    %873 = arith.addf %871, %872 : vector<3x384xf32>
    %874 = math.tanh %873 : vector<3x384xf32>
    %875 = arith.mulf %870, %874 : vector<3x384xf32>
    %c0_60 = arith.constant 0 : index
    %c0_61 = arith.constant 0 : index
    %876 = vector.load %arg16[%c0_60, %c0_61] : memref<33x384xf32, #tpu.memory_space<vmem>>, vector<33x384xf32>
    %c0_62 = arith.constant 0 : index
    %c0_63 = arith.constant 0 : index
    %877 = vector.load %arg8[%c0_62, %c0_63] : memref<24x33xbf16, #tpu.memory_space<vmem>>, vector<24x33xbf16>
    %878 = arith.truncf %876 : vector<33x384xf32> to vector<33x384xbf16>
    %cst_64 = arith.constant dense<0.000000e+00> : vector<24x384xf32>
    %879 = tpu.matmul %877, %878, %cst_64 {dimension_numbers = #tpu.dot_dimension_numbers<[1], [0], [0], [1], [0, 0, 1, 1], [], []>} : vector<24x33xbf16>, vector<33x384xbf16>, vector<24x384xf32> -> vector<24x384xf32>
    %c0_65 = arith.constant 0 : index
    %c0_66 = arith.constant 0 : index
    %880 = vector.load %arg9[%c0_65, %c0_66] : memref<24x1xf32, #tpu.memory_space<vmem>>, vector<24x1xf32>
    %881 = vector.broadcast %880 : vector<24x1xf32> to vector<24x384xf32>
    %882 = arith.addf %879, %881 : vector<24x384xf32>
    %c0_67 = arith.constant 0 : index
    %c0_68 = arith.constant 0 : index
    %883 = vector.load %arg10[%c0_67, %c0_68] : memref<9x24xbf16, #tpu.memory_space<vmem>>, vector<9x24xbf16>
    %884 = arith.truncf %882 : vector<24x384xf32> to vector<24x384xbf16>
    %cst_69 = arith.constant dense<0.000000e+00> : vector<9x384xf32>
    %885 = tpu.matmul %883, %884, %cst_69 {dimension_numbers = #tpu.dot_dimension_numbers<[1], [0], [0], [1], [0, 0, 1, 1], [], []>} : vector<9x24xbf16>, vector<24x384xbf16>, vector<9x384xf32> -> vector<9x384xf32>
    %c0_70 = arith.constant 0 : index
    %c0_71 = arith.constant 0 : index
    %886 = vector.load %arg11[%c0_70, %c0_71] : memref<9x1xf32, #tpu.memory_space<vmem>>, vector<9x1xf32>
    %887 = vector.broadcast %886 : vector<9x1xf32> to vector<9x384xf32>
    %888 = arith.addf %885, %887 : vector<9x384xf32>
    %cst_72 = arith.constant 0.000000e+00 : f32
    %889 = vector.broadcast %cst_72 : f32 to vector<8x384xf32>
    %890 = vector.extract_strided_slice %888 {offsets = [0, 0], sizes = [1, 384], strides = [1, 1]} : vector<9x384xf32> to vector<1x384xf32>
    %891 = vector.extract_strided_slice %875 {offsets = [0, 0], sizes = [1, 384], strides = [1, 1]} : vector<3x384xf32> to vector<1x384xf32>
    %892 = arith.mulf %890, %891 : vector<1x384xf32>
    %893 = vector.extract_strided_slice %888 {offsets = [1, 0], sizes = [1, 384], strides = [1, 1]} : vector<9x384xf32> to vector<1x384xf32>
    %894 = vector.extract_strided_slice %875 {offsets = [1, 0], sizes = [1, 384], strides = [1, 1]} : vector<3x384xf32> to vector<1x384xf32>
    %895 = arith.mulf %893, %894 : vector<1x384xf32>
    %896 = arith.addf %892, %895 : vector<1x384xf32>
    %897 = vector.extract_strided_slice %888 {offsets = [2, 0], sizes = [1, 384], strides = [1, 1]} : vector<9x384xf32> to vector<1x384xf32>
    %898 = vector.extract_strided_slice %875 {offsets = [2, 0], sizes = [1, 384], strides = [1, 1]} : vector<3x384xf32> to vector<1x384xf32>
    %899 = arith.mulf %897, %898 : vector<1x384xf32>
    %900 = arith.addf %896, %899 : vector<1x384xf32>
    %901 = arith.negf %900 : vector<1x384xf32>
    %902 = math.exp %901 : vector<1x384xf32>
    %cst_73 = arith.constant 1.000000e+00 : f32
    %903 = vector.broadcast %cst_73 : f32 to vector<1x384xf32>
    %904 = arith.addf %903, %902 : vector<1x384xf32>
    %905 = arith.divf %903, %904 : vector<1x384xf32>
    %906 = vector.extract_strided_slice %882 {offsets = [0, 0], sizes = [8, 384], strides = [1, 1]} : vector<24x384xf32> to vector<8x384xf32>
    %907 = vector.broadcast %905 : vector<1x384xf32> to vector<8x384xf32>
    %908 = arith.mulf %907, %906 : vector<8x384xf32>
    %909 = arith.addf %889, %908 : vector<8x384xf32>
    %910 = vector.extract_strided_slice %888 {offsets = [3, 0], sizes = [1, 384], strides = [1, 1]} : vector<9x384xf32> to vector<1x384xf32>
    %911 = vector.extract_strided_slice %875 {offsets = [0, 0], sizes = [1, 384], strides = [1, 1]} : vector<3x384xf32> to vector<1x384xf32>
    %912 = arith.mulf %910, %911 : vector<1x384xf32>
    %913 = vector.extract_strided_slice %888 {offsets = [4, 0], sizes = [1, 384], strides = [1, 1]} : vector<9x384xf32> to vector<1x384xf32>
    %914 = vector.extract_strided_slice %875 {offsets = [1, 0], sizes = [1, 384], strides = [1, 1]} : vector<3x384xf32> to vector<1x384xf32>
    %915 = arith.mulf %913, %914 : vector<1x384xf32>
    %916 = arith.addf %912, %915 : vector<1x384xf32>
    %917 = vector.extract_strided_slice %888 {offsets = [5, 0], sizes = [1, 384], strides = [1, 1]} : vector<9x384xf32> to vector<1x384xf32>
    %918 = vector.extract_strided_slice %875 {offsets = [2, 0], sizes = [1, 384], strides = [1, 1]} : vector<3x384xf32> to vector<1x384xf32>
    %919 = arith.mulf %917, %918 : vector<1x384xf32>
    %920 = arith.addf %916, %919 : vector<1x384xf32>
    %921 = arith.negf %920 : vector<1x384xf32>
    %922 = math.exp %921 : vector<1x384xf32>
    %cst_74 = arith.constant 1.000000e+00 : f32
    %923 = vector.broadcast %cst_74 : f32 to vector<1x384xf32>
    %924 = arith.addf %923, %922 : vector<1x384xf32>
    %925 = arith.divf %923, %924 : vector<1x384xf32>
    %926 = vector.extract_strided_slice %882 {offsets = [8, 0], sizes = [8, 384], strides = [1, 1]} : vector<24x384xf32> to vector<8x384xf32>
    %927 = vector.broadcast %925 : vector<1x384xf32> to vector<8x384xf32>
    %928 = arith.mulf %927, %926 : vector<8x384xf32>
    %929 = arith.addf %909, %928 : vector<8x384xf32>
    %930 = vector.extract_strided_slice %888 {offsets = [6, 0], sizes = [1, 384], strides = [1, 1]} : vector<9x384xf32> to vector<1x384xf32>
    %931 = vector.extract_strided_slice %875 {offsets = [0, 0], sizes = [1, 384], strides = [1, 1]} : vector<3x384xf32> to vector<1x384xf32>
    %932 = arith.mulf %930, %931 : vector<1x384xf32>
    %933 = vector.extract_strided_slice %888 {offsets = [7, 0], sizes = [1, 384], strides = [1, 1]} : vector<9x384xf32> to vector<1x384xf32>
    %934 = vector.extract_strided_slice %875 {offsets = [1, 0], sizes = [1, 384], strides = [1, 1]} : vector<3x384xf32> to vector<1x384xf32>
    %935 = arith.mulf %933, %934 : vector<1x384xf32>
    %936 = arith.addf %932, %935 : vector<1x384xf32>
    %937 = vector.extract_strided_slice %888 {offsets = [8, 0], sizes = [1, 384], strides = [1, 1]} : vector<9x384xf32> to vector<1x384xf32>
    %938 = vector.extract_strided_slice %875 {offsets = [2, 0], sizes = [1, 384], strides = [1, 1]} : vector<3x384xf32> to vector<1x384xf32>
    %939 = arith.mulf %937, %938 : vector<1x384xf32>
    %940 = arith.addf %936, %939 : vector<1x384xf32>
    %941 = arith.negf %940 : vector<1x384xf32>
    %942 = math.exp %941 : vector<1x384xf32>
    %cst_75 = arith.constant 1.000000e+00 : f32
    %943 = vector.broadcast %cst_75 : f32 to vector<1x384xf32>
    %944 = arith.addf %943, %942 : vector<1x384xf32>
    %945 = arith.divf %943, %944 : vector<1x384xf32>
    %946 = vector.extract_strided_slice %882 {offsets = [16, 0], sizes = [8, 384], strides = [1, 1]} : vector<24x384xf32> to vector<8x384xf32>
    %947 = vector.broadcast %945 : vector<1x384xf32> to vector<8x384xf32>
    %948 = arith.mulf %947, %946 : vector<8x384xf32>
    %949 = arith.addf %929, %948 : vector<8x384xf32>
    %c0_76 = arith.constant 0 : index
    %c0_77 = arith.constant 0 : index
    %950 = vector.load %arg12[%c0_76, %c0_77] : memref<1x8xbf16, #tpu.memory_space<vmem>>, vector<1x8xbf16>
    %951 = arith.truncf %949 : vector<8x384xf32> to vector<8x384xbf16>
    %cst_78 = arith.constant dense<0.000000e+00> : vector<1x384xf32>
    %952 = tpu.matmul %950, %951, %cst_78 {dimension_numbers = #tpu.dot_dimension_numbers<[1], [0], [0], [1], [0, 0, 1, 1], [], []>} : vector<1x8xbf16>, vector<8x384xbf16>, vector<1x384xf32> -> vector<1x384xf32>
    %c0_79 = arith.constant 0 : index
    %c0_80 = arith.constant 0 : index
    %953 = vector.load %arg13[%c0_79, %c0_80] : memref<1x3xbf16, #tpu.memory_space<vmem>>, vector<1x3xbf16>
    %954 = arith.truncf %875 : vector<3x384xf32> to vector<3x384xbf16>
    %cst_81 = arith.constant dense<0.000000e+00> : vector<1x384xf32>
    %955 = tpu.matmul %953, %954, %cst_81 {dimension_numbers = #tpu.dot_dimension_numbers<[1], [0], [0], [1], [0, 0, 1, 1], [], []>} : vector<1x3xbf16>, vector<3x384xbf16>, vector<1x384xf32> -> vector<1x384xf32>
    %956 = arith.addf %952, %955 : vector<1x384xf32>
    %c0_82 = arith.constant 0 : index
    %c0_83 = arith.constant 0 : index
    %957 = vector.load %arg14[%c0_82, %c0_83] : memref<1x1xf32, #tpu.memory_space<vmem>>, vector<1x1xf32>
    %958 = vector.broadcast %957 : vector<1x1xf32> to vector<1x384xf32>
    %959 = arith.addf %956, %958 : vector<1x384xf32>
    %c0_84 = arith.constant 0 : index
    %c0_85 = arith.constant 0 : index
    %960 = vector.load %arg15[%c0_84, %c0_85] : memref<1x384xf32, #tpu.memory_space<vmem>>, vector<1x384xf32>
    tpu.vector_store %arg15[%c0_84, %c0_85], %959 {strides = array<i32>} : memref<1x384xf32, #tpu.memory_space<vmem>>, vector<1x384xf32>,
    return
  }
  func.func @transform_0(%arg0: i32) -> (i32, i32) {
    %c0_i32 = arith.constant 0 : i32
    %c0_i32_0 = arith.constant 0 : i32
    return %c0_i32, %arg0 : i32, i32
  }
  func.func @transform_1(%arg0: i32) -> (i32, i32) {
    %c0_i32 = arith.constant 0 : i32
    %c0_i32_0 = arith.constant 0 : i32
    %c0_i32_1 = arith.constant 0 : i32
    return %c0_i32, %c0_i32_0 : i32, i32
  }
  func.func @transform_2(%arg0: i32) -> (i32, i32) {
    %c0_i32 = arith.constant 0 : i32
    %c0_i32_0 = arith.constant 0 : i32
    %c0_i32_1 = arith.constant 0 : i32
    return %c0_i32, %c0_i32_0 : i32, i32
  }
  func.func @transform_3(%arg0: i32) -> (i32, i32) {
    %c0_i32 = arith.constant 0 : i32
    %c0_i32_0 = arith.constant 0 : i32
    %c0_i32_1 = arith.constant 0 : i32
    return %c0_i32, %c0_i32_0 : i32, i32
  }
  func.func @transform_4(%arg0: i32) -> (i32, i32) {
    %c0_i32 = arith.constant 0 : i32
    %c0_i32_0 = arith.constant 0 : i32
    %c0_i32_1 = arith.constant 0 : i32
    return %c0_i32, %c0_i32_0 : i32, i32
  }
  func.func @transform_5(%arg0: i32) -> (i32, i32) {
    %c0_i32 = arith.constant 0 : i32
    %c0_i32_0 = arith.constant 0 : i32
    %c0_i32_1 = arith.constant 0 : i32
    return %c0_i32, %c0_i32_0 : i32, i32
  }
  func.func @transform_6(%arg0: i32) -> (i32, i32) {
    %c0_i32 = arith.constant 0 : i32
    %c0_i32_0 = arith.constant 0 : i32
    %c0_i32_1 = arith.constant 0 : i32
    return %c0_i32, %c0_i32_0 : i32, i32
  }
  func.func @transform_7(%arg0: i32) -> (i32, i32) {
    %c0_i32 = arith.constant 0 : i32
    %c0_i32_0 = arith.constant 0 : i32
    %c0_i32_1 = arith.constant 0 : i32
    return %c0_i32, %c0_i32_0 : i32, i32
  }
  func.func @transform_8(%arg0: i32) -> (i32, i32) {
    %c0_i32 = arith.constant 0 : i32
    %c0_i32_0 = arith.constant 0 : i32
    %c0_i32_1 = arith.constant 0 : i32
    return %c0_i32, %c0_i32_0 : i32, i32
  }
  func.func @transform_9(%arg0: i32) -> (i32, i32) {
    %c0_i32 = arith.constant 0 : i32
    %c0_i32_0 = arith.constant 0 : i32
    %c0_i32_1 = arith.constant 0 : i32
    return %c0_i32, %c0_i32_0 : i32, i32
  }
  func.func @transform_10(%arg0: i32) -> (i32, i32) {
    %c0_i32 = arith.constant 0 : i32
    %c0_i32_0 = arith.constant 0 : i32
    %c0_i32_1 = arith.constant 0 : i32
    return %c0_i32, %c0_i32_0 : i32, i32
  }
  func.func @transform_11(%arg0: i32) -> (i32, i32) {
    %c0_i32 = arith.constant 0 : i32
    %c0_i32_0 = arith.constant 0 : i32
    %c0_i32_1 = arith.constant 0 : i32
    return %c0_i32, %c0_i32_0 : i32, i32
  }
  func.func @transform_12(%arg0: i32) -> (i32, i32) {
    %c0_i32 = arith.constant 0 : i32
    %c0_i32_0 = arith.constant 0 : i32
    %c0_i32_1 = arith.constant 0 : i32
    return %c0_i32, %c0_i32_0 : i32, i32
  }
  func.func @transform_13(%arg0: i32) -> (i32, i32) {
    %c0_i32 = arith.constant 0 : i32
    %c0_i32_0 = arith.constant 0 : i32
    %c0_i32_1 = arith.constant 0 : i32
    return %c0_i32, %c0_i32_0 : i32, i32
  }
  func.func @transform_14(%arg0: i32) -> (i32, i32) {
    %c0_i32 = arith.constant 0 : i32
    %c0_i32_0 = arith.constant 0 : i32
    return %c0_i32, %arg0 : i32, i32
  }
}

</mosaic_0001>

<bundles_post_ra>
// kernel: tpu_custom_call.1
= control target key start
LH: loop header
LB: loop body
LE: loop exit
PB: predicated region body
PF: predicated region fallthrough
CT: control target
= control target key end

     0   :  { %s10864_s0 = inlined_call_operand.vmem [shape: bf16[7,4608], index: 0, kind: input, shape index: {}]   ;;  %s10865_s1 = inlined_call_operand.vmem [shape: bf16[12,7], index: 1, kind: input, shape index: {}]   ;;  %s10866_s2 = inlined_call_operand.vmem [shape: f32[12,1], index: 2, kind: input, shape index: {}]   ;;  %s10867_s3 = inlined_call_operand.vmem [shape: f32[12,3], index: 3, kind: input, shape index: {}]   ;;  %s10868_s4 = inlined_call_operand.vmem [shape: f32[12,3], index: 4, kind: input, shape index: {}]   ;;  %s10869_s5 = inlined_call_operand.vmem [shape: f32[12,1], index: 5, kind: input, shape index: {}]   ;;  %s10870_s6 = inlined_call_operand.vmem [shape: f32[12,3], index: 6, kind: input, shape index: {}]   ;;  %s10871_s7 = inlined_call_operand.vmem [shape: bf16[24,33], index: 7, kind: input, shape index: {}]   ;;  %s10872_s8 = inlined_call_operand.vmem [shape: f32[24,1], index: 8, kind: input, shape index: {}]   ;;  %s10873_s9 = inlined_call_operand.vmem [shape: bf16[9,24], index: 9, kind: input, shape index: {}]   ;;  %s10874_s10 = inlined_call_operand.vmem [shape: f32[9,1], index: 10, kind: input, shape index: {}]   ;;  %s10875_s11 = inlined_call_operand.vmem [shape: bf16[1,8], index: 11, kind: input, shape index: {}]   ;;  %s10876_s12 = inlined_call_operand.vmem [shape: bf16[1,3], index: 12, kind: input, shape index: {}]   ;;  %s10877_s13 = inlined_call_operand.<no memory space> [shape: f32[1,1], index: 13, kind: input, shape index: {}]   ;;  %s10878_s14 = inlined_call_operand.hbm [shape: f32[1,384], index: 14, kind: output, shape index: {}]  }
   0x1   :  { %v19_v0 = vstv %s10877_s13 }
   0x2   :  { %20 = vst [vmem:[#allocation3] sm:$0x1] %v19_v0 }
   0x3   :  { %v53_v1 = vld [vmem:[%s10864_s0] sm:$0xff]  ;;  %vm182_vm0 = vcmask 1042432   ;;  %vm183_vm1 = vcmask 1043456   ;;  %v54_v2 = vld [vmem:[%s10864_s0 + $0x8] sm:$0xff]  ;;  %v10879_v4 = vmov 65535   ;;  %v10880_v8 = vmov 0  }
   0x4   :  { %v6261_v3 = vcombine.high %v53_v1, %v53_v1  ;;  %v184_v5 = vsel %vm182_vm0, 4294967295, %v10879_v4  ;;  %v6263_v6 = vcombine.high %v54_v2, %v54_v2  ;;  %v6260_v7 = vcombine.low %v53_v1, %v53_v1  ;;  %326 = vmatprep.mubr.bf16.mxu0 %v10880_v8  ;;  %369 = vmatprep.mubr.bf16.mxu1 %v10880_v8  ;;  %v55_v9 = vld [vmem:[%s10864_s0 + $0x10] sm:$0xff]  ;;  %v56_v13 = vld [vmem:[%s10864_s0 + $0x18] sm:$0xff]  ;;  %v57_v14 = vld [vmem:[%s10864_s0 + $0x20] sm:$0xff] }
   0x5   :  { %v7614_v10 = vsel %vm183_vm1, %v184_v5, 0  ;;  %v6262_v11 = vcombine.low %v54_v2, %v54_v2  ;;  %v6264_v12 = vcombine.low %v55_v9, %v55_v9  ;;  %6532 = vset.pattern.permute.xlu0 %v10880_v8  ;;  %v6265_v18 = vcombine.high %v55_v9, %v55_v9  ;;  %v58_v22 = vld [vmem:[%s10864_s0 + $0x28] sm:$0xff]  ;;  %v7633_v23 = vld [vmem:[%s10865_s1] sm:$0x3f]   ;;  %v59_v32 = vld [vmem:[%s10864_s0 + $0x30] sm:$0xff] }
   0x6   :  { %v190_v15 = vand.u32 %v6261_v3, %v7614_v10  ;;  %v196_v16 = vand.u32 %v6263_v6, %v7614_v10  ;;  %v187_v17 = vand.u32 %v6260_v7, %v7614_v10  ;;  %v6266_v20 = vcombine.low %v56_v13, %v56_v13  ;;  %v60_v33 = vld [vmem:[%s10864_s0 + $0x38] sm:$0xff]  ;;  %v1068_v36 = vld [vmem:[%s10867_s3] sm:$0xff] }
   0x7   :  { %v193_v19 = vand.u32 %v6262_v11, %v7614_v10  ;;  %v6267_v21 = vcombine.high %v56_v13, %v56_v13  ;;  %v202_v24 = vand.u32 %v6265_v18, %v7614_v10  ;;  %v6269_v25 = vcombine.high %v57_v14, %v57_v14 }
   0x8   :  { %294 = vmatprep.subr.bf16.mxu0 %v190_v15  ;;  %337 = vmatprep.subr.bf16.mxu1 %v196_v16  ;;  %vm178_vm2 = vcmask 56320   ;;  %v199_v27 = vand.u32 %v6264_v12, %v7614_v10  ;;  %v205_v28 = vand.u32 %v6266_v20, %v7614_v10  ;;  %v6271_v29 = vcombine.high %v58_v22, %v58_v22 }
   0x9   :  { %295 = vmatpush1.bf16.msra.mxu0 %v187_v17  ;;  %338 = vmatpush1.bf16.msra.mxu1 %v193_v19  ;;  %v208_v26 = vand.u32 %v6267_v21, %v7614_v10  ;;  %v214_v30 = vand.u32 %v6269_v25, %v7614_v10  ;;  %v6268_v34 = vcombine.low %v57_v14, %v57_v14  ;;  %v7516_v39 = vmov 2  }
   0xa   :  { %380 = vmatprep.subr.bf16.mxu0 %v202_v24  ;;  %v220_v31 = vand.u32 %v6271_v29, %v7614_v10  ;;  %v6270_v35 = vcombine.low %v58_v22, %v58_v22  ;;  %v6273_v37 = vcombine.high %v59_v32, %v59_v32  ;;  %v6275_v38 = vcombine.high %v60_v33, %v60_v33 }
   0xb   :  { %423 = vmatprep.subr.bf16.mxu1 %v208_v26  ;;  %6534 = vset.pattern.permute.xlu1 %v7516_v39 }
   0xc   :  { %6296 = vmatmul.mubr.msk.bf16.vlgmr.msra.gmra.mrb[0].mxu0 %vm178_vm2, %v7633_v23  ;;  %6297 = vmatmul.mubr.msk.bf16.vlgmr.msra.gmra.mrb[0].mxu1 %vm178_vm2, %v7633_v23 }
   0xd   :  { %381 = vmatpush1.bf16.msra.mxu0 %v199_v27  ;;  %424 = vmatpush1.bf16.msra.mxu1 %v205_v28 }
   0xe   :  { %412 = vmatprep.mubr.bf16.mxu0 %v10880_v8  ;;  %455 = vmatprep.mubr.bf16.mxu1 %v10880_v8 }
   0xf   :  { %466 = vmatprep.subr.bf16.mxu0 %v214_v30  ;;  %509 = vmatprep.subr.bf16.mxu1 %v220_v31 }
  0x10   :  { %21 = vsyncpa [#allocation5], 0  ;;  %v211_v40 = vand.u32 %v6268_v34, %v7614_v10  ;;  %v217_v41 = vand.u32 %v6270_v35, %v7614_v10  ;;  %1089 = vperm.xlu1 %6534, %v1068_v36   ;;  %1072 = vperm.xlu0 %6532, %v1068_v36   ;;  %v226_v42 = vand.u32 %v6273_v37, %v7614_v10  ;;  %v61_v44 = vld [vmem:[%s10864_s0 + $0x40] sm:$0xff]  ;;  %v62_v45 = vld [vmem:[%s10864_s0 + $0x48] sm:$0xff]  ;;  %v7517_v51 = vmov 1  }
  0x11   :  { %v232_v43 = vand.u32 %v6275_v38, %v7614_v10  ;;  %v6272_v46 = vcombine.low %v59_v32, %v59_v32  ;;  %v6274_v47 = vcombine.low %v60_v33, %v60_v33  ;;  %v71_v48 = vld [vmem:[%s10866_s2] sm:$0xff]  ;;  %v6277_v49 = vcombine.high %v61_v44, %v61_v44  ;;  %v63_v56 = vld [vmem:[%s10864_s0 + $0x50] sm:$0xff]  ;;  %v64_v57 = vld [vmem:[%s10864_s0 + $0x58] sm:$0xff] }
  0x12   :  { %v6279_v50 = vcombine.high %v62_v45, %v62_v45  ;;  %v6276_v58 = vcombine.low %v61_v44, %v61_v44  ;;  %v6278_v59 = vcombine.low %v62_v45, %v62_v45  ;;  %v1069_v60 = vld [vmem:[%s10867_s3 + $0x8] sm:$0xf]  ;;  %v6281_v61 = vcombine.high %v63_v56, %v63_v56  ;;  %v65_v3 = vld [vmem:[%s10864_s0 + $0x60] sm:$0xff]  ;;  %v67_v17 = vld [vmem:[%s10864_s0 + $0x70] sm:$0xff] }
  0x13   :  { %v223_v52 = vand.u32 %v6272_v46, %v7614_v10  ;;  %v229_v53 = vand.u32 %v6274_v47, %v7614_v10  ;;  %v238_v54 = vand.u32 %v6277_v49, %v7614_v10  ;;  %v6283_v62 = vcombine.high %v64_v57, %v64_v57  ;;  %v66_v5 = vld [vmem:[%s10864_s0 + $0x68] sm:$0xff]  ;;  %v68_v18 = vld [vmem:[%s10864_s0 + $0x78] sm:$0xff]  ;;  %v1124_v21 = vld [vmem:[%s10868_s4] sm:$0xff] }
  0x14   :  { %6298 = vmatmul.mubr.msk.bf16.vlgmr.msra.gmra.mrb[4].mxu0 %vm178_vm2, %v7633_v23  ;;  %6299 = vmatmul.mubr.msk.bf16.vlgmr.msra.gmra.mrb[4].mxu1 %vm178_vm2, %v7633_v23  ;;  %v244_v55 = vand.u32 %v6279_v50, %v7614_v10  ;;  %v235_v63 = vand.u32 %v6276_v58, %v7614_v10  ;;  %v241_v0 = vand.u32 %v6278_v59, %v7614_v10  ;;  %v72_v9 = vld [vmem:[%s10866_s2 + $0x8] sm:$0xf]  ;;  %v69_v29 = vld [vmem:[%s10864_s0 + $0x80] sm:$0xff]  ;;  %vm1442_vm3 = vcmask 1041408  }
  0x15   :  { %467 = vmatpush1.bf16.msra.mxu0 %v211_v40  ;;  %510 = vmatpush1.bf16.msra.mxu1 %v217_v41  ;;  %v250_v1 = vand.u32 %v6281_v61, %v7614_v10  ;;  %v256_v2 = vand.u32 %v6283_v62, %v7614_v10  ;;  %v6280_v6 = vcombine.low %v63_v56, %v63_v56  ;;  %v70_v30 = vld [vmem:[%s10864_s0 + $0x88] sm:$0xff]  ;;  %v1096_v35 = vld [vmem:[%s10870_s6] sm:$0xff]  ;;  %vm1812_vm4 = vcmask 1044480  }
  0x16   :  { %498 = vmatprep.mubr.bf16.mxu0 %v10880_v8  ;;  %541 = vmatprep.mubr.bf16.mxu1 %v10880_v8  ;;  %v6282_v7 = vcombine.low %v64_v57, %v64_v57  ;;  %v6285_v11 = vcombine.high %v65_v3, %v65_v3  ;;  %v6287_v12 = vcombine.high %v66_v5, %v66_v5  ;;  %v1097_v46 = vld [vmem:[%s10870_s6 + $0x8] sm:$0xf]  ;;  %vm2905_vm5 = vcmask 1045504  }
  0x17   :  { %552 = vmatprep.subr.bf16.mxu0 %v226_v42  ;;  %595 = vmatprep.subr.bf16.mxu1 %v232_v43  ;;  %v247_v13 = vand.u32 %v6280_v6, %v7614_v10  ;;  %v6284_v19 = vcombine.low %v65_v3, %v65_v3  ;;  %v6286_v20 = vcombine.low %v66_v5, %v66_v5  ;;  %v1125_v43 = vld [vmem:[%s10868_s4 + $0x8] sm:$0xf]  ;;  %vm3275_vm6 = vcmask 1040384  }
  0x18   :  { %6535 = vset.pattern.permute.xlu1 %v10880_v8  ;;  %6533 = vset.pattern.permute.xlu0 %v7517_v51  ;;  %v253_v14 = vand.u32 %v6282_v7, %v7614_v10  ;;  %v262_v15 = vand.u32 %v6285_v11, %v7614_v10  ;;  %v268_v16 = vand.u32 %v6287_v12, %v7614_v10  ;;  %v1153_v47 = vld [vmem:[%s10869_s5 + $0x8] sm:$0xf]  ;;  %vm4020_vm7 = vcmask 1046528  }
  0x19   :  { %75 = vperm.xlu1 %6535, %v71_v48   ;;  %1081 = vperm.xlu0 %6533, %v1068_v36   ;;  %v6289_v22 = vcombine.high %v67_v17, %v67_v17  ;;  %v6291_v24 = vcombine.high %v68_v18, %v68_v18  ;;  %v259_v25 = vand.u32 %v6284_v19, %v7614_v10  ;;  %v5505_v48 = vld [vmem:[%s10872_s8 + $0x10] sm:$0xff]  ;;  %vm5529_vm8 = vcmask 269312  }
  0x1a   :  { %v265_v26 = vand.u32 %v6286_v20, %v7614_v10  ;;  %v6288_v31 = vcombine.low %v67_v17, %v67_v17  ;;  %v6290_v32 = vcombine.low %v68_v18, %v68_v18  ;;  %v6293_v33 = vcombine.high %v69_v29, %v69_v29 }
  0x1b   :  { %v274_v27 = vand.u32 %v6289_v22, %v7614_v10  ;;  %v280_v28 = vand.u32 %v6291_v24, %v7614_v10  ;;  %v6295_v34 = vcombine.high %v70_v30, %v70_v30  ;;  %v6292_v41 = vcombine.low %v69_v29, %v69_v29 }
  0x1c   :  { %6300 = vmatmul.mubr.msk.bf16.vlgmr.msra.gmra.mrb[8].mxu0 %vm178_vm2, %v7633_v23  ;;  %6301 = vmatmul.mubr.msk.bf16.vlgmr.msra.gmra.mrb[8].mxu1 %vm178_vm2, %v7633_v23  ;;  %v271_v36 = vand.u32 %v6288_v31, %v7614_v10  ;;  %v277_v37 = vand.u32 %v6290_v32, %v7614_v10  ;;  %v286_v38 = vand.u32 %v6293_v33, %v7614_v10  ;;  %vm7519_vm9 = vmmov 0  }
  0x1d   :  { %553 = vmatpush1.bf16.msra.mxu0 %v223_v52  ;;  %596 = vmatpush1.bf16.msra.mxu1 %v229_v53  ;;  %v292_v40 = vand.u32 %v6295_v34, %v7614_v10  ;;  %v6294_v42 = vcombine.low %v70_v30, %v70_v30  ;;  %v283_v44 = vand.u32 %v6292_v41, %v7614_v10  ;;  %vm5671_vm10 = vcmask 195584  }
  0x1e   :  { %584 = vmatprep.mubr.bf16.mxu0 %v10880_v8  ;;  %627 = vmatprep.mubr.bf16.mxu1 %v10880_v8  ;;  %vm6010_vm11 = vcmask 23552   ;;  %vm6106_vm12 = vcmask 64512  }
  0x1f   :  { %638 = vmatprep.subr.bf16.mxu0 %v238_v54  ;;  %681 = vmatprep.subr.bf16.mxu1 %v244_v55  ;;  %v289_v45 = vand.u32 %v6294_v42, %v7614_v10  ;;  %v1152_v10 = vld [vmem:[%s10869_s5] sm:$0xff] }
  0x20   :  { %1077 = vperm.xlu1 %6535, %v1069_v60   ;;  %1085 = vperm.xlu0 %6533, %v1069_v60  }
  0x24   :  { %6302 = vmatmul.mubr.msk.bf16.vlgmr.msra.gmra.mrb[12].mxu0 %vm178_vm2, %v7633_v23  ;;  %6303 = vmatmul.mubr.msk.bf16.vlgmr.msra.gmra.mrb[12].mxu1 %vm178_vm2, %v7633_v23 }
  0x25   :  { %639 = vmatpush1.bf16.msra.mxu0 %v235_v63  ;;  %682 = vmatpush1.bf16.msra.mxu1 %v241_v0 }
  0x26   :  { %670 = vmatprep.mubr.bf16.mxu0 %v10880_v8  ;;  %713 = vmatprep.mubr.bf16.mxu1 %v10880_v8 }
  0x27   :  { %724 = vmatprep.subr.bf16.mxu0 %v250_v1  ;;  %767 = vmatprep.subr.bf16.mxu1 %v256_v2 }
  0x28   :  { %6536 = vset.pattern.permute.xlu1 %v7516_v39  ;;  %6537 = vset.pattern.permute.xlu0 %v10880_v8 }
  0x29   :  { %1093 = vperm.xlu1 %6536, %v1069_v60   ;;  %80 = vperm.xlu0 %6537, %v72_v9  }
  0x2c   :  { %6304 = vmatmul.mubr.msk.bf16.vlgmr.msra.gmra.mrb[16].mxu0 %vm178_vm2, %v7633_v23  ;;  %6305 = vmatmul.mubr.msk.bf16.vlgmr.msra.gmra.mrb[16].mxu1 %vm178_vm2, %v7633_v23 }
  0x2d   :  { %725 = vmatpush1.bf16.msra.mxu0 %v247_v13  ;;  %768 = vmatpush1.bf16.msra.mxu1 %v253_v14 }
  0x2e   :  { %756 = vmatprep.mubr.bf16.mxu0 %v10880_v8  ;;  %799 = vmatprep.mubr.bf16.mxu1 %v10880_v8 }
  0x2f   :  { %810 = vmatprep.subr.bf16.mxu0 %v262_v15  ;;  %853 = vmatprep.subr.bf16.mxu1 %v268_v16 }
  0x30   :  { %6538 = vset.pattern.permute.xlu1 %v10880_v8  ;;  %6540 = vset.pattern.permute.xlu0 %v7516_v39 }
  0x31   :  { %1128 = vperm.xlu1 %6538, %v1124_v21   ;;  %1145 = vperm.xlu0 %6540, %v1124_v21  }
  0x34   :  { %6306 = vmatmul.mubr.msk.bf16.vlgmr.msra.gmra.mrb[20].mxu0 %vm178_vm2, %v7633_v23  ;;  %6307 = vmatmul.mubr.msk.bf16.vlgmr.msra.gmra.mrb[20].mxu1 %vm178_vm2, %v7633_v23 }
  0x35   :  { %811 = vmatpush1.bf16.msra.mxu0 %v259_v25  ;;  %854 = vmatpush1.bf16.msra.mxu1 %v265_v26 }
  0x36   :  { %842 = vmatprep.mubr.bf16.mxu0 %v10880_v8  ;;  %885 = vmatprep.mubr.bf16.mxu1 %v10880_v8 }
  0x37   :  { %896 = vmatprep.subr.bf16.mxu0 %v274_v27  ;;  %939 = vmatprep.subr.bf16.mxu1 %v280_v28 }
  0x38   :  { %6539 = vset.pattern.permute.xlu1 %v7517_v51  ;;  %6541 = vset.pattern.permute.xlu0 %v10880_v8 }
  0x39   :  { %1137 = vperm.xlu1 %6539, %v1124_v21   ;;  %1100 = vperm.xlu0 %6541, %v1096_v35  }
  0x3c   :  { %6308 = vmatmul.mubr.msk.bf16.vlgmr.msra.gmra.mrb[24].mxu0 %vm178_vm2, %v7633_v23  ;;  %6309 = vmatmul.mubr.msk.bf16.vlgmr.msra.gmra.mrb[24].mxu1 %vm178_vm2, %v7633_v23 }
  0x3d   :  { %897 = vmatpush1.bf16.msra.mxu0 %v271_v36  ;;  %940 = vmatpush1.bf16.msra.mxu1 %v277_v37 }
  0x3e   :  { %928 = vmatprep.mubr.bf16.mxu0 %v10880_v8  ;;  %971 = vmatprep.mubr.bf16.mxu1 %v10880_v8 }
  0x3f   :  { %982 = vmatprep.subr.bf16.mxu0 %v286_v38  ;;  %1025 = vmatprep.subr.bf16.mxu1 %v292_v40 }
  0x40   :  { %1109 = vperm.xlu1 %6539, %v1096_v35   ;;  %1133 = vperm.xlu0 %6541, %v1125_v43  }
  0x44   :  { %6310 = vmatmul.mubr.msk.bf16.vlgmr.msra.gmra.mrb[28].mxu0 %vm178_vm2, %v7633_v23  ;;  %6311 = vmatmul.mubr.msk.bf16.vlgmr.msra.gmra.mrb[28].mxu1 %vm178_vm2, %v7633_v23 }
  0x45   :  { %983 = vmatpush1.bf16.msra.mxu0 %v283_v44  ;;  %1026 = vmatpush1.bf16.msra.mxu1 %v289_v45 }
  0x46   :  { %1014 = vmatprep.mubr.bf16.mxu0 %v10880_v8  ;;  %1057 = vmatprep.mubr.bf16.mxu1 %v10880_v8 }
  0x47   :  { %6542 = vset.pattern.permute.xlu1 %v7516_v39  ;;  %6546 = vset.pattern.permute.xlu0 %v7517_v51 }
  0x48   :  { %1117 = vperm.xlu1 %6542, %v1096_v35   ;;  %1113 = vperm.xlu0 %6546, %v1097_v46  }
  0x4c   :  { %6312 = vmatmul.mubr.msk.bf16.vlgmr.msra.gmra.mrb[32].mxu0 %vm178_vm2, %v7633_v23  ;;  %6313 = vmatmul.mubr.msk.bf16.vlgmr.msra.gmra.mrb[32].mxu1 %vm178_vm2, %v7633_v23  ;;  %v5655_v23 = vld [vmem:[%s10874_s10 + $0x8] sm:$0x1] }
  0x4d   :  { %6543 = vset.pattern.permute.xlu1 %v10880_v8  ;;  %6548 = vset.pattern.permute.xlu0 %v10880_v8 }
  0x4e   :  { %1156 = vperm.xlu1 %6543, %v1152_v10   ;;  %1161 = vperm.xlu0 %6548, %v1153_v47  }
  0x4f   :  { %5579 = vmatprep.mubr.bf16.mxu0 %v10880_v8 }
  0x52   :  { %6544 = vset.pattern.permute.xlu1 %v7517_v51  ;;  %5518 = vperm.xlu0 %6548, %v5505_v48  }
  0x53   :  { %1141 = vperm.xlu1 %6544, %v1125_v43  }
  0x56   :  { %5663 = vperm.xlu0 %6548, %v5655_v23  }
  0x57   :  { %6545 = vset.pattern.permute.xlu1 %v10880_v8 }
  0x58   :  { %1105 = vperm.xlu1 %6545, %v1097_v46  }
  0x5c   :  { %6547 = vset.pattern.permute.xlu1 %v7516_v39 }
  0x5d   :  { %1149 = vperm.xlu1 %6547, %v1125_v43  }
  0x61   :  { %1121 = vperm.xlu1 %6547, %v1097_v46  }
  0x65   :  { %6549 = vset.pattern.permute.xlu1 %v10880_v8 }
  0x8f   :  { %v7809_v49 = vpop.permute.xlu1 %1089  ;;  %v7811_v50 = vpop.permute.xlu0 %1072 }
  0x90   :  { %11050 = vst [vmem:[#allocation7_spill] sm:$0xff] %v7809_v49  ;;  %11051 = vst [vmem:[#allocation8_spill] sm:$0xff] %v7811_v50  ;;  %v1164_v55 = vmul.f32 0.0, %v7811_v50  ;;  %v1170_v60 = vmul.f32 0.0, %v7809_v49 }
  0x98   :  { %v7813_v51 = vpop.permute.xlu1 %75  ;;  %v7815_v52 = vpop.permute.xlu0 %1081 }
  0x99   :  { %11052 = vst [vmem:[#allocation9_spill] sm:$0xff] %v7813_v51  ;;  %11053 = vst [vmem:[#allocation10_spill] sm:$0xff] %v7815_v52  ;;  %v1166_v39 = vmul.f32 0.0, %v7815_v52 }
  0x9b   :  { %v1168_v59 = vadd.f32 %v1166_v39, %v1164_v55 }
  0x9d   :  { %v1172_v3 = vadd.f32 %v1170_v60, %v1168_v59 }
  0x9f   :  { %v7817_v53 = vpop.permute.xlu1 %1077  ;;  %v7819_v54 = vpop.permute.xlu0 %1085 }
  0xa0   :  { %v1165_v56 = vmul.f32 0.0, %v7817_v53  ;;  %v1167_v57 = vmul.f32 0.0, %v7819_v54 }
  0xa2   :  { %v1169_v61 = vadd.f32 %v1167_v57, %v1165_v56 }
  0xa8   :  { %v7825_v58 = vpop.permute.xlu1 %1093  ;;  %v7829_v63 = vpop.permute.xlu0 %80 }
  0xa9   :  { %11054 = vst [vmem:[#allocation11_spill] sm:$0xff] %v7825_v58  ;;  %v1171_v62 = vmul.f32 0.0, %v7825_v58  ;;  %11055 = vst [vmem:[#allocation12_spill] sm:$0xff] %v7829_v63 }
  0xab   :  { %v1173_v9 = vadd.f32 %v1171_v62, %v1169_v61 }
  0xb0   :  { %v7857_v38 = vpop.permute.xlu1 %1128 }
  0xb1   :  { %11056 = vst [vmem:[#allocation13_spill] sm:$0xff] %v7857_v38 }
  0xb8   :  { %v7875_v60 = vpop.permute.xlu1 %1137 }
  0xb9   :  { %11063 = vst [vmem:[#allocation20_spill] sm:$0xff] %v7875_v60 }
  0xdf   :  { %v328_v0 = vpop.f32.mrb[0].mxu0  ;;  %v371_v1 = vpop.f32.mrb[0].mxu1 }
  0xe0   :  { %v329_v2 = vadd.f32 %v328_v0, %v7813_v51  ;;  %v372_v5 = vadd.f32 %v371_v1, %v7813_v51  ;;  %v330_v6 = vpop.f32.mrb[1].mxu0  ;;  %v7833_v7 = vpop.f32.mrb[1].mxu1 }
  0xe1   :  { %v331_v11 = vadd.f32 %v330_v6, %v7813_v51  ;;  %v332_v12 = vpop.f32.mrb[2].mxu0  ;;  %v375_v13 = vpop.f32.mrb[2].mxu1 }
  0xe2   :  { %v1174_v14 = vadd.f32 %v1172_v3, %v329_v2  ;;  %v1176_v15 = vadd.f32 %v1172_v3, %v372_v5  ;;  %v333_v16 = vadd.f32 %v332_v12, %v7829_v63  ;;  %v334_v17 = vpop.f32.mrb[3].mxu0  ;;  %v7837_v18 = vpop.f32.mrb[3].mxu1  ;;  %v376_v27 = vadd.f32 %v375_v13, %v7829_v63 }
  0xe3   :  { %v1175_v19 = vadd.f32 %v1172_v3, %v331_v11  ;;  %v335_v30 = vadd.f32 %v334_v17, %v7829_v63 }
  0xe4   :  { %v6314_v20 = vmul.f32 -1.442695, %v1174_v14  ;;  %v6316_v21 = vmul.f32 -1.442695, %v1176_v15  ;;  %v1177_v22 = vadd.f32 %v1173_v9, %v333_v16  ;;  %v1179_v35 = vadd.f32 %v1173_v9, %v376_v27 }
  0xe5   :  { %v6315_v24 = vmul.f32 -1.442695, %v1175_v19  ;;  %v1178_v36 = vadd.f32 %v1173_v9, %v335_v30 }
  0xe6   :  { %6590 = vpow2.f32 %v6314_v20  ;;  %v6317_v37 = vmul.f32 -1.442695, %v1177_v22  ;;  %v6319_v55 = vmul.f32 -1.442695, %v1179_v35 }
  0xe7   :  { %6592 = vpow2.f32 %v6316_v21  ;;  %v7839_v25 = vpop.f32.mrb[4].mxu0  ;;  %v7841_v26 = vpop.f32.mrb[4].mxu1  ;;  %v6318_v59 = vmul.f32 -1.442695, %v1178_v36 }
  0xe8   :  { %6594 = vpow2.f32 %v6315_v24  ;;  %v7844_v28 = vpop.f32.mrb[5].mxu0  ;;  %v7846_v29 = vpop.f32.mrb[5].mxu1 }
  0xe9   :  { %v7849_v31 = vpop.f32.mrb[6].mxu0  ;;  %v7851_v32 = vpop.f32.mrb[6].mxu1  ;;  %6596 = vtanh.f32 %v1177_v22 }
  0xea   :  { %v7853_v33 = vpop.f32.mrb[7].mxu0  ;;  %v7855_v34 = vpop.f32.mrb[7].mxu1  ;;  %6598 = vtanh.f32 %v1179_v35 }
  0xeb   :  { %6600 = vtanh.f32 %v1178_v36  ;;  %v7898_v21 = vpop.permute.xlu1 %1109 }
  0xec   :  { %6602 = vpow2.f32 %v6317_v37  ;;  %11072 = vst [vmem:[#allocation29_spill] sm:$0xff] %v7898_v21 }
  0xef   :  { %v7859_v40 = vpop.f32.mrb[8].mxu0  ;;  %v7861_v41 = vpop.f32.mrb[8].mxu1 }
  0xf0   :  { %11057 = vst [vmem:[#allocation14_spill] sm:$0xff] %v7861_v41  ;;  %v6591_v42 = vpop.eup %6590  ;;  %v7863_v43 = vpop.f32.mrb[9].mxu0 }
  0xf1   :  { %11058 = vst [vmem:[#allocation15_spill] sm:$0xff] %v7863_v43  ;;  %v7865_v44 = vpop.f32.mrb[9].mxu1  ;;  %v6593_v45 = vpop.eup %6592  ;;  %v1198_v46 = vadd.f32 1.0, %v6591_v42 }
  0xf2   :  { %11059 = vst [vmem:[#allocation16_spill] sm:$0xff] %v7865_v44  ;;  %v7867_v10 = vpop.f32.mrb[10].mxu0  ;;  %v7869_v47 = vpop.f32.mrb[10].mxu1  ;;  %v1200_v23 = vadd.f32 1.0, %v6593_v45 }
  0xf3   :  { %11060 = vst [vmem:[#allocation17_spill] sm:$0xff] %v7869_v47  ;;  %v6595_v48 = vpop.eup %6594  ;;  %v7871_v39 = vpop.f32.mrb[11].mxu0  ;;  %6604 = vrcp.f32 %v1198_v46 }
  0xf4   :  { %11061 = vst [vmem:[#allocation18_spill] sm:$0xff] %v7871_v39  ;;  %v7873_v56 = vpop.f32.mrb[11].mxu1  ;;  %v1199_v57 = vadd.f32 1.0, %v6595_v48  ;;  %6606 = vrcp.f32 %v1200_v23  ;;  %v6597_v2 = vpop.eup %6596 }
  0xf5   :  { %11062 = vst [vmem:[#allocation19_spill] sm:$0xff] %v7873_v56  ;;  %v6599_v6 = vpop.eup %6598  ;;  %v1225_v14 = vrot.slane %v6597_v2, 1 }
  0xf6   :  { %6608 = vrcp.f32 %v1199_v57  ;;  %v6601_v12 = vpop.eup %6600  ;;  %v1227_v16 = vrot.slane %v6599_v6, 1 }
  0xf7   :  { %6610 = vpow2.f32 %v6319_v55  ;;  %v7877_v61 = vpop.f32.mrb[12].mxu0  ;;  %v7879_v62 = vpop.f32.mrb[12].mxu1  ;;  %v1226_v20 = vrot.slane %v6601_v12, 1 }
  0xf8   :  { %11064 = vst [vmem:[#allocation21_spill] sm:$0xff] %v7877_v61  ;;  %11065 = vst [vmem:[#allocation22_spill] sm:$0xff] %v7879_v62  ;;  %6612 = vpow2.f32 %v6318_v59  ;;  %v7881_v0 = vpop.f32.mrb[13].mxu0  ;;  %v7883_v1 = vpop.f32.mrb[13].mxu1 }
  0xf9   :  { %11066 = vst [vmem:[#allocation23_spill] sm:$0xff] %v7881_v0  ;;  %11067 = vst [vmem:[#allocation24_spill] sm:$0xff] %v7883_v1  ;;  %v7885_v3 = vpop.f32.mrb[14].mxu0  ;;  %v7887_v5 = vpop.f32.mrb[14].mxu1 }
  0xfa   :  { %11068 = vst [vmem:[#allocation25_spill] sm:$0xff] %v7885_v3  ;;  %11069 = vst [vmem:[#allocation26_spill] sm:$0xff] %v7887_v5  ;;  %v7889_v9 = vpop.f32.mrb[15].mxu0  ;;  %v7891_v11 = vpop.f32.mrb[15].mxu1 }
  0xfb   :  { %11070 = vst [vmem:[#allocation27_spill] sm:$0xff] %v7889_v9  ;;  %11071 = vst [vmem:[#allocation28_spill] sm:$0xff] %v7891_v11  ;;  %v6603_v13 = vpop.eup %6602 }
  0xfc   :  { %v1201_v24 = vadd.f32 1.0, %v6603_v13 }
  0xfd   :  { %v7893_v15 = vpop.eup %6604 }
  0xfe   :  { %v7895_v17 = vpop.eup %6606  ;;  %v1231_v19 = vmul.f32 %v7893_v15, %v1225_v14  ;;  %v1219_v37 = vmul.f32 0.0, %v7893_v15  ;;  %6614 = vrcp.f32 %v1201_v24 }
  0xff   :  { %v1233_v27 = vmul.f32 %v7895_v17, %v1227_v16  ;;  %v7903_v30 = vpop.f32.mrb[16].mxu0  ;;  %v7905_v35 = vpop.f32.mrb[16].mxu1  ;;  %v1221_v23 = vmul.f32 0.0, %v7895_v17 }
 0x100   :  { %v7900_v22 = vpop.eup %6608  ;;  %11073 = vst [vmem:[#allocation30_spill] sm:$0xff] %v7903_v30  ;;  %11074 = vst [vmem:[#allocation31_spill] sm:$0xff] %v7905_v35  ;;  %v1237_v42 = vrot.slane %v1231_v19, 5  ;;  %v7909_v46 = vpop.f32.mrb[17].mxu0 }
 0x101   :  { %v6611_v36 = vpop.eup %6610  ;;  %v1232_v45 = vmul.f32 %v7900_v22, %v1226_v20  ;;  %11075 = vst [vmem:[#allocation32_spill] sm:$0xff] %v7909_v46  ;;  %v7911_v48 = vpop.f32.mrb[17].mxu1  ;;  %v1239_v55 = vrot.slane %v1233_v27, 5  ;;  %v1220_v6 = vmul.f32 0.0, %v7900_v22 }
 0x102   :  { %11076 = vst [vmem:[#allocation33_spill] sm:$0xff] %v7911_v48  ;;  %v7914_v57 = vpop.f32.mrb[18].mxu0  ;;  %v7916_v59 = vpop.f32.mrb[18].mxu1  ;;  %v7919_v12 = vadd.f32 %v1237_v42, %v1219_v37  ;;  %v1203_v19 = vadd.f32 1.0, %v6611_v36  ;;  %v10882_v42 = vlaneseq  ;;  %v374_v48 = vadd.f32 %v7833_v7, %v7813_v51 }
 0x103   :  { %11077 = vst [vmem:[#allocation34_spill] sm:$0xff] %v7914_v57  ;;  %11078 = vst [vmem:[#allocation35_spill] sm:$0xff] %v7916_v59  ;;  %v6613_v2 = vpop.eup %6612  ;;  %v1238_v13 = vrot.slane %v1232_v45, 5  ;;  %v7921_v14 = vpop.f32.mrb[19].mxu0  ;;  %v7925_v20 = vadd.f32 %v1239_v55, %v1221_v23 }
 0x104   :  { %11079 = vst [vmem:[#allocation36_spill] sm:$0xff] %v7921_v14  ;;  %v7923_v16 = vpop.f32.mrb[19].mxu1  ;;  %6616 = vtanh.f32 %v7919_v12  ;;  %v1202_v4 = vadd.f32 1.0, %v6613_v2  ;;  %v7932_v37 = vpop.permute.xlu1 %1117 }
 0x105   :  { %11080 = vst [vmem:[#allocation37_spill] sm:$0xff] %v7923_v16  ;;  %v7928_v27 = vadd.f32 %v1238_v13, %v1220_v6  ;;  %6618 = vtanh.f32 %v7925_v20  ;;  %11081 = vst [vmem:[#allocation38_spill] sm:$0xff] %v7932_v37  ;;  %v7951_v13 = vshrl.u32 %v10882_v42, 7  ;;  %v7953_v16 = vpop.permute.xlu0 %1145 }
 0x107   :  { %6620 = vtanh.f32 %v7928_v27  ;;  %v7934_v45 = vpop.f32.mrb[20].mxu0  ;;  %v7936_v8 = vpop.f32.mrb[20].mxu1  ;;  %11090 = vst [vmem:[#allocation47_spill] sm:$0xff] %v7951_v13 }
 0x108   :  { %6622 = vrcp.f32 %v1203_v19  ;;  %11082 = vst [vmem:[#allocation39_spill] sm:$0xff] %v7934_v45  ;;  %11083 = vst [vmem:[#allocation40_spill] sm:$0xff] %v7936_v8  ;;  %v7938_v24 = vpop.f32.mrb[21].mxu0  ;;  %v7940_v36 = vpop.f32.mrb[21].mxu1 }
 0x109   :  { %11084 = vst [vmem:[#allocation41_spill] sm:$0xff] %v7938_v24  ;;  %11085 = vst [vmem:[#allocation42_spill] sm:$0xff] %v7940_v36  ;;  %6624 = vrcp.f32 %v1202_v4  ;;  %v7942_v23 = vpop.f32.mrb[22].mxu0  ;;  %v7944_v55 = vpop.f32.mrb[22].mxu1  ;;  %v7958_v4 = vsub.s32 6, %v7951_v13 }
 0x10a   :  { %11086 = vst [vmem:[#allocation43_spill] sm:$0xff] %v7942_v23  ;;  %11087 = vst [vmem:[#allocation44_spill] sm:$0xff] %v7944_v55  ;;  %v7946_v2 = vpop.f32.mrb[23].mxu0  ;;  %v7948_v6 = vpop.f32.mrb[23].mxu1  ;;  %v7961_v55 = vsub.s32 7, %v7951_v13 }
 0x10b   :  { %11088 = vst [vmem:[#allocation45_spill] sm:$0xff] %v7946_v2  ;;  %11089 = vst [vmem:[#allocation46_spill] sm:$0xff] %v7948_v6  ;;  %v6615_v19 = vpop.eup %6614  ;;  %v7955_v8 = vpop.permute.xlu1 %1156  ;;  %v7964_v2 = vsub.s32 0, %v7951_v13 }
 0x10c   :  { %11091 = vst [vmem:[#allocation48_spill] sm:$0xff] %v7955_v8 }
 0x10e   :  { %v6617_v45 = vpop.eup %6616 }
 0x10f   :  { %v6619_v24 = vpop.eup %6618  ;;  %v1252_v36 = vrot.slane %v6617_v45, 5  ;;  %v7966_v6 = vpop.f32.mrb[24].mxu0 }
 0x110   :  { %11092 = vst [vmem:[#allocation49_spill] sm:$0xff] %v7966_v6  ;;  %v7968_v42 = vpop.f32.mrb[24].mxu1  ;;  %v1254_v14 = vrot.slane %v6619_v24, 5  ;;  %v7970_v59 = vpop.f32.mrb[25].mxu0  ;;  %v415_v24 = vadd.f32 %v7839_v25, %v7813_v51 }
 0x111   :  { %11093 = vst [vmem:[#allocation50_spill] sm:$0xff] %v7968_v42  ;;  %v6621_v23 = vpop.eup %6620  ;;  %11094 = vst [vmem:[#allocation51_spill] sm:$0xff] %v7970_v59  ;;  %v7972_v57 = vpop.f32.mrb[25].mxu1  ;;  %v1258_v46 = vmul.f32 %v7893_v15, %v1252_v36  ;;  %v1261_v35 = vmul.f32 %v6615_v19, %v1252_v36  ;;  %v378_v42 = vadd.f32 %v7837_v18, %v7829_v63 }
 0x112   :  { %11095 = vst [vmem:[#allocation52_spill] sm:$0xff] %v7972_v57  ;;  %v6623_v45 = vpop.eup %6622  ;;  %v1253_v30 = vrot.slane %v6621_v23, 5  ;;  %v7977_v13 = vpop.f32.mrb[26].mxu0  ;;  %v1260_v57 = vmul.f32 %v7895_v17, %v1254_v14 }
 0x113   :  { %11096 = vst [vmem:[#allocation53_spill] sm:$0xff] %v7977_v13  ;;  %v7979_v11 = vpop.f32.mrb[26].mxu1  ;;  %v1263_v59 = vmul.f32 %v6623_v45, %v1254_v14  ;;  %v7986_v6 = vpop.f32.mrb[27].mxu0  ;;  %v7991_v36 = vrot.slane %v1258_v46, %v7958_v4  ;;  %v7994_v23 = vrot.slane %v1258_v46, %v7961_v55  ;;  %v7997_v19 = vrot.slane %v1261_v35, %v7964_v2 }
 0x114   :  { %11097 = vst [vmem:[#allocation54_spill] sm:$0xff] %v7979_v11  ;;  %11098 = vst [vmem:[#allocation55_spill] sm:$0xff] %v7986_v6  ;;  %v7988_v7 = vpop.f32.mrb[27].mxu1  ;;  %v6625_v15 = vpop.eup %6624  ;;  %v1259_v18 = vmul.f32 %v7900_v22, %v1253_v30  ;;  %v8001_v17 = vrot.slane %v1260_v57, %v7958_v4  ;;  %v8004_v14 = vrot.slane %v1260_v57, %v7961_v55 }
 0x115   :  { %11099 = vst [vmem:[#allocation56_spill] sm:$0xff] %v7988_v7  ;;  %v1262_v25 = vmul.f32 %v6625_v15, %v1253_v30  ;;  %v8007_v45 = vrot.slane %v1263_v59, %v7964_v2  ;;  %v1458_v7 = vmul.f32 %v7991_v36, %v7811_v50  ;;  %v1461_v46 = vmul.f32 %v7991_v36, %v7817_v53  ;;  %v8027_v6 = vpop.permute.xlu0 %1100  ;;  %v8029_v11 = vpop.permute.xlu1 %1141 }
 0x116   :  { %v1464_v35 = vmul.f32 %v7994_v23, %v7815_v52  ;;  %v1467_v22 = vmul.f32 %v7994_v23, %v7819_v54  ;;  %v1476_v30 = vmul.f32 %v7997_v19, %v7809_v49  ;;  %v1479_v57 = vmul.f32 %v7997_v19, %v7825_v58  ;;  %11100 = vst [vmem:[#allocation57_spill] sm:$0xff] %v8027_v6 }
 0x117   :  { %v8022_v59 = vrot.slane %v1259_v18, %v7958_v4  ;;  %v8025_v15 = vrot.slane %v1259_v18, %v7961_v55  ;;  %11101 = vst [vmem:[#allocation58_spill] sm:$0xff] %v8029_v11  ;;  %v8032_v9 = vrot.slane %v1262_v25, %v7964_v2  ;;  %v1460_v5 = vmul.f32 %v8001_v17, %v7811_v50  ;;  %v8036_v3 = vpop.f32.mrb[28].mxu0  ;;  %v8038_v0 = vpop.f32.mrb[28].mxu1 }
 0x118   :  { %v1470_v13 = vadd.f32 %v1464_v35, %v1458_v7  ;;  %v1473_v1 = vadd.f32 %v1467_v22, %v1461_v46  ;;  %11102 = vst [vmem:[#allocation59_spill] sm:$0xff] %v8036_v3  ;;  %11103 = vst [vmem:[#allocation60_spill] sm:$0xff] %v8038_v0  ;;  %v8048_v46 = vpop.f32.mrb[29].mxu0  ;;  %v8050_v35 = vpop.f32.mrb[29].mxu1  ;;  %v1463_v43 = vmul.f32 %v8001_v17, %v7817_v53 }
 0x119   :  { %v1459_v18 = vmul.f32 %v8022_v59, %v7811_v50  ;;  %v1462_v62 = vmul.f32 %v8022_v59, %v7817_v53  ;;  %v1465_v7 = vmul.f32 %v8025_v15, %v7815_v52  ;;  %v1468_v25 = vmul.f32 %v8025_v15, %v7819_v54  ;;  %11104 = vst [vmem:[#allocation61_spill] sm:$0xff] %v8048_v46  ;;  %v8056_v56 = vpop.f32.mrb[30].mxu0  ;;  %v8058_v39 = vpop.f32.mrb[30].mxu1 }
 0x11a   :  { %11105 = vst [vmem:[#allocation62_spill] sm:$0xff] %v8050_v35  ;;  %v1482_v22 = vadd.f32 %v1476_v30, %v1470_v13  ;;  %v1485_v3 = vadd.f32 %v1479_v57, %v1473_v1  ;;  %v1477_v0 = vmul.f32 %v8032_v9, %v7809_v49  ;;  %v1480_v61 = vmul.f32 %v8032_v9, %v7825_v58  ;;  %v8064_v13 = vpop.f32.mrb[31].mxu0  ;;  %v8066_v1 = vpop.f32.mrb[31].mxu1 }
 0x11b   :  { %11106 = vst [vmem:[#allocation63_spill] sm:$0xff] %v8056_v56  ;;  %11107 = vst [vmem:[#allocation64_spill] sm:$0xff] %v8058_v39  ;;  %v1471_v47 = vadd.f32 %v1465_v7, %v1459_v18  ;;  %v1474_v44 = vadd.f32 %v1468_v25, %v1462_v62  ;;  %v1466_v35 = vmul.f32 %v8004_v14, %v7815_v52  ;;  %v8072_v18 = vpop.permute.xlu0 %1133 }
 0x11c   :  { %11108 = vst [vmem:[#allocation65_spill] sm:$0xff] %v8064_v13  ;;  %11109 = vst [vmem:[#allocation66_spill] sm:$0xff] %v8066_v1  ;;  %v1488_v30 = vadd.f32 %v1482_v22, %v374_v48  ;;  %v1491_v57 = vadd.f32 %v1485_v3, %v378_v42  ;;  %v1469_v46 = vmul.f32 %v8004_v14, %v7819_v54  ;;  %v8078_v3 = vpop.permute.xlu1 %1105  ;;  %v1336_v42 = vmul.f32 0.0, %v8027_v6 }
 0x11d   :  { %v419_v39 = vadd.f32 %v7849_v31, %v7829_v63  ;;  %11110 = vst [vmem:[#allocation67_spill] sm:$0xff] %v8072_v18  ;;  %v1483_v62 = vadd.f32 %v1477_v0, %v1471_v47  ;;  %v1486_v7 = vadd.f32 %v1480_v61, %v1474_v44  ;;  %v1472_v25 = vadd.f32 %v1466_v35, %v1460_v5 }
 0x11e   :  { %v1478_v56 = vmul.f32 %v8007_v45, %v7809_v49  ;;  %v6326_v41 = vmul.f32 -1.442695, %v1488_v30  ;;  %v1475_v13 = vadd.f32 %v1469_v46, %v1463_v43  ;;  %v1481_v48 = vmul.f32 %v8007_v45, %v7825_v58  ;;  %11111 = vst [vmem:[#allocation68_spill] sm:$0xff] %v8078_v3 }
 0x11f   :  { %v1489_v22 = vadd.f32 %v1483_v62, %v415_v24  ;;  %v417_v31 = vadd.f32 %v7844_v28, %v7813_v51  ;;  %v1492_v47 = vadd.f32 %v1486_v7, %v419_v39  ;;  %v421_v61 = vadd.f32 %v7853_v33, %v7829_v63  ;;  %v8086_v0 = vpop.f32.mrb[32].mxu0  ;;  %v8088_v30 = vpop.permute.xlu0 %1113 }
 0x120   :  { %v1484_v1 = vadd.f32 %v1478_v56, %v1472_v25  ;;  %6626 = vpow2.f32 %v6326_v41  ;;  %v1487_v44 = vadd.f32 %v1481_v48, %v1475_v13  ;;  %v1338_v43 = vmul.f32 0.0, %v7898_v21  ;;  %11112 = vst [vmem:[#allocation69_spill] sm:$0xff] %v8086_v0  ;;  %11113 = vst [vmem:[#allocation70_spill] sm:$0xff] %v8088_v30  ;;  %v8090_v62 = vpop.permute.xlu1 %1149 }
 0x121   :  { %v6327_v5 = vmul.f32 -1.442695, %v1489_v22  ;;  %v6329_v39 = vmul.f32 -1.442695, %v1491_v57  ;;  %v1277_v41 = vmul.f32 %v8022_v59, %v7857_v38  ;;  %v1339_v33 = vmul.f32 0.0, %v8088_v30 }
 0x122   :  { %v1490_v46 = vadd.f32 %v1484_v1, %v417_v31  ;;  %v1493_v35 = vadd.f32 %v1487_v44, %v421_v61  ;;  %v1340_v28 = vadd.f32 %v1338_v43, %v1336_v42  ;;  %v1280_v56 = vmul.f32 %v8022_v59, %v8072_v18 }
 0x123   :  { %6628 = vpow2.f32 %v6327_v5  ;;  %v1295_v13 = vmul.f32 %v8025_v15, %v7875_v60  ;;  %v1298_v1 = vmul.f32 %v8025_v15, %v8029_v11  ;;  %v1342_v7 = vmul.f32 0.0, %v7932_v37 }
 0x124   :  { %v6328_v24 = vmul.f32 -1.442695, %v1490_v46  ;;  %v1319_v25 = vmul.f32 %v8032_v9, %v7953_v16  ;;  %v1322_v48 = vmul.f32 %v8032_v9, %v8090_v62  ;;  %v1337_v42 = vmul.f32 0.0, %v8078_v3  ;;  %v8115_v9 = vpop.permute.xlu1 %1121 }
 0x125   :  { %v1301_v22 = vadd.f32 %v1295_v13, %v1277_v41  ;;  %v1304_v31 = vadd.f32 %v1298_v1, %v1280_v56  ;;  %v1278_v59 = vmul.f32 %v8001_v17, %v7857_v38  ;;  %v1281_v44 = vmul.f32 %v8001_v17, %v8072_v18  ;;  %11114 = vst [vmem:[#allocation71_spill] sm:$0xff] %v8115_v9 }
 0x126   :  { %6630 = vpow2.f32 %v6328_v24  ;;  %v1296_v15 = vmul.f32 %v8004_v14, %v7875_v60  ;;  %v6330_v43 = vmul.f32 -1.442695, %v1492_v47  ;;  %v1320_v24 = vmul.f32 %v8007_v45, %v7953_v16 }
 0x127   :  { %6632 = vtanh.f32 %v1491_v57  ;;  %v1299_v57 = vmul.f32 %v8004_v14, %v8029_v11  ;;  %v1325_v5 = vadd.f32 %v1319_v25, %v1301_v22  ;;  %v1328_v46 = vadd.f32 %v1322_v48, %v1304_v31 }
 0x128   :  { %6634 = vpow2.f32 %v6329_v39  ;;  %v1302_v56 = vadd.f32 %v1296_v15, %v1278_v59  ;;  %v1323_v17 = vmul.f32 %v8007_v45, %v8090_v62  ;;  %v1341_v1 = vadd.f32 %v1339_v33, %v1337_v42 }
 0x129   :  { %v1305_v13 = vadd.f32 %v1299_v57, %v1281_v44  ;;  %6636 = vtanh.f32 %v1492_v47  ;;  %v1331_v39 = vadd.f32 %v1325_v5, %v7955_v8  ;;  %v8122_v14 = vadd.f32 %v1342_v7, %v1340_v28 }
 0x12a   :  { %v6627_v61 = vpop.eup %6626  ;;  %v1343_v25 = vmul.f32 0.0, %v8115_v9  ;;  %v1326_v48 = vadd.f32 %v1320_v24, %v1302_v56 }
 0x12b   :  { %v1512_v41 = vadd.f32 1.0, %v6627_v61  ;;  %v1329_v22 = vadd.f32 %v1323_v17, %v1305_v13  ;;  %v8125_v61 = vpop.permute.xlu0 %1161  ;;  %v1347_v59 = vadd.f32 %v8122_v14, %v1331_v39 }
 0x12c   :  { %11115 = vst [vmem:[#allocation72_spill] sm:$0xff] %v8125_v61  ;;  %v1332_v28 = vadd.f32 %v1326_v48, %v7955_v8  ;;  %v1334_v7 = vadd.f32 %v1328_v46, %v8125_v61  ;;  %v8130_v42 = vadd.f32 %v1343_v25, %v1341_v1 }
 0x12d   :  { %v6629_v0 = vpop.eup %6628  ;;  %6638 = vrcp.f32 %v1512_v41  ;;  %v6321_v47 = vmul.f32 -1.442695, %v1347_v59 }
 0x12e   :  { %v1513_v31 = vadd.f32 1.0, %v6629_v0  ;;  %6640 = vtanh.f32 %v1493_v35  ;;  %v6331_v0 = vmul.f32 -1.442695, %v1493_v35  ;;  %v1348_v57 = vadd.f32 %v8122_v14, %v1332_v28 }
 0x12f   :  { %6642 = vpow2.f32 %v6330_v43  ;;  %v1350_v5 = vadd.f32 %v8130_v42, %v1334_v7 }
 0x130   :  { %v6631_v44 = vpop.eup %6630  ;;  %6644 = vrcp.f32 %v1513_v31  ;;  %v6322_v46 = vmul.f32 -1.442695, %v1348_v57 }
 0x131   :  { %v1514_v45 = vadd.f32 1.0, %v6631_v44  ;;  %v6633_v33 = vpop.eup %6632  ;;  %v6324_v48 = vmul.f32 -1.442695, %v1350_v5 }
 0x132   :  { %v6635_v15 = vpop.eup %6634  ;;  %v1539_v43 = vrot.slane %v6633_v33, 1 }
 0x133   :  { %6646 = vrcp.f32 %v1514_v45  ;;  %v6637_v24 = vpop.eup %6636  ;;  %v1515_v56 = vadd.f32 1.0, %v6635_v15 }
 0x134   :  { %6648 = vpow2.f32 %v6321_v47  ;;  %v1540_v25 = vrot.slane %v6637_v24, 1 }
 0x135   :  { %6650 = vpow2.f32 %v6331_v0 }
 0x136   :  { %6652 = vrcp.f32 %v1515_v56  ;;  %v1335_v56 = vadd.f32 %v1329_v22, %v8125_v61  ;;  %v8166_v22 = vadd.f32 %v7851_v32, %v7829_v63 }
 0x137   :  { %v6639_v41 = vpop.eup %6638  ;;  %6654 = vpow2.f32 %v6322_v46 }
 0x138   :  { %v6641_v13 = vpop.eup %6640  ;;  %v1533_v17 = vmul.f32 %v6639_v41, %v7919_v12  ;;  %v1545_v39 = vmul.f32 %v6639_v41, %v1539_v43  ;;  %6656 = vpow2.f32 %v6324_v48  ;;  %v8170_v48 = vadd.f32 %v7855_v34, %v7829_v63 }
 0x139   :  { %v6643_v1 = vpop.eup %6642  ;;  %v1541_v45 = vrot.slane %v6641_v13, 1 }
 0x13a   :  { %v8135_v31 = vpop.eup %6644  ;;  %v1551_v35 = vrot.slane %v1545_v39, 5  ;;  %v1516_v12 = vadd.f32 1.0, %v6643_v1  ;;  %v1351_v39 = vadd.f32 %v8130_v42, %v1335_v56 }
 0x13b   :  { %v1534_v59 = vmul.f32 %v8135_v31, %v7928_v27  ;;  %v1546_v44 = vmul.f32 %v8135_v31, %v1540_v25  ;;  %v8162_v25 = vadd.f32 %v7846_v29, %v7813_v51  ;;  %v1297_v29 = vmul.f32 %v7994_v23, %v8029_v11 }
 0x13c   :  { %v8142_v28 = vadd.f32 %v1551_v35, %v1533_v17 }
 0x13d   :  { %v8140_v47 = vpop.eup %6646  ;;  %v1552_v7 = vrot.slane %v1546_v44, 5  ;;  %v1294_v44 = vmul.f32 %v7994_v23, %v7875_v60 }
 0x13e   :  { %11116 = vst [vmem:[#allocation73_spill] sm:$0xff] %v8142_v28  ;;  %v1535_v33 = vmul.f32 %v8140_v47, %v7925_v20  ;;  %v1547_v15 = vmul.f32 %v8140_v47, %v1541_v45  ;;  %v6649_v0 = vpop.eup %6648  ;;  %6658 = vtanh.f32 %v8142_v28 }
 0x13f   :  { %v8148_v27 = vadd.f32 %v1552_v7, %v1534_v59  ;;  %v1371_v24 = vadd.f32 1.0, %v6649_v0  ;;  %6660 = vtanh.f32 %v1350_v5  ;;  %v6651_v20 = vpop.eup %6650  ;;  %v8158_v5 = vadd.f32 %v7841_v26, %v7813_v51 }
 0x140   :  { %v1553_v57 = vrot.slane %v1547_v15, 5  ;;  %6662 = vrcp.f32 %v1516_v12  ;;  %v6653_v13 = vpop.eup %6652  ;;  %v1517_v17 = vadd.f32 1.0, %v6651_v20  ;;  %v1276_v59 = vmul.f32 %v7991_v36, %v7857_v38 }
 0x141   :  { %11117 = vst [vmem:[#allocation74_spill] sm:$0xff] %v8148_v27  ;;  %6664 = vtanh.f32 %v8148_v27  ;;  %v6655_v46 = vpop.eup %6654  ;;  %v1279_v26 = vmul.f32 %v7991_v36, %v8072_v18  ;;  %v8180_v12 = vmul.f32 -1.442695, %v1351_v39  ;;  %v1318_v0 = vmul.f32 %v7997_v19, %v7953_v16 }
 0x142   :  { %v8151_v43 = vadd.f32 %v1553_v57, %v1535_v33  ;;  %6666 = vrcp.f32 %v1371_v24  ;;  %v6657_v1 = vpop.eup %6656  ;;  %v1372_v34 = vadd.f32 1.0, %v6655_v46  ;;  %v1300_v7 = vadd.f32 %v1294_v44, %v1276_v59 }
 0x143   :  { %v1303_v15 = vadd.f32 %v1297_v29, %v1279_v26  ;;  %v1321_v36 = vmul.f32 %v7997_v19, %v8090_v62  ;;  %v8186_v20 = vadd.f32 1.0, %v6657_v1 }
 0x144   :  { %11118 = vst [vmem:[#allocation75_spill] sm:$0xff] %v8151_v43  ;;  %6668 = vtanh.f32 %v8151_v43  ;;  %v8190_v46 = vadd.f32 %v1318_v0, %v1300_v7 }
 0x145   :  { %6670 = vrcp.f32 %v1517_v17  ;;  %v8192_v59 = vadd.f32 %v1321_v36, %v1303_v15 }
 0x146   :  { %6672 = vtanh.f32 %v1351_v39 }
 0x147   :  { %6674 = vrcp.f32 %v1372_v34 }
 0x148   :  { %v6659_v35 = vpop.eup %6658  ;;  %6676 = vpow2.f32 %v8180_v12 }
 0x149   :  { %v6661_v45 = vpop.eup %6660  ;;  %v1566_v32 = vrot.slane %v6659_v35, 5 }
 0x14a   :  { %v6663_v33 = vpop.eup %6662  ;;  %v1398_v35 = vrot.slane %v6661_v45, 1 }
 0x14b   :  { %v6665_v57 = vpop.eup %6664  ;;  %v1572_v24 = vmul.f32 %v6639_v41, %v1566_v32  ;;  %v1575_v56 = vmul.f32 %v6653_v13, %v1566_v32 }
 0x14c   :  { %v8188_v23 = vpop.eup %6666  ;;  %v1567_v17 = vrot.slane %v6665_v57, 5 }
 0x14d   :  { %v8195_v44 = vrot.slane %v1572_v24, %v7958_v4  ;;  %v8198_v19 = vrot.slane %v1572_v24, %v7961_v55  ;;  %v8201_v41 = vrot.slane %v1575_v56, %v7964_v2  ;;  %v1404_v29 = vmul.f32 %v8188_v23, %v1398_v35 }
 0x14e   :  { %v6669_v26 = vpop.eup %6668  ;;  %v1573_v13 = vmul.f32 %v8135_v31, %v1567_v17  ;;  %v1576_v39 = vmul.f32 %v6663_v33, %v1567_v17 }
 0x14f   :  { %11119 = vst [vmem:[#allocation76_spill] sm:$0xff] %v8195_v44  ;;  %11120 = vst [vmem:[#allocation77_spill] sm:$0xff] %v8198_v19  ;;  %v1568_v1 = vrot.slane %v6669_v26, 5  ;;  %v1828_v45 = vmul.f32 %v8195_v44, %v7811_v50  ;;  %v1831_v32 = vmul.f32 %v8195_v44, %v7817_v53  ;;  %v1834_v7 = vmul.f32 %v8198_v19, %v7815_v52  ;;  %v8225_v44 = vpop.f32.mrb[32].mxu1 }
 0x150   :  { %11121 = vst [vmem:[#allocation78_spill] sm:$0xff] %v8201_v41  ;;  %v1837_v15 = vmul.f32 %v8198_v19, %v7819_v54  ;;  %v1846_v34 = vmul.f32 %v8201_v41, %v7809_v49  ;;  %v1849_v31 = vmul.f32 %v8201_v41, %v7825_v58  ;;  %v1585_v33 = vrot.slane %v1573_v13, %v7958_v4  ;;  %v6671_v41 = vpop.eup %6670 }
 0x151   :  { %v1603_v0 = vrot.slane %v1573_v13, %v7961_v55  ;;  %v1840_v36 = vadd.f32 %v1834_v7, %v1828_v45  ;;  %v1627_v24 = vrot.slane %v1576_v39, %v7964_v2  ;;  %v1574_v56 = vmul.f32 %v8140_v47, %v1568_v1  ;;  %11122 = vst [vmem:[#allocation79_spill] sm:$0xff] %v8225_v44  ;;  %v8229_v39 = vpop.f32.mrb[33].mxu0  ;;  %v6673_v9 = vpop.eup %6672 }
 0x152   :  { %v1843_v57 = vadd.f32 %v1837_v15, %v1831_v32  ;;  %v1829_v17 = vmul.f32 %v1585_v33, %v7811_v50  ;;  %v1832_v35 = vmul.f32 %v1585_v33, %v7817_v53  ;;  %11123 = vst [vmem:[#allocation80_spill] sm:$0xff] %v8229_v39  ;;  %v1577_v7 = vmul.f32 %v6671_v41, %v1568_v1  ;;  %v8237_v39 = vpop.eup %6674 }
 0x153   :  { %v1835_v26 = vmul.f32 %v1603_v0, %v7815_v52  ;;  %v1838_v19 = vmul.f32 %v1603_v0, %v7819_v54  ;;  %v1852_v43 = vadd.f32 %v1846_v34, %v1840_v36  ;;  %v1847_v13 = vmul.f32 %v1627_v24, %v7809_v49 }
 0x154   :  { %v1855_v27 = vadd.f32 %v1849_v31, %v1843_v57  ;;  %v1850_v45 = vmul.f32 %v1627_v24, %v7825_v58  ;;  %v1589_v15 = vrot.slane %v1574_v56, %v7958_v4  ;;  %v1607_v44 = vrot.slane %v1574_v56, %v7961_v55 }
 0x155   :  { %v1841_v47 = vadd.f32 %v1835_v26, %v1829_v17  ;;  %v1844_v32 = vadd.f32 %v1838_v19, %v1832_v35  ;;  %v1858_v28 = vadd.f32 %v1852_v43, %v8158_v5  ;;  %v1410_v34 = vrot.slane %v1404_v29, 5 }
 0x156   :  { %v1861_v37 = vadd.f32 %v1855_v27, %v8166_v22  ;;  %v1631_v57 = vrot.slane %v1577_v7, %v7964_v2  ;;  %v1830_v30 = vmul.f32 %v1589_v15, %v7811_v50  ;;  %v1833_v41 = vmul.f32 %v1589_v15, %v7817_v53 }
 0x157   :  { %v1853_v31 = vadd.f32 %v1847_v13, %v1841_v47  ;;  %v1856_v36 = vadd.f32 %v1850_v45, %v1844_v32  ;;  %v6338_v19 = vmul.f32 -1.442695, %v1858_v28  ;;  %v1392_v1 = vmul.f32 0.0, %v8188_v23 }
 0x158   :  { %v1836_v5 = vmul.f32 %v1607_v44, %v7815_v52  ;;  %v1839_v22 = vmul.f32 %v1607_v44, %v7819_v54  ;;  %v501_v29 = vadd.f32 %v7859_v40, %v7813_v51  ;;  %v505_v28 = vadd.f32 %v7867_v10, %v7829_v63 }
 0x159   :  { %v1859_v27 = vadd.f32 %v1853_v31, %v8162_v25  ;;  %v1862_v43 = vadd.f32 %v1856_v36, %v8170_v48  ;;  %6678 = vpow2.f32 %v6338_v19  ;;  %v8250_v56 = vadd.f32 %v1410_v34, %v1392_v1 }
 0x15a   :  { %v1842_v35 = vadd.f32 %v1836_v5, %v1830_v30  ;;  %v1848_v12 = vmul.f32 %v1631_v57, %v7809_v49  ;;  %6680 = vrcp.f32 %v8186_v20  ;;  %v1845_v25 = vadd.f32 %v1839_v22, %v1833_v41  ;;  %v6677_v5 = vpop.eup %6676 }
 0x15b   :  { %v6339_v17 = vmul.f32 -1.442695, %v1859_v27  ;;  %v1851_v48 = vmul.f32 %v1631_v57, %v7825_v58  ;;  %v1591_v26 = vmul.f32 %v1585_v33, %v7857_v38  ;;  %v1594_v13 = vmul.f32 %v1585_v33, %v8072_v18 }
 0x15c   :  { %v1854_v40 = vadd.f32 %v1848_v12, %v1842_v35  ;;  %v1609_v45 = vmul.f32 %v1603_v0, %v7875_v60  ;;  %v1612_v10 = vmul.f32 %v1603_v0, %v8029_v11  ;;  %v1633_v30 = vmul.f32 %v1627_v24, %v7953_v16 }
 0x15d   :  { %6682 = vpow2.f32 %v6339_v17  ;;  %v1857_v47 = vadd.f32 %v1851_v48, %v1845_v25  ;;  %v1636_v32 = vmul.f32 %v1627_v24, %v8090_v62  ;;  %v1399_v7 = vrot.slane %v6673_v9, 1 }
 0x15e   :  { %v1860_v20 = vadd.f32 %v1854_v40, %v501_v29  ;;  %6684 = vtanh.f32 %v8250_v56  ;;  %v1615_v34 = vadd.f32 %v1609_v45, %v1591_v26  ;;  %v1618_v31 = vadd.f32 %v1612_v10, %v1594_v13 }
 0x15f   :  { %v6341_v36 = vmul.f32 -1.442695, %v1861_v37  ;;  %v1863_v19 = vadd.f32 %v1857_v47, %v505_v28  ;;  %v1405_v33 = vmul.f32 %v8237_v39, %v1399_v7  ;;  %v1592_v41 = vmul.f32 %v1589_v15, %v7857_v38 }
 0x160   :  { %6686 = vtanh.f32 %v1861_v37  ;;  %v6340_v1 = vmul.f32 -1.442695, %v1860_v20  ;;  %v1639_v0 = vadd.f32 %v1633_v30, %v1615_v34  ;;  %v8264_v27 = vadd.f32 %v1636_v32, %v1618_v31 }
 0x161   :  { %v1393_v24 = vmul.f32 0.0, %v8237_v39  ;;  %v1411_v9 = vrot.slane %v1405_v33, 5  ;;  %v1595_v22 = vmul.f32 %v1589_v15, %v8072_v18  ;;  %v1610_v29 = vmul.f32 %v1607_v44, %v7875_v60 }
 0x162   :  { %6688 = vpow2.f32 %v6340_v1  ;;  %v1613_v35 = vmul.f32 %v1607_v44, %v8029_v11  ;;  %v1375_v48 = vadd.f32 1.0, %v6677_v5  ;;  %v1634_v26 = vmul.f32 %v1631_v57, %v7953_v16 }
 0x163   :  { %v6679_v17 = vpop.eup %6678  ;;  %6690 = vpow2.f32 %v6341_v36  ;;  %v8269_v28 = vadd.f32 %v1411_v9, %v1393_v24  ;;  %v1616_v37 = vadd.f32 %v1610_v29, %v1592_v41  ;;  %v1637_v15 = vmul.f32 %v1631_v57, %v8090_v62 }
 0x164   :  { %v6681_v12 = vpop.eup %6680  ;;  %v1882_v25 = vadd.f32 1.0, %v6679_v17  ;;  %6692 = vtanh.f32 %v1862_v43  ;;  %v1619_v13 = vadd.f32 %v1613_v35, %v1595_v22  ;;  %v6342_v45 = vmul.f32 -1.442695, %v1862_v43 }
 0x165   :  { %6694 = vtanh.f32 %v8269_v28  ;;  %v8275_v10 = vadd.f32 %v1634_v26, %v1616_v37  ;;  %v1330_v44 = vadd.f32 %v8190_v46, %v7955_v8  ;;  %v1333_v32 = vadd.f32 %v8192_v59, %v8125_v61 }
 0x166   :  { %6696 = vrcp.f32 %v1882_v25  ;;  %v8279_v30 = vadd.f32 %v1637_v15, %v1619_v13  ;;  %v6343_v31 = vmul.f32 -1.442695, %v1863_v19  ;;  %v1645_v37 = vadd.f32 %v1639_v0, %v7955_v8  ;;  %v11128_v13 = vld [vmem:[#allocation73_spill] sm:$0xff] }
 0x167   :  { %v6683_v40 = vpop.eup %6682  ;;  %6698 = vrcp.f32 %v1375_v48  ;;  %v1346_v20 = vadd.f32 %v8122_v14, %v1330_v44  ;;  %v8285_v34 = vadd.f32 %v8130_v42, %v1333_v32  ;;  %v11127_v48 = vld [vmem:[#allocation38_spill] sm:$0xff] }
 0x168   :  { %v1883_v47 = vadd.f32 1.0, %v6683_v40  ;;  %v6685_v7 = vpop.eup %6684 }
 0x169   :  { %v1425_v57 = vrot.slane %v6685_v7, 5 }
 0x16a   :  { %6700 = vrcp.f32 %v1883_v47  ;;  %v6687_v43 = vpop.eup %6686 }
 0x16b   :  { %6702 = vpow2.f32 %v6342_v45  ;;  %v8288_v46 = vmul.f32 %v8188_v23, %v1425_v57  ;;  %v8290_v36 = vmul.f32 %v6681_v12, %v1425_v57  ;;  %v1909_v24 = vrot.slane %v6687_v43, 1  ;;  %v11126_v12 = vld [vmem:[#allocation70_spill] sm:$0xff] }
 0x16c   :  { %6704 = vtanh.f32 %v1863_v19  ;;  %v6689_v33 = vpop.eup %6688  ;;  %v6320_v19 = vmul.f32 -1.442695, %v1346_v20  ;;  %v11129_v20 = vld [vmem:[#allocation71_spill] sm:$0xff] }
 0x16d   :  { %11124 = vst [vmem:[#allocation81_spill] sm:$0xff] %v8288_v46  ;;  %11125 = vst [vmem:[#allocation82_spill] sm:$0xff] %v8290_v36  ;;  %v6691_v59 = vpop.eup %6690  ;;  %v1884_v41 = vadd.f32 1.0, %v6689_v33  ;;  %v1657_v14 = vrot.slane %v8288_v46, %v7958_v4  ;;  %v1675_v1 = vrot.slane %v8288_v46, %v7961_v55  ;;  %v1699_v42 = vrot.slane %v8290_v36, %v7964_v2 }
 0x16e   :  { %v6693_v5 = vpop.eup %6692  ;;  %6706 = vpow2.f32 %v6343_v31  ;;  %v1885_v35 = vadd.f32 1.0, %v6691_v59 }
 0x16f   :  { %v6695_v23 = vpop.eup %6694  ;;  %6708 = vrcp.f32 %v1884_v41  ;;  %v1663_v9 = vmul.f32 %v1657_v14, %v8027_v6  ;;  %v1666_v22 = vmul.f32 %v1657_v14, %v8078_v3  ;;  %v1681_v29 = vmul.f32 %v1675_v1, %v7898_v21  ;;  %v11132_v14 = vld [vmem:[#allocation74_spill] sm:$0xff] }
 0x170   :  { %v8301_v17 = vpop.eup %6696  ;;  %v1684_v25 = vmul.f32 %v1675_v1, %v11126_v12  ;;  %v1705_v26 = vmul.f32 %v1699_v42, %v11127_v48  ;;  %v1426_v44 = vrot.slane %v6695_v23, 5  ;;  %v1910_v32 = vrot.slane %v6693_v5, 1 }
 0x171   :  { %v1903_v15 = vmul.f32 %v8301_v17, %v11128_v13  ;;  %v1915_v40 = vmul.f32 %v8301_v17, %v1909_v24  ;;  %v1687_v45 = vadd.f32 %v1681_v29, %v1663_v9  ;;  %v6699_v47 = vpop.eup %6698  ;;  %v1708_v57 = vmul.f32 %v1699_v42, %v11129_v20 }
 0x172   :  { %v1690_v7 = vadd.f32 %v1684_v25, %v1666_v22  ;;  %6710 = vpow2.f32 %v6320_v19  ;;  %v8313_v33 = vmul.f32 %v8237_v39, %v1426_v44  ;;  %v8315_v59 = vmul.f32 %v6699_v47, %v1426_v44 }
 0x173   :  { %v1921_v0 = vrot.slane %v1915_v40, 5  ;;  %v1711_v31 = vadd.f32 %v1705_v26, %v1687_v45  ;;  %v1648_v5 = vadd.f32 %v8264_v27, %v8125_v61  ;;  %6712 = vrcp.f32 %v1885_v35 }
 0x174   :  { %v8310_v43 = vpop.eup %6700  ;;  %11130 = vst [vmem:[#allocation73_spill] sm:$0xff] %v8313_v33  ;;  %11131 = vst [vmem:[#allocation83_spill] sm:$0xff] %v8315_v59  ;;  %v1714_v42 = vadd.f32 %v1708_v57, %v1690_v7  ;;  %v1661_v39 = vrot.slane %v8313_v33, %v7958_v4  ;;  %v1679_v22 = vrot.slane %v8313_v33, %v7961_v55  ;;  %v6323_v7 = vmul.f32 -1.442695, %v8285_v34  ;;  %v11134_v57 = vld [vmem:[#allocation75_spill] sm:$0xff] }
 0x175   :  { %v6703_v41 = vpop.eup %6702  ;;  %v1904_v1 = vmul.f32 %v8310_v43, %v11132_v14  ;;  %v1916_v24 = vmul.f32 %v8310_v43, %v1910_v32  ;;  %v8322_v23 = vadd.f32 %v1921_v0, %v1903_v15  ;;  %v1717_v9 = vadd.f32 %v1711_v31, %v1645_v37 }
 0x176   :  { %v6705_v19 = vpop.eup %6704  ;;  %v1703_v25 = vrot.slane %v8315_v59, %v7964_v2  ;;  %v1664_v27 = vmul.f32 %v1661_v39, %v8027_v6  ;;  %v1667_v13 = vmul.f32 %v1661_v39, %v8078_v3  ;;  %v1886_v37 = vadd.f32 1.0, %v6703_v41 }
 0x177   :  { %v1922_v29 = vrot.slane %v1916_v24, 5  ;;  %6714 = vtanh.f32 %v8322_v23  ;;  %v6333_v26 = vmul.f32 -1.442695, %v1717_v9  ;;  %v1911_v45 = vrot.slane %v6705_v19, 1 }
 0x178   :  { %v6707_v15 = vpop.eup %6706  ;;  %v1682_v44 = vmul.f32 %v1679_v22, %v7898_v21  ;;  %v1720_v35 = vadd.f32 %v1714_v42, %v1648_v5  ;;  %v1685_v32 = vmul.f32 %v1679_v22, %v11126_v12  ;;  %v1706_v24 = vmul.f32 %v1703_v25, %v11127_v48 }
 0x179   :  { %v8333_v40 = vadd.f32 %v1922_v29, %v1904_v1  ;;  %v8336_v47 = vpop.eup %6708  ;;  %6716 = vpow2.f32 %v6333_v26  ;;  %v1887_v14 = vadd.f32 1.0, %v6707_v15  ;;  %v1709_v19 = vmul.f32 %v1703_v25, %v11129_v20  ;;  %v11136_v15 = vld [vmem:[#allocation14_spill] sm:$0xff] }
 0x17a   :  { %v1905_v0 = vmul.f32 %v8336_v47, %v11134_v57  ;;  %v1917_v31 = vmul.f32 %v8336_v47, %v1911_v45  ;;  %v1688_v41 = vadd.f32 %v1682_v44, %v1664_v27  ;;  %v1691_v1 = vadd.f32 %v1685_v32, %v1667_v13  ;;  %v11138_v32 = vld [vmem:[#allocation76_spill] sm:$0xff] }
 0x17b   :  { %11133 = vst [vmem:[#allocation74_spill] sm:$0xff] %v8333_v40  ;;  %6718 = vtanh.f32 %v8333_v40  ;;  %v1646_v9 = vadd.f32 %v8275_v10, %v7955_v8  ;;  %v1649_v39 = vadd.f32 %v8279_v30, %v8125_v61  ;;  %v6336_v27 = vmul.f32 -1.442695, %v1720_v35  ;;  %v11137_v10 = vld [vmem:[#allocation15_spill] sm:$0xff] }
 0x17c   :  { %v6711_v5 = vpop.eup %6710  ;;  %6720 = vrcp.f32 %v1886_v37  ;;  %v1923_v42 = vrot.slane %v1917_v31, 5  ;;  %v1712_v22 = vadd.f32 %v1706_v24, %v1688_v41  ;;  %v1715_v29 = vadd.f32 %v1709_v19, %v1691_v1  ;;  %v11140_v41 = vld [vmem:[#allocation77_spill] sm:$0xff] }
 0x17d   :  { %6722 = vtanh.f32 %v8285_v34  ;;  %v1370_v13 = vadd.f32 1.0, %v6711_v5  ;;  %v6713_v25 = vpop.eup %6712  ;;  %v8355_v37 = vadd.f32 %v11136_v15, %v7813_v51  ;;  %v8359_v45 = vadd.f32 %v11137_v10, %v7813_v51  ;;  %v11141_v24 = vld [vmem:[#allocation17_spill] sm:$0xff] }
 0x17e   :  { %v8351_v26 = vadd.f32 %v1923_v42, %v1905_v0  ;;  %6724 = vpow2.f32 %v6323_v7  ;;  %v1718_v34 = vadd.f32 %v1712_v22, %v1646_v9  ;;  %v1721_v44 = vadd.f32 %v1715_v29, %v1649_v39  ;;  %v11139_v0 = vld [vmem:[#allocation16_spill] sm:$0xff]  ;;  %v11143_v42 = vld [vmem:[#allocation19_spill] sm:$0xff] }
 0x17f   :  { %6726 = vrcp.f32 %v1887_v14  ;;  %v1590_v7 = vmul.f32 %v11138_v32, %v7857_v38  ;;  %v8366_v31 = vadd.f32 %v11139_v0, %v7813_v51  ;;  %v1608_v14 = vmul.f32 %v11140_v41, %v7875_v60 }
 0x180   :  { %11135 = vst [vmem:[#allocation75_spill] sm:$0xff] %v8351_v26  ;;  %6728 = vtanh.f32 %v8351_v26  ;;  %v8372_v19 = vadd.f32 %v11141_v24, %v7829_v63  ;;  %v8378_v9 = vadd.f32 %v11143_v42, %v7829_v63  ;;  %v8381_v0 = vmul.f32 -1.442695, %v1721_v44  ;;  %v11144_v24 = vld [vmem:[#allocation78_spill] sm:$0xff] }
 0x181   :  { %v6715_v30 = vpop.eup %6714  ;;  %6730 = vtanh.f32 %v1720_v35  ;;  %v11142_v35 = vld [vmem:[#allocation18_spill] sm:$0xff]  ;;  %v1614_v15 = vadd.f32 %v1608_v14, %v1590_v7  ;;  %v1632_v36 = vmul.f32 %v11144_v24, %v7953_v16 }
 0x182   :  { %v1936_v57 = vrot.slane %v6715_v30, 5  ;;  %6732 = vpow2.f32 %v6336_v27  ;;  %v507_v5 = vadd.f32 %v11142_v35, %v7829_v63  ;;  %v6334_v30 = vmul.f32 -1.442695, %v1718_v34 }
 0x183   :  { %v6717_v1 = vpop.eup %6716  ;;  %6734 = vrcp.f32 %v1370_v13  ;;  %v8397_v7 = vadd.f32 %v1632_v36, %v1614_v15 }
 0x184   :  { %v1942_v22 = vmul.f32 %v8301_v17, %v1936_v57  ;;  %v1945_v29 = vmul.f32 %v6713_v25, %v1936_v57  ;;  %v1741_v27 = vadd.f32 1.0, %v6717_v1  ;;  %6736 = vtanh.f32 %v1721_v44 }
 0x185   :  { %v6719_v39 = vpop.eup %6718  ;;  %11148 = vst [vmem:[#allocation16_spill] sm:$0xff] %v8397_v7 }
 0x186   :  { %v1937_v10 = vrot.slane %v6719_v39, 5  ;;  %v6721_v46 = vpop.eup %6720  ;;  %v8386_v35 = vrot.slane %v1942_v22, %v7958_v4  ;;  %v8389_v42 = vrot.slane %v1942_v22, %v7961_v55  ;;  %v8392_v13 = vrot.slane %v1945_v29, %v7964_v2 }
 0x187   :  { %v8394_v17 = vpop.eup %6722  ;;  %6738 = vrcp.f32 %v1741_v27 }
 0x188   :  { %11145 = vst [vmem:[#allocation14_spill] sm:$0xff] %v8386_v35  ;;  %11146 = vst [vmem:[#allocation15_spill] sm:$0xff] %v8389_v42  ;;  %v1943_v25 = vmul.f32 %v8310_v43, %v1937_v10  ;;  %v1946_v34 = vmul.f32 %v6721_v46, %v1937_v10  ;;  %v8399_v57 = vpop.eup %6724  ;;  %v2182_v14 = vmul.f32 %v8386_v35, %v7811_v50  ;;  %6740 = vpow2.f32 %v6334_v30 }
 0x189   :  { %11147 = vst [vmem:[#allocation76_spill] sm:$0xff] %v8392_v13  ;;  %v2185_v1 = vmul.f32 %v8386_v35, %v7817_v53  ;;  %v2188_v39 = vmul.f32 %v8389_v42, %v7815_v52  ;;  %v2191_v44 = vmul.f32 %v8389_v42, %v7819_v54  ;;  %v6727_v22 = vpop.eup %6726  ;;  %v2200_v10 = vmul.f32 %v8392_v13, %v7809_v49 }
 0x18a   :  { %v1955_v46 = vrot.slane %v1943_v25, %v7958_v4  ;;  %v1973_v36 = vrot.slane %v1943_v25, %v7961_v55  ;;  %v8412_v43 = vrot.slane %v1946_v34, %v7964_v2  ;;  %v6729_v29 = vpop.eup %6728  ;;  %v2203_v59 = vmul.f32 %v8392_v13, %v7825_v58 }
 0x18b   :  { %v2194_v27 = vadd.f32 %v2188_v39, %v2182_v14  ;;  %v2197_v15 = vadd.f32 %v2191_v44, %v2185_v1  ;;  %v6731_v33 = vpop.eup %6730  ;;  %v8426_v39 = vmul.f32 %v11138_v32, %v8072_v18  ;;  %v1938_v26 = vrot.slane %v6729_v29, 5 }
 0x18c   :  { %v2183_v42 = vmul.f32 %v1955_v46, %v7811_v50  ;;  %v2186_v35 = vmul.f32 %v1955_v46, %v7817_v53  ;;  %v2189_v25 = vmul.f32 %v1973_v36, %v7815_v52  ;;  %v2192_v34 = vmul.f32 %v1973_v36, %v7819_v54  ;;  %v6733_v7 = vpop.eup %6732 }
 0x18d   :  { %v2201_v30 = vmul.f32 %v8412_v43, %v7809_v49  ;;  %v2206_v14 = vadd.f32 %v2200_v10, %v2194_v27  ;;  %v2209_v1 = vadd.f32 %v2203_v59, %v2197_v15  ;;  %v8428_v44 = vpop.eup %6734  ;;  %v2204_v51 = vmul.f32 %v8412_v43, %v7825_v58 }
 0x18e   :  { %v2195_v13 = vadd.f32 %v2189_v25, %v2183_v42  ;;  %v2198_v63 = vadd.f32 %v2192_v34, %v2186_v35  ;;  %v1768_v40 = vrot.slane %v6731_v33, 1  ;;  %v1961_v48 = vmul.f32 %v1955_v46, %v7857_v38  ;;  %v8435_v10 = vpop.eup %6736 }
 0x18f   :  { %v2212_v61 = vadd.f32 %v2206_v14, %v8359_v45  ;;  %v2215_v20 = vadd.f32 %v2209_v1, %v507_v5  ;;  %v1944_v15 = vmul.f32 %v8336_v47, %v1938_v26  ;;  %v1947_v32 = vmul.f32 %v6727_v22, %v1938_v26 }
 0x190   :  { %v2207_v27 = vadd.f32 %v2201_v30, %v2195_v13  ;;  %v2210_v59 = vadd.f32 %v2204_v51, %v2198_v63  ;;  %v1964_v35 = vmul.f32 %v1955_v46, %v8072_v18  ;;  %v1979_v42 = vmul.f32 %v1973_v36, %v7875_v60 }
 0x191   :  { %v6350_v8 = vmul.f32 -1.442695, %v2212_v61  ;;  %v1982_v29 = vmul.f32 %v1973_v36, %v8029_v11  ;;  %v8440_v25 = vpop.eup %6738  ;;  %v1959_v45 = vrot.slane %v1944_v15, %v7958_v4  ;;  %v1977_v51 = vrot.slane %v1944_v15, %v7961_v55 }
 0x192   :  { %v2213_v33 = vadd.f32 %v2207_v27, %v8355_v37  ;;  %v2001_v63 = vrot.slane %v1947_v32, %v7964_v2  ;;  %v2216_v47 = vadd.f32 %v2210_v59, %v8372_v19  ;;  %v1762_v61 = vmul.f32 %v8440_v25, %v8250_v56  ;;  %v6741_v5 = vpop.eup %6740 }
 0x193   :  { %6742 = vpow2.f32 %v6350_v8  ;;  %v1774_v26 = vmul.f32 %v8440_v25, %v1768_v40  ;;  %v2184_v22 = vmul.f32 %v1959_v45, %v7811_v50  ;;  %v2187_v37 = vmul.f32 %v1959_v45, %v7817_v53 }
 0x194   :  { %v6351_v13 = vmul.f32 -1.442695, %v2213_v33  ;;  %v2190_v46 = vmul.f32 %v1977_v51, %v7815_v52  ;;  %v2193_v36 = vmul.f32 %v1977_v51, %v7819_v54  ;;  %v2202_v34 = vmul.f32 %v2001_v63, %v7809_v49 }
 0x195   :  { %6744 = vpow2.f32 %v8381_v0  ;;  %v1611_v8 = vmul.f32 %v11140_v41, %v8029_v11  ;;  %v1780_v40 = vrot.slane %v1774_v26, 5  ;;  %v1985_v19 = vadd.f32 %v1979_v42, %v1961_v48 }
 0x196   :  { %6746 = vpow2.f32 %v6351_v13  ;;  %v2196_v56 = vadd.f32 %v2190_v46, %v2184_v22  ;;  %v2199_v30 = vadd.f32 %v2193_v36, %v2187_v37  ;;  %v2205_v14 = vmul.f32 %v2001_v63, %v7825_v58 }
 0x197   :  { %v1988_v1 = vadd.f32 %v1982_v29, %v1964_v35  ;;  %v2003_v27 = vmul.f32 %v8412_v43, %v7953_v16  ;;  %v1744_v15 = vadd.f32 1.0, %v6733_v7  ;;  %v8461_v32 = vadd.f32 %v1780_v40, %v1762_v61 }
 0x198   :  { %v2208_v59 = vadd.f32 %v2202_v34, %v2196_v56  ;;  %v2006_v0 = vmul.f32 %v8412_v43, %v8090_v62  ;;  %v2211_v33 = vadd.f32 %v2205_v14, %v2199_v30  ;;  %6748 = vtanh.f32 %v2215_v20 }
 0x199   :  { %v8465_v41 = vadd.f32 %v2003_v27, %v1985_v19  ;;  %v1742_v26 = vadd.f32 1.0, %v6741_v5  ;;  %6750 = vtanh.f32 %v8461_v32  ;;  %v1397_v29 = vrot.slane %v8394_v17, 1 }
 0x19a   :  { %v2214_v48 = vadd.f32 %v2208_v59, %v8366_v31  ;;  %v8469_v35 = vadd.f32 %v2006_v0, %v1988_v1  ;;  %v2217_v42 = vadd.f32 %v2211_v33, %v8378_v9  ;;  %v1635_v43 = vmul.f32 %v11144_v24, %v8090_v62 }
 0x19b   :  { %6752 = vrcp.f32 %v1742_v26  ;;  %v6353_v13 = vmul.f32 -1.442695, %v2215_v20  ;;  %v1962_v5 = vmul.f32 %v1959_v45, %v7857_v38  ;;  %v1965_v31 = vmul.f32 %v1959_v45, %v8072_v18 }
 0x19c   :  { %v6352_v7 = vmul.f32 -1.442695, %v2214_v48  ;;  %6754 = vrcp.f32 %v1744_v15  ;;  %v1617_v22 = vadd.f32 %v1611_v8, %v8426_v39  ;;  %v1980_v9 = vmul.f32 %v1977_v51, %v7875_v60 }
 0x19d   :  { %v6743_v61 = vpop.eup %6742  ;;  %v1983_v46 = vmul.f32 %v1977_v51, %v8029_v11  ;;  %v6354_v34 = vmul.f32 -1.442695, %v2216_v47  ;;  %v2004_v17 = vmul.f32 %v2001_v63, %v7953_v16  ;;  %v2007_v24 = vmul.f32 %v2001_v63, %v8090_v62 }
 0x19e   :  { %v2236_v37 = vadd.f32 1.0, %v6743_v61  ;;  %6756 = vpow2.f32 %v6352_v7  ;;  %v1986_v56 = vadd.f32 %v1980_v9, %v1962_v5  ;;  %v1403_v45 = vmul.f32 %v8428_v44, %v1397_v29 }
 0x19f   :  { %v6745_v36 = vpop.eup %6744  ;;  %6758 = vtanh.f32 %v2216_v47  ;;  %v1989_v40 = vadd.f32 %v1983_v46, %v1965_v31  ;;  %v8483_v8 = vadd.f32 %v1635_v43, %v1617_v22  ;;  %v1391_v14 = vmul.f32 0.0, %v8428_v44 }
 0x1a0   :  { %v6747_v20 = vpop.eup %6746  ;;  %6760 = vrcp.f32 %v2236_v37  ;;  %v8485_v19 = vadd.f32 %v2004_v17, %v1986_v56  ;;  %v1409_v30 = vrot.slane %v1403_v45, 5  ;;  %v1769_v1 = vrot.slane %v8435_v10, 1 }
 0x1a1   :  { %v2237_v39 = vadd.f32 1.0, %v6747_v20  ;;  %6762 = vpow2.f32 %v6353_v13  ;;  %v8487_v51 = vadd.f32 %v2007_v24, %v1989_v40  ;;  %v1373_v27 = vadd.f32 1.0, %v8399_v57 }
 0x1a2   :  { %v6749_v47 = vpop.eup %6748  ;;  %v8494_v0 = vadd.f32 %v1409_v30, %v1391_v14  ;;  %v6355_v26 = vmul.f32 -1.442695, %v2217_v42  ;;  %v1745_v22 = vadd.f32 1.0, %v6745_v36 }
 0x1a3   :  { %11149 = vst [vmem:[#allocation77_spill] sm:$0xff] %v8487_v51  ;;  %6764 = vrcp.f32 %v2237_v39  ;;  %v6751_v63 = vpop.eup %6750  ;;  %v2263_v10 = vrot.slane %v6749_v47, 1  ;;  %v11154_v39 = vld [vmem:[#allocation48_spill] sm:$0xff] }
 0x1a4   :  { %6766 = vpow2.f32 %v6354_v34  ;;  %v1795_v15 = vrot.slane %v6751_v63, 5  ;;  %11150 = vst [vmem:[#allocation17_spill] sm:$0xff] %v8494_v0  ;;  %v2015_v30 = vadd.f32 %v8465_v41, %v11154_v39  ;;  %v11156_v63 = vld [vmem:[#allocation74_spill] sm:$0xff] }
 0x1a5   :  { %v8492_v59 = vpop.eup %6752  ;;  %6768 = vtanh.f32 %v2217_v42 }
 0x1a6   :  { %v6755_v33 = vpop.eup %6754  ;;  %v1763_v48 = vmul.f32 %v8492_v59, %v8269_v28  ;;  %v1775_v7 = vmul.f32 %v8492_v59, %v1769_v1  ;;  %v8500_v29 = vmul.f32 %v8440_v25, %v1795_v15  ;;  %6770 = vtanh.f32 %v8494_v0 }
 0x1a7   :  { %v8502_v43 = vmul.f32 %v6755_v33, %v1795_v15  ;;  %6772 = vrcp.f32 %v1373_v27 }
 0x1a8   :  { %11151 = vst [vmem:[#allocation18_spill] sm:$0xff] %v8500_v29  ;;  %v6757_v57 = vpop.eup %6756  ;;  %v1781_v61 = vrot.slane %v1775_v7, 5  ;;  %v2027_v42 = vrot.slane %v8500_v29, %v7958_v4  ;;  %v2045_v28 = vrot.slane %v8500_v29, %v7961_v55  ;;  %6774 = vpow2.f32 %v6355_v26  ;;  %v11158_v7 = vld [vmem:[#allocation71_spill] sm:$0xff] }
 0x1a9   :  { %11152 = vst [vmem:[#allocation19_spill] sm:$0xff] %v8502_v43  ;;  %v6759_v13 = vpop.eup %6758  ;;  %v2238_v5 = vadd.f32 1.0, %v6757_v57  ;;  %v2069_v25 = vrot.slane %v8502_v43, %v7964_v2 }
 0x1aa   :  { %v8511_v31 = vpop.eup %6760  ;;  %v8513_v37 = vadd.f32 %v1781_v61, %v1763_v48  ;;  %v2033_v34 = vmul.f32 %v2027_v42, %v8027_v6  ;;  %v2264_v24 = vrot.slane %v6759_v13, 1  ;;  %v2036_v20 = vmul.f32 %v2027_v42, %v8078_v3  ;;  %v11159_v42 = vld [vmem:[#allocation72_spill] sm:$0xff] }
 0x1ab   :  { %v2257_v9 = vmul.f32 %v8511_v31, %v8322_v23  ;;  %v2269_v46 = vmul.f32 %v8511_v31, %v2263_v10  ;;  %6776 = vrcp.f32 %v2238_v5  ;;  %v6763_v17 = vpop.eup %6762  ;;  %v2051_v56 = vmul.f32 %v2045_v28, %v7898_v21  ;;  %v11155_v23 = vld [vmem:[#allocation38_spill] sm:$0xff] }
 0x1ac   :  { %11153 = vst [vmem:[#allocation78_spill] sm:$0xff] %v8513_v37  ;;  %v2054_v40 = vmul.f32 %v2045_v28, %v11126_v12  ;;  %v2075_v47 = vmul.f32 %v2069_v25, %v11155_v23  ;;  %6778 = vtanh.f32 %v8513_v37  ;;  %v2239_v26 = vadd.f32 1.0, %v6763_v17 }
 0x1ad   :  { %v8522_v45 = vpop.eup %6764  ;;  %v2275_v36 = vrot.slane %v2269_v46, 5  ;;  %v2057_v15 = vadd.f32 %v2051_v56, %v2033_v34  ;;  %v2078_v57 = vmul.f32 %v2069_v25, %v11158_v7  ;;  %6780 = vrcp.f32 %v1745_v22 }
 0x1ae   :  { %v6767_v14 = vpop.eup %6766  ;;  %v2258_v1 = vmul.f32 %v8522_v45, %v11156_v63  ;;  %v2270_v27 = vmul.f32 %v8522_v45, %v2264_v24  ;;  %v2060_v33 = vadd.f32 %v2054_v40, %v2036_v20  ;;  %v2018_v28 = vadd.f32 %v8469_v35, %v11159_v42 }
 0x1af   :  { %v8531_v48 = vadd.f32 %v2275_v36, %v2257_v9  ;;  %v6769_v10 = vpop.eup %6768  ;;  %v2081_v61 = vadd.f32 %v2075_v47, %v2057_v15  ;;  %v2240_v5 = vadd.f32 1.0, %v6767_v14  ;;  %v11163_v47 = vld [vmem:[#allocation75_spill] sm:$0xff] }
 0x1b0   :  { %v2276_v41 = vrot.slane %v2270_v27, 5  ;;  %v6771_v13 = vpop.eup %6770  ;;  %v2084_v46 = vadd.f32 %v2078_v57, %v2060_v33  ;;  %v2265_v25 = vrot.slane %v6769_v10, 1 }
 0x1b1   :  { %11157 = vst [vmem:[#allocation74_spill] sm:$0xff] %v8531_v48  ;;  %6782 = vtanh.f32 %v8531_v48  ;;  %v6773_v24 = vpop.eup %6772  ;;  %v2087_v17 = vadd.f32 %v2081_v61, %v2015_v30  ;;  %v1424_v9 = vrot.slane %v6771_v13, 5 }
 0x1b2   :  { %v8537_v34 = vadd.f32 %v2276_v41, %v2258_v1  ;;  %6784 = vrcp.f32 %v2239_v26  ;;  %v6775_v20 = vpop.eup %6774  ;;  %v2090_v36 = vadd.f32 %v2084_v46, %v2018_v28 }
 0x1b3   :  { %v6345_v22 = vmul.f32 -1.442695, %v2087_v17  ;;  %v8541_v56 = vmul.f32 %v8428_v44, %v1424_v9  ;;  %v8545_v35 = vmul.f32 %v6773_v24, %v1424_v9  ;;  %v2241_v41 = vadd.f32 1.0, %v6775_v20 }
 0x1b4   :  { %11160 = vst [vmem:[#allocation84_spill] sm:$0xff] %v8537_v34  ;;  %6786 = vtanh.f32 %v8537_v34  ;;  %v6348_v61 = vmul.f32 -1.442695, %v2090_v36 }
 0x1b5   :  { %11161 = vst [vmem:[#allocation85_spill] sm:$0xff] %v8541_v56  ;;  %v8543_v40 = vpop.eup %6776  ;;  %6788 = vrcp.f32 %v2240_v5  ;;  %11162 = vst [vmem:[#allocation86_spill] sm:$0xff] %v8545_v35  ;;  %v1653_v63 = vrot.slane %v8541_v56, %v7958_v4  ;;  %v1671_v44 = vrot.slane %v8541_v56, %v7961_v55  ;;  %v1695_v27 = vrot.slane %v8545_v35, %v7964_v2 }
 0x1b6   :  { %v2259_v14 = vmul.f32 %v8543_v40, %v11163_v47  ;;  %v2271_v30 = vmul.f32 %v8543_v40, %v2265_v25  ;;  %6790 = vpow2.f32 %v6345_v22  ;;  %v6779_v1 = vpop.eup %6778 }
 0x1b7   :  { %v1796_v33 = vrot.slane %v6779_v1, 5  ;;  %v1662_v26 = vmul.f32 %v1653_v63, %v8027_v6  ;;  %v1665_v57 = vmul.f32 %v1653_v63, %v8078_v3  ;;  %v6781_v10 = vpop.eup %6780  ;;  %v1680_v13 = vmul.f32 %v1671_v44, %v7898_v21  ;;  %v11168_v63 = vld [vmem:[#allocation21_spill] sm:$0xff] }
 0x1b8   :  { %v2277_v15 = vrot.slane %v2271_v30, 5  ;;  %v1683_v5 = vmul.f32 %v1671_v44, %v11126_v12  ;;  %6792 = vtanh.f32 %v2090_v36  ;;  %v1704_v22 = vmul.f32 %v1695_v27, %v11155_v23  ;;  %v11167_v30 = vld [vmem:[#allocation9_spill] sm:$0xff]  ;;  %v11169_v36 = vld [vmem:[#allocation22_spill] sm:$0xff]  ;;  %v11170_v44 = vld [vmem:[#allocation23_spill] sm:$0xff] }
 0x1b9   :  { %v8563_v46 = vmul.f32 %v8492_v59, %v1796_v33  ;;  %v8565_v24 = vmul.f32 %v6781_v10, %v1796_v33  ;;  %v1686_v9 = vadd.f32 %v1680_v13, %v1662_v26  ;;  %v1707_v20 = vmul.f32 %v1695_v27, %v11158_v7  ;;  %v11172_v13 = vld [vmem:[#allocation12_spill] sm:$0xff] }
 0x1ba   :  { %v8560_v28 = vadd.f32 %v2277_v15, %v2259_v14  ;;  %v1689_v25 = vadd.f32 %v1683_v5, %v1665_v57  ;;  %v587_v14 = vadd.f32 %v11168_v63, %v11167_v30  ;;  %v8574_v59 = vadd.f32 %v11169_v36, %v11167_v30  ;;  %v11173_v5 = vld [vmem:[#allocation25_spill] sm:$0xff]  ;;  %v11174_v36 = vld [vmem:[#allocation26_spill] sm:$0xff] }
 0x1bb   :  { %11165 = vst [vmem:[#allocation87_spill] sm:$0xff] %v8563_v46  ;;  %11166 = vst [vmem:[#allocation88_spill] sm:$0xff] %v8565_v24  ;;  %v6783_v17 = vpop.eup %6782  ;;  %v8578_v15 = vadd.f32 %v11170_v44, %v11167_v30  ;;  %v8580_v33 = vadd.f32 %v1704_v22, %v1686_v9  ;;  %v8589_v29 = vadd.f32 %v11174_v36, %v11172_v13  ;;  %v11175_v44 = vld [vmem:[#allocation27_spill] sm:$0xff] }
 0x1bc   :  { %11164 = vst [vmem:[#allocation75_spill] sm:$0xff] %v8560_v28  ;;  %v2290_v47 = vrot.slane %v6783_v17, 5  ;;  %6794 = vtanh.f32 %v8560_v28  ;;  %v6785_v1 = vpop.eup %6784  ;;  %v8582_v26 = vadd.f32 %v1707_v20, %v1689_v25  ;;  %v591_v17 = vadd.f32 %v11173_v5, %v11172_v13 }
 0x1bd   :  { %6796 = vrcp.f32 %v2241_v41  ;;  %v593_v9 = vadd.f32 %v11175_v44, %v11172_v13  ;;  %v8604_v20 = vrot.slane %v8563_v46, %v7958_v4  ;;  %v8619_v36 = vrot.slane %v8565_v24, %v7964_v2 }
 0x1be   :  { %11171 = vst [vmem:[#allocation21_spill] sm:$0xff] %v8582_v26  ;;  %v6787_v27 = vpop.eup %6786  ;;  %v2296_v57 = vmul.f32 %v8511_v31, %v2290_v47  ;;  %v2299_v10 = vmul.f32 %v6785_v1, %v2290_v47  ;;  %6798 = vpow2.f32 %v6348_v61  ;;  %v8609_v61 = vrot.slane %v8563_v46, %v7961_v55 }
 0x1bf   :  { %v6789_v63 = vpop.eup %6788  ;;  %v2291_v43 = vrot.slane %v6787_v27, 5 }
 0x1c0   :  { %v6791_v25 = vpop.eup %6790  ;;  %v8594_v22 = vrot.slane %v2296_v57, %v7958_v4  ;;  %v8597_v31 = vrot.slane %v2296_v57, %v7961_v55  ;;  %v8600_v41 = vrot.slane %v2299_v10, %v7964_v2 }
 0x1c1   :  { %v2297_v47 = vmul.f32 %v8522_v45, %v2291_v43  ;;  %v2300_v1 = vmul.f32 %v6789_v63, %v2291_v43  ;;  %v2111_v27 = vadd.f32 1.0, %v6791_v25 }
 0x1c2   :  { %11176 = vst [vmem:[#allocation22_spill] sm:$0xff] %v8594_v22  ;;  %11177 = vst [vmem:[#allocation23_spill] sm:$0xff] %v8597_v31  ;;  %v2551_v5 = vmul.f32 %v8594_v22, %v7811_v50  ;;  %v2557_v57 = vmul.f32 %v8597_v31, %v7815_v52  ;;  %v2554_v10 = vmul.f32 %v8594_v22, %v7817_v53  ;;  %v6793_v25 = vpop.eup %6792 }
 0x1c3   :  { %11178 = vst [vmem:[#allocation25_spill] sm:$0xff] %v8600_v41  ;;  %v2309_v43 = vrot.slane %v2297_v47, %v7958_v4  ;;  %v2327_v45 = vrot.slane %v2297_v47, %v7961_v55  ;;  %v2351_v63 = vrot.slane %v2300_v1, %v7964_v2  ;;  %v2560_v44 = vmul.f32 %v8597_v31, %v7819_v54 }
 0x1c4   :  { %v2563_v46 = vadd.f32 %v2557_v57, %v2551_v5  ;;  %v2569_v35 = vmul.f32 %v8600_v41, %v7809_v49  ;;  %6800 = vrcp.f32 %v2111_v27  ;;  %v2034_v22 = vmul.f32 %v8604_v20, %v8027_v6 }
 0x1c5   :  { %v2552_v24 = vmul.f32 %v2309_v43, %v7811_v50  ;;  %v2558_v56 = vmul.f32 %v2327_v45, %v7815_v52  ;;  %v2572_v47 = vmul.f32 %v8600_v41, %v7825_v58  ;;  %v2052_v1 = vmul.f32 %v8609_v61, %v7898_v21 }
 0x1c6   :  { %v6795_v31 = vpop.eup %6794  ;;  %v2575_v0 = vadd.f32 %v2569_v35, %v2563_v46  ;;  %v2566_v5 = vadd.f32 %v2560_v44, %v2554_v10  ;;  %v2555_v57 = vmul.f32 %v2309_v43, %v7817_v53  ;;  %v2561_v27 = vmul.f32 %v2327_v45, %v7819_v54 }
 0x1c7   :  { %v2292_v37 = vrot.slane %v6795_v31, 5  ;;  %v2564_v13 = vadd.f32 %v2558_v56, %v2552_v24  ;;  %v2570_v30 = vmul.f32 %v2351_v63, %v7809_v49  ;;  %v2138_v28 = vrot.slane %v6793_v25, 1  ;;  %v6797_v6 = vpop.eup %6796 }
 0x1c8   :  { %v2581_v34 = vadd.f32 %v2575_v0, %v587_v14  ;;  %v2578_v48 = vadd.f32 %v2572_v47, %v2566_v5  ;;  %v2567_v51 = vadd.f32 %v2561_v27, %v2555_v57  ;;  %v2573_v41 = vmul.f32 %v2351_v63, %v7825_v58  ;;  %v6799_v7 = vpop.eup %6798 }
 0x1c9   :  { %v2298_v21 = vmul.f32 %v8543_v40, %v2292_v37  ;;  %v2301_v35 = vmul.f32 %v6797_v6, %v2292_v37  ;;  %v2315_v46 = vmul.f32 %v2309_v43, %v7857_v38  ;;  %v2576_v10 = vadd.f32 %v2570_v30, %v2564_v13 }
 0x1ca   :  { %v6362_v44 = vmul.f32 -1.442695, %v2581_v34  ;;  %v2584_v26 = vadd.f32 %v2578_v48, %v591_v17  ;;  %v2579_v31 = vadd.f32 %v2573_v41, %v2567_v51  ;;  %v2333_v56 = vmul.f32 %v2327_v45, %v7875_v60 }
 0x1cb   :  { %v2313_v24 = vrot.slane %v2298_v21, %v7958_v4  ;;  %v2331_v0 = vrot.slane %v2298_v21, %v7961_v55  ;;  %v8646_v14 = vrot.slane %v2301_v35, %v7964_v2  ;;  %v2582_v25 = vadd.f32 %v2576_v10, %v8578_v15 }
 0x1cc   :  { %6802 = vpow2.f32 %v6362_v44  ;;  %v2585_v40 = vadd.f32 %v2579_v31, %v593_v9  ;;  %v2318_v6 = vmul.f32 %v2309_v43, %v8072_v18  ;;  %v2336_v37 = vmul.f32 %v2327_v45, %v8029_v11 }
 0x1cd   :  { %v2553_v48 = vmul.f32 %v2313_v24, %v7811_v50  ;;  %v2559_v51 = vmul.f32 %v2331_v0, %v7815_v52  ;;  %v6363_v34 = vmul.f32 -1.442695, %v2582_v25  ;;  %v2058_v30 = vadd.f32 %v2052_v1, %v2034_v22 }
 0x1ce   :  { %v8653_v13 = vpop.eup %6800  ;;  %v6365_v21 = vmul.f32 -1.442695, %v2584_v26  ;;  %v2556_v17 = vmul.f32 %v2313_v24, %v7817_v53  ;;  %v2562_v41 = vmul.f32 %v2331_v0, %v7819_v54  ;;  %v2339_v15 = vadd.f32 %v2333_v56, %v2315_v46 }
 0x1cf   :  { %v2565_v47 = vadd.f32 %v2559_v51, %v2553_v48  ;;  %v2571_v9 = vmul.f32 %v8646_v14, %v7809_v49  ;;  %6804 = vpow2.f32 %v6363_v34  ;;  %v2132_v43 = vmul.f32 %v8653_v13, %v8461_v32 }
 0x1d0   :  { %v2568_v45 = vadd.f32 %v2562_v41, %v2556_v17  ;;  %v2574_v22 = vmul.f32 %v8646_v14, %v7825_v58  ;;  %v2144_v1 = vmul.f32 %v8653_v13, %v2138_v28  ;;  %v2342_v5 = vadd.f32 %v2336_v37, %v2318_v6 }
 0x1d1   :  { %v2577_v57 = vadd.f32 %v2571_v9, %v2565_v47  ;;  %v6366_v27 = vmul.f32 -1.442695, %v2585_v40  ;;  %v2357_v35 = vmul.f32 %v2351_v63, %v7953_v16  ;;  %v2360_v46 = vmul.f32 %v2351_v63, %v8090_v62 }
 0x1d2   :  { %v2580_v10 = vadd.f32 %v2574_v22, %v2568_v45  ;;  %v2150_v44 = vrot.slane %v2144_v1, 5  ;;  %v2016_v31 = vadd.f32 %v8485_v19, %v11154_v39  ;;  %v2076_v32 = vmul.f32 %v8619_v36, %v11155_v23 }
 0x1d3   :  { %v2583_v56 = vadd.f32 %v2577_v57, %v8574_v59  ;;  %6806 = vpow2.f32 %v6365_v21  ;;  %v8671_v25 = vadd.f32 %v2357_v35, %v2339_v15  ;;  %v8673_v28 = vadd.f32 %v2360_v46, %v2342_v5  ;;  %v11179_v59 = vld [vmem:[#allocation16_spill] sm:$0xff]  ;;  %v11180_v5 = vld [vmem:[#allocation21_spill] sm:$0xff] }
 0x1d4   :  { %6808 = vtanh.f32 %v2584_v26  ;;  %v2586_v6 = vadd.f32 %v2580_v10, %v8589_v29  ;;  %v8676_v37 = vadd.f32 %v2150_v44, %v2132_v43  ;;  %v2082_v63 = vadd.f32 %v2076_v32, %v2058_v30  ;;  %v11181_v10 = vld [vmem:[#allocation71_spill] sm:$0xff]  ;;  %v11182_v32 = vld [vmem:[#allocation77_spill] sm:$0xff] }
 0x1d5   :  { %v6364_v48 = vmul.f32 -1.442695, %v2583_v56  ;;  %6810 = vpow2.f32 %v6366_v27  ;;  %v2316_v19 = vmul.f32 %v2313_v24, %v7857_v38  ;;  %v2319_v17 = vmul.f32 %v2313_v24, %v8072_v18 }
 0x1d6   :  { %v6803_v51 = vpop.eup %6802  ;;  %v2088_v34 = vadd.f32 %v2082_v63, %v2016_v31  ;;  %v1644_v21 = vadd.f32 %v11179_v59, %v11154_v39  ;;  %v1647_v41 = vadd.f32 %v8483_v8, %v11159_v42  ;;  %v2114_v29 = vadd.f32 1.0, %v6799_v7 }
 0x1d7   :  { %v2605_v26 = vadd.f32 1.0, %v6803_v51  ;;  %6812 = vpow2.f32 %v6364_v48  ;;  %v2334_v15 = vmul.f32 %v2331_v0, %v7875_v60  ;;  %v2037_v30 = vmul.f32 %v8604_v20, %v8078_v3 }
 0x1d8   :  { %6814 = vtanh.f32 %v2585_v40  ;;  %v2055_v47 = vmul.f32 %v8609_v61, %v11126_v12  ;;  %v2337_v24 = vmul.f32 %v2331_v0, %v8029_v11  ;;  %v6346_v43 = vmul.f32 -1.442695, %v2088_v34 }
 0x1d9   :  { %v6805_v9 = vpop.eup %6804  ;;  %6816 = vrcp.f32 %v2605_v26  ;;  %v2340_v45 = vadd.f32 %v2334_v15, %v2316_v19  ;;  %v2358_v8 = vmul.f32 %v8646_v14, %v7953_v16  ;;  %v2361_v40 = vmul.f32 %v8646_v14, %v8090_v62 }
 0x1da   :  { %v2606_v22 = vadd.f32 1.0, %v6805_v9  ;;  %6818 = vtanh.f32 %v8676_v37  ;;  %v2343_v7 = vadd.f32 %v2337_v24, %v2319_v17  ;;  %v1716_v61 = vadd.f32 %v8580_v33, %v1644_v21 }
 0x1db   :  { %6820 = vrcp.f32 %v2114_v29  ;;  %v8695_v20 = vadd.f32 %v2358_v8, %v2340_v45  ;;  %v2061_v0 = vadd.f32 %v2055_v47, %v2037_v30  ;;  %v8701_v57 = vadd.f32 %v11180_v5, %v1647_v41 }
 0x1dc   :  { %6822 = vrcp.f32 %v2606_v22  ;;  %v8698_v1 = vadd.f32 %v2361_v40, %v2343_v7  ;;  %v6332_v35 = vmul.f32 -1.442695, %v1716_v61  ;;  %v2079_v44 = vmul.f32 %v8619_v36, %v11181_v10  ;;  %v11183_v36 = vld [vmem:[#allocation74_spill] sm:$0xff] }
 0x1dd   :  { %v6807_v27 = vpop.eup %6806  ;;  %6824 = vpow2.f32 %v6346_v43  ;;  %v6367_v31 = vmul.f32 -1.442695, %v2586_v6  ;;  %v2019_v33 = vadd.f32 %v11182_v32, %v11159_v42  ;;  %v11184_v43 = vld [vmem:[#allocation84_spill] sm:$0xff]  ;;  %v11187_v32 = vld [vmem:[#allocation57_spill] sm:$0xff] }
 0x1de   :  { %v6809_v46 = vpop.eup %6808  ;;  %6826 = vtanh.f32 %v2586_v6  ;;  %v2085_v56 = vadd.f32 %v2079_v44, %v2061_v0  ;;  %v2608_v48 = vadd.f32 1.0, %v6807_v27 }
 0x1df   :  { %v6811_v14 = vpop.eup %6810  ;;  %6828 = vpow2.f32 %v6332_v35  ;;  %v2632_v34 = vrot.slane %v6809_v46, 1 }
 0x1e0   :  { %v2609_v17 = vadd.f32 1.0, %v6811_v14  ;;  %6830 = vpow2.f32 %v6367_v31  ;;  %v2091_v26 = vadd.f32 %v2085_v56, %v2019_v33  ;;  %v8724_v14 = vpop.f32.mrb[33].mxu1 }
 0x1e1   :  { %v6813_v63 = vpop.eup %6812  ;;  %11185 = vst [vmem:[#allocation26_spill] sm:$0xff] %v8724_v14  ;;  %v11209_v14 = vld [vmem:[#allocation36_spill] sm:$0xff] }
 0x1e2   :  { %v6815_v19 = vpop.eup %6814  ;;  %v2607_v51 = vadd.f32 1.0, %v6813_v63  ;;  %v6349_v44 = vmul.f32 -1.442695, %v2091_v26  ;;  %v11188_v63 = vld [vmem:[#allocation29_spill] sm:$0xff] }
 0x1e3   :  { %v8707_v59 = vpop.eup %6816  ;;  %v2633_v15 = vrot.slane %v6815_v19, 1  ;;  %v8731_v19 = vpop.f32.mrb[34].mxu0 }
 0x1e4   :  { %v6819_v21 = vpop.eup %6818  ;;  %6832 = vrcp.f32 %v2607_v51  ;;  %v2626_v41 = vmul.f32 %v8707_v59, %v11183_v36  ;;  %v2638_v6 = vmul.f32 %v8707_v59, %v2632_v34  ;;  %11189 = vst [vmem:[#allocation16_spill] sm:$0xff] %v8731_v19  ;;  %v8733_v51 = vpop.f32.mrb[34].mxu1 }
 0x1e5   :  { %v6821_v29 = vpop.eup %6820  ;;  %6834 = vrcp.f32 %v2608_v48  ;;  %v2165_v30 = vrot.slane %v6819_v21, 5  ;;  %11190 = vst [vmem:[#allocation21_spill] sm:$0xff] %v8733_v51  ;;  %v8738_v36 = vpop.f32.mrb[35].mxu0 }
 0x1e6   :  { %v8712_v47 = vpop.eup %6822  ;;  %v2644_v24 = vrot.slane %v2638_v6, 5  ;;  %6836 = vrcp.f32 %v2609_v17  ;;  %v2369_v17 = vadd.f32 %v8671_v25, %v11154_v39  ;;  %11191 = vst [vmem:[#allocation77_spill] sm:$0xff] %v8738_v36 }
 0x1e7   :  { %v6825_v9 = vpop.eup %6824  ;;  %v2627_v45 = vmul.f32 %v8712_v47, %v11184_v43  ;;  %v2639_v8 = vmul.f32 %v8712_v47, %v2633_v15  ;;  %v2171_v22 = vmul.f32 %v8653_v13, %v2165_v30  ;;  %v2174_v7 = vmul.f32 %v6821_v29, %v2165_v30 }
 0x1e8   :  { %v8718_v40 = vadd.f32 %v2644_v24, %v2626_v41  ;;  %v2112_v61 = vadd.f32 1.0, %v6825_v9  ;;  %6838 = vtanh.f32 %v2091_v26  ;;  %v6827_v0 = vpop.eup %6826  ;;  %v8740_v41 = vpop.f32.mrb[35].mxu1  ;;  %v2372_v24 = vadd.f32 %v8673_v28, %v11159_v42  ;;  %v11195_v28 = vld [vmem:[#allocation24_spill] sm:$0xff] }
 0x1e9   :  { %v2645_v5 = vrot.slane %v2639_v8, 5  ;;  %v2381_v27 = vrot.slane %v2171_v22, %v7958_v4  ;;  %v2399_v35 = vrot.slane %v2171_v22, %v7961_v55  ;;  %v2423_v46 = vrot.slane %v2174_v7, %v7964_v2  ;;  %2177 = vst [vmem:[#allocation2 + $0x8] sm:$0xc0] %v2171_v22  ;;  %2180 = vst [vmem:[#allocation2 + $0x20] sm:$0x1] %v2174_v7  ;;  %v6829_v13 = vpop.eup %6828 }
 0x1ea   :  { %6840 = vtanh.f32 %v8718_v40  ;;  %v2634_v34 = vrot.slane %v6827_v0, 1  ;;  %11192 = vst [vmem:[#allocation74_spill] sm:$0xff] %v8740_v41  ;;  %v6831_v6 = vpop.eup %6830  ;;  %v1740_v15 = vadd.f32 1.0, %v6829_v13  ;;  %v11198_v41 = vld [vmem:[#allocation28_spill] sm:$0xff] }
 0x1eb   :  { %v8726_v31 = vadd.f32 %v2645_v5, %v2627_v45  ;;  %v2387_v33 = vmul.f32 %v2381_v27, %v11187_v32  ;;  %v2390_v56 = vmul.f32 %v2381_v27, %v8078_v3  ;;  %v2405_v48 = vmul.f32 %v2399_v35, %v11188_v63  ;;  %v11193_v45 = vld [vmem:[#allocation75_spill] sm:$0xff] }
 0x1ec   :  { %v2408_v21 = vmul.f32 %v2399_v35, %v11126_v12  ;;  %6842 = vrcp.f32 %v2112_v61  ;;  %v2429_v29 = vmul.f32 %v2423_v46, %v11155_v23  ;;  %v2432_v9 = vmul.f32 %v2423_v46, %v11181_v10 }
 0x1ed   :  { %11186 = vst [vmem:[#allocation27_spill] sm:$0xff] %v8726_v31  ;;  %6844 = vtanh.f32 %v8726_v31  ;;  %v2411_v26 = vadd.f32 %v2405_v48, %v2387_v33  ;;  %v11194_v33 = vld [vmem:[#allocation9_spill] sm:$0xff]  ;;  %v2610_v46 = vadd.f32 1.0, %v6831_v6  ;;  %v11202_v6 = vld [vmem:[#allocation32_spill] sm:$0xff] }
 0x1ee   :  { %v8744_v30 = vpop.eup %6832  ;;  %v2414_v25 = vadd.f32 %v2408_v21, %v2390_v56  ;;  %6846 = vpow2.f32 %v6349_v44  ;;  %v8754_v56 = vadd.f32 %v11195_v28, %v11194_v33 }
 0x1ef   :  { %v6835_v43 = vpop.eup %6834  ;;  %v2628_v8 = vmul.f32 %v8744_v30, %v11193_v45  ;;  %v2640_v22 = vmul.f32 %v8744_v30, %v2634_v34  ;;  %v2435_v7 = vadd.f32 %v2429_v29, %v2411_v26  ;;  %6848 = vrcp.f32 %v1740_v15  ;;  %v11197_v45 = vld [vmem:[#allocation12_spill] sm:$0xff]  ;;  %v11199_v26 = vld [vmem:[#allocation30_spill] sm:$0xff] }
 0x1f0   :  { %v6837_v61 = vpop.eup %6836  ;;  %v2438_v0 = vadd.f32 %v2432_v9, %v2414_v25  ;;  %v8760_v34 = vadd.f32 %v11198_v41, %v11197_v45  ;;  %v8764_v29 = vadd.f32 %v11199_v26, %v11194_v33  ;;  %v8774_v9 = vadd.f32 %v11202_v6, %v11194_v33  ;;  %v11203_v41 = vld [vmem:[#allocation33_spill] sm:$0xff]  ;;  %v11208_v6 = vld [vmem:[#allocation78_spill] sm:$0xff] }
 0x1f1   :  { %v2646_v5 = vrot.slane %v2640_v22, 5  ;;  %v2441_v27 = vadd.f32 %v2435_v7, %v2369_v17  ;;  %v11200_v17 = vld [vmem:[#allocation31_spill] sm:$0xff]  ;;  %v11205_v7 = vld [vmem:[#allocation34_spill] sm:$0xff] }
 0x1f2   :  { %v6839_v35 = vpop.eup %6838  ;;  %v2444_v13 = vadd.f32 %v2438_v0, %v2372_v24  ;;  %v8768_v15 = vadd.f32 %v11200_v17, %v11194_v33  ;;  %v6335_v24 = vmul.f32 -1.442695, %v8701_v57  ;;  %v8784_v0 = vadd.f32 %v11205_v7, %v11197_v45 }
 0x1f3   :  { %v8756_v44 = vadd.f32 %v2646_v5, %v2628_v8  ;;  %v6357_v48 = vmul.f32 -1.442695, %v2441_v27  ;;  %v8778_v8 = vadd.f32 %v11203_v41, %v11194_v33  ;;  %v11206_v5 = vld [vmem:[#allocation35_spill] sm:$0xff]  ;;  %v2139_v28 = vrot.slane %v6839_v35, 1 }
 0x1f4   :  { %v6841_v21 = vpop.eup %6840  ;;  %11201 = vst [vmem:[#allocation75_spill] sm:$0xff] %v8768_v15  ;;  %v8788_v27 = vadd.f32 %v11206_v5, %v11197_v45  ;;  %v8795_v7 = vadd.f32 %v11209_v14, %v11197_v45 }
 0x1f5   :  { %11196 = vst [vmem:[#allocation84_spill] sm:$0xff] %v8756_v44  ;;  %v2659_v25 = vrot.slane %v6841_v21, 5  ;;  %6850 = vtanh.f32 %v8756_v44  ;;  %11204 = vst [vmem:[#allocation24_spill] sm:$0xff] %v8778_v8 }
 0x1f6   :  { %v8780_v22 = vpop.eup %6842  ;;  %11207 = vst [vmem:[#allocation28_spill] sm:$0xff] %v8788_v27  ;;  %6852 = vpow2.f32 %v6357_v48 }
 0x1f7   :  { %v6845_v21 = vpop.eup %6844  ;;  %6854 = vrcp.f32 %v2610_v46  ;;  %v2665_v26 = vmul.f32 %v8707_v59, %v2659_v25  ;;  %v2668_v17 = vmul.f32 %v6835_v43, %v2659_v25  ;;  %v2133_v41 = vmul.f32 %v8780_v22, %v11208_v6  ;;  %v11213_v25 = vld [vmem:[#allocation17_spill] sm:$0xff] }
 0x1f8   :  { %v6847_v36 = vpop.eup %6846  ;;  %v2660_v51 = vrot.slane %v6845_v21, 5  ;;  %v2145_v19 = vmul.f32 %v8780_v22, %v2139_v28  ;;  %6856 = vpow2.f32 %v6335_v24 }
 0x1f9   :  { %v8798_v5 = vpop.eup %6848  ;;  %v8801_v35 = vrot.slane %v2665_v26, %v7958_v4  ;;  %v8804_v59 = vrot.slane %v2665_v26, %v7961_v55  ;;  %v8807_v43 = vrot.slane %v2668_v17, %v7964_v2  ;;  %6858 = vtanh.f32 %v8701_v57 }
 0x1fa   :  { %v2666_v46 = vmul.f32 %v8712_v47, %v2660_v51  ;;  %v2669_v14 = vmul.f32 %v6837_v61, %v2660_v51  ;;  %v2151_v48 = vrot.slane %v2145_v19, 5  ;;  %v8813_v24 = vmul.f32 %v8798_v5, %v11213_v25 }
 0x1fb   :  { %11210 = vst [vmem:[#allocation30_spill] sm:$0xff] %v8801_v35  ;;  %11211 = vst [vmem:[#allocation31_spill] sm:$0xff] %v8804_v59  ;;  %v2921_v28 = vmul.f32 %v8801_v35, %v7811_v50  ;;  %v2924_v21 = vmul.f32 %v8801_v35, %v7817_v53  ;;  %v2927_v26 = vmul.f32 %v8804_v59, %v7815_v52  ;;  %v2115_v17 = vadd.f32 1.0, %v6847_v36 }
 0x1fc   :  { %11212 = vst [vmem:[#allocation32_spill] sm:$0xff] %v8807_v43  ;;  %v2930_v57 = vmul.f32 %v8804_v59, %v7819_v54  ;;  %v2939_v47 = vmul.f32 %v8807_v43, %v7809_v49  ;;  %v8826_v19 = vrot.slane %v2666_v46, %v7958_v4  ;;  %6860 = vtanh.f32 %v2444_v13 }
 0x1fd   :  { %v2933_v51 = vadd.f32 %v2927_v26, %v2921_v28  ;;  %v2696_v61 = vrot.slane %v2666_v46, %v7961_v55  ;;  %v8830_v6 = vrot.slane %v2669_v14, %v7964_v2  ;;  %v8832_v25 = vadd.f32 %v2151_v48, %v2133_v41 }
 0x1fe   :  { %v2936_v35 = vadd.f32 %v2930_v57, %v2924_v21  ;;  %v2942_v36 = vmul.f32 %v8807_v43, %v7825_v58  ;;  %v2922_v59 = vmul.f32 %v8826_v19, %v7811_v50  ;;  %v2925_v8 = vmul.f32 %v8826_v19, %v7817_v53 }
 0x1ff   :  { %v6851_v27 = vpop.eup %6850  ;;  %v2945_v15 = vadd.f32 %v2939_v47, %v2933_v51  ;;  %v2928_v28 = vmul.f32 %v2696_v61, %v7815_v52  ;;  %v6360_v46 = vmul.f32 -1.442695, %v2444_v13  ;;  %6862 = vrcp.f32 %v2115_v17 }
 0x200   :  { %v6853_v14 = vpop.eup %6852  ;;  %v2661_v26 = vrot.slane %v6851_v27, 5  ;;  %v2948_v41 = vadd.f32 %v2942_v36, %v2936_v35  ;;  %v2684_v48 = vmul.f32 %v8826_v19, %v7857_v38  ;;  %v2931_v21 = vmul.f32 %v2696_v61, %v7819_v54 }
 0x201   :  { %v6855_v57 = vpop.eup %6854  ;;  %v2951_v43 = vadd.f32 %v2945_v15, %v8754_v56  ;;  %v2934_v44 = vadd.f32 %v2928_v28, %v2922_v59  ;;  %v2940_v10 = vmul.f32 %v8830_v6, %v7809_v49  ;;  %v2465_v47 = vadd.f32 1.0, %v6853_v14 }
 0x202   :  { %v6857_v51 = vpop.eup %6856  ;;  %v2954_v13 = vadd.f32 %v2948_v41, %v8760_v34  ;;  %v2667_v17 = vmul.f32 %v8744_v30, %v2661_v26  ;;  %v2670_v27 = vmul.f32 %v6855_v57, %v2661_v26  ;;  %v2937_v35 = vadd.f32 %v2931_v21, %v2925_v8 }
 0x203   :  { %v8849_v36 = vpop.eup %6858  ;;  %v6374_v31 = vmul.f32 -1.442695, %v2951_v43  ;;  %v2946_v23 = vadd.f32 %v2940_v10, %v2934_v44  ;;  %v2943_v12 = vmul.f32 %v8830_v6, %v7825_v58  ;;  %6864 = vrcp.f32 %v2465_v47  ;;  %v11214_v43 = vld [vmem:[#allocation14_spill] sm:$0xff] }
 0x204   :  { %v6377_v56 = vmul.f32 -1.442695, %v2954_v13  ;;  %v2702_v15 = vmul.f32 %v2696_v61, %v7875_v60  ;;  %v2682_v59 = vrot.slane %v2667_v17, %v7958_v4  ;;  %v2700_v28 = vrot.slane %v2667_v17, %v7961_v55 }
 0x205   :  { %6866 = vpow2.f32 %v6374_v31  ;;  %v2952_v30 = vadd.f32 %v2946_v23, %v8764_v29  ;;  %v2724_v34 = vrot.slane %v2670_v27, %v7964_v2  ;;  %v2949_v8 = vadd.f32 %v2943_v12, %v2937_v35 }
 0x206   :  { %v6861_v14 = vpop.eup %6860  ;;  %v2923_v10 = vmul.f32 %v2682_v59, %v7811_v50  ;;  %6868 = vpow2.f32 %v6360_v46  ;;  %v1743_v44 = vadd.f32 1.0, %v6857_v51  ;;  %v8861_v26 = vmul.f32 %v11214_v43, %v7857_v38 }
 0x207   :  { %6870 = vtanh.f32 %v2954_v13  ;;  %v6375_v41 = vmul.f32 -1.442695, %v2952_v30  ;;  %v2929_v21 = vmul.f32 %v2700_v28, %v7815_v52  ;;  %v2955_v31 = vadd.f32 %v2949_v8, %v8784_v0 }
 0x208   :  { %6872 = vpow2.f32 %v6377_v56  ;;  %v2708_v23 = vadd.f32 %v2702_v15, %v2684_v48  ;;  %v2926_v29 = vmul.f32 %v2682_v59, %v7817_v53  ;;  %v2932_v12 = vmul.f32 %v2700_v28, %v7819_v54 }
 0x209   :  { %v8867_v57 = vpop.eup %6862  ;;  %6874 = vpow2.f32 %v6375_v41  ;;  %v2685_v46 = vmul.f32 %v2682_v59, %v7857_v38  ;;  %v2935_v47 = vadd.f32 %v2929_v21, %v2923_v10  ;;  %v2941_v51 = vmul.f32 %v2724_v34, %v7809_v49 }
 0x20a   :  { %v2938_v13 = vadd.f32 %v2932_v12, %v2926_v29  ;;  %v2944_v17 = vmul.f32 %v2724_v34, %v7825_v58  ;;  %v2687_v0 = vmul.f32 %v8826_v19, %v8072_v18  ;;  %v2705_v48 = vmul.f32 %v2696_v61, %v8029_v11 }
 0x20b   :  { %v2703_v27 = vmul.f32 %v2700_v28, %v7875_v60  ;;  %v2947_v35 = vadd.f32 %v2941_v51, %v2935_v47  ;;  %v2492_v56 = vrot.slane %v6861_v14, 1  ;;  %v2726_v15 = vmul.f32 %v8830_v6, %v7953_v16 }
 0x20c   :  { %v2950_v30 = vadd.f32 %v2944_v17, %v2938_v13  ;;  %v2711_v8 = vadd.f32 %v2705_v48, %v2687_v0  ;;  %v2729_v10 = vmul.f32 %v8830_v6, %v8090_v62  ;;  %v2688_v41 = vmul.f32 %v2682_v59, %v8072_v18 }
 0x20d   :  { %v8881_v21 = vpop.eup %6864  ;;  %v2953_v19 = vadd.f32 %v2947_v35, %v8774_v9  ;;  %v8884_v29 = vadd.f32 %v2726_v15, %v2708_v23  ;;  %6876 = vtanh.f32 %v8832_v25  ;;  %v2706_v61 = vmul.f32 %v2700_v28, %v8029_v11 }
 0x20e   :  { %v2956_v14 = vadd.f32 %v2950_v30, %v8795_v7  ;;  %v2486_v12 = vmul.f32 %v8881_v21, %v8676_v37  ;;  %v2498_v47 = vmul.f32 %v8881_v21, %v2492_v56  ;;  %v8892_v6 = vadd.f32 %v2729_v10, %v2711_v8  ;;  %v11215_v56 = vld [vmem:[#allocation15_spill] sm:$0xff] }
 0x20f   :  { %v6867_v59 = vpop.eup %6866  ;;  %v2709_v51 = vadd.f32 %v2703_v27, %v2685_v46  ;;  %v6376_v13 = vmul.f32 -1.442695, %v2953_v19  ;;  %v6378_v17 = vmul.f32 -1.442695, %v2955_v31  ;;  %v1767_v9 = vrot.slane %v8849_v36, 1 }
 0x210   :  { %v6869_v23 = vpop.eup %6868  ;;  %v2975_v0 = vadd.f32 1.0, %v6867_v59  ;;  %6878 = vtanh.f32 %v2955_v31  ;;  %v2504_v48 = vrot.slane %v2498_v47, 5  ;;  %v2712_v28 = vadd.f32 %v2706_v61, %v2688_v41 }
 0x211   :  { %v6871_v35 = vpop.eup %6870  ;;  %6880 = vpow2.f32 %v6376_v13  ;;  %v2727_v7 = vmul.f32 %v2724_v34, %v7953_v16  ;;  %v1963_v37 = vmul.f32 %v11214_v43, %v8072_v18  ;;  %v1978_v15 = vmul.f32 %v11215_v56, %v7875_v60 }
 0x212   :  { %v6873_v46 = vpop.eup %6872  ;;  %6882 = vrcp.f32 %v2975_v0  ;;  %v8900_v27 = vadd.f32 %v2504_v48, %v2486_v12  ;;  %v2730_v36 = vmul.f32 %v2724_v34, %v8090_v62  ;;  %v1773_v31 = vmul.f32 %v8798_v5, %v1767_v9  ;;  %v11218_v12 = vld [vmem:[#allocation37_spill] sm:$0xff]  ;;  %v11219_v34 = vld [vmem:[#allocation39_spill] sm:$0xff]  ;;  %v11221_v48 = vld [vmem:[#allocation76_spill] sm:$0xff] }
 0x213   :  { %v6875_v30 = vpop.eup %6874  ;;  %v2468_v8 = vadd.f32 1.0, %v6869_v23  ;;  %v8904_v10 = vadd.f32 %v2727_v7, %v2709_v51  ;;  %6884 = vrcp.f32 %v1743_v44  ;;  %v1981_v41 = vmul.f32 %v11215_v56, %v8029_v11  ;;  %v11222_v7 = vld [vmem:[#allocation73_spill] sm:$0xff]  ;;  %v11223_v56 = vld [vmem:[#allocation83_spill] sm:$0xff] }
 0x214   :  { %v2976_v43 = vadd.f32 1.0, %v6875_v30  ;;  %6886 = vpow2.f32 %v6378_v17  ;;  %v8908_v19 = vadd.f32 %v2730_v36, %v2712_v28  ;;  %v1779_v61 = vrot.slane %v1773_v31, 5 }
 0x215   :  { %11216 = vst [vmem:[#allocation33_spill] sm:$0xff] %v8904_v10  ;;  %v8912_v47 = vadd.f32 %v11218_v12, %v11197_v45  ;;  %v8916_v59 = vadd.f32 %v11219_v34, %v11194_v33  ;;  %6888 = vtanh.f32 %v8900_v27  ;;  %v8921_v44 = vadd.f32 %v8695_v20, %v11154_v39 }
 0x216   :  { %11217 = vst [vmem:[#allocation34_spill] sm:$0xff] %v8908_v19  ;;  %6890 = vrcp.f32 %v2976_v43  ;;  %v8925_v51 = vadd.f32 %v8698_v1, %v11159_v42  ;;  %v8928_v13 = vadd.f32 %v1779_v61, %v8813_v24  ;;  %v8931_v17 = vadd.f32 %v1978_v15, %v8861_v26  ;;  %v11224_v24 = vld [vmem:[#allocation81_spill] sm:$0xff]  ;;  %v11225_v15 = vld [vmem:[#allocation82_spill] sm:$0xff] }
 0x217   :  { %v6877_v9 = vpop.eup %6876  ;;  %v3002_v23 = vrot.slane %v6871_v35, 1  ;;  %6892 = vrcp.f32 %v2468_v8  ;;  %v8933_v0 = vadd.f32 %v1981_v41, %v1963_v37  ;;  %v8937_v20 = vmul.f32 %v11221_v48, %v7953_v16  ;;  %v11226_v41 = vld [vmem:[#allocation85_spill] sm:$0xff] }
 0x218   :  { %11220 = vst [vmem:[#allocation35_spill] sm:$0xff] %v8928_v13  ;;  %6894 = vtanh.f32 %v2956_v14  ;;  %v2166_v28 = vrot.slane %v6877_v9, 5  ;;  %v1449_v1 = vrot.slane %v11222_v7, 6  ;;  %v1450_v36 = vrot.slane %v11223_v56, 6  ;;  %v11227_v7 = vld [vmem:[#allocation86_spill] sm:$0xff] }
 0x219   :  { %6896 = vtanh.f32 %v8928_v13  ;;  %v1446_v26 = vrot.slane %v11224_v24, 6  ;;  %v1447_v35 = vrot.slane %v11225_v15, 6  ;;  %v1443_v43 = vrot.slane %v11226_v41, 6 }
 0x21a   :  { %v6879_v31 = vpop.eup %6878  ;;  %v2172_v37 = vmul.f32 %v8780_v22, %v2166_v28  ;;  %v2175_v30 = vmul.f32 %v8867_v57, %v2166_v28  ;;  %v1451_v8 = vsel %vm1442_vm3, %v1449_v1, %v1450_v36  ;;  %v2978_v12 = vadd.f32 1.0, %v6873_v46 }
 0x21b   :  { %v6881_v61 = vpop.eup %6880  ;;  %v6379_v34 = vmul.f32 -1.442695, %v2956_v14  ;;  %1457 = vst [vmem:[#allocation2 + $0x10] sm:$0x7] %v1451_v8  ;;  %v1448_v9 = vsel %vm1442_vm3, %v1446_v26, %v1447_v35  ;;  %v1444_v56 = vrot.slane %v11227_v7, 6  ;;  %v8962_v1 = vadd.f32 %v8884_v29, %v11154_v39  ;;  %v11229_v7 = vld [vmem:[#allocation38_spill] sm:$0xff] }
 0x21c   :  { %v8950_v24 = vpop.eup %6882  ;;  %v2977_v15 = vadd.f32 1.0, %v6881_v61  ;;  %v2385_v13 = vrot.slane %v2172_v37, %v7958_v4  ;;  %v2403_v22 = vrot.slane %v2172_v37, %v7961_v55  ;;  %v2427_v57 = vrot.slane %v2175_v30, %v7964_v2  ;;  %2178 = vst [vmem:[#allocation2 + $0x10] sm:$0xc0] %v2172_v37  ;;  %2181 = vst [vmem:[#allocation2 + $0x28] sm:$0x1] %v2175_v30 }
 0x21d   :  { %1456 = vst [vmem:[#allocation2 + $0x8] sm:$0x7] %v1448_v9  ;;  %v8955_v28 = vpop.eup %6884  ;;  %v2996_v14 = vmul.f32 %v8950_v24, %v8718_v40  ;;  %v3008_v46 = vmul.f32 %v8950_v24, %v3002_v23  ;;  %v1445_v36 = vsel %vm1442_vm3, %v1443_v43, %v1444_v56  ;;  %v3003_v41 = vrot.slane %v6879_v31, 1  ;;  %v11228_v23 = vld [vmem:[#allocation70_spill] sm:$0xff] }
 0x21e   :  { %v6887_v26 = vpop.eup %6886  ;;  %6898 = vrcp.f32 %v2977_v15  ;;  %v2388_v35 = vmul.f32 %v2385_v13, %v11187_v32  ;;  %v2391_v37 = vmul.f32 %v2385_v13, %v8078_v3  ;;  %v2406_v30 = vmul.f32 %v2403_v22, %v11188_v63  ;;  %1455 = vst [vmem:[#allocation2] sm:$0x7] %v1445_v36  ;;  %v11230_v13 = vld [vmem:[#allocation27_spill] sm:$0xff] }
 0x21f   :  { %v6889_v8 = vpop.eup %6888  ;;  %6900 = vrcp.f32 %v2978_v12  ;;  %v3014_v40 = vrot.slane %v3008_v46, 5  ;;  %v2409_v61 = vmul.f32 %v2403_v22, %v11228_v23  ;;  %v2430_v56 = vmul.f32 %v2427_v57, %v11229_v7  ;;  %v11231_v12 = vld [vmem:[#allocation71_spill] sm:$0xff] }
 0x220   :  { %v8969_v9 = vpop.eup %6890  ;;  %6902 = vpow2.f32 %v6379_v34  ;;  %v2519_v29 = vrot.slane %v6889_v8, 5  ;;  %v2412_v43 = vadd.f32 %v2406_v30, %v2388_v35  ;;  %v2433_v46 = vmul.f32 %v2427_v57, %v11231_v12 }
 0x221   :  { %v6893_v15 = vpop.eup %6892  ;;  %v8972_v33 = vadd.f32 %v3014_v40, %v2996_v14  ;;  %v2997_v19 = vmul.f32 %v8969_v9, %v11230_v13  ;;  %v3009_v36 = vmul.f32 %v8969_v9, %v3003_v41  ;;  %v2415_v34 = vadd.f32 %v2409_v61, %v2391_v37 }
 0x222   :  { %v6895_v31 = vpop.eup %6894  ;;  %v8979_v22 = vmul.f32 %v8881_v21, %v2519_v29  ;;  %v8981_v10 = vmul.f32 %v6893_v15, %v2519_v29  ;;  %v2436_v35 = vadd.f32 %v2430_v56, %v2412_v43  ;;  %v2979_v14 = vadd.f32 1.0, %v6887_v26 }
 0x223   :  { %v6897_v30 = vpop.eup %6896  ;;  %6904 = vtanh.f32 %v8972_v33  ;;  %v3015_v8 = vrot.slane %v3009_v36, 5  ;;  %v2741_v40 = vadd.f32 %v8892_v6, %v11159_v42  ;;  %v2439_v29 = vadd.f32 %v2433_v46, %v2415_v34 }
 0x224   :  { %11232 = vst [vmem:[#allocation78_spill] sm:$0xff] %v8979_v22  ;;  %11233 = vst [vmem:[#allocation36_spill] sm:$0xff] %v8981_v10  ;;  %v2750_v41 = vrot.slane %v8979_v22, %v7958_v4  ;;  %v2768_v57 = vrot.slane %v8979_v22, %v7961_v55  ;;  %v2792_v21 = vrot.slane %v8981_v10, %v7964_v2  ;;  %v3004_v61 = vrot.slane %v6895_v31, 1 }
 0x225   :  { %v8992_v37 = vadd.f32 %v3015_v8, %v2997_v19  ;;  %v2442_v43 = vadd.f32 %v2436_v35, %v8921_v44  ;;  %v1794_v26 = vrot.slane %v6897_v30, 5  ;;  %v9003_v19 = vadd.f32 %v2439_v29, %v8925_v51 }
 0x226   :  { %v2756_v56 = vmul.f32 %v2750_v41, %v11187_v32  ;;  %v2759_v6 = vmul.f32 %v2750_v41, %v8078_v3  ;;  %v2774_v15 = vmul.f32 %v2768_v57, %v11188_v63  ;;  %v2777_v13 = vmul.f32 %v2768_v57, %v11228_v23  ;;  %v11234_v41 = vld [vmem:[#allocation84_spill] sm:$0xff] }
 0x227   :  { %6906 = vtanh.f32 %v8992_v37  ;;  %v2798_v36 = vmul.f32 %v2792_v21, %v11229_v7  ;;  %v2801_v46 = vmul.f32 %v2792_v21, %v11231_v12  ;;  %v6358_v35 = vmul.f32 -1.442695, %v2442_v43 }
 0x228   :  { %v9005_v31 = vpop.eup %6898  ;;  %v2780_v44 = vadd.f32 %v2774_v15, %v2756_v56  ;;  %v2783_v34 = vadd.f32 %v2777_v13, %v2759_v6  ;;  %v9008_v30 = vmul.f32 %v8798_v5, %v1794_v26  ;;  %v2005_v21 = vmul.f32 %v11221_v48, %v8090_v62 }
 0x229   :  { %v6901_v8 = vpop.eup %6900  ;;  %v2998_v57 = vmul.f32 %v9005_v31, %v11234_v41  ;;  %v3010_v10 = vmul.f32 %v9005_v31, %v3004_v61  ;;  %v2008_v51 = vadd.f32 %v8937_v20, %v8931_v17  ;;  %6908 = vpow2.f32 %v6358_v35 }
 0x22a   :  { %v6903_v29 = vpop.eup %6902  ;;  %v2804_v22 = vadd.f32 %v2798_v36, %v2780_v44  ;;  %v2807_v56 = vadd.f32 %v2801_v46, %v2783_v34  ;;  %v9018_v43 = vmul.f32 %v8955_v28, %v1794_v26  ;;  %6910 = vrcp.f32 %v2979_v14  ;;  %v11236_v46 = vld [vmem:[#allocation43_spill] sm:$0xff] }
 0x22b   :  { %v3016_v5 = vrot.slane %v3010_v10, 5  ;;  %v2023_v6 = vrot.slane %v9008_v30, %v7958_v4  ;;  %v2041_v61 = vrot.slane %v9008_v30, %v7961_v55  ;;  %v2011_v17 = vadd.f32 %v2005_v21, %v8933_v0 }
 0x22c   :  { %v2810_v48 = vadd.f32 %v2804_v22, %v8962_v1  ;;  %v2813_v15 = vadd.f32 %v2807_v56, %v2741_v40  ;;  %v2065_v20 = vrot.slane %v9018_v43, %v7964_v2  ;;  %v9035_v44 = vadd.f32 %v11236_v46, %v11197_v45 }
 0x22d   :  { %v6905_v13 = vpop.eup %6904  ;;  %v9028_v36 = vadd.f32 %v3016_v5, %v2998_v57  ;;  %v2032_v28 = vmul.f32 %v2023_v6, %v11187_v32  ;;  %v2035_v10 = vmul.f32 %v2023_v6, %v8078_v3  ;;  %v2050_v14 = vmul.f32 %v2041_v61, %v11188_v63 }
 0x22e   :  { %v3029_v26 = vrot.slane %v6905_v13, 5  ;;  %v6369_v1 = vmul.f32 -1.442695, %v2810_v48  ;;  %v2014_v0 = vadd.f32 %v2008_v51, %v11154_v39  ;;  %v2053_v22 = vmul.f32 %v2041_v61, %v11228_v23 }
 0x22f   :  { %11235 = vst [vmem:[#allocation17_spill] sm:$0xff] %v9028_v36  ;;  %6912 = vtanh.f32 %v9028_v36  ;;  %v2056_v40 = vadd.f32 %v2050_v14, %v2032_v28  ;;  %v2074_v34 = vmul.f32 %v2065_v20, %v11229_v7  ;;  %v2980_v57 = vadd.f32 1.0, %v6903_v29  ;;  %v11240_v14 = vld [vmem:[#allocation22_spill] sm:$0xff] }
 0x230   :  { %v3035_v35 = vmul.f32 %v8950_v24, %v3029_v26  ;;  %v3038_v41 = vmul.f32 %v6901_v8, %v3029_v26  ;;  %v2017_v21 = vadd.f32 %v2011_v17, %v11159_v42  ;;  %6914 = vpow2.f32 %v6369_v1 }
 0x231   :  { %v6907_v56 = vpop.eup %6906  ;;  %v2059_v5 = vadd.f32 %v2053_v22, %v2035_v10  ;;  %v2077_v6 = vmul.f32 %v2065_v20, %v11231_v12  ;;  %v2080_v48 = vadd.f32 %v2074_v34, %v2056_v40  ;;  %v6372_v8 = vmul.f32 -1.442695, %v2813_v15 }
 0x232   :  { %v9045_v51 = vrot.slane %v3035_v35, %v7958_v4  ;;  %v9048_v61 = vrot.slane %v3035_v35, %v7961_v55  ;;  %v9051_v13 = vrot.slane %v3038_v41, %v7964_v2  ;;  %v3030_v24 = vrot.slane %v6907_v56, 5 }
 0x233   :  { %6916 = vtanh.f32 %v9003_v19  ;;  %v2083_v29 = vadd.f32 %v2077_v6, %v2059_v5  ;;  %v9054_v17 = vadd.f32 %v2080_v48, %v2014_v0  ;;  %v6909_v28 = vpop.eup %6908  ;;  %v2314_v26 = vmul.f32 %v11240_v14, %v7857_v38  ;;  %v11241_v0 = vld [vmem:[#allocation23_spill] sm:$0xff] }
 0x234   :  { %11237 = vst [vmem:[#allocation14_spill] sm:$0xff] %v9045_v51  ;;  %11238 = vst [vmem:[#allocation15_spill] sm:$0xff] %v9048_v61  ;;  %v3297_v20 = vmul.f32 %v9045_v51, %v7811_v50  ;;  %v3303_v10 = vmul.f32 %v9048_v61, %v7815_v52  ;;  %6918 = vrcp.f32 %v2980_v57  ;;  %v6911_v46 = vpop.eup %6910  ;;  %v3300_v1 = vmul.f32 %v9045_v51, %v7817_v53 }
 0x235   :  { %11239 = vst [vmem:[#allocation37_spill] sm:$0xff] %v9051_v13  ;;  %v3306_v22 = vmul.f32 %v9048_v61, %v7819_v54  ;;  %6920 = vtanh.f32 %v2813_v15  ;;  %v2332_v40 = vmul.f32 %v11241_v0, %v7875_v60  ;;  %v3315_v35 = vmul.f32 %v9051_v13, %v7809_v49 }
 0x236   :  { %v3309_v34 = vadd.f32 %v3303_v10, %v3297_v20  ;;  %v3036_v41 = vmul.f32 %v8969_v9, %v3030_v24  ;;  %v3039_v57 = vmul.f32 %v6911_v46, %v3030_v24  ;;  %v3318_v5 = vmul.f32 %v9051_v13, %v7825_v58  ;;  %v11243_v24 = vld [vmem:[#allocation75_spill] sm:$0xff] }
 0x237   :  { %v3312_v56 = vadd.f32 %v3306_v22, %v3300_v1  ;;  %6922 = vpow2.f32 %v6372_v8  ;;  %v2466_v6 = vadd.f32 1.0, %v6909_v28  ;;  %v6361_v45 = vmul.f32 -1.442695, %v9003_v19 }
 0x238   :  { %v3321_v48 = vadd.f32 %v3315_v35, %v3309_v34  ;;  %v3048_v61 = vrot.slane %v3036_v41, %v7958_v4  ;;  %v3066_v15 = vrot.slane %v3036_v41, %v7961_v55  ;;  %v9076_v51 = vrot.slane %v3039_v57, %v7964_v2  ;;  %v11244_v34 = vld [vmem:[#allocation28_spill] sm:$0xff] }
 0x239   :  { %v6913_v20 = vpop.eup %6912  ;;  %v3324_v10 = vadd.f32 %v3318_v5, %v3312_v56  ;;  %6924 = vrcp.f32 %v2466_v6  ;;  %v9079_v9 = vadd.f32 %v2083_v29, %v2017_v21  ;;  %v2335_v12 = vmul.f32 %v11241_v0, %v8029_v11 }
 0x23a   :  { %v3327_v46 = vadd.f32 %v3321_v48, %v11243_v24  ;;  %v3031_v1 = vrot.slane %v6913_v20, 5  ;;  %v3054_v8 = vmul.f32 %v3048_v61, %v7857_v38  ;;  %v3072_v28 = vmul.f32 %v3066_v15, %v7875_v60  ;;  %v6915_v22 = vpop.eup %6914 }
 0x23b   :  { %11242 = vst [vmem:[#allocation39_spill] sm:$0xff] %v9079_v9  ;;  %v3330_v35 = vadd.f32 %v3324_v10, %v11244_v34  ;;  %v3096_v41 = vmul.f32 %v9076_v51, %v7953_v16  ;;  %v3298_v57 = vmul.f32 %v3048_v61, %v7811_v50  ;;  %v3301_v19 = vmul.f32 %v3048_v61, %v7817_v53 }
 0x23c   :  { %v6386_v56 = vmul.f32 -1.442695, %v3327_v46  ;;  %v3078_v21 = vadd.f32 %v3072_v28, %v3054_v8  ;;  %v3304_v29 = vmul.f32 %v3066_v15, %v7815_v52  ;;  %v3307_v5 = vmul.f32 %v3066_v15, %v7819_v54 }
 0x23d   :  { %v6917_v6 = vpop.eup %6916  ;;  %v3316_v48 = vmul.f32 %v9076_v51, %v7809_v49  ;;  %v3319_v20 = vmul.f32 %v9076_v51, %v7825_v58  ;;  %6926 = vpow2.f32 %v6361_v45  ;;  %v9097_v10 = vmul.f32 %v11240_v14, %v8072_v18 }
 0x23e   :  { %v6919_v24 = vpop.eup %6918  ;;  %6928 = vpow2.f32 %v6386_v56  ;;  %v9099_v46 = vadd.f32 %v3096_v41, %v3078_v21  ;;  %v3310_v8 = vadd.f32 %v3304_v29, %v3298_v57  ;;  %v3313_v28 = vadd.f32 %v3307_v5, %v3301_v19  ;;  %v11245_v19 = vld [vmem:[#allocation24_spill] sm:$0xff] }
 0x23f   :  { %v6921_v34 = vpop.eup %6920  ;;  %v3037_v13 = vmul.f32 %v9005_v31, %v3031_v1  ;;  %v3040_v9 = vmul.f32 %v6919_v24, %v3031_v1  ;;  %v2834_v36 = vadd.f32 1.0, %v6915_v22  ;;  %v2493_v23 = vrot.slane %v6917_v6, 1 }
 0x240   :  { %v3322_v7 = vadd.f32 %v3316_v48, %v3310_v8  ;;  %v3325_v45 = vadd.f32 %v3319_v20, %v3313_v28  ;;  %v9104_v63 = vadd.f32 %v2332_v40, %v2314_v26  ;;  %v3057_v22 = vmul.f32 %v3048_v61, %v8072_v18 }
 0x241   :  { %v6923_v14 = vpop.eup %6922  ;;  %v3052_v56 = vrot.slane %v3037_v13, %v7958_v4  ;;  %v3070_v41 = vrot.slane %v3037_v13, %v7961_v55  ;;  %v3094_v57 = vrot.slane %v3040_v9, %v7964_v2  ;;  %6930 = vrcp.f32 %v2834_v36 }
 0x242   :  { %v3328_v31 = vadd.f32 %v3322_v7, %v11245_v19  ;;  %v3331_v1 = vadd.f32 %v3325_v45, %v8912_v47  ;;  %v3075_v0 = vmul.f32 %v3066_v15, %v8029_v11  ;;  %v6389_v26 = vmul.f32 -1.442695, %v3330_v35 }
 0x243   :  { %v9113_v21 = vpop.eup %6924  ;;  %v3055_v40 = vmul.f32 %v3052_v56, %v7857_v38  ;;  %v3073_v29 = vmul.f32 %v3070_v41, %v7875_v60  ;;  %v3299_v13 = vmul.f32 %v3052_v56, %v7811_v50  ;;  %6932 = vtanh.f32 %v3330_v35 }
 0x244   :  { %v6387_v9 = vmul.f32 -1.442695, %v3328_v31  ;;  %v3305_v36 = vmul.f32 %v3070_v41, %v7815_v52  ;;  %v2837_v7 = vadd.f32 1.0, %v6923_v14  ;;  %v3097_v47 = vmul.f32 %v3094_v57, %v7953_v16 }
 0x245   :  { %v3079_v5 = vadd.f32 %v3073_v29, %v3055_v40  ;;  %v3302_v61 = vmul.f32 %v3052_v56, %v7817_v53  ;;  %v3308_v15 = vmul.f32 %v3070_v41, %v7819_v54  ;;  %v3317_v48 = vmul.f32 %v3094_v57, %v7809_v49 }
 0x246   :  { %6934 = vpow2.f32 %v6387_v9  ;;  %v3311_v6 = vadd.f32 %v3305_v36, %v3299_v13  ;;  %v3081_v20 = vadd.f32 %v3075_v0, %v3057_v22  ;;  %v3320_v28 = vmul.f32 %v3094_v57, %v7825_v58 }
 0x247   :  { %v6927_v24 = vpop.eup %6926  ;;  %v9123_v8 = vadd.f32 %v3097_v47, %v3079_v5  ;;  %v3314_v35 = vadd.f32 %v3308_v15, %v3302_v61  ;;  %v3099_v45 = vmul.f32 %v9076_v51, %v8090_v62  ;;  %6936 = vpow2.f32 %v6389_v26 }
 0x248   :  { %v6929_v14 = vpop.eup %6928  ;;  %v6390_v19 = vmul.f32 -1.442695, %v3331_v1  ;;  %v3323_v31 = vadd.f32 %v3317_v48, %v3311_v6  ;;  %v2861_v40 = vrot.slane %v6921_v34, 1  ;;  %v2487_v22 = vmul.f32 %v9113_v21, %v8832_v25 }
 0x249   :  { %v3351_v29 = vadd.f32 1.0, %v6929_v14  ;;  %v3326_v9 = vadd.f32 %v3320_v28, %v3314_v35  ;;  %v9128_v13 = vadd.f32 %v3099_v45, %v3081_v20  ;;  %6938 = vrcp.f32 %v2837_v7  ;;  %v11250_v45 = vld [vmem:[#allocation87_spill] sm:$0xff] }
 0x24a   :  { %v3329_v0 = vadd.f32 %v3323_v31, %v8916_v59  ;;  %v2499_v36 = vmul.f32 %v9113_v21, %v2493_v23  ;;  %v3058_v5 = vmul.f32 %v3052_v56, %v8072_v18  ;;  %v2469_v34 = vadd.f32 1.0, %v6927_v24 }
 0x24b   :  { %v9135_v51 = vpop.eup %6930  ;;  %6940 = vrcp.f32 %v3351_v29  ;;  %v3332_v26 = vadd.f32 %v3326_v9, %v9035_v44  ;;  %v3076_v47 = vmul.f32 %v3070_v41, %v8029_v11  ;;  %v2341_v56 = vadd.f32 %v2335_v12, %v9097_v10  ;;  %v11246_v41 = vld [vmem:[#allocation25_spill] sm:$0xff]  ;;  %v11252_v9 = vld [vmem:[#allocation18_spill] sm:$0xff] }
 0x24c   :  { %6942 = vpow2.f32 %v6390_v19  ;;  %v6388_v61 = vmul.f32 -1.442695, %v3329_v0  ;;  %v2855_v25 = vmul.f32 %v9135_v51, %v8900_v27  ;;  %v2867_v59 = vmul.f32 %v9135_v51, %v2861_v40  ;;  %v11251_v40 = vld [vmem:[#allocation88_spill] sm:$0xff]  ;;  %v11253_v0 = vld [vmem:[#allocation19_spill] sm:$0xff] }
 0x24d   :  { %6944 = vtanh.f32 %v3331_v1  ;;  %v2505_v7 = vrot.slane %v2499_v36, 5  ;;  %v3082_v23 = vadd.f32 %v3076_v47, %v3058_v5  ;;  %v6933_v15 = vpop.eup %6932  ;;  %v3100_v44 = vmul.f32 %v3094_v57, %v8090_v62 }
 0x24e   :  { %6946 = vpow2.f32 %v6388_v61  ;;  %v2873_v6 = vrot.slane %v2867_v59, 5  ;;  %v2356_v20 = vmul.f32 %v11246_v41, %v7953_v16  ;;  %v2359_v27 = vmul.f32 %v11246_v41, %v8090_v62 }
 0x24f   :  { %6948 = vrcp.f32 %v2469_v34  ;;  %v9144_v48 = vadd.f32 %v2505_v7, %v2487_v22  ;;  %v9152_v35 = vadd.f32 %v3100_v44, %v3082_v23  ;;  %v1819_v14 = vrot.slane %v11250_v45, 3 }
 0x250   :  { %v6935_v24 = vpop.eup %6934  ;;  %6950 = vtanh.f32 %v3332_v26  ;;  %v9150_v1 = vadd.f32 %v2873_v6, %v2855_v25  ;;  %v9156_v10 = vadd.f32 %v2356_v20, %v9104_v63  ;;  %v9158_v57 = vadd.f32 %v2359_v27, %v2341_v56 }
 0x251   :  { %11247 = vst [vmem:[#allocation76_spill] sm:$0xff] %v9152_v35  ;;  %v3352_v12 = vadd.f32 1.0, %v6935_v24  ;;  %6952 = vtanh.f32 %v9144_v48  ;;  %v6937_v28 = vpop.eup %6936  ;;  %v3378_v31 = vrot.slane %v6933_v15, 1  ;;  %v1820_v29 = vrot.slane %v11251_v40, 3 }
 0x252   :  { %11248 = vst [vmem:[#allocation73_spill] sm:$0xff] %v9156_v10  ;;  %11249 = vst [vmem:[#allocation83_spill] sm:$0xff] %v9158_v57  ;;  %6954 = vtanh.f32 %v9150_v1  ;;  %v1816_v22 = vrot.slane %v11252_v9, 3  ;;  %v1817_v36 = vrot.slane %v11253_v0, 3  ;;  %v3354_v63 = vadd.f32 1.0, %v6937_v28 }
 0x253   :  { %6956 = vrcp.f32 %v3352_v12  ;;  %v6939_v19 = vpop.eup %6938  ;;  %v1813_v34 = vrot.slane %v9008_v30, 3  ;;  %v1814_v47 = vrot.slane %v9018_v43, 3  ;;  %v6391_v7 = vmul.f32 -1.442695, %v3332_v26 }
 0x254   :  { %v1821_v23 = vsel %vm1812_vm4, %v1819_v14, %v1820_v29  ;;  %v1818_v15 = vsel %vm1812_vm4, %v1816_v22, %v1817_v36  ;;  %6958 = vrcp.f32 %v3354_v63  ;;  %v6344_v24 = vmul.f32 -1.442695, %v9054_v17  ;;  %v11254_v14 = vld [vmem:[#allocation33_spill] sm:$0xff]  ;;  %v11255_v22 = vld [vmem:[#allocation34_spill] sm:$0xff] }
 0x255   :  { %v9165_v5 = vpop.eup %6940  ;;  %1827 = vst [vmem:[#allocation2 + $0x10] sm:$0x38] %v1821_v23  ;;  %v1815_v6 = vsel %vm1812_vm4, %v1813_v34, %v1814_v47  ;;  %1826 = vst [vmem:[#allocation2 + $0x8] sm:$0x38] %v1818_v15  ;;  %6960 = vpow2.f32 %v6391_v7  ;;  %v3108_v9 = vadd.f32 %v9099_v46, %v11154_v39  ;;  %v2742_v0 = vadd.f32 %v11255_v22, %v11159_v42 }
 0x256   :  { %v6943_v61 = vpop.eup %6942  ;;  %v3372_v25 = vmul.f32 %v9165_v5, %v8972_v33  ;;  %v3384_v59 = vmul.f32 %v9165_v5, %v3378_v31  ;;  %1825 = vst [vmem:[#allocation2] sm:$0x38] %v1815_v6  ;;  %v2739_v31 = vadd.f32 %v11254_v14, %v11154_v39  ;;  %v3111_v46 = vadd.f32 %v9128_v13, %v11159_v42  ;;  %v11260_v6 = vld [vmem:[#allocation29_spill] sm:$0xff] }
 0x257   :  { %v6945_v56 = vpop.eup %6944  ;;  %v3355_v43 = vadd.f32 1.0, %v6943_v61 }
 0x258   :  { %v6947_v44 = vpop.eup %6946  ;;  %v3390_v41 = vrot.slane %v3384_v59, 5  ;;  %v3379_v28 = vrot.slane %v6945_v56, 1 }
 0x259   :  { %v6949_v30 = vpop.eup %6948  ;;  %v3353_v20 = vadd.f32 1.0, %v6947_v44 }
 0x25a   :  { %v6951_v33 = vpop.eup %6950  ;;  %v9175_v27 = vadd.f32 %v3390_v41, %v3372_v25 }
 0x25b   :  { %v6953_v26 = vpop.eup %6952  ;;  %6962 = vrcp.f32 %v3353_v20  ;;  %v3380_v59 = vrot.slane %v6951_v33, 1  ;;  %v11261_v33 = vld [vmem:[#allocation70_spill] sm:$0xff] }
 0x25c   :  { %v6955_v12 = vpop.eup %6954  ;;  %6964 = vtanh.f32 %v9175_v27  ;;  %v2520_v45 = vrot.slane %v6953_v26, 5 }
 0x25d   :  { %v9181_v40 = vpop.eup %6956  ;;  %6966 = vrcp.f32 %v3355_v43  ;;  %v2888_v29 = vrot.slane %v6955_v12, 5  ;;  %v11262_v12 = vld [vmem:[#allocation38_spill] sm:$0xff] }
 0x25e   :  { %v3373_v17 = vmul.f32 %v9181_v40, %v8992_v37  ;;  %v3385_v36 = vmul.f32 %v9181_v40, %v3379_v28  ;;  %v9191_v63 = vmul.f32 %v9113_v21, %v2520_v45  ;;  %v9193_v34 = vmul.f32 %v6949_v30, %v2520_v45  ;;  %v6959_v41 = vpop.eup %6958  ;;  %v11263_v45 = vld [vmem:[#allocation71_spill] sm:$0xff] }
 0x25f   :  { %v9196_v47 = vmul.f32 %v9135_v51, %v2888_v29  ;;  %v9198_v61 = vmul.f32 %v6939_v19, %v2888_v29  ;;  %6968 = vpow2.f32 %v6344_v24  ;;  %v6961_v24 = vpop.eup %6960 }
 0x260   :  { %11256 = vst [vmem:[#allocation81_spill] sm:$0xff] %v9191_v63  ;;  %11257 = vst [vmem:[#allocation82_spill] sm:$0xff] %v9193_v34  ;;  %v3391_v25 = vrot.slane %v3385_v36, 5  ;;  %v2754_v37 = vrot.slane %v9191_v63, %v7958_v4  ;;  %v2772_v21 = vrot.slane %v9191_v63, %v7961_v55  ;;  %v2796_v13 = vrot.slane %v9193_v34, %v7964_v2 }
 0x261   :  { %11258 = vst [vmem:[#allocation85_spill] sm:$0xff] %v9196_v47  ;;  %11259 = vst [vmem:[#allocation86_spill] sm:$0xff] %v9198_v61  ;;  %v3120_v7 = vrot.slane %v9196_v47, %v7958_v4  ;;  %v3138_v51 = vrot.slane %v9196_v47, %v7961_v55  ;;  %v3162_v19 = vrot.slane %v9198_v61, %v7964_v2  ;;  %v11264_v61 = vld [vmem:[#allocation17_spill] sm:$0xff]  ;;  %v3356_v42 = vadd.f32 1.0, %v6961_v24 }
 0x262   :  { %v9214_v23 = vadd.f32 %v3391_v25, %v3373_v17  ;;  %v2757_v56 = vmul.f32 %v2754_v37, %v11187_v32  ;;  %v2760_v15 = vmul.f32 %v2754_v37, %v8078_v3  ;;  %v2775_v44 = vmul.f32 %v2772_v21, %v11260_v6 }
 0x263   :  { %v3126_v30 = vmul.f32 %v3120_v7, %v11187_v32  ;;  %v3129_v43 = vmul.f32 %v3120_v7, %v8078_v3  ;;  %v3144_v20 = vmul.f32 %v3138_v51, %v11260_v6  ;;  %v3147_v26 = vmul.f32 %v3138_v51, %v11261_v33 }
 0x264   :  { %6970 = vtanh.f32 %v9214_v23  ;;  %v3168_v28 = vmul.f32 %v3162_v19, %v11262_v12  ;;  %v3171_v14 = vmul.f32 %v3162_v19, %v11263_v45  ;;  %v2778_v29 = vmul.f32 %v2772_v21, %v11261_v33 }
 0x265   :  { %v9227_v22 = vpop.eup %6962  ;;  %v3150_v17 = vadd.f32 %v3144_v20, %v3126_v30  ;;  %v3153_v36 = vadd.f32 %v3147_v26, %v3129_v43  ;;  %v2781_v25 = vadd.f32 %v2775_v44, %v2757_v56  ;;  %v2799_v37 = vmul.f32 %v2796_v13, %v11262_v12 }
 0x266   :  { %v6965_v7 = vpop.eup %6964  ;;  %v3374_v51 = vmul.f32 %v9227_v22, %v11264_v61  ;;  %v3386_v47 = vmul.f32 %v9227_v22, %v3380_v59  ;;  %v2784_v34 = vadd.f32 %v2778_v29, %v2760_v15  ;;  %v2802_v63 = vmul.f32 %v2796_v13, %v11263_v45 }
 0x267   :  { %v6967_v57 = vpop.eup %6966  ;;  %v3405_v19 = vrot.slane %v6965_v7, 5  ;;  %v3174_v10 = vadd.f32 %v3168_v28, %v3150_v17  ;;  %v3177_v21 = vadd.f32 %v3171_v14, %v3153_v36  ;;  %v2805_v35 = vadd.f32 %v2799_v37, %v2781_v25 }
 0x268   :  { %v3392_v30 = vrot.slane %v3386_v47, 5  ;;  %v2808_v43 = vadd.f32 %v2802_v63, %v2784_v34  ;;  %v11268_v34 = vld [vmem:[#allocation9_spill] sm:$0xff] }
 0x269   :  { %v6969_v56 = vpop.eup %6968  ;;  %v3411_v44 = vmul.f32 %v9165_v5, %v3405_v19  ;;  %v3414_v20 = vmul.f32 %v6959_v41, %v3405_v19  ;;  %v3180_v26 = vadd.f32 %v3174_v10, %v3108_v9  ;;  %v3183_v12 = vadd.f32 %v3177_v21, %v3111_v46  ;;  %v11269_v5 = vld [vmem:[#allocation40_spill] sm:$0xff]  ;;  %v11270_v10 = vld [vmem:[#allocation41_spill] sm:$0xff] }
 0x26a   :  { %v9235_v61 = vadd.f32 %v3392_v30, %v3374_v51  ;;  %v2811_v59 = vadd.f32 %v2805_v35, %v2739_v31  ;;  %v9237_v15 = vadd.f32 %v2808_v43, %v2742_v0  ;;  %v9250_v41 = vadd.f32 %v11269_v5, %v11268_v34 }
 0x26b   :  { %v9240_v13 = vrot.slane %v3411_v44, %v7958_v4  ;;  %v9243_v28 = vrot.slane %v3411_v44, %v7961_v55  ;;  %v9246_v47 = vrot.slane %v3414_v20, %v7964_v2  ;;  %v6381_v63 = vmul.f32 -1.442695, %v3180_v26  ;;  %v11273_v44 = vld [vmem:[#allocation45_spill] sm:$0xff] }
 0x26c   :  { %v761_v9 = vadd.f32 %v11270_v10, %v11268_v34  ;;  %6972 = vtanh.f32 %v9235_v61  ;;  %v2110_v17 = vadd.f32 1.0, %v6969_v56  ;;  %v11272_v56 = vld [vmem:[#allocation12_spill] sm:$0xff]  ;;  %v6370_v10 = vmul.f32 -1.442695, %v2811_v59 }
 0x26d   :  { %11265 = vst [vmem:[#allocation27_spill] sm:$0xff] %v9240_v13  ;;  %11266 = vst [vmem:[#allocation84_spill] sm:$0xff] %v9243_v28  ;;  %v3429_v35 = vmul.f32 %v9240_v13, %v7857_v38  ;;  %v3447_v31 = vmul.f32 %v9243_v28, %v7875_v60  ;;  %v3666_v0 = vmul.f32 %v9240_v13, %v7811_v50  ;;  %6974 = vrcp.f32 %v3356_v42 }
 0x26e   :  { %11267 = vst [vmem:[#allocation43_spill] sm:$0xff] %v9246_v47  ;;  %v6971_v46 = vpop.eup %6970  ;;  %v3672_v24 = vmul.f32 %v9243_v28, %v7815_v52  ;;  %v3669_v14 = vmul.f32 %v9240_v13, %v7817_v53  ;;  %v3675_v29 = vmul.f32 %v9243_v28, %v7819_v54  ;;  %v3471_v37 = vmul.f32 %v9246_v47, %v7953_v16 }
 0x26f   :  { %v3406_v36 = vrot.slane %v6971_v46, 5  ;;  %v3453_v25 = vadd.f32 %v3447_v31, %v3429_v35  ;;  %6976 = vpow2.f32 %v6381_v63  ;;  %v3684_v42 = vmul.f32 %v9246_v47, %v7809_v49  ;;  %v11274_v63 = vld [vmem:[#allocation39_spill] sm:$0xff] }
 0x270   :  { %v3678_v7 = vadd.f32 %v3672_v24, %v3666_v0  ;;  %v3681_v51 = vadd.f32 %v3675_v29, %v3669_v14  ;;  %v3687_v19 = vmul.f32 %v9246_v47, %v7825_v58  ;;  %v765_v20 = vadd.f32 %v11273_v44, %v11272_v56 }
 0x271   :  { %v3412_v21 = vmul.f32 %v9181_v40, %v3406_v36  ;;  %v3415_v30 = vmul.f32 %v6967_v57, %v3406_v36  ;;  %v9274_v43 = vadd.f32 %v3471_v37, %v3453_v25  ;;  %v6347_v35 = vmul.f32 -1.442695, %v11274_v63 }
 0x272   :  { %v3690_v26 = vadd.f32 %v3684_v42, %v3678_v7  ;;  %v3693_v5 = vadd.f32 %v3687_v19, %v3681_v51  ;;  %6978 = vtanh.f32 %v11274_v63  ;;  %v6384_v24 = vmul.f32 -1.442695, %v3183_v12 }
 0x273   :  { %11271 = vst [vmem:[#allocation22_spill] sm:$0xff] %v9274_v43  ;;  %v3424_v31 = vrot.slane %v3412_v21, %v7958_v4  ;;  %v9281_v0 = vrot.slane %v3412_v21, %v7961_v55  ;;  %v9284_v46 = vrot.slane %v3415_v30, %v7964_v2  ;;  %6980 = vrcp.f32 %v2110_v17  ;;  %v11275_v30 = vld [vmem:[#allocation44_spill] sm:$0xff] }
 0x274   :  { %v3696_v57 = vadd.f32 %v3690_v26, %v761_v9  ;;  %v3699_v40 = vadd.f32 %v3693_v5, %v765_v20  ;;  %6982 = vtanh.f32 %v3183_v12  ;;  %v806_v44 = vadd.f32 %v11275_v30, %v11272_v56 }
 0x275   :  { %v3430_v14 = vmul.f32 %v3424_v31, %v7857_v38  ;;  %v3448_v59 = vmul.f32 %v9281_v0, %v7875_v60  ;;  %v3667_v29 = vmul.f32 %v3424_v31, %v7811_v50  ;;  %v3673_v25 = vmul.f32 %v9281_v0, %v7815_v52 }
 0x276   :  { %v6973_v36 = vpop.eup %6972  ;;  %v6398_v37 = vmul.f32 -1.442695, %v3696_v57  ;;  %v3670_v7 = vmul.f32 %v3424_v31, %v7817_v53  ;;  %6984 = vpow2.f32 %v6370_v10  ;;  %v3472_v17 = vmul.f32 %v9284_v46, %v7953_v16 }
 0x277   :  { %v6975_v9 = vpop.eup %6974  ;;  %v3454_v42 = vadd.f32 %v3448_v59, %v3430_v14  ;;  %v3407_v51 = vrot.slane %v6973_v36, 5  ;;  %v3676_v19 = vmul.f32 %v9281_v0, %v7819_v54  ;;  %v3679_v21 = vadd.f32 %v3673_v25, %v3667_v29 }
 0x278   :  { %v3685_v12 = vmul.f32 %v9284_v46, %v7809_v49  ;;  %6986 = vpow2.f32 %v6398_v37  ;;  %v3688_v10 = vmul.f32 %v9284_v46, %v7825_v58 }
 0x279   :  { %v6977_v20 = vpop.eup %6976  ;;  %v9302_v26 = vadd.f32 %v3472_v17, %v3454_v42  ;;  %v3682_v5 = vadd.f32 %v3676_v19, %v3670_v7  ;;  %v3413_v63 = vmul.f32 %v9227_v22, %v3407_v51  ;;  %v3416_v14 = vmul.f32 %v6975_v9, %v3407_v51 }
 0x27a   :  { %v3691_v57 = vadd.f32 %v3685_v12, %v3679_v21  ;;  %v3204_v59 = vadd.f32 1.0, %v6977_v20  ;;  %6988 = vpow2.f32 %v6347_v35  ;;  %v3433_v21 = vmul.f32 %v3424_v31, %v8072_v18 }
 0x27b   :  { %v3694_v29 = vadd.f32 %v3688_v10, %v3682_v5  ;;  %v9308_v36 = vrot.slane %v3413_v63, %v7958_v4  ;;  %v9311_v25 = vrot.slane %v3413_v63, %v7961_v55  ;;  %6990 = vpow2.f32 %v6384_v24 }
 0x27c   :  { %v3697_v37 = vadd.f32 %v3691_v57, %v9250_v41  ;;  %v9315_v7 = vrot.slane %v3416_v14, %v7964_v2  ;;  %6992 = vrcp.f32 %v3204_v59  ;;  %v6979_v42 = vpop.eup %6978  ;;  %v3451_v59 = vmul.f32 %v9281_v0, %v8029_v11 }
 0x27d   :  { %v3700_v22 = vadd.f32 %v3694_v29, %v806_v44  ;;  %v3431_v9 = vmul.f32 %v9308_v36, %v7857_v38  ;;  %v3449_v35 = vmul.f32 %v9311_v25, %v7875_v60  ;;  %v3668_v17 = vmul.f32 %v9308_v36, %v7811_v50  ;;  %v9323_v51 = vpop.eup %6980 }
 0x27e   :  { %v6399_v24 = vmul.f32 -1.442695, %v3697_v37  ;;  %v3671_v41 = vmul.f32 %v9308_v36, %v7817_v53  ;;  %v3674_v19 = vmul.f32 %v9311_v25, %v7815_v52  ;;  %v6983_v12 = vpop.eup %6982  ;;  %6994 = vtanh.f32 %v3699_v40  ;;  %v11277_v37 = vld [vmem:[#allocation42_spill] sm:$0xff] }
 0x27f   :  { %v3455_v30 = vadd.f32 %v3449_v35, %v3431_v9  ;;  %v3473_v44 = vmul.f32 %v9315_v7, %v7953_v16  ;;  %v3677_v20 = vmul.f32 %v9311_v25, %v7819_v54  ;;  %v3686_v63 = vmul.f32 %v9315_v7, %v7809_v49 }
 0x280   :  { %v6985_v5 = vpop.eup %6984  ;;  %6996 = vpow2.f32 %v6399_v24  ;;  %v3680_v10 = vadd.f32 %v3674_v19, %v3668_v17  ;;  %v3689_v31 = vmul.f32 %v9315_v7, %v7825_v58  ;;  %v804_v9 = vadd.f32 %v11277_v37, %v11268_v34  ;;  %v11278_v24 = vld [vmem:[#allocation46_spill] sm:$0xff] }
 0x281   :  { %v9336_v57 = vadd.f32 %v3473_v44, %v3455_v30  ;;  %v3683_v14 = vadd.f32 %v3677_v20, %v3671_v41  ;;  %v6401_v35 = vmul.f32 -1.442695, %v3699_v40  ;;  %v808_v17 = vadd.f32 %v11278_v24, %v11272_v56 }
 0x282   :  { %v6987_v29 = vpop.eup %6986  ;;  %v3692_v19 = vadd.f32 %v3686_v63, %v3680_v10  ;;  %v3457_v30 = vadd.f32 %v3451_v59, %v3433_v21  ;;  %v3475_v41 = vmul.f32 %v9284_v46, %v8090_v62  ;;  %v2835_v28 = vadd.f32 1.0, %v6985_v5 }
 0x283   :  { %11276 = vst [vmem:[#allocation23_spill] sm:$0xff] %v9336_v57  ;;  %v3720_v43 = vadd.f32 1.0, %v6987_v29  ;;  %v3695_v47 = vadd.f32 %v3689_v31, %v3683_v14  ;;  %v2137_v13 = vrot.slane %v6979_v42, 1  ;;  %v3231_v58 = vrot.slane %v6983_v12, 1  ;;  %v11279_v42 = vld [vmem:[#allocation35_spill] sm:$0xff] }
 0x284   :  { %v6989_v44 = vpop.eup %6988  ;;  %v3698_v20 = vadd.f32 %v3692_v19, %v804_v9  ;;  %v9348_v37 = vadd.f32 %v3475_v41, %v3457_v30  ;;  %v6402_v21 = vmul.f32 -1.442695, %v3700_v22 }
 0x285   :  { %v6991_v0 = vpop.eup %6990  ;;  %6998 = vrcp.f32 %v3720_v43  ;;  %v3701_v57 = vadd.f32 %v3695_v47, %v808_v17  ;;  %v2143_v10 = vmul.f32 %v9323_v51, %v2137_v13  ;;  %v2131_v47 = vmul.f32 %v9323_v51, %v11279_v42 }
 0x286   :  { %v9350_v40 = vpop.eup %6992  ;;  %v6400_v24 = vmul.f32 -1.442695, %v3698_v20  ;;  %7000 = vrcp.f32 %v2835_v28  ;;  %v2113_v59 = vadd.f32 1.0, %v6989_v44 }
 0x287   :  { %7002 = vpow2.f32 %v6401_v35  ;;  %v3225_v46 = vmul.f32 %v9350_v40, %v9150_v1  ;;  %v3237_v5 = vmul.f32 %v9350_v40, %v3231_v58  ;;  %v2149_v43 = vrot.slane %v2143_v10, 5 }
 0x288   :  { %7004 = vpow2.f32 %v6400_v24  ;;  %v6995_v12 = vpop.eup %6994  ;;  %v3207_v1 = vadd.f32 1.0, %v6991_v0  ;;  %v6403_v17 = vmul.f32 -1.442695, %v3701_v57  ;;  %v3434_v24 = vmul.f32 %v9308_v36, %v8072_v18 }
 0x289   :  { %7006 = vtanh.f32 %v3700_v22  ;;  %v3243_v63 = vrot.slane %v3237_v5, 5  ;;  %v9358_v31 = vadd.f32 %v2149_v43, %v2131_v47  ;;  %v3747_v58 = vrot.slane %v6995_v12, 1 }
 0x28a   :  { %v6997_v14 = vpop.eup %6996  ;;  %7008 = vpow2.f32 %v6402_v21  ;;  %v3476_v5 = vmul.f32 %v9315_v7, %v8090_v62 }
 0x28b   :  { %11280 = vst [vmem:[#allocation75_spill] sm:$0xff] %v9358_v31  ;;  %v3721_v28 = vadd.f32 1.0, %v6997_v14  ;;  %v9360_v13 = vadd.f32 %v3243_v63, %v3225_v46  ;;  %7010 = vtanh.f32 %v9237_v15  ;;  %v6373_v46 = vmul.f32 -1.442695, %v9237_v15 }
 0x28d   :  { %11281 = vst [vmem:[#allocation28_spill] sm:$0xff] %v9360_v13  ;;  %7012 = vrcp.f32 %v3721_v28 }
 0x28e   :  { %7014 = vtanh.f32 %v3701_v57 }
 0x28f   :  { %v9363_v29 = vpop.eup %6998  ;;  %7016 = vtanh.f32 %v9360_v13 }
 0x290   :  { %v9366_v22 = vpop.eup %7000  ;;  %v3741_v9 = vmul.f32 %v9363_v29, %v9175_v27  ;;  %v3753_v35 = vmul.f32 %v9363_v29, %v3747_v58  ;;  %7018 = vtanh.f32 %v9358_v31  ;;  %v3452_v27 = vmul.f32 %v9311_v25, %v8029_v11  ;;  %v11298_v31 = vld [vmem:[#allocation72_spill] sm:$0xff] }
 0x291   :  { %v7003_v19 = vpop.eup %7002  ;;  %7020 = vrcp.f32 %v3207_v1  ;;  %v2856_v30 = vmul.f32 %v9366_v22, %v9144_v48 }
 0x292   :  { %v7005_v41 = vpop.eup %7004  ;;  %v3759_v44 = vrot.slane %v3753_v35, 5  ;;  %7022 = vrcp.f32 %v2113_v59  ;;  %v3723_v10 = vadd.f32 1.0, %v7003_v19  ;;  %v3458_v48 = vadd.f32 %v3452_v27, %v3434_v24  ;;  %v11284_v59 = vld [vmem:[#allocation49_spill] sm:$0xff]  ;;  %v11285_v35 = vld [vmem:[#allocation50_spill] sm:$0xff] }
 0x293   :  { %v7007_v20 = vpop.eup %7006  ;;  %v3722_v0 = vadd.f32 1.0, %v7005_v41  ;;  %7024 = vpow2.f32 %v6403_v17  ;;  %v9398_v17 = vadd.f32 %v11285_v35, %v11268_v34 }
 0x294   :  { %v9378_v57 = vadd.f32 %v3759_v44, %v3741_v9  ;;  %v7009_v21 = vpop.eup %7008  ;;  %v3748_v47 = vrot.slane %v7007_v20, 1  ;;  %v9386_v25 = vadd.f32 %v3476_v5, %v3458_v48  ;;  %v9394_v9 = vadd.f32 %v11284_v59, %v11268_v34  ;;  %v11287_v20 = vld [vmem:[#allocation53_spill] sm:$0xff] }
 0x295   :  { %7026 = vrcp.f32 %v3722_v0  ;;  %v7011_v42 = vpop.eup %7010  ;;  %v3724_v63 = vadd.f32 1.0, %v7009_v21  ;;  %v9406_v0 = vadd.f32 %v11287_v20, %v11272_v56 }
 0x296   :  { %11282 = vst [vmem:[#allocation24_spill] sm:$0xff] %v9378_v57  ;;  %7028 = vtanh.f32 %v9378_v57  ;;  %v2862_v43 = vrot.slane %v7011_v42, 1  ;;  %11283 = vst [vmem:[#allocation25_spill] sm:$0xff] %v9386_v25 }
 0x297   :  { %v9384_v36 = vpop.eup %7012  ;;  %7030 = vrcp.f32 %v3723_v10 }
 0x298   :  { %v7015_v12 = vpop.eup %7014  ;;  %v3742_v14 = vmul.f32 %v9384_v36, %v9214_v23  ;;  %v3754_v15 = vmul.f32 %v9384_v36, %v3748_v47  ;;  %7032 = vpow2.f32 %v6373_v46  ;;  %v2868_v7 = vmul.f32 %v9366_v22, %v2862_v43  ;;  %v11286_v23 = vld [vmem:[#allocation51_spill] sm:$0xff] }
 0x299   :  { %v7017_v28 = vpop.eup %7016  ;;  %v9402_v44 = vadd.f32 %v11286_v23, %v11268_v34  ;;  %7034 = vrcp.f32 %v3724_v63  ;;  %v3749_v5 = vrot.slane %v7015_v12, 1 }
 0x29a   :  { %v7019_v1 = vpop.eup %7018  ;;  %v3760_v58 = vrot.slane %v3754_v15, 5  ;;  %v3258_v19 = vrot.slane %v7017_v28, 5  ;;  %v2874_v24 = vrot.slane %v2868_v7, 5  ;;  %v11294_v28 = vld [vmem:[#allocation54_spill] sm:$0xff] }
 0x29b   :  { %v7021_v41 = vpop.eup %7020  ;;  %v2164_v27 = vrot.slane %v7019_v1, 5  ;;  %v9437_v7 = vadd.f32 %v11294_v28, %v11272_v56  ;;  %v11295_v1 = vld [vmem:[#allocation55_spill] sm:$0xff] }
 0x29c   :  { %v7023_v10 = vpop.eup %7022  ;;  %v9408_v21 = vadd.f32 %v3760_v58, %v3742_v14  ;;  %v9411_v46 = vmul.f32 %v9350_v40, %v3258_v19  ;;  %v9413_v48 = vmul.f32 %v7021_v41, %v3258_v19  ;;  %v9415_v42 = vadd.f32 %v2874_v24, %v2856_v30  ;;  %v11292_v30 = vld [vmem:[#allocation30_spill] sm:$0xff] }
 0x29d   :  { %v9418_v47 = vmul.f32 %v9323_v51, %v2164_v27  ;;  %v9420_v43 = vmul.f32 %v7023_v10, %v2164_v27  ;;  %v7025_v15 = vpop.eup %7024  ;;  %v9433_v51 = vmul.f32 %v11292_v30, %v7857_v38  ;;  %v9441_v58 = vadd.f32 %v11295_v1, %v11272_v56 }
 0x29e   :  { %11288 = vst [vmem:[#allocation87_spill] sm:$0xff] %v9408_v21  ;;  %11289 = vst [vmem:[#allocation88_spill] sm:$0xff] %v9411_v46  ;;  %7036 = vtanh.f32 %v9408_v21  ;;  %v3496_v63 = vrot.slane %v9411_v46, %v7958_v4  ;;  %v3514_v40 = vrot.slane %v9411_v46, %v7961_v55  ;;  %v3538_v14 = vrot.slane %v9413_v48, %v7964_v2  ;;  %v11297_v46 = vld [vmem:[#allocation38_spill] sm:$0xff] }
 0x29f   :  { %11290 = vst [vmem:[#allocation18_spill] sm:$0xff] %v9413_v48  ;;  %11291 = vst [vmem:[#allocation19_spill] sm:$0xff] %v9415_v42  ;;  %v9429_v12 = vpop.eup %7026  ;;  %7038 = vtanh.f32 %v9415_v42  ;;  %v9455_v10 = vadd.f32 %v9123_v8, %v11154_v39  ;;  %v3725_v1 = vadd.f32 1.0, %v7025_v15  ;;  %v3484_v8 = vadd.f32 %v9302_v26, %v11154_v39 }
 0x2a0   :  { %11293 = vst [vmem:[#allocation33_spill] sm:$0xff] %v9433_v51  ;;  %2176 = vst [vmem:[#allocation2] sm:$0xc0] %v9418_v47  ;;  %v7029_v59 = vpop.eup %7028  ;;  %v3743_v35 = vmul.f32 %v9429_v12, %v9235_v61  ;;  %v3755_v19 = vmul.f32 %v9429_v12, %v3749_v5  ;;  %v3502_v41 = vmul.f32 %v3496_v63, %v11187_v32  ;;  %v11299_v5 = vld [vmem:[#allocation76_spill] sm:$0xff] }
 0x2a1   :  { %2179 = vst [vmem:[#allocation2 + $0x18] sm:$0x1] %v9420_v43  ;;  %v3505_v23 = vmul.f32 %v3496_v63, %v8078_v3  ;;  %v3774_v20 = vrot.slane %v7029_v59, 5  ;;  %v3520_v24 = vmul.f32 %v3514_v40, %v11260_v6  ;;  %v3523_v27 = vmul.f32 %v3514_v40, %v11261_v33  ;;  %11296 = vst [vmem:[#allocation34_spill] sm:$0xff] %v9455_v10  ;;  %v7031_v28 = vpop.eup %7030 }
 0x2a2   :  { %v3761_v48 = vrot.slane %v3755_v19, 5  ;;  %v3544_v61 = vmul.f32 %v3538_v14, %v11297_v46  ;;  %v9460_v25 = vadd.f32 %v11299_v5, %v11298_v31  ;;  %v7033_v42 = vpop.eup %7032  ;;  %v3547_v15 = vmul.f32 %v3538_v14, %v11263_v45  ;;  %v11302_v19 = vld [vmem:[#allocation73_spill] sm:$0xff] }
 0x2a3   :  { %v3780_v63 = vmul.f32 %v9363_v29, %v3774_v20  ;;  %v3783_v59 = vmul.f32 %v7031_v28, %v3774_v20  ;;  %v3526_v56 = vadd.f32 %v3520_v24, %v3502_v41  ;;  %v3529_v34 = vadd.f32 %v3523_v27, %v3505_v23 }
 0x2a4   :  { %11300 = vst [vmem:[#allocation71_spill] sm:$0xff] %v9460_v25  ;;  %v9463_v40 = vadd.f32 %v3761_v48, %v3743_v35  ;;  %v9470_v21 = vadd.f32 %v11302_v19, %v11154_v39  ;;  %v7035_v35 = vpop.eup %7034  ;;  %v3487_v26 = vadd.f32 %v9348_v37, %v11298_v31  ;;  %v2838_v41 = vadd.f32 1.0, %v7033_v42 }
 0x2a5   :  { %v9473_v5 = vrot.slane %v3780_v63, %v7958_v4  ;;  %v9476_v51 = vrot.slane %v3780_v63, %v7961_v55  ;;  %v9479_v29 = vrot.slane %v3783_v59, %v7964_v2  ;;  %v3550_v48 = vadd.f32 %v3544_v61, %v3526_v56 }
 0x2a6   :  { %11301 = vst [vmem:[#allocation17_spill] sm:$0xff] %v9463_v40  ;;  %7040 = vtanh.f32 %v9463_v40  ;;  %v3553_v14 = vadd.f32 %v3547_v15, %v3529_v34  ;;  %v9490_v24 = vrot.slane %v9418_v47, %v7958_v4 }
 0x2a7   :  { %11303 = vst [vmem:[#allocation40_spill] sm:$0xff] %v9473_v5  ;;  %11304 = vst [vmem:[#allocation41_spill] sm:$0xff] %v9476_v51  ;;  %7042 = vrcp.f32 %v3725_v1  ;;  %v3798_v23 = vmul.f32 %v9473_v5, %v7857_v38  ;;  %v3816_v20 = vmul.f32 %v9476_v51, %v7875_v60  ;;  %v3840_v27 = vmul.f32 %v9479_v29, %v7953_v16 }
 0x2a8   :  { %11305 = vst [vmem:[#allocation45_spill] sm:$0xff] %v9479_v29  ;;  %v7037_v56 = vpop.eup %7036  ;;  %v4036_v37 = vmul.f32 %v9473_v5, %v7811_v50  ;;  %v4042_v34 = vmul.f32 %v9476_v51, %v7815_v52  ;;  %v4039_v42 = vmul.f32 %v9473_v5, %v7817_v53  ;;  %v4054_v63 = vmul.f32 %v9479_v29, %v7809_v49 }
 0x2a9   :  { %v9500_v28 = vpop.eup %7038  ;;  %v3775_v1 = vrot.slane %v7037_v56, 5  ;;  %v3822_v61 = vadd.f32 %v3816_v20, %v3798_v23  ;;  %v4045_v59 = vmul.f32 %v9476_v51, %v7819_v54  ;;  %v3556_v19 = vadd.f32 %v3550_v48, %v3484_v8  ;;  %v11307_v56 = vld [vmem:[#allocation11_spill] sm:$0xff] }
 0x2aa   :  { %v4048_v15 = vadd.f32 %v4042_v34, %v4036_v37  ;;  %v3559_v39 = vadd.f32 %v3553_v14, %v3487_v26  ;;  %v10997_v40 = vrot.slane %v9500_v28, 5  ;;  %v4057_v23 = vmul.f32 %v9479_v29, %v11307_v56 }
 0x2ab   :  { %v9507_v57 = vadd.f32 %v3840_v27, %v3822_v61  ;;  %v3781_v25 = vmul.f32 %v9384_v36, %v3775_v1  ;;  %v3784_v5 = vmul.f32 %v7035_v35, %v3775_v1  ;;  %v4051_v10 = vadd.f32 %v4045_v59, %v4039_v42 }
 0x2ac   :  { %v4060_v13 = vadd.f32 %v4054_v63, %v4048_v15  ;;  %v6393_v20 = vmul.f32 -1.442695, %v3556_v19  ;;  %7044 = vrcp.f32 %v2838_v41  ;;  %v9519_v48 = vrot.slane %v9418_v47, %v7961_v55 }
 0x2ad   :  { %11306 = vst [vmem:[#allocation39_spill] sm:$0xff] %v9507_v57  ;;  %v3793_v30 = vrot.slane %v3781_v25, %v7958_v4  ;;  %v3811_v37 = vrot.slane %v3781_v25, %v7961_v55  ;;  %v9515_v8 = vrot.slane %v3784_v5, %v7964_v2  ;;  %v4063_v35 = vadd.f32 %v4057_v23, %v4051_v10  ;;  %v11334_v57 = vld [vmem:[#allocation17_spill] sm:$0xff] }
 0x2ae   :  { %v4066_v36 = vadd.f32 %v4060_v13, %v9394_v9  ;;  %7046 = vpow2.f32 %v6393_v20  ;;  %v9525_v26 = vmul.f32 %v9366_v22, %v10997_v40  ;;  %v9531_v5 = vmul.f32 %v9490_v24, %v11187_v32 }
 0x2af   :  { %v3799_v14 = vmul.f32 %v3793_v30, %v7857_v38  ;;  %v3817_v25 = vmul.f32 %v3811_v37, %v7875_v60  ;;  %v9535_v47 = vrot.slane %v9420_v43, %v7964_v2  ;;  %v3841_v10 = vmul.f32 %v9515_v8, %v7953_v16 }
 0x2b0   :  { %v7041_v13 = vpop.eup %7040  ;;  %v6410_v9 = vmul.f32 -1.442695, %v4066_v36  ;;  %v4037_v22 = vmul.f32 %v3793_v30, %v7811_v50  ;;  %v4043_v41 = vmul.f32 %v3811_v37, %v7815_v52  ;;  %v4069_v1 = vadd.f32 %v4063_v35, %v9406_v0 }
 0x2b1   :  { %v7043_v27 = vpop.eup %7042  ;;  %v3776_v34 = vrot.slane %v7041_v13, 5  ;;  %v3823_v42 = vadd.f32 %v3817_v25, %v3799_v14  ;;  %v4040_v61 = vmul.f32 %v3793_v30, %v7817_v53  ;;  %v4055_v43 = vmul.f32 %v9515_v8, %v7809_v49 }
 0x2b2   :  { %7048 = vpow2.f32 %v6410_v9  ;;  %v4049_v63 = vadd.f32 %v4043_v41, %v4037_v22  ;;  %v4046_v59 = vmul.f32 %v3811_v37, %v7819_v54  ;;  %v3820_v23 = vmul.f32 %v3811_v37, %v8029_v11 }
 0x2b3   :  { %v3782_v15 = vmul.f32 %v9429_v12, %v3776_v34  ;;  %v3785_v19 = vmul.f32 %v7043_v27, %v3776_v34  ;;  %v9548_v20 = vadd.f32 %v3841_v10, %v3823_v42  ;;  %v4058_v0 = vmul.f32 %v9515_v8, %v11307_v56 }
 0x2b4   :  { %v4061_v36 = vadd.f32 %v4055_v43, %v4049_v63  ;;  %v4052_v14 = vadd.f32 %v4046_v59, %v4040_v61  ;;  %v3802_v35 = vmul.f32 %v3793_v30, %v8072_v18  ;;  %v6396_v9 = vmul.f32 -1.442695, %v3559_v39 }
 0x2b5   :  { %v9554_v25 = vrot.slane %v3782_v15, %v7958_v4  ;;  %v9557_v13 = vrot.slane %v3782_v15, %v7961_v55  ;;  %v9560_v12 = vrot.slane %v3785_v19, %v7964_v2  ;;  %v6413_v22 = vmul.f32 -1.442695, %v4069_v1 }
 0x2b6   :  { %v7045_v37 = vpop.eup %7044  ;;  %v4067_v10 = vadd.f32 %v4061_v36, %v9402_v44  ;;  %v4064_v41 = vadd.f32 %v4058_v0, %v4052_v14  ;;  %7050 = vtanh.f32 %v3559_v39  ;;  %v3826_v34 = vadd.f32 %v3820_v23, %v3802_v35 }
 0x2b7   :  { %v3800_v27 = vmul.f32 %v9554_v25, %v7857_v38  ;;  %v3818_v30 = vmul.f32 %v9557_v13, %v7875_v60  ;;  %7052 = vtanh.f32 %v4069_v1  ;;  %v3842_v61 = vmul.f32 %v9560_v12, %v7953_v16 }
 0x2b8   :  { %v7047_v42 = vpop.eup %7046  ;;  %v4038_v63 = vmul.f32 %v9554_v25, %v7811_v50  ;;  %v4044_v44 = vmul.f32 %v9557_v13, %v7815_v52  ;;  %v6411_v43 = vmul.f32 -1.442695, %v4067_v10  ;;  %v4056_v59 = vmul.f32 %v9560_v12, %v7809_v49 }
 0x2b9   :  { %v3824_v39 = vadd.f32 %v3818_v30, %v3800_v27  ;;  %v4041_v15 = vmul.f32 %v9554_v25, %v7817_v53  ;;  %v4047_v1 = vmul.f32 %v9557_v13, %v7819_v54  ;;  %v4070_v23 = vadd.f32 %v4064_v41, %v9441_v58 }
 0x2ba   :  { %v4050_v19 = vadd.f32 %v4044_v44, %v4038_v63  ;;  %7054 = vpow2.f32 %v6411_v43  ;;  %v3580_v36 = vadd.f32 1.0, %v7047_v42  ;;  %v4059_v35 = vmul.f32 %v9560_v12, %v11307_v56 }
 0x2bb   :  { %v9580_v14 = vadd.f32 %v3842_v61, %v3824_v39  ;;  %v4053_v0 = vadd.f32 %v4047_v1, %v4041_v15  ;;  %v2389_v10 = vmul.f32 %v9490_v24, %v8078_v3  ;;  %7056 = vpow2.f32 %v6396_v9 }
 0x2bc   :  { %v7049_v27 = vpop.eup %7048  ;;  %v4062_v30 = vadd.f32 %v4056_v59, %v4050_v19  ;;  %v3844_v40 = vmul.f32 %v9515_v8, %v8090_v62  ;;  %v2404_v63 = vmul.f32 %v9519_v48, %v11260_v6  ;;  %7058 = vrcp.f32 %v3580_v36 }
 0x2bd   :  { %11308 = vst [vmem:[#allocation44_spill] sm:$0xff] %v9580_v14  ;;  %v4090_v58 = vadd.f32 1.0, %v7049_v27  ;;  %v4065_v41 = vadd.f32 %v4059_v35, %v4053_v0  ;;  %v2407_v42 = vmul.f32 %v9519_v48, %v11261_v33  ;;  %7060 = vpow2.f32 %v6413_v22  ;;  %v11310_v35 = vld [vmem:[#allocation83_spill] sm:$0xff] }
 0x2be   :  { %v4068_v61 = vadd.f32 %v4062_v30, %v9398_v17  ;;  %v9593_v44 = vadd.f32 %v3844_v40, %v3826_v34  ;;  %v11309_v24 = vrot.slane %v9500_v28, 5  ;;  %v3124_v43 = vrot.slane %v9525_v26, %v7958_v4 }
 0x2bf   :  { %7062 = vrcp.f32 %v4090_v58  ;;  %v4071_v8 = vadd.f32 %v4065_v41, %v9437_v7  ;;  %v2428_v39 = vmul.f32 %v9535_v47, %v11297_v46  ;;  %v3142_v17 = vrot.slane %v9525_v26, %v7961_v55 }
 0x2c0   :  { %v9597_v9 = vmul.f32 %v7045_v37, %v11309_v24  ;;  %v7051_v59 = vpop.eup %7050  ;;  %v6412_v48 = vmul.f32 -1.442695, %v4068_v61  ;;  %v2410_v28 = vadd.f32 %v2404_v63, %v9531_v5  ;;  %v6414_v22 = vmul.f32 -1.442695, %v4070_v23 }
 0x2c1   :  { %v7053_v37 = vpop.eup %7052  ;;  %7064 = vtanh.f32 %v4070_v23  ;;  %v3127_v7 = vmul.f32 %v3124_v43, %v11187_v32  ;;  %v2413_v34 = vadd.f32 %v2407_v42, %v2389_v10  ;;  %v3130_v15 = vmul.f32 %v3124_v43, %v8078_v3 }
 0x2c2   :  { %v3166_v40 = vrot.slane %v9597_v9, %v7964_v2  ;;  %7066 = vpow2.f32 %v6412_v48  ;;  %v3145_v1 = vmul.f32 %v3142_v17, %v11260_v6  ;;  %v3148_v19 = vmul.f32 %v3142_v17, %v11261_v33  ;;  %v11311_v17 = vld [vmem:[#allocation30_spill] sm:$0xff] }
 0x2c3   :  { %v3607_v36 = vrot.slane %v7051_v59, 1  ;;  %v2371_v27 = vadd.f32 %v11310_v35, %v11298_v31  ;;  %v2431_v5 = vmul.f32 %v9535_v47, %v11263_v45  ;;  %v2434_v58 = vadd.f32 %v2428_v39, %v2410_v28  ;;  %v11312_v39 = vld [vmem:[#allocation31_spill] sm:$0xff] }
 0x2c4   :  { %v3169_v0 = vmul.f32 %v3166_v40, %v11297_v46  ;;  %v7055_v23 = vpop.eup %7054  ;;  %v3151_v30 = vadd.f32 %v3145_v1, %v3127_v7  ;;  %v3154_v63 = vadd.f32 %v3148_v19, %v3130_v15  ;;  %v3172_v10 = vmul.f32 %v3166_v40, %v11263_v45  ;;  %v11314_v1 = vld [vmem:[#allocation34_spill] sm:$0xff] }
 0x2c5   :  { %v4091_v41 = vadd.f32 1.0, %v7055_v23  ;;  %v4117_v42 = vrot.slane %v7053_v37, 1  ;;  %7068 = vpow2.f32 %v6414_v22  ;;  %v2437_v61 = vadd.f32 %v2431_v5, %v2413_v34  ;;  %v7057_v24 = vpop.eup %7056  ;;  %v11313_v34 = vld [vmem:[#allocation28_spill] sm:$0xff] }
 0x2c6   :  { %v3175_v43 = vadd.f32 %v3169_v0, %v3151_v30  ;;  %v3178_v59 = vadd.f32 %v3172_v10, %v3154_v63  ;;  %v9620_v48 = vadd.f32 %v2434_v58, %v9470_v21  ;;  %v2686_v35 = vmul.f32 %v11311_v17, %v8072_v18  ;;  %v9624_v47 = vpop.eup %7058  ;;  %v11316_v30 = vld [vmem:[#allocation24_spill] sm:$0xff] }
 0x2c7   :  { %7070 = vrcp.f32 %v4091_v41  ;;  %v9626_v7 = vadd.f32 %v2437_v61, %v2371_v27  ;;  %v2701_v40 = vmul.f32 %v11312_v39, %v7875_v60  ;;  %v2704_v28 = vmul.f32 %v11312_v39, %v8029_v11  ;;  %v7061_v37 = vpop.eup %7060  ;;  %v11315_v27 = vld [vmem:[#allocation71_spill] sm:$0xff]  ;;  %v11317_v61 = vld [vmem:[#allocation33_spill] sm:$0xff] }
 0x2c8   :  { %v6415_v22 = vmul.f32 -1.442695, %v4071_v8  ;;  %v3601_v21 = vmul.f32 %v9624_v47, %v11313_v34  ;;  %v3613_v15 = vmul.f32 %v9624_v47, %v3607_v36  ;;  %v3181_v19 = vadd.f32 %v3175_v43, %v11314_v1 }
 0x2c9   :  { %v9636_v0 = vpop.eup %7062  ;;  %v3583_v5 = vadd.f32 1.0, %v7057_v24  ;;  %v9639_v23 = vadd.f32 %v3178_v59, %v11315_v27  ;;  %7072 = vtanh.f32 %v4071_v8  ;;  %v2707_v17 = vadd.f32 %v2701_v40, %v11317_v61  ;;  %v11319_v59 = vld [vmem:[#allocation32_spill] sm:$0xff]  ;;  %v11320_v8 = vld [vmem:[#allocation81_spill] sm:$0xff]  ;;  %v11321_v40 = vld [vmem:[#allocation82_spill] sm:$0xff] }
 0x2ca   :  { %v4111_v63 = vmul.f32 %v9636_v0, %v11316_v30  ;;  %v4123_v10 = vmul.f32 %v9636_v0, %v4117_v42  ;;  %v3619_v58 = vrot.slane %v3613_v15, 5  ;;  %v2710_v39 = vadd.f32 %v2704_v28, %v2686_v35 }
 0x2cb   :  { %v7065_v41 = vpop.eup %7064  ;;  %v4093_v34 = vadd.f32 1.0, %v7061_v37  ;;  %7074 = vpow2.f32 %v6415_v22  ;;  %v2725_v27 = vmul.f32 %v11319_v59, %v7953_v16  ;;  %v2728_v42 = vmul.f32 %v11319_v59, %v8090_v62 }
 0x2cc   :  { %v7067_v36 = vpop.eup %7066  ;;  %v4129_v43 = vrot.slane %v4123_v10, 5  ;;  %v9645_v1 = vadd.f32 %v3619_v58, %v3601_v21  ;;  %7076 = vrcp.f32 %v3583_v5  ;;  %v2542_v35 = vrot.slane %v11320_v8, 5  ;;  %v11324_v10 = vld [vmem:[#allocation78_spill] sm:$0xff]  ;;  %v11325_v58 = vld [vmem:[#allocation36_spill] sm:$0xff] }
 0x2cd   :  { %v4092_v24 = vadd.f32 1.0, %v7067_v36  ;;  %v2543_v28 = vrot.slane %v11321_v40, 5  ;;  %v4118_v22 = vrot.slane %v7065_v41, 1  ;;  %v9656_v21 = vadd.f32 %v2725_v27, %v2707_v17  ;;  %v11327_v40 = vld [vmem:[#allocation9_spill] sm:$0xff] }
 0x2ce   :  { %11318 = vst [vmem:[#allocation42_spill] sm:$0xff] %v9645_v1  ;;  %v9651_v15 = vadd.f32 %v4129_v43, %v4111_v63  ;;  %7078 = vtanh.f32 %v9645_v1  ;;  %v9658_v5 = vadd.f32 %v2728_v42, %v2710_v39  ;;  %v2539_v63 = vrot.slane %v11324_v10, 5  ;;  %v11326_v43 = vld [vmem:[#allocation87_spill] sm:$0xff] }
 0x2cf   :  { %v7069_v37 = vpop.eup %7068  ;;  %7080 = vrcp.f32 %v4092_v24  ;;  %11322 = vst [vmem:[#allocation46_spill] sm:$0xff] %v9656_v21  ;;  %v2544_v30 = vsel %vm182_vm0, %v2542_v35, %v2543_v28  ;;  %v2540_v61 = vrot.slane %v11325_v58, 5  ;;  %v6382_v42 = vmul.f32 -1.442695, %v3181_v19  ;;  %v11328_v28 = vld [vmem:[#allocation52_spill] sm:$0xff]  ;;  %v11332_v19 = vld [vmem:[#allocation61_spill] sm:$0xff] }
 0x2d0   :  { %11323 = vst [vmem:[#allocation35_spill] sm:$0xff] %v9658_v5  ;;  %7082 = vtanh.f32 %v9651_v15  ;;  %2550 = vst [vmem:[#allocation2 + $0x28] sm:$0xe] %v2544_v30  ;;  %v4094_v39 = vadd.f32 1.0, %v7069_v37  ;;  %v3821_v35 = vmul.f32 %v9557_v13, %v8029_v11  ;;  %v9674_v30 = vadd.f32 %v11328_v28, %v11327_v40  ;;  %v11330_v58 = vld [vmem:[#allocation56_spill] sm:$0xff]  ;;  %v11331_v37 = vld [vmem:[#allocation59_spill] sm:$0xff] }
 0x2d1   :  { %v9664_v36 = vpop.eup %7070  ;;  %7084 = vrcp.f32 %v4093_v34  ;;  %v2541_v17 = vsel %vm182_vm0, %v2539_v63, %v2540_v61  ;;  %v9684_v61 = vadd.f32 %v11331_v37, %v11327_v40  ;;  %v11333_v28 = vld [vmem:[#allocation63_spill] sm:$0xff]  ;;  %v3845_v14 = vmul.f32 %v9560_v12, %v8090_v62  ;;  %v11335_v5 = vld [vmem:[#allocation65_spill] sm:$0xff]  ;;  %v11338_v21 = vld [vmem:[#allocation14_spill] sm:$0xff] }
 0x2d2   :  { %v4112_v24 = vmul.f32 %v9664_v36, %v11326_v43  ;;  %v4124_v41 = vmul.f32 %v9664_v36, %v4118_v22  ;;  %2549 = vst [vmem:[#allocation2 + $0x20] sm:$0xe] %v2541_v17  ;;  %7086 = vrcp.f32 %v4094_v39  ;;  %v11329_v22 = vld [vmem:[#allocation12_spill] sm:$0xff]  ;;  %v9688_v43 = vadd.f32 %v11332_v19, %v11327_v40 }
 0x2d3   :  { %v7073_v27 = vpop.eup %7072  ;;  %v9680_v63 = vadd.f32 %v11330_v58, %v11329_v22  ;;  %v3803_v17 = vmul.f32 %v9554_v25, %v8072_v18  ;;  %v9698_v58 = vadd.f32 %v11333_v28, %v11329_v22 }
 0x2d4   :  { %v4130_v59 = vrot.slane %v4124_v41, 5  ;;  %v4119_v41 = vrot.slane %v7073_v27, 1 }
 0x2d5   :  { %v7075_v8 = vpop.eup %7074  ;;  %v3827_v51 = vadd.f32 %v3821_v35, %v3803_v17 }
 0x2d6   :  { %v9676_v34 = vadd.f32 %v4130_v59, %v4112_v24  ;;  %v7077_v10 = vpop.eup %7076  ;;  %v6385_v24 = vmul.f32 -1.442695, %v9639_v23  ;;  %v4095_v59 = vadd.f32 1.0, %v7075_v8  ;;  %v9707_v8 = vadd.f32 %v11335_v5, %v11329_v22 }
 0x2d7   :  { %v9718_v35 = vadd.f32 %v3845_v14, %v3827_v51  ;;  %v9733_v51 = vadd.f32 %v9593_v44, %v11298_v31  ;;  %v6356_v44 = vmul.f32 -1.442695, %v9620_v48 }
 0x2d8   :  { %v7079_v13 = vpop.eup %7078  ;;  %7088 = vtanh.f32 %v9676_v34 }
 0x2d9   :  { %v9694_v39 = vpop.eup %7080  ;;  %v3634_v37 = vrot.slane %v7079_v13, 5  ;;  %7090 = vpow2.f32 %v6382_v42  ;;  %11339 = vst [vmem:[#allocation51_spill] sm:$0xff] %v9718_v35 }
 0x2da   :  { %v7083_v19 = vpop.eup %7082  ;;  %v4113_v27 = vmul.f32 %v9694_v39, %v11334_v57  ;;  %v4125_v29 = vmul.f32 %v9694_v39, %v4119_v41  ;;  %v9716_v57 = vmul.f32 %v11338_v21, %v7857_v38  ;;  %7092 = vpow2.f32 %v6385_v24 }
 0x2db   :  { %v4144_v25 = vrot.slane %v7083_v19, 5  ;;  %v9710_v28 = vmul.f32 %v9624_v47, %v3634_v37  ;;  %v9712_v13 = vmul.f32 %v7077_v10, %v3634_v37  ;;  %v7085_v42 = vpop.eup %7084  ;;  %v11340_v10 = vld [vmem:[#allocation48_spill] sm:$0xff]  ;;  %7094 = vrcp.f32 %v4095_v59 }
 0x2dc   :  { %v4131_v41 = vrot.slane %v4125_v29, 5  ;;  %v9727_v37 = vadd.f32 %v9548_v20, %v11340_v10  ;;  %7096 = vtanh.f32 %v9639_v23  ;;  %v7087_v59 = vpop.eup %7086 }
 0x2dd   :  { %11336 = vst [vmem:[#allocation49_spill] sm:$0xff] %v9710_v28  ;;  %11337 = vst [vmem:[#allocation50_spill] sm:$0xff] %v9712_v13  ;;  %v4150_v12 = vmul.f32 %v9636_v0, %v4144_v25  ;;  %v4153_v17 = vmul.f32 %v7085_v42, %v4144_v25  ;;  %v3865_v5 = vrot.slane %v9710_v28, %v7958_v4 }
 0x2de   :  { %v3883_v47 = vrot.slane %v9710_v28, %v7961_v55  ;;  %v9729_v19 = vadd.f32 %v4131_v41, %v4113_v27  ;;  %v3907_v23 = vrot.slane %v9712_v13, %v7964_v2 }
 0x2df   :  { %v9736_v29 = vrot.slane %v4150_v12, %v7958_v4  ;;  %v9739_v14 = vrot.slane %v4150_v12, %v7961_v55  ;;  %v9742_v0 = vrot.slane %v4153_v17, %v7964_v2  ;;  %v3871_v20 = vmul.f32 %v3865_v5, %v11187_v32 }
 0x2e0   :  { %11341 = vst [vmem:[#allocation53_spill] sm:$0xff] %v9729_v19  ;;  %7098 = vtanh.f32 %v9729_v19  ;;  %v3889_v24 = vmul.f32 %v3883_v47, %v11260_v6  ;;  %v3874_v42 = vmul.f32 %v3865_v5, %v8078_v3  ;;  %v3892_v28 = vmul.f32 %v3883_v47, %v11261_v33 }
 0x2e1   :  { %11342 = vst [vmem:[#allocation54_spill] sm:$0xff] %v9736_v29  ;;  %11343 = vst [vmem:[#allocation55_spill] sm:$0xff] %v9739_v14  ;;  %v4168_v27 = vmul.f32 %v9736_v29, %v7857_v38  ;;  %v4186_v25 = vmul.f32 %v9739_v14, %v7875_v60  ;;  %v4405_v12 = vmul.f32 %v9736_v29, %v7811_v50  ;;  %7100 = vpow2.f32 %v6356_v44 }
 0x2e2   :  { %11344 = vst [vmem:[#allocation38_spill] sm:$0xff] %v9742_v0  ;;  %v7089_v41 = vpop.eup %7088  ;;  %v4408_v17 = vmul.f32 %v9736_v29, %v7817_v53  ;;  %v4411_v48 = vmul.f32 %v9739_v14, %v7815_v52  ;;  %v4210_v5 = vmul.f32 %v9742_v0, %v7953_v16  ;;  %v4414_v13 = vmul.f32 %v9739_v14, %v7819_v54 }
 0x2e3   :  { %v7091_v35 = vpop.eup %7090  ;;  %v4145_v22 = vrot.slane %v7089_v41, 5  ;;  %v4192_v1 = vadd.f32 %v4186_v25, %v4168_v27  ;;  %v4423_v6 = vmul.f32 %v9742_v0, %v7809_v49  ;;  %v4426_v29 = vmul.f32 %v9742_v0, %v11307_v56 }
 0x2e4   :  { %v4417_v19 = vadd.f32 %v4411_v48, %v4405_v12  ;;  %v3895_v3 = vadd.f32 %v3889_v24, %v3871_v20  ;;  %v4420_v47 = vadd.f32 %v4414_v13, %v4408_v17  ;;  %v9774_v25 = vpop.eup %7092  ;;  %v3898_v31 = vadd.f32 %v3892_v28, %v3874_v42 }
 0x2e5   :  { %v9771_v32 = vadd.f32 %v4210_v5, %v4192_v1  ;;  %v4151_v41 = vmul.f32 %v9664_v36, %v4145_v22  ;;  %v4154_v27 = vmul.f32 %v7087_v59, %v4145_v22  ;;  %v3913_v14 = vmul.f32 %v3907_v23, %v11297_v46  ;;  %v7095_v1 = vpop.eup %7094 }
 0x2e6   :  { %v4429_v33 = vadd.f32 %v4423_v6, %v4417_v19  ;;  %v3916_v12 = vmul.f32 %v3907_v23, %v11263_v45  ;;  %v4432_v48 = vadd.f32 %v4426_v29, %v4420_v47  ;;  %v3205_v20 = vadd.f32 1.0, %v7091_v35  ;;  %v9784_v6 = vpop.eup %7096 }
 0x2e7   :  { %11345 = vst [vmem:[#allocation76_spill] sm:$0xff] %v9771_v32  ;;  %v4163_v40 = vrot.slane %v4151_v41, %v7958_v4  ;;  %v4181_v0 = vrot.slane %v4151_v41, %v7961_v55  ;;  %v4205_v36 = vrot.slane %v4154_v27, %v7964_v2  ;;  %v3919_v22 = vadd.f32 %v3913_v14, %v3895_v3 }
 0x2e8   :  { %v4435_v13 = vadd.f32 %v4429_v33, %v9674_v30  ;;  %v9782_v24 = vadd.f32 %v3916_v12, %v3898_v31  ;;  %v4438_v28 = vadd.f32 %v4432_v48, %v9680_v63  ;;  %v9792_v33 = vmul.f32 -1.442695, %v9626_v7 }
 0x2e9   :  { %v4169_v19 = vmul.f32 %v4163_v40, %v7857_v38  ;;  %v4172_v29 = vmul.f32 %v4163_v40, %v8072_v18  ;;  %v4187_v59 = vmul.f32 %v4181_v0, %v7875_v60  ;;  %v4190_v23 = vmul.f32 %v4181_v0, %v8029_v11 }
 0x2ea   :  { %v7099_v42 = vpop.eup %7098  ;;  %v6422_v35 = vmul.f32 -1.442695, %v4435_v13  ;;  %v4211_v30 = vmul.f32 %v4205_v36, %v7953_v16  ;;  %v4214_v63 = vmul.f32 %v4205_v36, %v8090_v62  ;;  %v4406_v17 = vmul.f32 %v4163_v40, %v7811_v50 }
 0x2eb   :  { %v4146_v3 = vrot.slane %v7099_v42, 5  ;;  %v4193_v31 = vadd.f32 %v4187_v59, %v4169_v19  ;;  %v4196_v14 = vadd.f32 %v4190_v23, %v4172_v29  ;;  %v4412_v5 = vmul.f32 %v4181_v0, %v7815_v52 }
 0x2ec   :  { %7102 = vpow2.f32 %v6422_v35  ;;  %v6425_v47 = vmul.f32 -1.442695, %v4438_v28  ;;  %v4424_v48 = vmul.f32 %v4205_v36, %v7809_v49  ;;  %v4409_v59 = vmul.f32 %v4163_v40, %v7817_v53 }
 0x2ed   :  { %v9798_v41 = vadd.f32 %v4211_v30, %v4193_v31  ;;  %v4152_v44 = vmul.f32 %v9694_v39, %v4146_v3  ;;  %7104 = vrcp.f32 %v3205_v20  ;;  %v9801_v27 = vadd.f32 %v4214_v63, %v4196_v14 }
 0x2ee   :  { %v4418_v12 = vadd.f32 %v4412_v5, %v4406_v17  ;;  %v4155_v13 = vmul.f32 %v7095_v1, %v4146_v3  ;;  %7106 = vtanh.f32 %v4438_v28  ;;  %v4415_v23 = vmul.f32 %v4181_v0, %v7819_v54  ;;  %v7101_v17 = vpop.eup %7100 }
 0x2ef   :  { %v4167_v19 = vrot.slane %v4152_v44, %v7958_v4  ;;  %v4185_v29 = vrot.slane %v4152_v44, %v7961_v55  ;;  %v3925_v39 = vadd.f32 %v3919_v22, %v9727_v37  ;;  %v4427_v63 = vmul.f32 %v4205_v36, %v11307_v56 }
 0x2f0   :  { %v4430_v42 = vadd.f32 %v4424_v48, %v4418_v12  ;;  %v4209_v35 = vrot.slane %v4155_v13, %v7964_v2  ;;  %v4421_v44 = vadd.f32 %v4415_v23, %v4409_v59  ;;  %v11348_v59 = vld [vmem:[#allocation15_spill] sm:$0xff] }
 0x2f1   :  { %v4170_v20 = vmul.f32 %v4167_v19, %v7857_v38  ;;  %v4173_v31 = vmul.f32 %v4167_v19, %v8072_v18  ;;  %v4188_v1 = vmul.f32 %v4185_v29, %v7875_v60  ;;  %v4191_v28 = vmul.f32 %v4185_v29, %v8029_v11 }
 0x2f2   :  { %v4436_v3 = vadd.f32 %v4430_v42, %v9684_v61  ;;  %v4212_v30 = vmul.f32 %v4209_v35, %v7953_v16  ;;  %v4407_v40 = vmul.f32 %v4167_v19, %v7811_v50  ;;  %v4215_v37 = vmul.f32 %v4209_v35, %v8090_v62 }
 0x2f3   :  { %v4194_v14 = vadd.f32 %v4188_v1, %v4170_v20  ;;  %v4197_v0 = vadd.f32 %v4191_v28, %v4173_v31  ;;  %v4413_v22 = vmul.f32 %v4185_v29, %v7815_v52  ;;  %v4410_v12 = vmul.f32 %v4167_v19, %v7817_v53 }
 0x2f4   :  { %v6423_v5 = vmul.f32 -1.442695, %v4436_v3  ;;  %v4416_v48 = vmul.f32 %v4185_v29, %v7819_v54  ;;  %v4425_v36 = vmul.f32 %v4209_v35, %v7809_v49  ;;  %v4433_v31 = vadd.f32 %v4427_v63, %v4421_v44 }
 0x2f5   :  { %v9822_v61 = vadd.f32 %v4212_v30, %v4194_v14  ;;  %v9824_v13 = vadd.f32 %v4215_v37, %v4197_v0  ;;  %v4419_v42 = vadd.f32 %v4413_v22, %v4407_v40  ;;  %v4428_v28 = vmul.f32 %v4209_v35, %v11307_v56  ;;  %v11349_v22 = vld [vmem:[#allocation19_spill] sm:$0xff] }
 0x2f6   :  { %v7103_v20 = vpop.eup %7102  ;;  %7108 = vpow2.f32 %v6423_v5  ;;  %v4422_v1 = vadd.f32 %v4416_v48, %v4410_v12  ;;  %v3071_v19 = vmul.f32 %v11348_v59, %v7875_v60  ;;  %v3928_v3 = vadd.f32 %v9782_v24, %v9733_v51 }
 0x2f7   :  { %11346 = vst [vmem:[#allocation73_spill] sm:$0xff] %v9822_v61  ;;  %11347 = vst [vmem:[#allocation83_spill] sm:$0xff] %v9824_v13  ;;  %v9828_v32 = vpop.eup %7104  ;;  %v4459_v23 = vadd.f32 1.0, %v7103_v20  ;;  %v4431_v29 = vadd.f32 %v4425_v36, %v4419_v42  ;;  %7110 = vpow2.f32 %v6425_v47  ;;  %v4439_v30 = vadd.f32 %v4433_v31, %v9698_v58  ;;  %v11353_v36 = vld [vmem:[#allocation85_spill] sm:$0xff]  ;;  %v11373_v61 = vld [vmem:[#allocation42_spill] sm:$0xff] }
 0x2f8   :  { %v4434_v40 = vadd.f32 %v4428_v28, %v4422_v1  ;;  %v3208_v14 = vadd.f32 1.0, %v9774_v25  ;;  %v7107_v63 = vpop.eup %7106  ;;  %v3232_v0 = vrot.slane %v9784_v6, 1  ;;  %v3226_v5 = vmul.f32 %v9828_v32, %v11349_v22 }
 0x2f9   :  { %7112 = vrcp.f32 %v4459_v23  ;;  %v4437_v35 = vadd.f32 %v4431_v29, %v9688_v43  ;;  %v3077_v25 = vadd.f32 %v3071_v19, %v9716_v57  ;;  %v6405_v24 = vmul.f32 -1.442695, %v3925_v39 }
 0x2fa   :  { %v9839_v37 = vadd.f32 %v4434_v40, %v9707_v8  ;;  %7114 = vpow2.f32 %v9792_v33  ;;  %v3238_v58 = vmul.f32 %v9828_v32, %v3232_v0  ;;  %v3056_v8 = vmul.f32 %v11338_v21, %v8072_v18  ;;  %v11350_v33 = vld [vmem:[#allocation37_spill] sm:$0xff] }
 0x2fb   :  { %v6424_v51 = vmul.f32 -1.442695, %v4437_v35  ;;  %7116 = vtanh.f32 %v9626_v7  ;;  %v3074_v6 = vmul.f32 %v11348_v59, %v8029_v11  ;;  %v6426_v47 = vmul.f32 -1.442695, %v4439_v30  ;;  %v11355_v59 = vld [vmem:[#allocation86_spill] sm:$0xff] }
 0x2fc   :  { %7118 = vrcp.f32 %v3208_v14  ;;  %v3244_v43 = vrot.slane %v3238_v58, 5  ;;  %v3095_v44 = vmul.f32 %v11350_v33, %v7953_v16  ;;  %v3098_v7 = vmul.f32 %v11350_v33, %v8090_v62 }
 0x2fd   :  { %7120 = vpow2.f32 %v6424_v51  ;;  %v3080_v57 = vadd.f32 %v3074_v6, %v3056_v8  ;;  %v2912_v39 = vrot.slane %v9525_v26, 2  ;;  %v2913_v42 = vrot.slane %v9597_v9, 2 }
 0x2fe   :  { %7122 = vtanh.f32 %v4439_v30  ;;  %v9855_v12 = vadd.f32 %v3244_v43, %v3226_v5  ;;  %v9858_v21 = vadd.f32 %v3095_v44, %v3077_v25  ;;  %v2909_v20 = vrot.slane %v11353_v36, 2 }
 0x2ff   :  { %7124 = vpow2.f32 %v6405_v24  ;;  %v2464_v1 = vadd.f32 1.0, %v7101_v17  ;;  %v9862_v28 = vadd.f32 %v3098_v7, %v3080_v57  ;;  %v2910_v19 = vrot.slane %v11355_v59, 2  ;;  %v11359_v59 = vld [vmem:[#allocation60_spill] sm:$0xff] }
 0x300   :  { %11351 = vst [vmem:[#allocation30_spill] sm:$0xff] %v9855_v12  ;;  %v7109_v48 = vpop.eup %7108  ;;  %11352 = vst [vmem:[#allocation31_spill] sm:$0xff] %v9858_v21  ;;  %v4486_v29 = vrot.slane %v7107_v63, 1  ;;  %7126 = vpow2.f32 %v6426_v47  ;;  %v2914_v30 = vsel %vm2905_vm5, %v2912_v39, %v2913_v42  ;;  %v6408_v24 = vmul.f32 -1.442695, %v3928_v3 }
 0x301   :  { %v4460_v31 = vadd.f32 1.0, %v7109_v48  ;;  %11354 = vst [vmem:[#allocation28_spill] sm:$0xff] %v9862_v28  ;;  %v7111_v23 = vpop.eup %7110  ;;  %2920 = vst [vmem:[#allocation2 + $0x28] sm:$0x70] %v2914_v30  ;;  %v2911_v40 = vsel %vm2905_vm5, %v2909_v20, %v2910_v19  ;;  %v11357_v20 = vld [vmem:[#allocation23_spill] sm:$0xff] }
 0x302   :  { %2919 = vst [vmem:[#allocation2 + $0x20] sm:$0x70] %v2911_v40  ;;  %v4462_v63 = vadd.f32 1.0, %v7111_v23  ;;  %v11362_v40 = vld [vmem:[#allocation72_spill] sm:$0xff] }
 0x303   :  { %v9866_v26 = vpop.eup %7112  ;;  %7128 = vrcp.f32 %v4460_v31  ;;  %v9887_v31 = vadd.f32 %v11357_v20, %v11340_v10 }
 0x304   :  { %v7115_v9 = vpop.eup %7114  ;;  %v4480_v14 = vmul.f32 %v9866_v26, %v9651_v15  ;;  %v4492_v17 = vmul.f32 %v9866_v26, %v4486_v29  ;;  %7130 = vtanh.f32 %v9855_v12 }
 0x305   :  { %v7117_v35 = vpop.eup %7116  ;;  %7132 = vrcp.f32 %v2464_v1  ;;  %v11358_v1 = vld [vmem:[#allocation9_spill] sm:$0xff] }
 0x306   :  { %v7119_v0 = vpop.eup %7118  ;;  %v4498_v22 = vrot.slane %v4492_v17, 5  ;;  %7134 = vtanh.f32 %v9839_v37  ;;  %v2491_v57 = vrot.slane %v7117_v35, 1  ;;  %v9891_v19 = vadd.f32 %v11359_v59, %v11358_v1  ;;  %v11371_v59 = vld [vmem:[#allocation53_spill] sm:$0xff] }
 0x307   :  { %v7121_v5 = vpop.eup %7120  ;;  %7136 = vtanh.f32 %v3928_v3  ;;  %v6427_v3 = vmul.f32 -1.442695, %v9839_v37  ;;  %v9903_v35 = vadd.f32 1.0, %v7115_v9 }
 0x308   :  { %v7123_v51 = vpop.eup %7122  ;;  %v9874_v58 = vadd.f32 %v4498_v22, %v4480_v14  ;;  %v4461_v25 = vadd.f32 1.0, %v7121_v5  ;;  %7138 = vrcp.f32 %v4462_v63  ;;  %v11363_v14 = vld [vmem:[#allocation25_spill] sm:$0xff]  ;;  %v11365_v22 = vld [vmem:[#allocation75_spill] sm:$0xff] }
 0x309   :  { %v7125_v15 = vpop.eup %7124  ;;  %v4487_v6 = vrot.slane %v7123_v51, 1  ;;  %v9901_v17 = vadd.f32 %v11363_v14, %v11362_v40  ;;  %v11372_v14 = vld [vmem:[#allocation70_spill] sm:$0xff] }
 0x30a   :  { %11356 = vst [vmem:[#allocation34_spill] sm:$0xff] %v9874_v58  ;;  %7140 = vtanh.f32 %v9874_v58  ;;  %v3949_v43 = vadd.f32 1.0, %v7125_v15  ;;  %v7127_v8 = vpop.eup %7126 }
 0x30b   :  { %7142 = vrcp.f32 %v4461_v25  ;;  %v4463_v48 = vadd.f32 1.0, %v7127_v8 }
 0x30c   :  { %7144 = vpow2.f32 %v6408_v24 }
 0x30d   :  { %v9877_v47 = vpop.eup %7128  ;;  %7146 = vrcp.f32 %v3949_v43 }
 0x30e   :  { %v7131_v33 = vpop.eup %7130  ;;  %v4481_v44 = vmul.f32 %v9877_v47, %v9676_v34  ;;  %v4493_v7 = vmul.f32 %v9877_v47, %v4487_v6  ;;  %7148 = vpow2.f32 %v6427_v3  ;;  %v11369_v3 = vld [vmem:[#allocation68_spill] sm:$0xff] }
 0x30f   :  { %v9883_v39 = vpop.eup %7132  ;;  %v3259_v42 = vrot.slane %v7131_v33, 5  ;;  %7150 = vrcp.f32 %v4463_v48  ;;  %v11370_v48 = vld [vmem:[#allocation29_spill] sm:$0xff] }
 0x310   :  { %v7135_v36 = vpop.eup %7134  ;;  %v4499_v23 = vrot.slane %v4493_v7, 5  ;;  %v2497_v34 = vmul.f32 %v9883_v39, %v2491_v57  ;;  %v2485_v5 = vmul.f32 %v9883_v39, %v11365_v22 }
 0x311   :  { %v7137_v29 = vpop.eup %7136  ;;  %v9895_v37 = vmul.f32 %v9828_v32, %v3259_v42  ;;  %v9897_v30 = vmul.f32 %v7119_v0, %v3259_v42  ;;  %v4488_v15 = vrot.slane %v7135_v36, 1 }
 0x312   :  { %v9905_v63 = vadd.f32 %v4499_v23, %v4481_v44  ;;  %v2503_v51 = vrot.slane %v2497_v34, 5  ;;  %v7139_v25 = vpop.eup %7138  ;;  %v3976_v43 = vrot.slane %v7137_v29, 1  ;;  %v11368_v44 = vld [vmem:[#allocation57_spill] sm:$0xff] }
 0x313   :  { %11360 = vst [vmem:[#allocation71_spill] sm:$0xff] %v9895_v37  ;;  %11361 = vst [vmem:[#allocation24_spill] sm:$0xff] %v9897_v30  ;;  %v3500_v32 = vrot.slane %v9895_v37, %v7958_v4  ;;  %v3518_v0 = vrot.slane %v9895_v37, %v7961_v55  ;;  %v3542_v24 = vrot.slane %v9897_v30, %v7964_v2 }
 0x314   :  { %11364 = vst [vmem:[#allocation33_spill] sm:$0xff] %v9905_v63  ;;  %v7141_v9 = vpop.eup %7140  ;;  %7152 = vtanh.f32 %v9905_v63  ;;  %v9916_v8 = vadd.f32 %v2503_v51, %v2485_v5 }
 0x315   :  { %v9918_v6 = vpop.eup %7142  ;;  %v4513_v33 = vrot.slane %v7141_v9, 5  ;;  %v3503_v7 = vmul.f32 %v3500_v32, %v11368_v44  ;;  %v3506_v57 = vmul.f32 %v3500_v32, %v11369_v3  ;;  %v3521_v42 = vmul.f32 %v3518_v0, %v11370_v48 }
 0x316   :  { %11366 = vst [vmem:[#allocation32_spill] sm:$0xff] %v9916_v8  ;;  %11367 = vst [vmem:[#allocation81_spill] sm:$0xff] %v9918_v6  ;;  %v7145_v20 = vpop.eup %7144  ;;  %v4482_v23 = vmul.f32 %v9918_v6, %v11371_v59  ;;  %v4494_v34 = vmul.f32 %v9918_v6, %v4488_v15  ;;  %v3524_v36 = vmul.f32 %v3518_v0, %v11372_v14  ;;  %7154 = vtanh.f32 %v9916_v8 }
 0x317   :  { %v3545_v29 = vmul.f32 %v3542_v24, %v11297_v46  ;;  %v9928_v22 = vpop.eup %7146  ;;  %v4519_v5 = vmul.f32 %v9866_v26, %v4513_v33  ;;  %v4522_v51 = vmul.f32 %v7139_v25, %v4513_v33  ;;  %v3527_v9 = vadd.f32 %v3521_v42, %v3503_v7 }
 0x318   :  { %v3548_v32 = vmul.f32 %v3542_v24, %v11263_v45  ;;  %v4500_v13 = vrot.slane %v4494_v34, 5  ;;  %v3970_v28 = vmul.f32 %v9928_v22, %v11373_v61  ;;  %v3982_v59 = vmul.f32 %v9928_v22, %v3976_v43 }
 0x319   :  { %v3530_v21 = vadd.f32 %v3524_v36, %v3506_v57  ;;  %v4528_v15 = vrot.slane %v4519_v5, %v7958_v4  ;;  %v4546_v0 = vrot.slane %v4519_v5, %v7961_v55  ;;  %v4570_v63 = vrot.slane %v4522_v51, %v7964_v2  ;;  %v9944_v57 = vpop.eup %7148 }
 0x31a   :  { %v3551_v6 = vadd.f32 %v3545_v29, %v3527_v9  ;;  %v9938_v12 = vadd.f32 %v4500_v13, %v4482_v23  ;;  %v3952_v26 = vadd.f32 1.0, %v7145_v20  ;;  %v3988_v25 = vrot.slane %v3982_v59, 5  ;;  %v7151_v20 = vpop.eup %7150 }
 0x31b   :  { %v3554_v33 = vadd.f32 %v3548_v32, %v3530_v21  ;;  %v4537_v24 = vmul.f32 %v4528_v15, %v7857_v38  ;;  %v4540_v7 = vmul.f32 %v4528_v15, %v8072_v18  ;;  %v4555_v61 = vmul.f32 %v4546_v0, %v7875_v60 }
 0x31c   :  { %11374 = vst [vmem:[#allocation82_spill] sm:$0xff] %v9938_v12  ;;  %v4558_v43 = vmul.f32 %v4546_v0, %v8029_v11  ;;  %v4579_v42 = vmul.f32 %v4570_v63, %v7953_v16  ;;  %v4774_v34 = vmul.f32 %v4528_v15, %v7811_v50  ;;  %v4780_v13 = vmul.f32 %v4546_v0, %v7815_v52 }
 0x31d   :  { %v4561_v21 = vadd.f32 %v4555_v61, %v4537_v24  ;;  %v4582_v36 = vmul.f32 %v4570_v63, %v8090_v62  ;;  %v4777_v29 = vmul.f32 %v4528_v15, %v7817_v53  ;;  %v4792_v9 = vmul.f32 %v4570_v63, %v7809_v49 }
 0x31e   :  { %v4564_v23 = vadd.f32 %v4558_v43, %v4540_v7  ;;  %v7153_v5 = vpop.eup %7152  ;;  %v4786_v51 = vadd.f32 %v4780_v13, %v4774_v34  ;;  %v4783_v32 = vmul.f32 %v4546_v0, %v7819_v54  ;;  %v4795_v59 = vmul.f32 %v4570_v63, %v11307_v56  ;;  %v11377_v43 = vld [vmem:[#allocation12_spill] sm:$0xff] }
 0x31f   :  { %v9955_v30 = vadd.f32 %v4579_v42, %v4561_v21  ;;  %v4514_v8 = vrot.slane %v7153_v5, 5  ;;  %v9959_v37 = vadd.f32 %v3988_v25, %v3970_v28  ;;  %v3557_v61 = vadd.f32 %v3551_v6, %v9887_v31  ;;  %v11378_v34 = vld [vmem:[#allocation64_spill] sm:$0xff] }
 0x320   :  { %v9957_v58 = vadd.f32 %v4582_v36, %v4564_v23  ;;  %v4798_v24 = vadd.f32 %v4792_v9, %v4786_v51  ;;  %v4789_v7 = vadd.f32 %v4783_v32, %v4777_v29  ;;  %v9963_v15 = vadd.f32 %v3554_v33, %v9901_v17 }
 0x321   :  { %11375 = vst [vmem:[#allocation78_spill] sm:$0xff] %v9955_v30  ;;  %v978_v13 = vadd.f32 %v11378_v34, %v11377_v43  ;;  %7156 = vtanh.f32 %v9959_v37  ;;  %v4520_v63 = vmul.f32 %v9877_v47, %v4514_v8  ;;  %v4523_v0 = vmul.f32 %v7151_v20, %v4514_v8 }
 0x322   :  { %11376 = vst [vmem:[#allocation36_spill] sm:$0xff] %v9957_v58  ;;  %v4804_v42 = vadd.f32 %v4798_v24, %v9891_v19  ;;  %v4801_v21 = vadd.f32 %v4795_v59, %v4789_v7  ;;  %v6394_v28 = vmul.f32 -1.442695, %v3557_v61  ;;  %7158 = vrcp.f32 %v9903_v35  ;;  %v7155_v35 = vpop.eup %7154  ;;  %v11395_v58 = vld [vmem:[#allocation81_spill] sm:$0xff] }
 0x323   :  { %7160 = vrcp.f32 %v3952_v26  ;;  %v4532_v31 = vrot.slane %v4520_v63, %v7958_v4  ;;  %v4550_v17 = vrot.slane %v4520_v63, %v7961_v55  ;;  %v4574_v6 = vrot.slane %v4523_v0, %v7964_v2  ;;  %v11380_v0 = vld [vmem:[#allocation62_spill] sm:$0xff] }
 0x324   :  { %v6434_v25 = vmul.f32 -1.442695, %v4804_v42  ;;  %v9974_v33 = vadd.f32 %v4801_v21, %v978_v13  ;;  %7162 = vpow2.f32 %v6394_v28  ;;  %v976_v42 = vadd.f32 %v11380_v0, %v11358_v1 }
 0x325   :  { %v4538_v47 = vmul.f32 %v4532_v31, %v7857_v38  ;;  %v4541_v8 = vmul.f32 %v4532_v31, %v8072_v18  ;;  %v4556_v19 = vmul.f32 %v4550_v17, %v7875_v60  ;;  %v4559_v20 = vmul.f32 %v4550_v17, %v8029_v11 }
 0x326   :  { %11379 = vst [vmem:[#allocation87_spill] sm:$0xff] %v9974_v33  ;;  %7164 = vpow2.f32 %v6434_v25  ;;  %v4580_v26 = vmul.f32 %v4574_v6, %v7953_v16  ;;  %v4583_v29 = vmul.f32 %v4574_v6, %v8090_v62  ;;  %v4775_v5 = vmul.f32 %v4532_v31, %v7811_v50 }
 0x327   :  { %v4562_v23 = vadd.f32 %v4556_v19, %v4538_v47  ;;  %v4565_v36 = vadd.f32 %v4559_v20, %v4541_v8  ;;  %v4778_v51 = vmul.f32 %v4532_v31, %v7817_v53  ;;  %v4781_v9 = vmul.f32 %v4550_v17, %v7815_v52  ;;  %v11381_v31 = vld [vmem:[#allocation66_spill] sm:$0xff] }
 0x328   :  { %v4784_v32 = vmul.f32 %v4550_v17, %v7819_v54  ;;  %v4793_v34 = vmul.f32 %v4574_v6, %v7809_v49  ;;  %v4796_v13 = vmul.f32 %v4574_v6, %v11307_v56  ;;  %v2518_v21 = vrot.slane %v7155_v35, 5  ;;  %v11382_v6 = vld [vmem:[#allocation46_spill] sm:$0xff]  ;;  %v11406_v56 = vld [vmem:[#allocation45_spill] sm:$0xff] }
 0x329   :  { %v9986_v59 = vadd.f32 %v4580_v26, %v4562_v23  ;;  %v9988_v24 = vadd.f32 %v4583_v29, %v4565_v36  ;;  %v4787_v7 = vadd.f32 %v4781_v9, %v4775_v5  ;;  %v980_v25 = vadd.f32 %v11381_v31, %v11377_v43 }
 0x32a   :  { %v4790_v61 = vadd.f32 %v4784_v32, %v4778_v51  ;;  %v9997_v20 = vmul.f32 %v9883_v39, %v2518_v21  ;;  %v10003_v23 = vadd.f32 %v11382_v6, %v11340_v10  ;;  %v4223_v9 = vadd.f32 %v9798_v41, %v11340_v10 }
 0x32b   :  { %v7157_v63 = vpop.eup %7156  ;;  %v4799_v47 = vadd.f32 %v4793_v34, %v4787_v7  ;;  %7166 = vtanh.f32 %v9974_v33  ;;  %v4226_v39 = vadd.f32 %v9801_v27, %v11362_v40  ;;  %v6397_v0 = vmul.f32 -1.442695, %v9963_v15 }
 0x32c   :  { %v7159_v28 = vpop.eup %7158  ;;  %v4003_v17 = vrot.slane %v7157_v63, 5  ;;  %v4802_v8 = vadd.f32 %v4796_v13, %v4790_v61  ;;  %v2746_v32 = vrot.slane %v9997_v20, %v7958_v4  ;;  %v4464_v63 = vadd.f32 1.0, %v9944_v57 }
 0x32d   :  { %v7161_v19 = vpop.eup %7160  ;;  %v9999_v26 = vmul.f32 %v7159_v28, %v2518_v21  ;;  %v4805_v5 = vadd.f32 %v4799_v47, %v976_v42  ;;  %v2764_v27 = vrot.slane %v9997_v20, %v7961_v55  ;;  %7168 = vtanh.f32 %v9963_v15 }
 0x32e   :  { %v7163_v36 = vpop.eup %7162  ;;  %v10006_v35 = vmul.f32 %v9928_v22, %v4003_v17  ;;  %v10008_v29 = vmul.f32 %v7161_v19, %v4003_v17  ;;  %v10010_v51 = vadd.f32 %v4802_v8, %v980_v25  ;;  %v2755_v17 = vmul.f32 %v2746_v32, %v11368_v44 }
 0x32f   :  { %v6435_v13 = vmul.f32 -1.442695, %v4805_v5  ;;  %v3581_v25 = vadd.f32 1.0, %v7163_v36  ;;  %v2758_v8 = vmul.f32 %v2746_v32, %v11369_v3  ;;  %v2773_v5 = vmul.f32 %v2764_v27, %v11370_v48 }
 0x330   :  { %v7165_v7 = vpop.eup %7164  ;;  %v4235_v22 = vrot.slane %v10006_v35, %v7958_v4  ;;  %v4253_v61 = vrot.slane %v10006_v35, %v7961_v55  ;;  %v4277_v34 = vrot.slane %v10008_v29, %v7964_v2  ;;  %v2788_v36 = vrot.slane %v9999_v26, %v7964_v2 }
 0x331   :  { %v4828_v41 = vadd.f32 1.0, %v7165_v7  ;;  %v2776_v7 = vmul.f32 %v2764_v27, %v11372_v14 }
 0x332   :  { %v4241_v42 = vmul.f32 %v4235_v22, %v11368_v44  ;;  %v4244_v21 = vmul.f32 %v4235_v22, %v11369_v3  ;;  %v4259_v28 = vmul.f32 %v4253_v61, %v11370_v48  ;;  %v4262_v31 = vmul.f32 %v4253_v61, %v11372_v14 }
 0x333   :  { %7170 = vrcp.f32 %v4828_v41  ;;  %v4283_v47 = vmul.f32 %v4277_v34, %v11297_v46  ;;  %v4286_v6 = vmul.f32 %v4277_v34, %v11263_v45  ;;  %v2779_v61 = vadd.f32 %v2773_v5, %v2755_v17  ;;  %v11387_v5 = vld [vmem:[#allocation88_spill] sm:$0xff] }
 0x334   :  { %v4265_v57 = vadd.f32 %v4259_v28, %v4241_v42  ;;  %7172 = vpow2.f32 %v6435_v13  ;;  %v4268_v19 = vadd.f32 %v4262_v31, %v4244_v21  ;;  %v11383_v13 = vld [vmem:[#allocation27_spill] sm:$0xff]  ;;  %v2782_v34 = vadd.f32 %v2776_v7, %v2758_v8 }
 0x335   :  { %7174 = vtanh.f32 %v9938_v12  ;;  %v3432_v32 = vmul.f32 %v11383_v13, %v8072_v18  ;;  %v11384_v42 = vld [vmem:[#allocation35_spill] sm:$0xff]  ;;  %v2797_v28 = vmul.f32 %v2788_v36, %v11297_v46  ;;  %v7167_v31 = vpop.eup %7166  ;;  %v2800_v27 = vmul.f32 %v2788_v36, %v11263_v45 }
 0x336   :  { %v4289_v15 = vadd.f32 %v4283_v47, %v4265_v57  ;;  %7176 = vpow2.f32 %v6397_v0  ;;  %v4292_v22 = vadd.f32 %v4286_v6, %v4268_v19  ;;  %v2740_v21 = vadd.f32 %v11384_v42, %v11362_v40  ;;  %v11385_v57 = vld [vmem:[#allocation84_spill] sm:$0xff]  ;;  %v11386_v19 = vld [vmem:[#allocation71_spill] sm:$0xff] }
 0x337   :  { %7178 = vrcp.f32 %v3581_v25  ;;  %v3450_v47 = vmul.f32 %v11385_v57, %v8029_v11  ;;  %v2803_v17 = vadd.f32 %v2797_v28, %v2779_v61  ;;  %v3278_v6 = vrot.slane %v11386_v19, 7  ;;  %v11388_v7 = vld [vmem:[#allocation43_spill] sm:$0xff]  ;;  %v11390_v28 = vld [vmem:[#allocation34_spill] sm:$0xff]  ;;  %v11391_v19 = vld [vmem:[#allocation24_spill] sm:$0xff] }
 0x338   :  { %v4295_v41 = vadd.f32 %v4289_v15, %v4223_v9  ;;  %7180 = vrcp.f32 %v4464_v63  ;;  %v4298_v0 = vadd.f32 %v4292_v22, %v4226_v39  ;;  %v3277_v9 = vrot.slane %v11387_v5, 7  ;;  %v7169_v63 = vpop.eup %7168 }
 0x339   :  { %7182 = vtanh.f32 %v10010_v51  ;;  %v2806_v15 = vadd.f32 %v2800_v27, %v2782_v34  ;;  %v3456_v8 = vadd.f32 %v3450_v47, %v3432_v32  ;;  %v3474_v13 = vmul.f32 %v11388_v7, %v8090_v62  ;;  %3293 = vst [vmem:[#allocation2 + $0x28] sm:$0x80] %v3278_v6 }
 0x33a   :  { %v6417_v25 = vmul.f32 -1.442695, %v4295_v41  ;;  %v4855_v39 = vrot.slane %v7167_v31, 1  ;;  %v2809_v36 = vadd.f32 %v2803_v17, %v10003_v23  ;;  %3292 = vst [vmem:[#allocation2 + $0x20] sm:$0x80] %v3277_v9  ;;  %v2536_v22 = vrot.slane %v9997_v20, 5 }
 0x33b   :  { %v10060_v41 = vadd.f32 %v2806_v15, %v2740_v21  ;;  %v10062_v42 = vadd.f32 %v3474_v13, %v3456_v8  ;;  %v2537_v32 = vrot.slane %v9999_v26, 5  ;;  %v3283_v5 = vrot.slane %v11391_v19, 7  ;;  %v11392_v26 = vld [vmem:[#allocation18_spill] sm:$0xff] }
 0x33c   :  { %7184 = vpow2.f32 %v6417_v25  ;;  %v6368_v57 = vmul.f32 -1.442695, %v2809_v36  ;;  %v3608_v25 = vrot.slane %v7169_v63, 1  ;;  %v3281_v8 = vrot.slane %v11392_v26, 7 }
 0x33d   :  { %v10058_v61 = vpop.eup %7170  ;;  %v2538_v21 = vsel %vm182_vm0, %v2536_v22, %v2537_v32  ;;  %v5477_v32 = vld [vmem:[#allocation2 + $0x8] sm:$0xff]  ;;  %v3284_v19 = vsel %vm3275_vm6, %v3278_v6, %v3283_v5 }
 0x33e   :  { %11389 = vst [vmem:[#allocation52_spill] sm:$0xff] %v10058_v61  ;;  %v7173_v34 = vpop.eup %7172  ;;  %v4849_v27 = vmul.f32 %v10058_v61, %v11390_v28  ;;  %v4861_v31 = vmul.f32 %v10058_v61, %v4855_v39  ;;  %7186 = vpow2.f32 %v6368_v57  ;;  %2548 = vst [vmem:[#allocation2 + $0x18] sm:$0xe] %v2538_v21  ;;  %v11394_v39 = vld [vmem:[#allocation30_spill] sm:$0xff] }
 0x33f   :  { %v7175_v23 = vpop.eup %7174  ;;  %v4829_v47 = vadd.f32 1.0, %v7173_v34  ;;  %v5478_v34 = vld [vmem:[#allocation2 + $0x10] sm:$0xff]  ;;  %3296 = vst [vmem:[#allocation2 + $0x40] sm:$0x3] %v3284_v19 }
 0x340   :  { %v7177_v20 = vpop.eup %7176  ;;  %v4867_v17 = vrot.slane %v4861_v31, 5  ;;  %v4515_v13 = vrot.slane %v7175_v23, 5  ;;  %v5481_v22 = vld [vmem:[#allocation2 + $0x28] sm:$0xff] }
 0x341   :  { %v10070_v15 = vpop.eup %7178  ;;  %7188 = vrcp.f32 %v4829_v47  ;;  %v3584_v31 = vadd.f32 1.0, %v7177_v20  ;;  %v5480_v57 = vld [vmem:[#allocation2 + $0x20] sm:$0xff]  ;;  %v3282_v47 = vsel %vm3275_vm6, %v3277_v9, %v3281_v8  ;;  %v5496_v26 = vpack.c.bf16 %v5481_v22, %v5478_v34 }
 0x342   :  { %v10073_v7 = vadd.f32 %v4867_v17, %v4849_v27  ;;  %v3602_v63 = vmul.f32 %v10070_v15, %v11394_v39  ;;  %v3614_v36 = vmul.f32 %v10070_v15, %v3608_v25  ;;  %v7181_v28 = vpop.eup %7180  ;;  %v5495_v27 = vpack.c.bf16 %v5480_v57, %v5477_v32  ;;  %3295 = vst [vmem:[#allocation2 + $0x38] sm:$0x3] %v3282_v47 }
 0x343   :  { %v7183_v23 = vpop.eup %7182  ;;  %7190 = vtanh.f32 %v4298_v0  ;;  %v6420_v39 = vmul.f32 -1.442695, %v4298_v0  ;;  %v4521_v20 = vmul.f32 %v11395_v58, %v4515_v13  ;;  %v4524_v30 = vmul.f32 %v7181_v28, %v4515_v13  ;;  %6494 = vmatprep.subr.bf16.mxu1 %v5496_v26  ;;  %v11398_v28 = vld [vmem:[#allocation33_spill] sm:$0xff] }
 0x344   :  { %11393 = vst [vmem:[#allocation56_spill] sm:$0xff] %v10073_v7  ;;  %v3620_v21 = vrot.slane %v3614_v36, 5  ;;  %5547 = vmatprep.subr.bf16.mxu0 %v5495_v27  ;;  %7192 = vrcp.f32 %v3584_v31  ;;  %6495 = vmatpush3.bf16.msra.mxu1 %v5496_v26  ;;  %v4856_v0 = vrot.slane %v7183_v23, 1 }
 0x345   :  { %v10085_v6 = vrot.slane %v4521_v20, %v7958_v4  ;;  %v10088_v9 = vrot.slane %v4521_v20, %v7961_v55  ;;  %v10091_v5 = vrot.slane %v4524_v30, %v7964_v2 }
 0x346   :  { %v7185_v17 = vpop.eup %7184  ;;  %v10080_v25 = vadd.f32 %v3620_v21, %v3602_v63 }
 0x347   :  { %v4319_v61 = vadd.f32 1.0, %v7185_v17  ;;  %11396 = vst [vmem:[#allocation59_spill] sm:$0xff] %v10088_v9  ;;  %11397 = vst [vmem:[#allocation61_spill] sm:$0xff] %v10091_v5  ;;  %v4539_v8 = vmul.f32 %v10085_v6, %v7857_v38  ;;  %v4542_v13 = vmul.f32 %v10085_v6, %v8072_v18  ;;  %v4557_v63 = vmul.f32 %v10088_v9, %v7875_v60 }
 0x348   :  { %7194 = vtanh.f32 %v10080_v25  ;;  %v7187_v58 = vpop.eup %7186  ;;  %v4581_v30 = vmul.f32 %v10091_v5, %v7953_v16  ;;  %v4776_v34 = vmul.f32 %v10085_v6, %v7811_v50  ;;  %v4782_v57 = vmul.f32 %v10088_v9, %v7815_v52 }
 0x349   :  { %7196 = vrcp.f32 %v4319_v61  ;;  %v4560_v61 = vmul.f32 %v10088_v9, %v8029_v11  ;;  %v4563_v32 = vadd.f32 %v4557_v63, %v4539_v8  ;;  %v4584_v47 = vmul.f32 %v10091_v5, %v8090_v62  ;;  %v11399_v8 = vld [vmem:[#allocation69_spill] sm:$0xff] }
 0x34a   :  { %7198 = vpow2.f32 %v6420_v39  ;;  %v2833_v21 = vadd.f32 1.0, %v7187_v58  ;;  %v4788_v23 = vadd.f32 %v4782_v57, %v4776_v34  ;;  %v4794_v17 = vmul.f32 %v10091_v5, %v7809_v49 }
 0x34b   :  { %v10099_v36 = vpop.eup %7188  ;;  %7200 = vtanh.f32 %v10060_v41  ;;  %v4566_v19 = vadd.f32 %v4560_v61, %v4542_v13  ;;  %v10115_v27 = vadd.f32 %v4581_v30, %v4563_v32  ;;  %v1017_v13 = vadd.f32 %v11399_v8, %v11358_v1 }
 0x34c   :  { %v4850_v31 = vmul.f32 %v10099_v36, %v11398_v28  ;;  %v4862_v22 = vmul.f32 %v10099_v36, %v4856_v0  ;;  %7202 = vrcp.f32 %v2833_v21  ;;  %v4800_v63 = vadd.f32 %v4794_v17, %v4788_v23 }
 0x34d   :  { %v7191_v39 = vpop.eup %7190  ;;  %v10119_v20 = vadd.f32 %v4584_v47, %v4566_v19  ;;  %v6371_v61 = vmul.f32 -1.442695, %v10060_v41 }
 0x34e   :  { %v4868_v26 = vrot.slane %v4862_v22, 5  ;;  %v7193_v58 = vpop.eup %7192  ;;  %v4346_v30 = vrot.slane %v7191_v39, 1  ;;  %v10126_v22 = vadd.f32 %v4800_v63, %v1017_v13 }
 0x34f   :  { %7204 = vpow2.f32 %v6371_v61 }
 0x350   :  { %v10121_v0 = vadd.f32 %v4868_v26, %v4850_v31 }
 0x352   :  { %v7195_v28 = vpop.eup %7194 }
 0x353   :  { %v7197_v34 = vpop.eup %7196  ;;  %v3635_v32 = vrot.slane %v7195_v28, 5 }
 0x354   :  { %v7199_v57 = vpop.eup %7198  ;;  %v4340_v19 = vmul.f32 %v7197_v34, %v9959_v37  ;;  %v4352_v47 = vmul.f32 %v7197_v34, %v4346_v30  ;;  %v11400_v37 = vld [vmem:[#allocation44_spill] sm:$0xff] }
 0x355   :  { %v7201_v31 = vpop.eup %7200  ;;  %v10130_v21 = vmul.f32 %v10070_v15, %v3635_v32  ;;  %v10132_v26 = vmul.f32 %v7193_v58, %v3635_v32  ;;  %v3854_v8 = vadd.f32 %v11400_v37, %v11340_v10  ;;  %v4322_v13 = vadd.f32 1.0, %v7199_v57  ;;  %v11402_v57 = vld [vmem:[#allocation32_spill] sm:$0xff] }
 0x356   :  { %v4358_v23 = vrot.slane %v4352_v47, 5  ;;  %v2860_v15 = vrot.slane %v7201_v31, 1  ;;  %v7203_v61 = vpop.eup %7202  ;;  %v11401_v47 = vld [vmem:[#allocation51_spill] sm:$0xff] }
 0x357   :  { %v3869_v41 = vrot.slane %v10130_v21, %v7958_v4  ;;  %v3887_v17 = vrot.slane %v10130_v21, %v7961_v55  ;;  %v3911_v39 = vrot.slane %v10132_v26, %v7964_v2  ;;  %v3857_v12 = vadd.f32 %v11401_v47, %v11362_v40 }
 0x358   :  { %v10142_v63 = vadd.f32 %v4358_v23, %v4340_v19  ;;  %v2854_v19 = vmul.f32 %v7203_v61, %v11402_v57  ;;  %v2866_v1 = vmul.f32 %v7203_v61, %v2860_v15 }
 0x359   :  { %v3872_v58 = vmul.f32 %v3869_v41, %v11368_v44  ;;  %v3875_v28 = vmul.f32 %v3869_v41, %v11369_v3  ;;  %v3890_v30 = vmul.f32 %v3887_v17, %v11370_v48  ;;  %v3893_v32 = vmul.f32 %v3887_v17, %v11372_v14  ;;  %v7205_v50 = vpop.eup %7204 }
 0x35a   :  { %7206 = vtanh.f32 %v10142_v63  ;;  %v3914_v37 = vmul.f32 %v3911_v39, %v11297_v46  ;;  %v3917_v7 = vmul.f32 %v3911_v39, %v11263_v45  ;;  %v2872_v52 = vrot.slane %v2866_v1, 5 }
 0x35b   :  { %v3896_v23 = vadd.f32 %v3890_v30, %v3872_v58  ;;  %v3899_v31 = vadd.f32 %v3893_v32, %v3875_v28  ;;  %7208 = vrcp.f32 %v4322_v13  ;;  %v2836_v47 = vadd.f32 1.0, %v7205_v50 }
 0x35c   :  { %v10154_v43 = vadd.f32 %v2872_v52, %v2854_v19  ;;  %v11404_v52 = vld [vmem:[#allocation41_spill] sm:$0xff]  ;;  %v4595_v32 = vadd.f32 %v9988_v24, %v11362_v40 }
 0x35d   :  { %v3920_v41 = vadd.f32 %v3914_v37, %v3896_v23  ;;  %v3923_v49 = vadd.f32 %v3917_v7, %v3899_v31  ;;  %v4592_v7 = vadd.f32 %v9986_v59, %v11340_v10 }
 0x35e   :  { %7210 = vtanh.f32 %v10154_v43 }
 0x35f   :  { %v3926_v17 = vadd.f32 %v3920_v41, %v3854_v8  ;;  %v3929_v33 = vadd.f32 %v3923_v49, %v3857_v12  ;;  %v3819_v12 = vmul.f32 %v11404_v52, %v8029_v11 }
 0x361   :  { %v6406_v5 = vmul.f32 -1.442695, %v3926_v17  ;;  %v6409_v19 = vmul.f32 -1.442695, %v3929_v33 }
 0x363   :  { %7212 = vpow2.f32 %v6406_v5 }
 0x364   :  { %v7207_v57 = vpop.eup %7206  ;;  %7214 = vrcp.f32 %v2836_v47 }
 0x365   :  { %v4373_v58 = vrot.slane %v7207_v57, 5  ;;  %v7209_v28 = vpop.eup %7208  ;;  %7216 = vtanh.f32 %v3929_v33  ;;  %v11405_v57 = vld [vmem:[#allocation40_spill] sm:$0xff]  ;;  %v3843_v33 = vmul.f32 %v11406_v56, %v8090_v62 }
 0x367   :  { %v10157_v39 = vmul.f32 %v7197_v34, %v4373_v58  ;;  %v10159_v13 = vmul.f32 %v7209_v28, %v4373_v58  ;;  %v3801_v58 = vmul.f32 %v11405_v57, %v8072_v18 }
 0x368   :  { %v7211_v30 = vpop.eup %7210 }
 0x369   :  { %11403 = vst [vmem:[#allocation63_spill] sm:$0xff] %v10157_v39  ;;  %v4604_v1 = vrot.slane %v10157_v39, %v7958_v4  ;;  %v4622_v49 = vrot.slane %v10157_v39, %v7961_v55  ;;  %v4646_v50 = vrot.slane %v10159_v13, %v7964_v2  ;;  %v2887_v17 = vrot.slane %v7211_v30, 5 }
 0x36a   :  { %v3825_v39 = vadd.f32 %v3819_v12, %v3801_v58 }
 0x36b   :  { %v4610_v5 = vmul.f32 %v4604_v1, %v11368_v44  ;;  %v4613_v34 = vmul.f32 %v4604_v1, %v11369_v3  ;;  %v4628_v8 = vmul.f32 %v4622_v49, %v11370_v48  ;;  %v4631_v15 = vmul.f32 %v4622_v49, %v11372_v14 }
 0x36c   :  { %v4652_v37 = vmul.f32 %v4646_v50, %v11297_v46  ;;  %v4655_v59 = vmul.f32 %v4646_v50, %v11263_v45  ;;  %v2893_v52 = vmul.f32 %v7203_v61, %v2887_v17 }
 0x36d   :  { %v7213_v23 = vpop.eup %7212  ;;  %v4634_v31 = vadd.f32 %v4628_v8, %v4610_v5  ;;  %v4637_v41 = vadd.f32 %v4631_v15, %v4613_v34  ;;  %v10185_v8 = vadd.f32 %v3843_v33, %v3825_v39  ;;  %v3657_v33 = vrot.slane %v10130_v21, 4  ;;  %v11409_v21 = vld [vmem:[#allocation49_spill] sm:$0xff] }
 0x36e   :  { %v3950_v47 = vadd.f32 1.0, %v7213_v23  ;;  %v7215_v28 = vpop.eup %7214  ;;  %v3116_v50 = vrot.slane %v2893_v52, %v7958_v4  ;;  %v3134_v34 = vrot.slane %v2893_v52, %v7961_v55  ;;  %v11407_v23 = vld [vmem:[#allocation31_spill] sm:$0xff] }
 0x36f   :  { %v4658_v1 = vadd.f32 %v4652_v37, %v4634_v31  ;;  %v4661_v49 = vadd.f32 %v4655_v59, %v4637_v41  ;;  %v2896_v24 = vmul.f32 %v7215_v28, %v2887_v17  ;;  %v3107_v39 = vadd.f32 %v11407_v23, %v11340_v10  ;;  %v11408_v17 = vld [vmem:[#allocation28_spill] sm:$0xff] }
 0x370   :  { %7218 = vrcp.f32 %v3950_v47  ;;  %v3125_v30 = vmul.f32 %v3116_v50, %v11368_v44  ;;  %v3143_v61 = vmul.f32 %v3134_v34, %v11370_v48  ;;  %v3128_v12 = vmul.f32 %v3116_v50, %v11369_v3 }
 0x371   :  { %v4664_v9 = vadd.f32 %v4658_v1, %v4592_v7  ;;  %v4667_v5 = vadd.f32 %v4661_v49, %v4595_v32  ;;  %7220 = vpow2.f32 %v6409_v19  ;;  %v3158_v37 = vrot.slane %v2896_v24, %v7964_v2  ;;  %v7217_v7 = vpop.eup %7216 }
 0x372   :  { %v3146_v56 = vmul.f32 %v3134_v34, %v11372_v14  ;;  %v6438_v32 = vmul.f32 -1.442695, %v10010_v51  ;;  %v3149_v19 = vadd.f32 %v3143_v61, %v3125_v30  ;;  %v3977_v31 = vrot.slane %v7217_v7, 1 }
 0x373   :  { %v6429_v15 = vmul.f32 -1.442695, %v4664_v9  ;;  %v3167_v9 = vmul.f32 %v3158_v37, %v11297_v46  ;;  %v3110_v47 = vadd.f32 %v11408_v17, %v11362_v40  ;;  %v3170_v57 = vmul.f32 %v3158_v37, %v11263_v45 }
 0x374   :  { %v3152_v41 = vadd.f32 %v3146_v56, %v3128_v12  ;;  %v2906_v49 = vrot.slane %v2893_v52, 2  ;;  %v3658_v61 = vrot.slane %v10132_v26, 4  ;;  %v6432_v23 = vmul.f32 -1.442695, %v4667_v5  ;;  %v11410_v26 = vld [vmem:[#allocation50_spill] sm:$0xff] }
 0x375   :  { %7222 = vpow2.f32 %v6429_v15  ;;  %v3173_v58 = vadd.f32 %v3167_v9, %v3149_v19  ;;  %v2907_v15 = vrot.slane %v2896_v24, 2  ;;  %v3654_v19 = vrot.slane %v11409_v21, 4 }
 0x376   :  { %7224 = vpow2.f32 %v6438_v32  ;;  %v3176_v50 = vadd.f32 %v3170_v57, %v3152_v41  ;;  %v3659_v52 = vsel %vm183_vm1, %v3657_v33, %v3658_v61 }
 0x377   :  { %v3179_v34 = vadd.f32 %v3173_v58, %v3107_v39  ;;  %7226 = vtanh.f32 %v10121_v0  ;;  %3665 = vst [vmem:[#allocation2 + $0x40] sm:$0x1c] %v3659_v52  ;;  %v3655_v39 = vrot.slane %v11410_v26, 4 }
 0x378   :  { %7228 = vtanh.f32 %v4667_v5  ;;  %v3182_v56 = vadd.f32 %v3176_v50, %v3110_v47 }
 0x379   :  { %v6380_v37 = vmul.f32 -1.442695, %v3179_v34  ;;  %v3656_v9 = vsel %vm183_vm1, %v3654_v19, %v3655_v39  ;;  %v11411_v39 = vld [vmem:[#allocation73_spill] sm:$0xff] }
 0x37a   :  { %v7219_v59 = vpop.eup %7218  ;;  %3664 = vst [vmem:[#allocation2 + $0x38] sm:$0x1c] %v3656_v9  ;;  %v4224_v9 = vadd.f32 %v11411_v39, %v11340_v10 }
 0x37b   :  { %v7221_v28 = vpop.eup %7220  ;;  %v3971_v1 = vmul.f32 %v7219_v59, %v10080_v25  ;;  %v3983_v51 = vmul.f32 %v7219_v59, %v3977_v31  ;;  %v2908_v25 = vsel %vm2905_vm5, %v2906_v49, %v2907_v15  ;;  %7230 = vpow2.f32 %v6380_v37 }
 0x37c   :  { %v3953_v12 = vadd.f32 1.0, %v7221_v28  ;;  %2918 = vst [vmem:[#allocation2 + $0x18] sm:$0x70] %v2908_v25  ;;  %v6383_v28 = vmul.f32 -1.442695, %v3182_v56 }
 0x37d   :  { %v3989_v30 = vrot.slane %v3983_v51, 5 }
 0x37f   :  { %v7223_v7 = vpop.eup %7222  ;;  %v10203_v32 = vadd.f32 %v3989_v30, %v3971_v1 }
 0x380   :  { %v4688_v24 = vadd.f32 1.0, %v7223_v7  ;;  %v7225_v31 = vpop.eup %7224 }
 0x381   :  { %7232 = vtanh.f32 %v10203_v32  ;;  %v7227_v41 = vpop.eup %7226  ;;  %v4832_v47 = vadd.f32 1.0, %v7225_v31  ;;  %v11412_v31 = vld [vmem:[#allocation83_spill] sm:$0xff] }
 0x382   :  { %7234 = vrcp.f32 %v4688_v24  ;;  %v7229_v17 = vpop.eup %7228  ;;  %v4883_v15 = vrot.slane %v7227_v41, 5  ;;  %v4227_v41 = vadd.f32 %v11412_v31, %v11362_v40 }
 0x383   :  { %7236 = vrcp.f32 %v3953_v12  ;;  %v4715_v58 = vrot.slane %v7229_v17, 1 }
 0x384   :  { %7238 = vpow2.f32 %v6432_v23  ;;  %v4889_v21 = vmul.f32 %v10099_v36, %v4883_v15 }
 0x385   :  { %7240 = vtanh.f32 %v3182_v56  ;;  %v7231_v5 = vpop.eup %7230 }
 0x386   :  { %v3203_v1 = vadd.f32 1.0, %v7231_v5  ;;  %7242 = vrcp.f32 %v4832_v47 }
 0x388   :  { %7244 = vrcp.f32 %v3203_v1 }
 0x389   :  { %7246 = vpow2.f32 %v6383_v28 }
 0x38b   :  { %v7233_v57 = vpop.eup %7232 }
 0x38c   :  { %v10211_v51 = vpop.eup %7234  ;;  %v4004_v49 = vrot.slane %v7233_v57, 5  ;;  %v10241_v57 = vrot.slane %v4889_v21, %v7958_v4 }
 0x38d   :  { %v7237_v33 = vpop.eup %7236  ;;  %v4709_v50 = vmul.f32 %v10211_v51, %v10142_v63  ;;  %v4721_v34 = vmul.f32 %v10211_v51, %v4715_v58  ;;  %v10244_v58 = vrot.slane %v4889_v21, %v7961_v55 }
 0x38e   :  { %v7239_v30 = vpop.eup %7238  ;;  %v10216_v61 = vmul.f32 %v7219_v59, %v4004_v49  ;;  %v10218_v12 = vmul.f32 %v7237_v33, %v4004_v49 }
 0x38f   :  { %v4727_v37 = vrot.slane %v4721_v34, 5  ;;  %v4691_v25 = vadd.f32 1.0, %v7239_v30  ;;  %v7241_v26 = vpop.eup %7240  ;;  %v11413_v34 = vld [vmem:[#allocation54_spill] sm:$0xff] }
 0x390   :  { %v4239_v56 = vrot.slane %v10216_v61, %v7958_v4  ;;  %v4257_v7 = vrot.slane %v10216_v61, %v7961_v55  ;;  %v4281_v63 = vrot.slane %v10218_v12, %v7964_v2  ;;  %v7243_v28 = vpop.eup %7242  ;;  %v3230_v33 = vrot.slane %v7241_v26, 1 }
 0x391   :  { %v10226_v52 = vadd.f32 %v4727_v37, %v4709_v50  ;;  %v4171_v30 = vmul.f32 %v11413_v34, %v8072_v18  ;;  %v11414_v37 = vld [vmem:[#allocation55_spill] sm:$0xff] }
 0x392   :  { %v4242_v59 = vmul.f32 %v4239_v56, %v11368_v44  ;;  %v4245_v19 = vmul.f32 %v4239_v56, %v11369_v3  ;;  %v4260_v23 = vmul.f32 %v4257_v7, %v11370_v48  ;;  %v4263_v24 = vmul.f32 %v4257_v7, %v11372_v14  ;;  %v10246_v50 = vpop.eup %7244 }
 0x393   :  { %7248 = vtanh.f32 %v10226_v52  ;;  %v4284_v36 = vmul.f32 %v4281_v63, %v11297_v46  ;;  %v4287_v5 = vmul.f32 %v4281_v63, %v11263_v45  ;;  %v4189_v56 = vmul.f32 %v11414_v37, %v8029_v11 }
 0x394   :  { %v4266_v17 = vadd.f32 %v4260_v23, %v4242_v59  ;;  %v4269_v47 = vadd.f32 %v4263_v24, %v4245_v19  ;;  %7250 = vrcp.f32 %v4691_v25  ;;  %v4892_v7 = vmul.f32 %v7243_v28, %v4883_v15  ;;  %v7247_v19 = vpop.eup %7246 }
 0x395   :  { %v3224_v59 = vmul.f32 %v10246_v50, %v10154_v43  ;;  %v3236_v21 = vmul.f32 %v10246_v50, %v3230_v33  ;;  %v4907_v23 = vmul.f32 %v10241_v57, %v7857_v38  ;;  %v4925_v24 = vmul.f32 %v10244_v58, %v7875_v60 }
 0x396   :  { %v4290_v1 = vadd.f32 %v4284_v36, %v4266_v17  ;;  %v4293_v49 = vadd.f32 %v4287_v5, %v4269_v47  ;;  %v4195_v31 = vadd.f32 %v4189_v56, %v4171_v30  ;;  %v10260_v17 = vrot.slane %v4892_v7, %v7964_v2  ;;  %v11415_v47 = vld [vmem:[#allocation38_spill] sm:$0xff] }
 0x397   :  { %v3242_v39 = vrot.slane %v3236_v21, 5  ;;  %v3206_v15 = vadd.f32 1.0, %v7247_v19  ;;  %v4213_v36 = vmul.f32 %v11415_v47, %v8090_v62  ;;  %v4910_v30 = vmul.f32 %v10241_v57, %v8072_v18 }
 0x398   :  { %v4296_v63 = vadd.f32 %v4290_v1, %v4224_v9  ;;  %v4299_v25 = vadd.f32 %v4293_v49, %v4227_v41  ;;  %v4931_v41 = vadd.f32 %v4925_v24, %v4907_v23  ;;  %v4949_v1 = vmul.f32 %v10260_v17, %v7953_v16 }
 0x399   :  { %v10262_v9 = vadd.f32 %v3242_v39, %v3224_v59  ;;  %v10269_v49 = vadd.f32 %v4213_v36, %v4195_v31  ;;  %v4928_v37 = vmul.f32 %v10244_v58, %v8029_v11 }
 0x39a   :  { %v6418_v26 = vmul.f32 -1.442695, %v4296_v63  ;;  %v4955_v56 = vadd.f32 %v4949_v1, %v4931_v41  ;;  %v6421_v24 = vmul.f32 -1.442695, %v4299_v25 }
 0x39c   :  { %7252 = vpow2.f32 %v6418_v26  ;;  %v4934_v26 = vadd.f32 %v4928_v37, %v4910_v30  ;;  %v4961_v39 = vadd.f32 %v4955_v56, %v11340_v10  ;;  %v4028_v30 = vrot.slane %v10218_v12, 1 }
 0x39d   :  { %v7249_v43 = vpop.eup %7248  ;;  %7254 = vtanh.f32 %v10262_v9 }
 0x39e   :  { %v4742_v5 = vrot.slane %v7249_v43, 5  ;;  %v7251_v28 = vpop.eup %7250  ;;  %7256 = vrcp.f32 %v3206_v15 }
 0x39f   :  { %7258 = vtanh.f32 %v4299_v25 }
 0x3a0   :  { %v10272_v33 = vmul.f32 %v10211_v51, %v4742_v5  ;;  %v10274_v34 = vmul.f32 %v7251_v28, %v4742_v5  ;;  %v4952_v28 = vmul.f32 %v10260_v17, %v8090_v62 }
 0x3a2   :  { %v4973_v7 = vrot.slane %v10272_v33, %v7958_v4  ;;  %v4991_v63 = vrot.slane %v10272_v33, %v7961_v55  ;;  %v5015_v51 = vrot.slane %v10274_v34, %v7964_v2  ;;  %v4958_v56 = vadd.f32 %v4952_v28, %v4934_v26  ;;  %v11416_v28 = vld [vmem:[#allocation22_spill] sm:$0xff] }
 0x3a4   :  { %v4979_v59 = vmul.f32 %v4973_v7, %v11368_v44  ;;  %v4982_v21 = vmul.f32 %v4973_v7, %v11369_v3  ;;  %v4997_v19 = vmul.f32 %v4991_v63, %v11370_v48  ;;  %v5000_v23 = vmul.f32 %v4991_v63, %v11372_v14 }
 0x3a5   :  { %v5021_v41 = vmul.f32 %v5015_v51, %v11297_v46  ;;  %v5024_v47 = vmul.f32 %v5015_v51, %v11263_v45  ;;  %v4027_v63 = vrot.slane %v10216_v61, 1  ;;  %v4024_v51 = vrot.slane %v10006_v35, 1 }
 0x3a6   :  { %v7253_v31 = vpop.eup %7252  ;;  %v5003_v15 = vadd.f32 %v4997_v19, %v4979_v59  ;;  %v5006_v43 = vadd.f32 %v5000_v23, %v4982_v21 }
 0x3a7   :  { %v4320_v36 = vadd.f32 1.0, %v7253_v31  ;;  %v7255_v5 = vpop.eup %7254  ;;  %v4029_v23 = vsel %vm4020_vm7, %v4027_v63, %v4028_v30  ;;  %v4025_v31 = vrot.slane %v10008_v29, 1 }
 0x3a8   :  { %v5027_v1 = vadd.f32 %v5021_v41, %v5003_v15  ;;  %v5030_v7 = vadd.f32 %v5024_v47, %v5006_v43  ;;  %v3257_v25 = vrot.slane %v7255_v5, 5  ;;  %v7257_v37 = vpop.eup %7256  ;;  %4035 = vst [vmem:[#allocation2 + $0x40] sm:$0xe0] %v4029_v23 }
 0x3a9   :  { %7260 = vrcp.f32 %v4320_v36  ;;  %v4026_v26 = vsel %vm4020_vm7, %v4024_v51, %v4025_v31 }
 0x3aa   :  { %7262 = vpow2.f32 %v6421_v24  ;;  %v5033_v59 = vadd.f32 %v5027_v1, %v4961_v39  ;;  %v3263_v21 = vmul.f32 %v10246_v50, %v3257_v25  ;;  %v3266_v19 = vmul.f32 %v7257_v37, %v3257_v25  ;;  %v7259_v39 = vpop.eup %7258  ;;  %4034 = vst [vmem:[#allocation2 + $0x38] sm:$0xe0] %v4026_v26 }
 0x3ab   :  { %v4964_v50 = vadd.f32 %v4958_v56, %v11362_v40  ;;  %v3483_v1 = vadd.f32 %v11416_v28, %v11340_v10  ;;  %v4347_v30 = vrot.slane %v7259_v39, 1  ;;  %v3486_v37 = vadd.f32 %v10062_v42, %v11362_v40 }
 0x3ac   :  { %v6441_v15 = vmul.f32 -1.442695, %v5033_v59  ;;  %v3492_v61 = vrot.slane %v3263_v21, %v7958_v4  ;;  %v3510_v43 = vrot.slane %v3263_v21, %v7961_v55  ;;  %v3534_v12 = vrot.slane %v3266_v19, %v7964_v2 }
 0x3ad   :  { %v3276_v24 = vrot.slane %v3263_v21, 7  ;;  %v3279_v35 = vrot.slane %v3266_v19, 7  ;;  %v10317_v21 = vadd.f32 %v5030_v7, %v4964_v50 }
 0x3ae   :  { %7264 = vpow2.f32 %v6441_v15  ;;  %v3501_v41 = vmul.f32 %v3492_v61, %v11368_v44  ;;  %v3504_v29 = vmul.f32 %v3492_v61, %v11369_v3  ;;  %v3519_v47 = vmul.f32 %v3510_v43, %v11370_v48 }
 0x3af   :  { %3291 = vst [vmem:[#allocation2 + $0x18] sm:$0x80] %v3276_v24  ;;  %v3522_v36 = vmul.f32 %v3510_v43, %v11372_v14  ;;  %v3280_v5 = vsel %vm3275_vm6, %v3276_v24, %v3279_v35  ;;  %v3543_v25 = vmul.f32 %v3534_v12, %v11297_v46  ;;  %v3546_v59 = vmul.f32 %v3534_v12, %v11263_v45  ;;  %v5476_v35 = vld [vmem:[#allocation2] sm:$0xff] }
 0x3b0   :  { %v3525_v63 = vadd.f32 %v3519_v47, %v3501_v41  ;;  %3294 = vst [vmem:[#allocation2 + $0x30] sm:$0x3] %v3280_v5  ;;  %7266 = vtanh.f32 %v10317_v21 }
 0x3b1   :  { %v3528_v56 = vadd.f32 %v3522_v36, %v3504_v29 }
 0x3b2   :  { %v3549_v19 = vadd.f32 %v3543_v25, %v3525_v63 }
 0x3b3   :  { %v7261_v51 = vpop.eup %7260  ;;  %v3552_v61 = vadd.f32 %v3546_v59, %v3528_v56 }
 0x3b4   :  { %v7263_v23 = vpop.eup %7262  ;;  %v4341_v31 = vmul.f32 %v7261_v51, %v10203_v32  ;;  %v4353_v15 = vmul.f32 %v7261_v51, %v4347_v30  ;;  %v3555_v43 = vadd.f32 %v3549_v19, %v3483_v1 }
 0x3b5   :  { %v3558_v26 = vadd.f32 %v3552_v61, %v3486_v37  ;;  %v4323_v12 = vadd.f32 1.0, %v7263_v23 }
 0x3b6   :  { %v4359_v24 = vrot.slane %v4353_v15, 5  ;;  %v5479_v39 = vld [vmem:[#allocation2 + $0x18] sm:$0xff]  ;;  %v6392_v42 = vmul.f32 -1.442695, %v3555_v43 }
 0x3b7   :  { %v5494_v41 = vpack.c.bf16 %v5479_v39, %v5476_v35  ;;  %v6395_v28 = vmul.f32 -1.442695, %v3558_v26  ;;  %v4593_v39 = vadd.f32 %v10115_v27, %v11340_v10 }
 0x3b8   :  { %v7265_v29 = vpop.eup %7264  ;;  %v10321_v47 = vadd.f32 %v4359_v24, %v4341_v31  ;;  %7268 = vpow2.f32 %v6392_v42  ;;  %v4596_v42 = vadd.f32 %v10119_v20, %v11362_v40 }
 0x3b9   :  { %v5057_v7 = vadd.f32 1.0, %v7265_v29  ;;  %5548 = vmatpush1.bf16.msra.mxu0 %v5494_v41 }
 0x3ba   :  { %7270 = vtanh.f32 %v10321_v47  ;;  %v7267_v32 = vpop.eup %7266 }
 0x3bb   :  { %7272 = vrcp.f32 %v5057_v7  ;;  %v5084_v5 = vrot.slane %v7267_v32, 1 }
 0x3bc   :  { %7274 = vrcp.f32 %v4323_v12 }
 0x3bd   :  { %7276 = vtanh.f32 %v3558_v26 }
 0x3c2   :  { %v7269_v50 = vpop.eup %7268 }
 0x3c3   :  { %v3579_v1 = vadd.f32 1.0, %v7269_v50 }
 0x3c4   :  { %v7271_v36 = vpop.eup %7270 }
 0x3c5   :  { %v10324_v63 = vpop.eup %7272  ;;  %v4374_v25 = vrot.slane %v7271_v36, 5  ;;  %7278 = vrcp.f32 %v3579_v1 }
 0x3c6   :  { %11417 = vst [vmem:[#allocation17_spill] sm:$0xff] %v10324_v63  ;;  %v7275_v30 = vpop.eup %7274  ;;  %v5078_v37 = vmul.f32 %v10324_v63, %v10226_v52  ;;  %v5090_v56 = vmul.f32 %v10324_v63, %v5084_v5  ;;  %7280 = vpow2.f32 %v6395_v28 }
 0x3c7   :  { %v4380_v59 = vmul.f32 %v7261_v51, %v4374_v25  ;;  %v4383_v19 = vmul.f32 %v7275_v30, %v4374_v25  ;;  %v7277_v51 = vpop.eup %7276 }
 0x3c8   :  { %v5096_v23 = vrot.slane %v5090_v56, 5  ;;  %v3606_v36 = vrot.slane %v7277_v51, 1 }
 0x3c9   :  { %v4608_v31 = vrot.slane %v4380_v59, %v7958_v4  ;;  %v4626_v15 = vrot.slane %v4380_v59, %v7961_v55  ;;  %v4650_v61 = vrot.slane %v4383_v19, %v7964_v2 }
 0x3ca   :  { %v10332_v43 = vadd.f32 %v5096_v23, %v5078_v37 }
 0x3cb   :  { %v4611_v24 = vmul.f32 %v4608_v31, %v11368_v44  ;;  %v4614_v26 = vmul.f32 %v4608_v31, %v11369_v3  ;;  %v4629_v52 = vmul.f32 %v4626_v15, %v11370_v48  ;;  %v4632_v35 = vmul.f32 %v4626_v15, %v11372_v14 }
 0x3cc   :  { %v4653_v12 = vmul.f32 %v4650_v61, %v11297_v46  ;;  %v4656_v7 = vmul.f32 %v4650_v61, %v11263_v45  ;;  %v4397_v15 = vrot.slane %v4383_v19, 6  ;;  %v6436_v61 = vmul.f32 -1.442695, %v10126_v22  ;;  %v11421_v19 = vld [vmem:[#allocation63_spill] sm:$0xff] }
 0x3cd   :  { %v4635_v41 = vadd.f32 %v4629_v52, %v4611_v24  ;;  %v4638_v29 = vadd.f32 %v4632_v35, %v4614_v26  ;;  %v4394_v24 = vrot.slane %v10159_v13, 6  ;;  %v4779_v26 = vmul.f32 %v10085_v6, %v7817_v53  ;;  %v11418_v52 = vld [vmem:[#allocation59_spill] sm:$0xff]  ;;  %v11422_v13 = vld [vmem:[#allocation12_spill] sm:$0xff] }
 0x3ce   :  { %v4785_v35 = vmul.f32 %v11418_v52, %v7819_v54 }
 0x3cf   :  { %v4659_v32 = vadd.f32 %v4653_v12, %v4635_v41  ;;  %v4662_v50 = vadd.f32 %v4656_v7, %v4638_v29  ;;  %v7279_v5 = vpop.eup %7278  ;;  %v4396_v29 = vrot.slane %v4380_v59, 6 }
 0x3d0   :  { %v3600_v25 = vmul.f32 %v7279_v5, %v10262_v9  ;;  %v3612_v30 = vmul.f32 %v7279_v5, %v3606_v36  ;;  %v7281_v27 = vpop.eup %7280  ;;  %v4791_v7 = vadd.f32 %v4785_v35, %v4779_v26 }
 0x3d1   :  { %v4665_v28 = vadd.f32 %v4659_v32, %v4593_v39  ;;  %v10344_v1 = vadd.f32 %v4662_v50, %v4596_v42  ;;  %v3582_v20 = vadd.f32 1.0, %v7281_v27  ;;  %v11419_v39 = vld [vmem:[#allocation11_spill] sm:$0xff]  ;;  %v11420_v42 = vld [vmem:[#allocation61_spill] sm:$0xff]  ;;  %v4393_v32 = vrot.slane %v11421_v19, 6  ;;  %v11423_v50 = vld [vmem:[#allocation16_spill] sm:$0xff] }
 0x3d2   :  { %v3618_v56 = vrot.slane %v3612_v30, 5  ;;  %v4797_v41 = vmul.f32 %v11420_v42, %v11419_v39  ;;  %v1021_v36 = vadd.f32 %v11423_v50, %v11422_v13  ;;  %v4398_v6 = vsel %vm1442_vm3, %v4396_v29, %v4397_v15 }
 0x3d3   :  { %v6430_v37 = vmul.f32 -1.442695, %v4665_v28  ;;  %4404 = vst [vmem:[#allocation2 + $0x58] sm:$0x7] %v4398_v6  ;;  %v4395_v27 = vsel %vm1442_vm3, %v4393_v32, %v4394_v24  ;;  %v11424_v24 = vld [vmem:[#allocation39_spill] sm:$0xff] }
 0x3d4   :  { %v10347_v23 = vadd.f32 %v3618_v56, %v3600_v25  ;;  %v4803_v30 = vadd.f32 %v4797_v41, %v4791_v7  ;;  %4403 = vst [vmem:[#allocation2 + $0x50] sm:$0x7] %v4395_v27  ;;  %v3852_v35 = vadd.f32 %v11424_v24, %v11340_v10  ;;  %v11425_v27 = vld [vmem:[#allocation87_spill] sm:$0xff] }
 0x3d5   :  { %7282 = vpow2.f32 %v6430_v37 }
 0x3d6   :  { %7284 = vtanh.f32 %v10347_v23 }
 0x3d7   :  { %7286 = vrcp.f32 %v3582_v20  ;;  %v4809_v20 = vadd.f32 %v4803_v30, %v1021_v36 }
 0x3d8   :  { %7288 = vtanh.f32 %v10344_v1 }
 0x3df   :  { %v7283_v31 = vpop.eup %7282 }
 0x3e0   :  { %v4689_v9 = vadd.f32 1.0, %v7283_v31  ;;  %v7285_v51 = vpop.eup %7284 }
 0x3e1   :  { %v3633_v12 = vrot.slane %v7285_v51, 5  ;;  %v7287_v22 = vpop.eup %7286  ;;  %v3855_v51 = vadd.f32 %v10185_v8, %v11362_v40 }
 0x3e2   :  { %7290 = vrcp.f32 %v4689_v9  ;;  %v7289_v9 = vpop.eup %7288 }
 0x3e3   :  { %7292 = vpow2.f32 %v6436_v61  ;;  %v3639_v28 = vmul.f32 %v7279_v5, %v3633_v12  ;;  %v3642_v25 = vmul.f32 %v7287_v22, %v3633_v12  ;;  %v4716_v19 = vrot.slane %v7289_v9, 1 }
 0x3e5   :  { %v3861_v59 = vrot.slane %v3639_v28, %v7958_v4  ;;  %v3879_v37 = vrot.slane %v3639_v28, %v7961_v55  ;;  %v3903_v56 = vrot.slane %v3642_v25, %v7964_v2  ;;  %v3651_v31 = vrot.slane %v3639_v28, 4 }
 0x3e6   :  { %v3652_v61 = vrot.slane %v3642_v25, 4 }
 0x3e7   :  { %v3870_v26 = vmul.f32 %v3861_v59, %v11368_v44  ;;  %v3873_v5 = vmul.f32 %v3861_v59, %v11369_v3  ;;  %v3888_v15 = vmul.f32 %v3879_v37, %v11370_v48  ;;  %v3891_v52 = vmul.f32 %v3879_v37, %v11372_v14 }
 0x3e8   :  { %v3912_v42 = vmul.f32 %v3903_v56, %v11297_v46  ;;  %v3915_v12 = vmul.f32 %v3903_v56, %v11263_v45  ;;  %v3653_v7 = vsel %vm183_vm1, %v3651_v31, %v3652_v61  ;;  %v6437_v59 = vmul.f32 -1.442695, %v11425_v27  ;;  %v11427_v61 = vld [vmem:[#allocation8_spill] sm:$0xff] }
 0x3e9   :  { %v3894_v41 = vadd.f32 %v3888_v15, %v3870_v26  ;;  %v3897_v29 = vadd.f32 %v3891_v52, %v3873_v5  ;;  %3663 = vst [vmem:[#allocation2 + $0x30] sm:$0x1c] %v3653_v7  ;;  %v5129_v9 = vmul.f32 %v10241_v57, %v11427_v61  ;;  %v11428_v26 = vld [vmem:[#allocation10_spill] sm:$0xff]  ;;  %v6433_v15 = vmul.f32 -1.442695, %v10344_v1  ;;  %v11429_v52 = vld [vmem:[#allocation7_spill] sm:$0xff] }
 0x3ea   :  { %v5135_v5 = vmul.f32 %v10244_v58, %v11428_v26  ;;  %v5147_v24 = vmul.f32 %v10260_v17, %v11429_v52 }
 0x3eb   :  { %v3918_v22 = vadd.f32 %v3912_v42, %v3894_v41  ;;  %v3921_v50 = vadd.f32 %v3915_v12, %v3897_v29  ;;  %v6439_v42 = vmul.f32 -1.442695, %v4809_v20  ;;  %v11430_v29 = vld [vmem:[#allocation9_spill] sm:$0xff]  ;;  %v11431_v12 = vld [vmem:[#allocation79_spill] sm:$0xff] }
 0x3ec   :  { %v10378_v32 = vpop.eup %7290  ;;  %v1060_v7 = vadd.f32 %v11431_v12, %v11430_v29 }
 0x3ed   :  { %v7293_v36 = vpop.eup %7292  ;;  %v4710_v6 = vmul.f32 %v10378_v32, %v10321_v47  ;;  %v4722_v8 = vmul.f32 %v10378_v32, %v4716_v19  ;;  %v3924_v28 = vadd.f32 %v3918_v22, %v3852_v35  ;;  %v3927_v25 = vadd.f32 %v3921_v50, %v3855_v51 }
 0x3ee   :  { %v4830_v31 = vadd.f32 1.0, %v7293_v36  ;;  %v5141_v47 = vadd.f32 %v5135_v5, %v5129_v9  ;;  %v11432_v36 = vld [vmem:[#allocation56_spill] sm:$0xff] }
 0x3ef   :  { %v4728_v30 = vrot.slane %v4722_v8, 5  ;;  %v6404_v37 = vmul.f32 -1.442695, %v3924_v28  ;;  %v6407_v19 = vmul.f32 -1.442695, %v3927_v25 }
 0x3f0   :  { %v5153_v35 = vadd.f32 %v5147_v24, %v5141_v47 }
 0x3f1   :  { %v10384_v56 = vadd.f32 %v4728_v30, %v4710_v6  ;;  %7294 = vpow2.f32 %v6404_v37  ;;  %v11433_v30 = vld [vmem:[#allocation82_spill] sm:$0xff] }
 0x3f2   :  { %7296 = vtanh.f32 %v4809_v20  ;;  %v5159_v8 = vadd.f32 %v5153_v35, %v1060_v7 }
 0x3f3   :  { %11426 = vst [vmem:[#allocation65_spill] sm:$0xff] %v10384_v56  ;;  %7298 = vpow2.f32 %v6437_v59 }
 0x3f4   :  { %7300 = vrcp.f32 %v4830_v31  ;;  %v6447_v20 = vmul.f32 -1.442695, %v5159_v8 }
 0x3f5   :  { %7302 = vtanh.f32 %v3927_v25 }
 0x3f6   :  { %7304 = vpow2.f32 %v6433_v15 }
 0x3f7   :  { %7306 = vtanh.f32 %v11432_v36 }
 0x3fb   :  { %v7295_v51 = vpop.eup %7294 }
 0x3fc   :  { %v7297_v41 = vpop.eup %7296  ;;  %v3948_v22 = vadd.f32 1.0, %v7295_v51 }
 0x3fd   :  { %v7299_v50 = vpop.eup %7298  ;;  %v4857_v1 = vrot.slane %v7297_v41, 1 }
 0x3fe   :  { %v7301_v6 = vpop.eup %7300  ;;  %7308 = vrcp.f32 %v3948_v22  ;;  %v4831_v28 = vadd.f32 1.0, %v7299_v50 }
 0x3ff   :  { %7310 = vpow2.f32 %v6439_v42  ;;  %v4851_v27 = vmul.f32 %v7301_v6, %v11433_v30  ;;  %v4863_v59 = vmul.f32 %v7301_v6, %v4857_v1  ;;  %v7303_v31 = vpop.eup %7302 }
 0x400   :  { %7312 = vpow2.f32 %v6407_v19  ;;  %v7305_v9 = vpop.eup %7304  ;;  %v3975_v47 = vrot.slane %v7303_v31, 1 }
 0x401   :  { %v4869_v37 = vrot.slane %v4863_v59, 5  ;;  %7314 = vrcp.f32 %v4831_v28  ;;  %v7307_v5 = vpop.eup %7306  ;;  %v4692_v24 = vadd.f32 1.0, %v7305_v9  ;;  %v11436_v28 = vld [vmem:[#allocation52_spill] sm:$0xff] }
 0x402   :  { %7316 = vpow2.f32 %v6447_v20  ;;  %v4882_v7 = vrot.slane %v7307_v5, 5  ;;  %v11437_v5 = vld [vmem:[#allocation80_spill] sm:$0xff] }
 0x403   :  { %v10397_v25 = vadd.f32 %v4869_v37, %v4851_v27 }
 0x404   :  { %v4888_v30 = vmul.f32 %v11436_v28, %v4882_v7 }
 0x405   :  { %11434 = vst [vmem:[#allocation14_spill] sm:$0xff] %v10397_v25  ;;  %7318 = vtanh.f32 %v10397_v25 }
 0x406   :  { %7320 = vtanh.f32 %v10384_v56  ;;  %v4897_v20 = vrot.slane %v4888_v30, %v7958_v4  ;;  %v4915_v37 = vrot.slane %v4888_v30, %v7961_v55  ;;  %v11441_v56 = vld [vmem:[#allocation77_spill] sm:$0xff] }
 0x407   :  { %7322 = vrcp.f32 %v4692_v24  ;;  %v11438_v24 = vld [vmem:[#allocation26_spill] sm:$0xff] }
 0x408   :  { %v10400_v15 = vpop.eup %7308 }
 0x409   :  { %v7311_v35 = vpop.eup %7310  ;;  %v3969_v51 = vmul.f32 %v10400_v15, %v10347_v23  ;;  %v3981_v42 = vmul.f32 %v10400_v15, %v3975_v47  ;;  %v1019_v47 = vadd.f32 %v11437_v5, %v11430_v29 }
 0x40a   :  { %v7313_v41 = vpop.eup %7312  ;;  %v4833_v19 = vadd.f32 1.0, %v7311_v35  ;;  %v10417_v35 = vadd.f32 %v11438_v24, %v11430_v29  ;;  %v11440_v24 = vld [vmem:[#allocation76_spill] sm:$0xff] }
 0x40b   :  { %v3987_v12 = vrot.slane %v3981_v42, 5  ;;  %v3951_v22 = vadd.f32 1.0, %v7313_v41  ;;  %v7315_v8 = vpop.eup %7314  ;;  %v4909_v42 = vmul.f32 %v4897_v20, %v8072_v18  ;;  %v4924_v41 = vmul.f32 %v4915_v37, %v7875_v60 }
 0x40c   :  { %v7317_v1 = vpop.eup %7316  ;;  %v4891_v27 = vmul.f32 %v7315_v8, %v4882_v7  ;;  %v10431_v25 = vadd.f32 %v11440_v24, %v11340_v10 }
 0x40d   :  { %v10406_v50 = vadd.f32 %v3987_v12, %v3969_v51  ;;  %v4906_v51 = vmul.f32 %v4897_v20, %v7857_v38  ;;  %v4927_v12 = vmul.f32 %v4915_v37, %v8029_v11  ;;  %v5183_v7 = vadd.f32 1.0, %v7317_v1 }
 0x40e   :  { %v4939_v31 = vrot.slane %v4891_v27, %v7964_v2  ;;  %v1023_v1 = vadd.f32 %v11441_v56, %v11422_v13  ;;  %v5138_v56 = vmul.f32 %v10244_v58, %v7819_v54  ;;  %v5137_v58 = vmul.f32 %v4915_v37, %v7819_v54 }
 0x40f   :  { %11435 = vst [vmem:[#allocation48_spill] sm:$0xff] %v10406_v50  ;;  %7324 = vtanh.f32 %v10406_v50  ;;  %v7319_v59 = vpop.eup %7318  ;;  %v4930_v27 = vadd.f32 %v4924_v41, %v4906_v51  ;;  %v5128_v51 = vmul.f32 %v4897_v20, %v11427_v61 }
 0x410   :  { %7326 = vrcp.f32 %v4833_v19  ;;  %v7321_v23 = vpop.eup %7320  ;;  %v4884_v9 = vrot.slane %v7319_v59, 5  ;;  %v11439_v19 = vld [vmem:[#allocation21_spill] sm:$0xff]  ;;  %v4933_v59 = vadd.f32 %v4927_v12, %v4909_v42  ;;  %v4948_v29 = vmul.f32 %v4939_v31, %v7953_v16 }
 0x411   :  { %7328 = vrcp.f32 %v3951_v22  ;;  %v10425_v22 = vadd.f32 %v11439_v19, %v11422_v13  ;;  %v4743_v8 = vrot.slane %v7321_v23, 5  ;;  %v7323_v30 = vpop.eup %7322  ;;  %v4951_v5 = vmul.f32 %v4939_v31, %v8090_v62 }
 0x412   :  { %v4890_v28 = vmul.f32 %v7301_v6, %v4884_v9  ;;  %v10440_v6 = vadd.f32 %v4948_v29, %v4930_v27  ;;  %v5134_v42 = vmul.f32 %v4915_v37, %v11428_v26  ;;  %7330 = vrcp.f32 %v5183_v7 }
 0x413   :  { %v10436_v63 = vmul.f32 %v10378_v32, %v4743_v8  ;;  %v10438_v19 = vmul.f32 %v7323_v30, %v4743_v8  ;;  %v10442_v23 = vadd.f32 %v4951_v5, %v4933_v59  ;;  %v5132_v12 = vmul.f32 %v10241_v57, %v7817_v53 }
 0x414   :  { %11442 = vst [vmem:[#allocation15_spill] sm:$0xff] %v10440_v6  ;;  %v10451_v32 = vrot.slane %v4890_v28, %v7958_v4  ;;  %v5140_v27 = vadd.f32 %v5134_v42, %v5128_v51  ;;  %v5146_v59 = vmul.f32 %v4939_v31, %v11429_v52  ;;  %v10455_v29 = vrot.slane %v4890_v28, %v7961_v55 }
 0x415   :  { %11443 = vst [vmem:[#allocation19_spill] sm:$0xff] %v10442_v23  ;;  %v5144_v24 = vadd.f32 %v5138_v56, %v5132_v12  ;;  %v5150_v7 = vmul.f32 %v10260_v17, %v11419_v39  ;;  %v5131_v57 = vmul.f32 %v4897_v20, %v7817_v53  ;;  %v5149_v28 = vmul.f32 %v4939_v31, %v11419_v39 }
 0x416   :  { %v5152_v51 = vadd.f32 %v5146_v59, %v5140_v27  ;;  %v4908_v12 = vmul.f32 %v10451_v32, %v7857_v38  ;;  %v4926_v31 = vmul.f32 %v10455_v29, %v7875_v60 }
 0x417   :  { %v5143_v50 = vadd.f32 %v5137_v58, %v5131_v57 }
 0x418   :  { %v5158_v37 = vadd.f32 %v5152_v51, %v1019_v47  ;;  %v6444_v47 = vmul.f32 -1.442695, %v10317_v21  ;;  %v4763_v21 = vrot.slane %v10274_v34, 3  ;;  %v4995_v34 = vrot.slane %v10436_v63, %v7961_v55 }
 0x419   :  { %v7325_v41 = vpop.eup %7324  ;;  %v5155_v56 = vadd.f32 %v5149_v28, %v5143_v50  ;;  %v4225_v50 = vadd.f32 %v10269_v49, %v11362_v40 }
 0x41a   :  { %v7327_v8 = vpop.eup %7326  ;;  %v4002_v30 = vrot.slane %v7325_v41, 5  ;;  %v5156_v41 = vadd.f32 %v5150_v7, %v5144_v24  ;;  %v6446_v7 = vmul.f32 -1.442695, %v5158_v37 }
 0x41b   :  { %v7329_v5 = vpop.eup %7328  ;;  %v4893_v42 = vmul.f32 %v7327_v8, %v4884_v9  ;;  %v4911_v9 = vmul.f32 %v10451_v32, %v8072_v18  ;;  %v4929_v8 = vmul.f32 %v10455_v29, %v8029_v11  ;;  %v5161_v28 = vadd.f32 %v5155_v56, %v1023_v1 }
 0x41c   :  { %v10462_v23 = vmul.f32 %v10400_v15, %v4002_v30  ;;  %v10464_v6 = vmul.f32 %v7329_v5, %v4002_v30  ;;  %v10490_v11 = vpop.eup %7330  ;;  %7332 = vpow2.f32 %v6446_v7  ;;  %v5162_v49 = vadd.f32 %v5156_v41, %v10425_v22 }
 0x41d   :  { %v4935_v60 = vadd.f32 %v4929_v8, %v4911_v9  ;;  %7334 = vpow2.f32 %v6444_v47  ;;  %v4977_v1 = vrot.slane %v10436_v63, %v7958_v4  ;;  %v4766_v56 = vrot.slane %v10438_v19, 3 }
 0x41e   :  { %v4231_v17 = vrot.slane %v10462_v23, %v7958_v4  ;;  %v4249_v20 = vrot.slane %v10462_v23, %v7961_v55  ;;  %v4273_v15 = vrot.slane %v10464_v6, %v7964_v2  ;;  %v6450_v8 = vmul.f32 -1.442695, %v5162_v49 }
 0x41f   :  { %v4980_v22 = vmul.f32 %v4977_v1, %v11368_v44  ;;  %v4983_v41 = vmul.f32 %v4977_v1, %v11369_v3  ;;  %7336 = vtanh.f32 %v5162_v49  ;;  %v5133_v47 = vmul.f32 %v10451_v32, %v7817_v53 }
 0x420   :  { %v4240_v30 = vmul.f32 %v4231_v17, %v11368_v44  ;;  %v4243_v27 = vmul.f32 %v4231_v17, %v11369_v3  ;;  %v4258_v59 = vmul.f32 %v4249_v20, %v11370_v48  ;;  %v4261_v5 = vmul.f32 %v4249_v20, %v11372_v14 }
 0x421   :  { %v4282_v24 = vmul.f32 %v4273_v15, %v11297_v46  ;;  %v4285_v51 = vmul.f32 %v4273_v15, %v11263_v45  ;;  %v4932_v17 = vadd.f32 %v4926_v31, %v4908_v12  ;;  %v4947_v20 = vrot.slane %v4893_v42, %v7964_v2 }
 0x422   :  { %v4264_v57 = vadd.f32 %v4258_v59, %v4240_v30  ;;  %v4267_v58 = vadd.f32 %v4261_v5, %v4243_v27  ;;  %v4998_v27 = vmul.f32 %v4995_v34, %v11370_v48  ;;  %v6449_v59 = vmul.f32 -1.442695, %v5161_v28 }
 0x423   :  { %v4950_v37 = vmul.f32 %v4947_v20, %v7953_v16  ;;  %v4953_v30 = vmul.f32 %v4947_v20, %v8090_v62  ;;  %v5151_v53 = vmul.f32 %v4947_v20, %v11419_v39 }
 0x424   :  { %v4288_v18 = vadd.f32 %v4282_v24, %v4264_v57  ;;  %v4291_v38 = vadd.f32 %v4285_v51, %v4267_v58  ;;  %v5004_v5 = vadd.f32 %v4998_v27, %v4980_v22  ;;  %v5136_v58 = vmul.f32 %v10455_v29, %v11428_v26 }
 0x425   :  { %v4956_v42 = vadd.f32 %v4950_v37, %v4932_v17  ;;  %v4959_v9 = vadd.f32 %v4953_v30, %v4935_v60  ;;  %v5130_v60 = vmul.f32 %v10451_v32, %v11427_v61  ;;  %v5148_v51 = vmul.f32 %v4947_v20, %v11429_v52  ;;  %v11444_v52 = vld [vmem:[#allocation74_spill] sm:$0xff] }
 0x426   :  { %v4294_v15 = vadd.f32 %v4288_v18, %v10431_v25  ;;  %v4297_v12 = vadd.f32 %v4291_v38, %v4225_v50  ;;  %v5001_v38 = vmul.f32 %v4995_v34, %v11372_v14  ;;  %v5019_v25 = vrot.slane %v10438_v19, %v7964_v2  ;;  %v7333_v61 = vpop.eup %7332 }
 0x427   :  { %v4962_v18 = vadd.f32 %v4956_v42, %v11340_v10  ;;  %v4965_v50 = vadd.f32 %v4959_v9, %v11362_v40  ;;  %v5139_v19 = vmul.f32 %v10455_v29, %v7819_v54  ;;  %v4765_v32 = vrot.slane %v10436_v63, 3 }
 0x428   :  { %v6416_v31 = vmul.f32 -1.442695, %v4294_v15  ;;  %v5007_v24 = vadd.f32 %v5001_v38, %v4983_v41  ;;  %v5022_v7 = vmul.f32 %v5019_v25, %v11297_v46  ;;  %v5025_v57 = vmul.f32 %v5019_v25, %v11263_v45  ;;  %v7335_v15 = vpop.eup %7334 }
 0x429   :  { %v5182_v37 = vadd.f32 1.0, %v7333_v61  ;;  %v5142_v30 = vadd.f32 %v5136_v58, %v5130_v60  ;;  %v5145_v1 = vadd.f32 %v5139_v19, %v5133_v47  ;;  %v4767_v54 = vsel %vm1812_vm4, %v4765_v32, %v4766_v56  ;;  %v7337_v20 = vpop.eup %7336 }
 0x42a   :  { %7338 = vpow2.f32 %v6416_v31  ;;  %v5028_v17 = vadd.f32 %v5022_v7, %v5004_v5  ;;  %v5031_v49 = vadd.f32 %v5025_v57, %v5007_v24  ;;  %v1066_v29 = vadd.f32 %v11444_v52, %v11422_v13  ;;  %4773 = vst [vmem:[#allocation2 + $0x58] sm:$0x38] %v4767_v54 }
 0x42b   :  { %7340 = vtanh.f32 %v5161_v28  ;;  %v4762_v28 = vrot.slane %v10272_v33, 3  ;;  %v5154_v42 = vadd.f32 %v5148_v51, %v5142_v30  ;;  %v5157_v9 = vadd.f32 %v5151_v53, %v5145_v1  ;;  %v11445_v30 = vld [vmem:[#allocation48_spill] sm:$0xff] }
 0x42c   :  { %7342 = vpow2.f32 %v6450_v8  ;;  %v5034_v26 = vadd.f32 %v5028_v17, %v4962_v18  ;;  %v5037_v34 = vadd.f32 %v5031_v49, %v4965_v50  ;;  %v6419_v39 = vmul.f32 -1.442695, %v4297_v12 }
 0x42d   :  { %7344 = vrcp.f32 %v5182_v37  ;;  %v5160_v22 = vadd.f32 %v5154_v42, %v10417_v35  ;;  %v10529_v33 = vadd.f32 %v5157_v9, %v1066_v29  ;;  %v4764_v41 = vsel %vm1812_vm4, %v4762_v28, %v4763_v21 }
 0x42e   :  { %v6442_v63 = vmul.f32 -1.442695, %v5034_v26  ;;  %7346 = vpow2.f32 %v6449_v59  ;;  %4772 = vst [vmem:[#allocation2 + $0x50] sm:$0x38] %v4764_v41  ;;  %v4021_v56 = vrot.slane %v10462_v23, 1  ;;  %v4022_v31 = vrot.slane %v10464_v6, 1 }
 0x42f   :  { %7348 = vtanh.f32 %v4297_v12  ;;  %v5210_v59 = vrot.slane %v7337_v20, 1  ;;  %v6448_v38 = vmul.f32 -1.442695, %v5160_v22  ;;  %v5060_v35 = vadd.f32 1.0, %v7335_v15 }
 0x430   :  { %7350 = vpow2.f32 %v6442_v63  ;;  %v4023_v27 = vsel %vm4020_vm7, %v4021_v56, %v4022_v31  ;;  %v5204_v6 = vmul.f32 %v10490_v11, %v10121_v0  ;;  %v6445_v32 = vmul.f32 -1.442695, %v5037_v34 }
 0x431   :  { %7352 = vpow2.f32 %v6419_v39  ;;  %4033 = vst [vmem:[#allocation2 + $0x30] sm:$0xe0] %v4023_v27  ;;  %v5216_v21 = vmul.f32 %v10490_v11, %v5210_v59  ;;  %v6451_v15 = vmul.f32 -1.442695, %v10529_v33 }
 0x433   :  { %v5222_v5 = vrot.slane %v5216_v21, 5 }
 0x434   :  { %v7339_v13 = vpop.eup %7338 }
 0x435   :  { %v4318_v8 = vadd.f32 1.0, %v7339_v13  ;;  %v7341_v18 = vpop.eup %7340  ;;  %v5228_v24 = vadd.f32 %v5222_v5, %v5204_v6 }
 0x436   :  { %v7343_v12 = vpop.eup %7342  ;;  %v5209_v23 = vrot.slane %v7341_v18, 1 }
 0x437   :  { %7354 = vrcp.f32 %v4318_v8  ;;  %v10537_v25 = vpop.eup %7344  ;;  %v5186_v50 = vadd.f32 1.0, %v7343_v12 }
 0x438   :  { %7356 = vtanh.f32 %v10332_v43  ;;  %v5215_v60 = vmul.f32 %v10537_v25, %v5209_v23  ;;  %v7347_v47 = vpop.eup %7346  ;;  %v5203_v57 = vmul.f32 %v10537_v25, %v11432_v36 }
 0x439   :  { %7358 = vpow2.f32 %v6448_v38  ;;  %v7349_v7 = vpop.eup %7348  ;;  %v5185_v61 = vadd.f32 1.0, %v7347_v47 }
 0x43a   :  { %7360 = vrcp.f32 %v5060_v35  ;;  %v5221_v58 = vrot.slane %v5215_v60, 5  ;;  %v7351_v19 = vpop.eup %7350  ;;  %v4345_v49 = vrot.slane %v7349_v7, 1 }
 0x43b   :  { %7362 = vtanh.f32 %v5037_v34  ;;  %v7353_v51 = vpop.eup %7352  ;;  %v5058_v0 = vadd.f32 1.0, %v7351_v19  ;;  %v11446_v34 = vld [vmem:[#allocation17_spill] sm:$0xff] }
 0x43c   :  { %7364 = vtanh.f32 %v5228_v24  ;;  %v5227_v17 = vadd.f32 %v5221_v58, %v5203_v57  ;;  %v4321_v37 = vadd.f32 1.0, %v7353_v51  ;;  %v11447_v19 = vld [vmem:[#allocation65_spill] sm:$0xff] }
 0x43d   :  { %7366 = vrcp.f32 %v5186_v50 }
 0x43e   :  { %7368 = vtanh.f32 %v5227_v17 }
 0x43f   :  { %7370 = vrcp.f32 %v5058_v0 }
 0x440   :  { %7372 = vrcp.f32 %v5185_v61 }
 0x441   :  { %v10544_v53 = vpop.eup %7354  ;;  %7374 = vpow2.f32 %v6445_v32  ;;  %v11448_v32 = vld [vmem:[#allocation13_spill] sm:$0xff] }
 0x442   :  { %v4339_v1 = vmul.f32 %v10544_v53, %v11445_v30  ;;  %v4351_v28 = vmul.f32 %v10544_v53, %v4345_v49  ;;  %v7357_v36 = vpop.eup %7356  ;;  %7376 = vrcp.f32 %v4321_v37  ;;  %v11449_v30 = vld [vmem:[#allocation67_spill] sm:$0xff] }
 0x443   :  { %v7359_v26 = vpop.eup %7358  ;;  %v5111_v52 = vrot.slane %v7357_v36, 5  ;;  %7378 = vpow2.f32 %v6451_v15  ;;  %v11451_v15 = vld [vmem:[#allocation58_spill] sm:$0xff] }
 0x444   :  { %v4357_v54 = vrot.slane %v4351_v28, 5  ;;  %v7361_v29 = vpop.eup %7360  ;;  %v5184_v20 = vadd.f32 1.0, %v7359_v26  ;;  %v11450_v28 = vld [vmem:[#allocation20_spill] sm:$0xff] }
 0x445   :  { %v7363_v42 = vpop.eup %7362  ;;  %v5117_v39 = vmul.f32 %v11446_v34, %v5111_v52  ;;  %v5120_v63 = vmul.f32 %v7361_v29, %v5111_v52 }
 0x446   :  { %v10550_v9 = vadd.f32 %v4357_v54, %v4339_v1  ;;  %v7365_v22 = vpop.eup %7364  ;;  %v5085_v8 = vrot.slane %v7363_v42, 1 }
 0x447   :  { %5126 = vst [vmem:[#allocation2 + $0x68] sm:$0x1] %v5120_v63  ;;  %v5327_v41 = vrot.slane %v5117_v39, %v7958_v4  ;;  %v5345_v56 = vrot.slane %v5117_v39, %v7961_v55  ;;  %v5369_v31 = vrot.slane %v5120_v63, %v7964_v2  ;;  %5123 = vst [vmem:[#allocation2 + $0x50] sm:$0xc0] %v5117_v39  ;;  %v5237_v13 = vrot.slane %v7365_v22, 5  ;;  %v7367_v27 = vpop.eup %7366 }
 0x448   :  { %7380 = vtanh.f32 %v10550_v9  ;;  %v7369_v21 = vpop.eup %7368 }
 0x449   :  { %7382 = vtanh.f32 %v10529_v33  ;;  %v5333_v18 = vmul.f32 %v5327_v41, %v11368_v44  ;;  %v5336_v59 = vmul.f32 %v5327_v41, %v11369_v3  ;;  %v5351_v38 = vmul.f32 %v5345_v56, %v11370_v48  ;;  %v10564_v5 = vpop.eup %7370 }
 0x44a   :  { %v5354_v35 = vmul.f32 %v5345_v56, %v11372_v14  ;;  %v5243_v12 = vmul.f32 %v10490_v11, %v5237_v13  ;;  %v5246_v23 = vmul.f32 %v7367_v27, %v5237_v13  ;;  %v5375_v6 = vmul.f32 %v5369_v31, %v11297_v46  ;;  %v7373_v24 = vpop.eup %7372 }
 0x44b   :  { %7384 = vrcp.f32 %v5184_v20  ;;  %v5357_v60 = vadd.f32 %v5351_v38, %v5333_v18  ;;  %v5378_v47 = vmul.f32 %v5369_v31, %v11263_v45  ;;  %v5236_v50 = vrot.slane %v7369_v21, 5  ;;  %v7375_v49 = vpop.eup %7374 }
 0x44c   :  { %v5360_v33 = vadd.f32 %v5354_v35, %v5336_v59  ;;  %v5255_v7 = vrot.slane %v5243_v12, %v7958_v4  ;;  %v5273_v57 = vrot.slane %v5243_v12, %v7961_v55  ;;  %v5297_v58 = vrot.slane %v5246_v23, %v7964_v2  ;;  %v7377_v54 = vpop.eup %7376 }
 0x44d   :  { %v5079_v11 = vmul.f32 %v10564_v5, %v11447_v19  ;;  %v5381_v51 = vadd.f32 %v5375_v6, %v5357_v60  ;;  %v5242_v17 = vmul.f32 %v10537_v25, %v5236_v50  ;;  %v5245_v0 = vmul.f32 %v7373_v24, %v5236_v50  ;;  %v7379_v25 = vpop.eup %7378 }
 0x44e   :  { %v5384_v61 = vadd.f32 %v5378_v47, %v5360_v33  ;;  %v5261_v37 = vmul.f32 %v5255_v7, %v11448_v32  ;;  %v5264_v1 = vmul.f32 %v5255_v7, %v11449_v30  ;;  %v5279_v36 = vmul.f32 %v5273_v57, %v11450_v28 }
 0x44f   :  { %v5282_v26 = vmul.f32 %v5273_v57, %v11451_v15  ;;  %v5303_v52 = vmul.f32 %v5297_v58, %v7953_v16  ;;  %v5306_v29 = vmul.f32 %v5297_v58, %v8090_v62  ;;  %v5251_v42 = vrot.slane %v5242_v17, %v7958_v4 }
 0x450   :  { %v5269_v34 = vrot.slane %v5242_v17, %v7961_v55  ;;  %v5285_v39 = vadd.f32 %v5279_v36, %v5261_v37  ;;  %v5293_v20 = vrot.slane %v5245_v0, %v7964_v2  ;;  %v5091_v22 = vmul.f32 %v10564_v5, %v5085_v8 }
 0x451   :  { %v5288_v63 = vadd.f32 %v5282_v26, %v5264_v1  ;;  %v5260_v56 = vmul.f32 %v5251_v42, %v11448_v32  ;;  %v5263_v31 = vmul.f32 %v5251_v42, %v11449_v30  ;;  %v5061_v58 = vadd.f32 1.0, %v7375_v49  ;;  %v11453_v42 = vld [vmem:[#allocation36_spill] sm:$0xff] }
 0x452   :  { %v7381_v41 = vpop.eup %7380  ;;  %v5278_v13 = vmul.f32 %v5269_v34, %v11450_v28  ;;  %v5281_v27 = vmul.f32 %v5269_v34, %v11451_v15  ;;  %v5309_v38 = vadd.f32 %v5303_v52, %v5285_v39  ;;  %v5302_v21 = vmul.f32 %v5293_v20, %v7953_v16 }
 0x453   :  { %v7383_v18 = vpop.eup %7382  ;;  %v4372_v59 = vrot.slane %v7381_v41, 5  ;;  %v5312_v35 = vadd.f32 %v5306_v29, %v5288_v63  ;;  %v5305_v6 = vmul.f32 %v5293_v20, %v8090_v62  ;;  %v5097_v8 = vrot.slane %v5091_v22, 5  ;;  %v5486_v63 = vld [vmem:[#allocation2 + $0x50] sm:$0xff] }
 0x454   :  { %v5284_v12 = vadd.f32 %v5278_v13, %v5260_v56  ;;  %v5287_v23 = vadd.f32 %v5281_v27, %v5263_v31  ;;  %v5315_v50 = vadd.f32 %v5309_v38, %v11340_v10  ;;  %v4594_v34 = vadd.f32 %v11453_v42, %v11362_v40 }
 0x455   :  { %v10589_v60 = vpop.eup %7384  ;;  %v4378_v33 = vmul.f32 %v10544_v53, %v4372_v59  ;;  %v4381_v47 = vmul.f32 %v7377_v54, %v4372_v59  ;;  %v5318_v24 = vadd.f32 %v5312_v35, %v11362_v40  ;;  %v10598_v19 = vadd.f32 %v5097_v8, %v5079_v11  ;;  %v11452_v53 = vld [vmem:[#allocation78_spill] sm:$0xff] }
 0x456   :  { %v10594_v7 = vadd.f32 %v5302_v21, %v5284_v12  ;;  %v10596_v57 = vadd.f32 %v5305_v6, %v5287_v23  ;;  %v5387_v1 = vadd.f32 %v5381_v51, %v5315_v50  ;;  %v4591_v36 = vadd.f32 %v11452_v53, %v11340_v10  ;;  %v11454_v59 = vld [vmem:[#allocation14_spill] sm:$0xff] }
 0x457   :  { %v4600_v17 = vrot.slane %v4378_v33, %v7958_v4  ;;  %v4618_v0 = vrot.slane %v4378_v33, %v7961_v55  ;;  %v4642_v37 = vrot.slane %v4381_v47, %v7964_v2  ;;  %v10605_v26 = vadd.f32 %v5384_v61, %v5318_v24  ;;  %v5483_v61 = vld [vmem:[#allocation2 + $0x38] sm:$0xff] }
 0x458   :  { %7386 = vtanh.f32 %v10598_v19  ;;  %v5211_v54 = vrot.slane %v7383_v18, 1  ;;  %v5498_v56 = vpack.c.bf16 %v5486_v63, %v5483_v61  ;;  %v4390_v31 = vrot.slane %v4378_v33, 6  ;;  %v10623_v33 = vld [vmem:[%s10871_s7] sm:$0xff]   ;;  %v6200_v63 = vld [vmem:[#allocation3] sm:$0x1] }
 0x459   :  { %v4609_v52 = vmul.f32 %v4600_v17, %v11368_v44  ;;  %v4612_v11 = vmul.f32 %v4600_v17, %v11369_v3  ;;  %v4627_v49 = vmul.f32 %v4618_v0, %v11370_v48  ;;  %v4630_v29 = vmul.f32 %v4618_v0, %v11372_v14  ;;  %6500 = vmatprep.mubr.msk.bf16.mxu1 %vm5529_vm8, %v10623_v33 }
 0x45a   :  { %v4651_v51 = vmul.f32 %v4642_v37, %v11297_v46  ;;  %v4654_v39 = vmul.f32 %v4642_v37, %v11263_v45  ;;  %7388 = vrcp.f32 %v5061_v58  ;;  %v5217_v41 = vmul.f32 %v10589_v60, %v5211_v54  ;;  %5549 = vmatprep.subr.bf16.mxu0 %v5498_v56  ;;  %v5484_v56 = vld [vmem:[#allocation2 + $0x40] sm:$0xff] }
 0x45b   :  { %v4633_v20 = vadd.f32 %v4627_v49, %v4609_v52  ;;  %v4636_v22 = vadd.f32 %v4630_v29, %v4612_v11  ;;  %v4391_v13 = vrot.slane %v4381_v47, 6  ;;  %v5205_v38 = vmul.f32 %v10589_v60, %v11454_v59  ;;  %v5503_v47 = vld [vmem:[%s10872_s8] sm:$0xff] }
 0x45c   :  { %v5223_v35 = vrot.slane %v5217_v41, 5  ;;  %v5187_v8 = vadd.f32 1.0, %v7379_v25  ;;  %v6453_v24 = vmul.f32 -1.442695, %v5387_v1  ;;  %5508 = vperm.xlu1 %6549, %v5503_v47   ;;  %v5504_v25 = vld [vmem:[%s10872_s8 + $0x8] sm:$0xff]  ;;  %v5654_v52 = vld [vmem:[%s10874_s10] sm:$0xff] }
 0x45d   :  { %v4657_v27 = vadd.f32 %v4651_v51, %v4633_v20  ;;  %v4660_v18 = vadd.f32 %v4654_v39, %v4636_v22  ;;  %v4392_v21 = vsel %vm1442_vm3, %v4390_v31, %v4391_v13 }
 0x45e   :  { %v5229_v6 = vadd.f32 %v5223_v35, %v5205_v38  ;;  %4402 = vst [vmem:[#allocation2 + $0x48] sm:$0x7] %v4392_v21 }
 0x45f   :  { %v4663_v12 = vadd.f32 %v4657_v27, %v4591_v36  ;;  %v4666_v23 = vadd.f32 %v4660_v18, %v4594_v34 }
 0x460   :  { %7390 = vtanh.f32 %v5229_v6  ;;  %5513 = vperm.xlu1 %6549, %v5504_v25  }
 0x461   :  { %v6428_v50 = vmul.f32 -1.442695, %v4663_v12  ;;  %v6431_v13 = vmul.f32 -1.442695, %v4666_v23 }
 0x462   :  { %v7387_v58 = vpop.eup %7386 }
 0x463   :  { %7392 = vpow2.f32 %v6428_v50  ;;  %v5112_v17 = vrot.slane %v7387_v58, 5 }
 0x464   :  { %v7389_v0 = vpop.eup %7388  ;;  %7394 = vrcp.f32 %v5187_v8  ;;  %5658 = vperm.xlu1 %6549, %v5654_v52   ;;  %v11455_v8 = vmov 0  }
 0x465   :  { %7396 = vpow2.f32 %v6453_v24  ;;  %v5118_v37 = vmul.f32 %v10564_v5, %v5112_v17  ;;  %v5121_v1 = vmul.f32 %v7389_v0, %v5112_v17  ;;  %v10649_v50 = vsel %vm3275_vm6, 65535, %v11455_v8 }
 0x466   :  { %7398 = vtanh.f32 %v4666_v23 }
 0x467   :  { %5127 = vst [vmem:[#allocation2 + $0x70] sm:$0x1] %v5121_v1  ;;  %v5331_v53 = vrot.slane %v5118_v37, %v7958_v4  ;;  %v5349_v36 = vrot.slane %v5118_v37, %v7961_v55  ;;  %v5373_v54 = vrot.slane %v5121_v1, %v7964_v2  ;;  %5124 = vst [vmem:[#allocation2 + $0x58] sm:$0xc0] %v5118_v37 }
 0x468   :  { %6203 = vperm.xlu1 %6549, %v6200_v63  }
 0x469   :  { %v5334_v11 = vmul.f32 %v5331_v53, %v11368_v44  ;;  %v5337_v49 = vmul.f32 %v5331_v53, %v11369_v3  ;;  %v5352_v5 = vmul.f32 %v5349_v36, %v11370_v48  ;;  %v5355_v29 = vmul.f32 %v5349_v36, %v11372_v14 }
 0x46a   :  { %v5376_v34 = vmul.f32 %v5373_v54, %v11297_v46  ;;  %v7391_v51 = vpop.eup %7390  ;;  %v5379_v61 = vmul.f32 %v5373_v54, %v11263_v45 }
 0x46b   :  { %v5358_v42 = vadd.f32 %v5352_v5, %v5334_v11  ;;  %v5361_v39 = vadd.f32 %v5355_v29, %v5337_v49  ;;  %v5238_v22 = vrot.slane %v7391_v51, 5  ;;  %v10665_v11 = vld [vmem:[%s10871_s7 + $0x8] ss:$0 sps:$4 sm:$0xff]  }
 0x46d   :  { %v7393_v20 = vpop.eup %7392  ;;  %v5382_v41 = vadd.f32 %v5376_v34, %v5358_v42  ;;  %v5385_v18 = vadd.f32 %v5379_v61, %v5361_v39  ;;  %v5244_v21 = vmul.f32 %v10589_v60, %v5238_v22 }
 0x46e   :  { %v7395_v31 = vpop.eup %7394  ;;  %v4687_v27 = vadd.f32 1.0, %v7393_v20  ;;  %v5487_v59 = vld [vmem:[#allocation2 + $0x58] sm:$0xff]  ;;  %v5490_v38 = vld [vmem:[#allocation2 + $0x70] sm:$0x1] }
 0x46f   :  { %v7397_v35 = vpop.eup %7396  ;;  %v5247_v12 = vmul.f32 %v7395_v31, %v5238_v22  ;;  %v5499_v6 = vpack.c.bf16 %v5487_v59, %v5484_v56  ;;  %v5502_v24 = vpack.c.bf16 %v5490_v38, %v5490_v38  ;;  %v5259_v58 = vrot.slane %v5244_v21, %v7958_v4 }
 0x470   :  { %7400 = vrcp.f32 %v4687_v27  ;;  %v5277_v23 = vrot.slane %v5244_v21, %v7961_v55  ;;  %v5411_v17 = vadd.f32 1.0, %v7397_v35 }
 0x471   :  { %v5301_v47 = vrot.slane %v5247_v12, %v7964_v2  ;;  %6496 = vmatprep.subr.bf16.mxu1 %v5499_v6  ;;  %7402 = vpow2.f32 %v6431_v13  ;;  %v5545_v60 = vand.u32 %v10649_v50, %v5502_v24  ;;  %v5262_v0 = vmul.f32 %v5259_v58, %v11448_v32  ;;  %v7399_v32 = vpop.eup %7398 }
 0x472   :  { %6497 = vmatpush3.bf16.msra.mxu1 %v5499_v6  ;;  %v5265_v25 = vmul.f32 %v5259_v58, %v11449_v30  ;;  %v5280_v37 = vmul.f32 %v5277_v23, %v11450_v28  ;;  %v5283_v1 = vmul.f32 %v5277_v23, %v11451_v15  ;;  %7404 = vtanh.f32 %v10605_v26 }
 0x473   :  { %6498 = vmatprep.subr.bf16.mxu1 %v5545_v60  ;;  %v5304_v54 = vmul.f32 %v5301_v47, %v7953_v16  ;;  %v5307_v52 = vmul.f32 %v5301_v47, %v8090_v62  ;;  %v6456_v30 = vmul.f32 -1.442695, %v10605_v26  ;;  %7406 = vrcp.f32 %v5411_v17 }
 0x474   :  { %v5286_v53 = vadd.f32 %v5280_v37, %v5262_v0  ;;  %v5289_v36 = vadd.f32 %v5283_v1, %v5265_v25  ;;  %v4714_v49 = vrot.slane %v7399_v32, 1 }
 0x475   :  { %7408 = vpow2.f32 %v6456_v30  ;;  %v11457_v30 = vld [vmem:[#allocation19_spill] sm:$0xff] }
 0x476   :  { %6499 = vmatpush3.bf16.msra.mxu1 %v5545_v60  ;;  %v5310_v28 = vadd.f32 %v5304_v54, %v5286_v53  ;;  %v5313_v15 = vadd.f32 %v5307_v52, %v5289_v36  ;;  %v11456_v52 = vld [vmem:[#allocation15_spill] sm:$0xff] }
 0x477   :  { %v4960_v32 = vadd.f32 %v11456_v52, %v11340_v10 }
 0x478   :  { %v5316_v5 = vadd.f32 %v5310_v28, %v11340_v10  ;;  %v5319_v29 = vadd.f32 %v5313_v15, %v11362_v40  ;;  %v4963_v28 = vadd.f32 %v11457_v30, %v11362_v40 }
 0x479   :  { %6501 = vmatmul.mubr.msk.bf16.vlgmr.msra.gmra.mrb[36].mxu1 %vm5529_vm8, %v10665_v11 }
 0x47a   :  { %v7401_v16 = vpop.eup %7400  ;;  %5716 = vmatprep.mubr.bf16.mxu1 %v11455_v8  ;;  %v5388_v26 = vadd.f32 %v5382_v41, %v5316_v5  ;;  %v5391_v34 = vadd.f32 %v5385_v18, %v5319_v29 }
 0x47b   :  { %v4708_v62 = vmul.f32 %v7401_v16, %v10550_v9  ;;  %v4720_v42 = vmul.f32 %v7401_v16, %v4714_v49  ;;  %v7403_v51 = vpop.eup %7402 }
 0x47c   :  { %v6454_v61 = vmul.f32 -1.442695, %v5388_v26  ;;  %v7405_v63 = vpop.eup %7404  ;;  %v4690_v20 = vadd.f32 1.0, %v7403_v51  ;;  %v6457_v12 = vmul.f32 -1.442695, %v5391_v34 }
 0x47d   :  { %v4726_v39 = vrot.slane %v4720_v42, 5  ;;  %v7407_v56 = vpop.eup %7406  ;;  %v5438_v31 = vrot.slane %v7405_v63, 1 }
 0x47e   :  { %7410 = vpow2.f32 %v6454_v61  ;;  %v5432_v9 = vmul.f32 %v7407_v56, %v10332_v43 }
 0x47f   :  { %v10674_v22 = vadd.f32 %v4726_v39, %v4708_v62  ;;  %v5444_v13 = vmul.f32 %v7407_v56, %v5438_v31  ;;  %v7409_v27 = vpop.eup %7408 }
 0x480   :  { %v5414_v41 = vadd.f32 1.0, %v7409_v27 }
 0x481   :  { %7412 = vtanh.f32 %v10674_v22  ;;  %v5450_v59 = vrot.slane %v5444_v13, 5 }
 0x482   :  { %7414 = vrcp.f32 %v4690_v20 }
 0x483   :  { %v5456_v18 = vadd.f32 %v5450_v59, %v5432_v9  ;;  %7416 = vtanh.f32 %v5391_v34 }
 0x485   :  { %7418 = vtanh.f32 %v5456_v18 }
 0x486   :  { %7420 = vrcp.f32 %v5414_v41 }
 0x488   :  { %v7411_v38 = vpop.eup %7410 }
 0x489   :  { %v5412_v35 = vadd.f32 1.0, %v7411_v38 }
 0x48b   :  { %v7413_v21 = vpop.eup %7412  ;;  %7422 = vrcp.f32 %v5412_v35 }
 0x48c   :  { %v4741_v6 = vrot.slane %v7413_v21, 5  ;;  %v7415_v24 = vpop.eup %7414  ;;  %7424 = vpow2.f32 %v6457_v12 }
 0x48d   :  { %v7417_v25 = vpop.eup %7416 }
 0x48e   :  { %v4747_v58 = vmul.f32 %v7401_v16, %v4741_v6  ;;  %v4750_v23 = vmul.f32 %v7415_v24, %v4741_v6  ;;  %v5439_v26 = vrot.slane %v7417_v25, 1 }
 0x48f   :  { %v7419_v54 = vpop.eup %7418 }
 0x490   :  { %v4759_v47 = vrot.slane %v4747_v58, 3  ;;  %v4760_v17 = vrot.slane %v4750_v23, 3  ;;  %v4969_v43 = vrot.slane %v4747_v58, %v7958_v4  ;;  %v4987_v60 = vrot.slane %v4747_v58, %v7961_v55  ;;  %v7421_v42 = vpop.eup %7420 }
 0x491   :  { %v5011_v0 = vrot.slane %v4750_v23, %v7964_v2  ;;  %v5465_v62 = vrot.slane %v7419_v54, 5 }
 0x492   :  { %v4978_v37 = vmul.f32 %v4969_v43, %v11368_v44  ;;  %v4981_v1 = vmul.f32 %v4969_v43, %v11369_v3  ;;  %v4996_v53 = vmul.f32 %v4987_v60, %v11370_v48  ;;  %v4999_v36 = vmul.f32 %v4987_v60, %v11372_v14 }
 0x493   :  { %v5020_v15 = vmul.f32 %v5011_v0, %v11297_v46  ;;  %v4761_v49 = vsel %vm1812_vm4, %v4759_v47, %v4760_v17  ;;  %v5023_v16 = vmul.f32 %v5011_v0, %v11263_v45  ;;  %v10692_v61 = vmul.f32 %v7407_v56, %v5465_v62 }
 0x494   :  { %v5002_v5 = vadd.f32 %v4996_v53, %v4978_v37  ;;  %v5005_v29 = vadd.f32 %v4999_v36, %v4981_v1  ;;  %4771 = vst [vmem:[#allocation2 + $0x48] sm:$0x38] %v4761_v49  ;;  %v10694_v63 = vmul.f32 %v7421_v42, %v5465_v62  ;;  %v5314_v62 = vadd.f32 %v10594_v7, %v11340_v10 }
 0x495   :  { %v7423_v34 = vpop.eup %7422  ;;  %v5317_v42 = vadd.f32 %v10596_v57, %v11362_v40 }
 0x496   :  { %v5026_v51 = vadd.f32 %v5020_v15, %v5002_v5  ;;  %v5029_v39 = vadd.f32 %v5023_v16, %v5005_v29  ;;  %v5433_v20 = vmul.f32 %v7423_v34, %v10598_v19  ;;  %v5445_v31 = vmul.f32 %v7423_v34, %v5439_v26  ;;  %v7425_v9 = vpop.eup %7424 }
 0x497   :  { %v5415_v38 = vadd.f32 1.0, %v7425_v9 }
 0x498   :  { %v5032_v13 = vadd.f32 %v5026_v51, %v4960_v32  ;;  %v5035_v27 = vadd.f32 %v5029_v39, %v4963_v28  ;;  %v5451_v59 = vrot.slane %v5445_v31, 5 }
 0x49a   :  { %v6440_v41 = vmul.f32 -1.442695, %v5032_v13  ;;  %v5457_v18 = vadd.f32 %v5451_v59, %v5433_v20  ;;  %v6443_v21 = vmul.f32 -1.442695, %v5035_v27 }
 0x49c   :  { %7426 = vpow2.f32 %v6440_v41 }
 0x49d   :  { %7428 = vtanh.f32 %v5457_v18 }
 0x49e   :  { %7430 = vrcp.f32 %v5415_v38 }
 0x49f   :  { %7432 = vtanh.f32 %v5035_v27 }
 0x4a6   :  { %v7427_v35 = vpop.eup %7426 }
 0x4a7   :  { %v5056_v56 = vadd.f32 1.0, %v7427_v35  ;;  %v7429_v12 = vpop.eup %7428 }
 0x4a8   :  { %v5466_v6 = vrot.slane %v7429_v12, 5  ;;  %v7431_v24 = vpop.eup %7430 }
 0x4a9   :  { %7434 = vrcp.f32 %v5056_v56  ;;  %v7433_v23 = vpop.eup %7432 }
 0x4aa   :  { %7436 = vpow2.f32 %v6443_v21  ;;  %v10697_v19 = vmul.f32 %v7423_v34, %v5466_v6  ;;  %v10699_v58 = vmul.f32 %v7431_v24, %v5466_v6  ;;  %v5083_v47 = vrot.slane %v7433_v23, 1 }
 0x4b3   :  { %v7435_v17 = vpop.eup %7434 }
 0x4b4   :  { %v5077_v43 = vmul.f32 %v7435_v17, %v10674_v22  ;;  %v5089_v60 = vmul.f32 %v7435_v17, %v5083_v47  ;;  %v7437_v0 = vpop.eup %7436  ;;  %v5489_v22 = vld [vmem:[#allocation2 + $0x68] sm:$0x1] }
 0x4b5   :  { %v5059_v37 = vadd.f32 1.0, %v7437_v0  ;;  %v5501_v26 = vpack.c.bf16 %v5489_v22, %v5489_v22  ;;  %v5519_v0 = vpop.permute.xlu0 %5518 }
 0x4b6   :  { %v5095_v25 = vrot.slane %v5089_v60, 5 }
 0x4b8   :  { %v5101_v1 = vadd.f32 %v5095_v25, %v5077_v43 }
 0x4ba   :  { %7438 = vtanh.f32 %v5101_v1 }
 0x4bb   :  { %7440 = vrcp.f32 %v5059_v37 }
 0x4c4   :  { %v7439_v53 = vpop.eup %7438 }
 0x4c5   :  { %v5110_v36 = vrot.slane %v7439_v53, 5  ;;  %v7441_v54 = vpop.eup %7440 }
 0x4c7   :  { %v5116_v52 = vmul.f32 %v7435_v17, %v5110_v36  ;;  %v5119_v32 = vmul.f32 %v7441_v54, %v5110_v36 }
 0x4c9   :  { %5125 = vst [vmem:[#allocation2 + $0x60] sm:$0x1] %v5119_v32  ;;  %v5323_v30 = vrot.slane %v5116_v52, %v7958_v4  ;;  %v5341_v28 = vrot.slane %v5116_v52, %v7961_v55  ;;  %v5365_v15 = vrot.slane %v5119_v32, %v7964_v2  ;;  %5122 = vst [vmem:[#allocation2 + $0x48] sm:$0xc0] %v5116_v52 }
 0x4ca   :  { %v6003_v32 = vpack.c.bf16 %v10699_v58, %v10697_v19 }
 0x4cb   :  { %v5332_v49 = vmul.f32 %v5323_v30, %v11368_v44  ;;  %v5335_v5 = vmul.f32 %v5323_v30, %v11369_v3  ;;  %v5350_v29 = vmul.f32 %v5341_v28, %v11370_v48  ;;  %v5353_v16 = vmul.f32 %v5341_v28, %v11372_v14  ;;  %v5482_v3 = vld [vmem:[#allocation2 + $0x30] sm:$0xff] }
 0x4cc   :  { %v5374_v51 = vmul.f32 %v5365_v15, %v11297_v46  ;;  %v5377_v39 = vmul.f32 %v5365_v15, %v11263_v45  ;;  %v5542_v48 = vand.u32 %v10649_v50, %v5501_v26  ;;  %v11458_v28 = vmov 65535  }
 0x4cd   :  { %v5356_v55 = vadd.f32 %v5350_v29, %v5332_v49  ;;  %v5359_v34 = vadd.f32 %v5353_v16, %v5335_v5  ;;  %v6014_v15 = vsel %vm3275_vm6, 4294967295, %v11458_v28  ;;  %v6009_v22 = vrot.slane %v6003_v32, 3  ;;  %v6589_v5 = vld [vmem:[%s10873_s9] sm:$0x1f]  }
 0x4ce   :  { %v6015_v29 = vsel %vm1442_vm3, %v6014_v15, 0 }
 0x4cf   :  { %v5380_v44 = vadd.f32 %v5374_v51, %v5356_v55  ;;  %v5383_v20 = vadd.f32 %v5377_v39, %v5359_v34  ;;  %v6023_v16 = vand.u32 %v6015_v29, %v6009_v22 }
 0x4d0   :  { %v5485_v31 = vld [vmem:[#allocation2 + $0x48] sm:$0xff]  ;;  %v5488_v14 = vld [vmem:[#allocation2 + $0x60] sm:$0x1] }
 0x4d1   :  { %v5386_v13 = vadd.f32 %v5380_v44, %v5314_v62  ;;  %v5389_v27 = vadd.f32 %v5383_v20, %v5317_v42  ;;  %v5497_v10 = vpack.c.bf16 %v5485_v31, %v5482_v3  ;;  %v5500_v7 = vpack.c.bf16 %v5488_v14, %v5488_v14 }
 0x4d2   :  { %v6002_v3 = vpack.c.bf16 %v10694_v63, %v10692_v61 }
 0x4d3   :  { %v6452_v9 = vmul.f32 -1.442695, %v5386_v13  ;;  %5550 = vmatpush1.bf16.msra.mxu0 %v5497_v10  ;;  %v5539_v40 = vand.u32 %v10649_v50, %v5500_v7  ;;  %v6455_v46 = vmul.f32 -1.442695, %v5389_v27 }
 0x4d4   :  { %5551 = vmatprep.subr.bf16.mxu0 %v5542_v48 }
 0x4d5   :  { %7442 = vpow2.f32 %v6452_v9  ;;  %v6008_v9 = vrot.slane %v6002_v3, 3 }
 0x4d6   :  { %7444 = vtanh.f32 %v5389_v27 }
 0x4d7   :  { %5552 = vmatpush1.bf16.msra.mxu0 %v5539_v40 }
 0x4da   :  { %6460 = vmatmul.mubr.msk.bf16.vlgmr.msra.gmra.mrb[36].mxu0 %vm5529_vm8, %v10623_v33 }
 0x4db   :  { %5589 = vmatprep.mubr.bf16.mxu0 %v11455_v8  ;;  %v5509_v17 = vpop.permute.xlu1 %5508 }
 0x4df   :  { %v7443_v45 = vpop.eup %7442 }
 0x4e0   :  { %v5410_v57 = vadd.f32 1.0, %v7443_v45  ;;  %v7445_v59 = vpop.eup %7444 }
 0x4e1   :  { %v5437_v41 = vrot.slane %v7445_v59, 1 }
 0x4e2   :  { %7446 = vrcp.f32 %v5410_v57  ;;  %6461 = vmatmul.mubr.msk.bf16.gmra.mrb[40].mxu0 %vm5529_vm8, %v10665_v11  ;;  %v7518_v11 = vmov 0.0  }
 0x4e3   :  { %7448 = vpow2.f32 %v6455_v46  ;;  %6504 = vmatprep.subr.bf16.mxu0 %v7518_v11  ;;  %6508 = vmatprep.mubr.msk.bf16.mxu0 %vm7519_vm9, %v7518_v11 }
 0x4ec   :  { %v7447_v18 = vpop.eup %7446 }
 0x4ed   :  { %v5431_v38 = vmul.f32 %v7447_v18, %v5101_v1  ;;  %v5443_v50 = vmul.f32 %v7447_v18, %v5437_v41  ;;  %v7449_v35 = vpop.eup %7448  ;;  %v5514_v1 = vpop.permute.xlu1 %5513  ;;  %v6020_v41 = vand.u32 %v6015_v29, %v6008_v9 }
 0x4ee   :  { %v5413_v56 = vadd.f32 1.0, %v7449_v35  ;;  %v5773_v35 = vrot.slane %v10697_v19, 6 }
 0x4ef   :  { %v5449_v21 = vrot.slane %v5443_v50, 5 }
 0x4f1   :  { %v5455_v33 = vadd.f32 %v5449_v21, %v5431_v38  ;;  %v10782_v38 = vpop.permute.xlu1 %5658 }
 0x4f3   :  { %7450 = vtanh.f32 %v5455_v33  ;;  %v5854_v33 = vrot.slane %v10697_v19, 3 }
 0x4f4   :  { %7452 = vrcp.f32 %v5413_v56  ;;  %v5797_v56 = vrot.slane %v10699_v58, 6 }
 0x4fd   :  { %v7451_v12 = vpop.eup %7450 }
 0x4fe   :  { %v5464_v6 = vrot.slane %v7451_v12, 5  ;;  %v7453_v24 = vpop.eup %7452  ;;  %v5875_v12 = vrot.slane %v10699_v58, 3 }
 0x500   :  { %v10722_v23 = vmul.f32 %v7447_v18, %v5464_v6  ;;  %v10724_v47 = vmul.f32 %v7453_v24, %v5464_v6 }
 0x502   :  { %v6001_v27 = vpack.c.bf16 %v10724_v47, %v10722_v23 }
 0x504   :  { %v6007_v59 = vrot.slane %v6001_v27, 3 }
 0x506   :  { %v6017_v18 = vand.u32 %v6015_v29, %v6007_v59 }
 0x54c   :  { %v6502_v43 = vpop.f32.mrb[36].mxu1 }
 0x54d   :  { %v5632_v60 = vpop.f32.mrb[37].mxu1  ;;  %v10731_v53 = vadd.f32 %v6502_v43, %v5519_v0 }
 0x54e   :  { %v10729_v25 = vadd.f32 %v5632_v60, %v5509_v17  ;;  %v6503_v37 = vpop.f32.mrb[38].mxu1 }
 0x54f   :  { %v5635_v36 = vpop.f32.mrb[39].mxu1  ;;  %v5653_v30 = vpack.c.bf16 %v10731_v53, %v10731_v53 }
 0x550   :  { %v10733_v54 = vadd.f32 %v5635_v36, %v5514_v1  ;;  %v6000_v36 = vld [vmem:[%s10876_s12] sm:$0x1] }
 0x551   :  { %v5682_v49 = vsel %vm183_vm1, %v5653_v30, 0 }
 0x552   :  { %v5650_v52 = vpack.c.bf16 %v10733_v54, %v10729_v25 }
 0x554   :  { %6505 = vmatpush3.bf16.msra.mxu0 %v5650_v52 }
 0x555   :  { %6506 = vmatprep.subr.bf16.mxu0 %v7518_v11 }
 0x558   :  { %6507 = vmatpush3.bf16.msra.mxu0 %v5682_v49 }
 0x559   :  { %6512 = vmatprep.subr.bf16.mxu0 %v7518_v11 }
 0x55b   :  { %6509 = vmatmul.mubr.msk.bf16.vlgmr.msra.gmra.mrb[44].mxu0 %vm5671_vm10, %v6589_v5 }
 0x55c   :  { %6513 = vmatpush3.bf16.msra.mxu0 %v6023_v16  ;;  %6514 = vmatprep.mubr.msk.bf16.mxu0 %vm7519_vm9, %v7518_v11 }
 0x55d   :  { %6518 = vmatprep.subr.bf16.mxu0 %v7518_v11 }
 0x563   :  { %6515 = vmatmul.mubr.msk.bf16.vlgmr.msra.gmra.mrb[48].mxu0 %vm6010_vm11, %v6000_v36 }
 0x564   :  { %6520 = vmatprep.mubr.msk.bf16.mxu0 %vm7519_vm9, %v7518_v11 }
 0x5ad   :  { %v5581_v62 = vpop.f32.mrb[36].mxu0 }
 0x5ae   :  { %v5583_v42 = vpop.f32.mrb[37].mxu0  ;;  %v10760_v44 = vadd.f32 %v5581_v62, %v5509_v17 }
 0x5af   :  { %v5585_v26 = vpop.f32.mrb[38].mxu0  ;;  %v10756_v51 = vadd.f32 %v5583_v42, %v5509_v17  ;;  %v10789_v17 = vpop.permute.xlu0 %5663 }
 0x5b0   :  { %v10754_v55 = vadd.f32 %v5585_v26, %v5514_v1  ;;  %v5587_v34 = vpop.f32.mrb[39].mxu0 }
 0x5b1   :  { %v10758_v39 = vadd.f32 %v5587_v34, %v5514_v1 }
 0x5b2   :  { %v5648_v31 = vpack.c.bf16 %v10754_v55, %v10760_v44 }
 0x5b3   :  { %v5649_v20 = vpack.c.bf16 %v10758_v39, %v10756_v51 }
 0x5b5   :  { %v5591_v48 = vpop.f32.mrb[40].mxu0  ;;  %5684 = vmatprep.subr.bf16.mxu1 %v5649_v20 }
 0x5b6   :  { %v10768_v14 = vadd.f32 %v5591_v48, %v5519_v0  ;;  %v5593_v13 = vpop.f32.mrb[41].mxu0  ;;  %5685 = vmatpush1.bf16.msra.mxu1 %v5648_v31 }
 0x5b7   :  { %v10772_v10 = vadd.f32 %v5593_v13, %v5519_v0  ;;  %v5595_v7 = vpop.f32.mrb[42].mxu0 }
 0x5b8   :  { %v5651_v40 = vpack.c.bf16 %v10768_v14, %v10768_v14  ;;  %v5596_v45 = vpop.f32.mrb[43].mxu0  ;;  %v11459_v7 = vld [vmem:[#allocation47_spill] sm:$0xff] }
 0x5b9   :  { %v5652_v46 = vpack.c.bf16 %v10772_v10, %v10772_v10  ;;  %v10801_v9 = vsub.s32 3, %v11459_v7 }
 0x5ba   :  { %v5676_v57 = vsel %vm183_vm1, %v5651_v40, 0 }
 0x5bb   :  { %6465 = vmatprep.subr.msk.bf16.mxu1 %vm183_vm1, %v5652_v46 }
 0x5bc   :  { %5687 = vmatpush1.bf16.msra.mxu1 %v5676_v57 }
 0x5bd   :  { %6025 = vmatprep.subr.bf16.mxu1 %v6020_v41 }
 0x5bf   :  { %6466 = vmatmul.mubr.msk.bf16.vlgmr.msra.gmra.mrb[40].mxu1 %vm5671_vm10, %v6589_v5 }
 0x5c0   :  { %6026 = vmatpush1.bf16.msra.mxu1 %v6017_v18  ;;  %6057 = vmatprep.mubr.bf16.mxu1 %v11455_v8 }
 0x5c7   :  { %6477 = vmatmul.mubr.msk.bf16.vlgmr.msra.gmra.mrb[44].mxu1 %vm6010_vm11, %v6000_v36  ;;  %v5796_v36 = vrot.slane %v10694_v63, 6 }
 0x5c8   :  { %6151 = vmatprep.mubr.bf16.mxu1 %v11455_v8 }
 0x62e   :  { %v5761_v50 = vpop.f32.mrb[44].mxu0 }
 0x62f   :  { %v5762_v21 = vadd.f32 %v5761_v50, %v10782_v38  ;;  %v6510_v6 = vpop.f32.mrb[45].mxu0 }
 0x630   :  { %v5764_v24 = vpop.f32.mrb[46].mxu0  ;;  %v10813_v6 = vld [vmem:[%s10875_s11] sm:$0x1]  ;;  %s7521_s11 = smov [#allocation4]  }
 0x631   :  { %v5779_v43 = vmul.f32 %v5773_v35, %v5762_v21  ;;  %v5803_v60 = vmul.f32 %v5797_v56, %v5762_v21  ;;  %v5860_v0 = vmul.f32 %v5854_v33, %v5762_v21  ;;  %v5881_v37 = vmul.f32 %v5875_v12, %v5762_v21  ;;  %v6511_v1 = vpop.f32.mrb[47].mxu0  ;;  %s6251_s25 = sshll.u32 %s7521_s11, 4  ;;  %s6252_s25 = int_to_ptr.vmem [resolvable:$true] %s6251_s25 }
 0x632   :  { %v5765_v52 = vadd.f32 %v5764_v24, %v10789_v17  ;;  %v5932_v32 = vmul.f32 %v5762_v21, %v10697_v19  ;;  %v5772_v24 = vrot.slane %v10692_v61, 6  ;;  %s7490_s0 = scalar_lea.vmem %s6252_s25, 48  ;;  %s7494_s26 = scalar_lea.vmem %s6252_s25, 64 }
 0x633   :  { %v5785_v30 = vrot.slane %v5779_v43, 1  ;;  %v5866_v28 = vrot.slane %v5860_v0, 1  ;;  %v5809_v5 = vrot.slane %v5803_v60, 2  ;;  %v5887_v16 = vrot.slane %v5881_v37, 2  ;;  %p7491_p0 = scmp.ne.s32.totalorder %s6252_s25, %s7490_s0  ;;  %p7495_p1 = scmp.lt.s32.totalorder %s6252_s25, %s6252_s25 }
 0x634   :  { %v5938_v15 = vrot.slane %v5932_v32, 1  ;;  %v5947_v22 = vmul.f32 %v5765_v52, %v10699_v58  ;;  %v5852_v60 = vrot.slane %v10722_v23, 3  ;;  %v5853_v52 = vrot.slane %v10692_v61, 3  ;;  %p7496_p2 = scmp.lt.s32.totalorder %s7494_s26, %s7490_s0 }
 0x635   :  { %v5791_v49 = vadd.f32 %v5785_v30, %v5779_v43  ;;  %v5872_v29 = vadd.f32 %v5866_v28, %v5860_v0  ;;  %v5795_v43 = vrot.slane %v10724_v47, 6  ;;  %v5873_v0 = vrot.slane %v10724_v47, 3 }
 0x636   :  { %v5944_v62 = vadd.f32 %v5938_v15, %v5932_v32  ;;  %v5953_v42 = vrot.slane %v5947_v22, 2  ;;  %v5874_v32 = vrot.slane %v10694_v63, 3  ;;  %p7497_p3 = por %p7496_p2, %p7495_p1 }
 0x637   :  { %v5815_v19 = vadd.f32 %v5809_v5, %v5791_v49  ;;  %v5893_v26 = vadd.f32 %v5887_v16, %v5872_v29 }
 0x638   :  { %v5959_v34 = vadd.f32 %v5953_v42, %v5944_v62  ;;  %p7498_p4 = pnand %p7497_p3, %p7491_p0 }
 0x639   :  { %v6470_v20 = vmul.f32 -1.442695, %v5815_v19  ;;  %v6473_v3 = vmul.f32 -1.442695, %v5893_v26 }
 0x63a   :  { %v6476_v31 = vmul.f32 -1.442695, %v5959_v34 }
 0x63b   :  { %7454 = vpow2.f32 %v6470_v20 }
 0x63c   :  { %7456 = vpow2.f32 %v6473_v3 }
 0x63d   :  { %7458 = vpow2.f32 %v6476_v31 }
 0x645   :  { %v7455_v58 = vpop.eup %7454 }
 0x646   :  { %v7457_v48 = vpop.eup %7456  ;;  %v5827_v11 = vadd.f32 1.0, %v7455_v58 }
 0x647   :  { %v7459_v13 = vpop.eup %7458  ;;  %v5905_v8 = vadd.f32 1.0, %v7457_v48 }
 0x648   :  { %7460 = vrcp.f32 %v5827_v11  ;;  %v5971_v27 = vadd.f32 1.0, %v7459_v13 }
 0x649   :  { %7462 = vrcp.f32 %v5905_v8 }
 0x64a   :  { %7464 = vrcp.f32 %v5971_v27 }
 0x652   :  { %v7461_v40 = vpop.eup %7460 }
 0x653   :  { %v7463_v45 = vpop.eup %7462  ;;  %v5845_v46 = vrot.slane %v7461_v40, %v7964_v2 }
 0x654   :  { %v7465_v57 = vpop.eup %7464  ;;  %v5923_v59 = vrot.slane %v7463_v45, %v10801_v9 }
 0x655   :  { %v5848_v41 = vmul.f32 %v5845_v46, %v10729_v25  ;;  %v5989_v18 = vrot.slane %v7465_v57, %v7958_v4 }
 0x656   :  { %v5926_v50 = vmul.f32 %v5923_v59, %v10733_v54  ;;  %v5771_v54 = vrot.slane %v10722_v23, 6 }
 0x657   :  { %v5992_v21 = vmul.f32 %v5989_v18, %v10731_v53 }
 0x658   :  { %v5929_v35 = vadd.f32 %v5926_v50, %v5848_v41 }
 0x65a   :  { %v5995_v56 = vadd.f32 %v5992_v21, %v5929_v35 }
 0x65c   :  { %v5999_v33 = vpack.c.bf16 %v5995_v56, %v5995_v56 }
 0x65e   :  { %v6117_v12 = vsel %vm183_vm1, %v5999_v33, 0 }
 0x65f   :  { %6519 = vmatpush3.bf16.msra.mxu0 %v6117_v12 }
 0x662   :  { %6521 = vmatmul.mubr.msk.bf16.vlgmr.msra.gmra.mrb[52].mxu0 %vm6106_vm12, %v10813_v6 }
 0x692   :  { %v5718_v25 = vpop.f32.mrb[40].mxu1 }
 0x693   :  { %v5719_v53 = vadd.f32 %v5718_v25, %v10782_v38  ;;  %v5720_v37 = vpop.f32.mrb[41].mxu1 }
 0x694   :  { %v5721_v1 = vadd.f32 %v5720_v37, %v10782_v38  ;;  %v5722_v30 = vpop.f32.mrb[42].mxu1 }
 0x695   :  { %v5777_v28 = vmul.f32 %v5771_v54, %v5719_v53  ;;  %v5801_v15 = vmul.f32 %v5795_v43, %v5719_v53  ;;  %v5858_v22 = vmul.f32 %v5852_v60, %v5719_v53  ;;  %v5879_v49 = vmul.f32 %v5873_v0, %v5719_v53  ;;  %v5724_v5 = vpop.f32.mrb[43].mxu1 }
 0x696   :  { %v5778_v29 = vmul.f32 %v5772_v24, %v5721_v1  ;;  %v5802_v16 = vmul.f32 %v5796_v36, %v5721_v1  ;;  %v5859_v62 = vmul.f32 %v5853_v52, %v5721_v1  ;;  %v5880_v42 = vmul.f32 %v5874_v32, %v5721_v1 }
 0x697   :  { %v5783_v19 = vrot.slane %v5777_v28, 1  ;;  %v5807_v26 = vrot.slane %v5801_v15, 2  ;;  %v5864_v34 = vrot.slane %v5858_v22, 1  ;;  %v5885_v38 = vrot.slane %v5879_v49, 2 }
 0x698   :  { %v5784_v20 = vrot.slane %v5778_v29, 1  ;;  %v5808_v3 = vrot.slane %v5802_v16, 2  ;;  %v5865_v31 = vrot.slane %v5859_v62, 1  ;;  %v5886_v58 = vrot.slane %v5880_v42, 2 }
 0x699   :  { %v5789_v48 = vadd.f32 %v5783_v19, %v5777_v28  ;;  %v5870_v11 = vadd.f32 %v5864_v34, %v5858_v22  ;;  %v5723_v13 = vadd.f32 %v5722_v30, %v10789_v17  ;;  %v5930_v8 = vmul.f32 %v5719_v53, %v10722_v23 }
 0x69a   :  { %v5790_v27 = vadd.f32 %v5784_v20, %v5778_v29  ;;  %v5871_v40 = vadd.f32 %v5865_v31, %v5859_v62  ;;  %v5725_v45 = vadd.f32 %v5724_v5, %v10789_v17  ;;  %v5931_v46 = vmul.f32 %v5721_v1, %v10692_v61 }
 0x69b   :  { %v5813_v57 = vadd.f32 %v5807_v26, %v5789_v48  ;;  %v5891_v59 = vadd.f32 %v5885_v38, %v5870_v11  ;;  %v5936_v41 = vrot.slane %v5930_v8, 1  ;;  %v5945_v18 = vmul.f32 %v5723_v13, %v10724_v47 }
 0x69c   :  { %v5814_v50 = vadd.f32 %v5808_v3, %v5790_v27  ;;  %v5892_v35 = vadd.f32 %v5886_v58, %v5871_v40  ;;  %v5937_v21 = vrot.slane %v5931_v46, 1  ;;  %v5946_v56 = vmul.f32 %v5725_v45, %v10694_v63 }
 0x69d   :  { %v6468_v33 = vmul.f32 -1.442695, %v5813_v57  ;;  %v6471_v12 = vmul.f32 -1.442695, %v5891_v59  ;;  %v5942_v25 = vadd.f32 %v5936_v41, %v5930_v8  ;;  %v5951_v23 = vrot.slane %v5945_v18, 2 }
 0x69e   :  { %v6469_v54 = vmul.f32 -1.442695, %v5814_v50  ;;  %v6472_v24 = vmul.f32 -1.442695, %v5892_v35  ;;  %v5943_v53 = vadd.f32 %v5937_v21, %v5931_v46  ;;  %v5952_v17 = vrot.slane %v5946_v56, 2 }
 0x69f   :  { %7466 = vpow2.f32 %v6468_v33  ;;  %v5957_v61 = vadd.f32 %v5951_v23, %v5942_v25  ;;  %v6204_v23 = vpop.permute.xlu1 %6203 }
 0x6a0   :  { %7468 = vpow2.f32 %v6471_v12  ;;  %v5958_v43 = vadd.f32 %v5952_v17, %v5943_v53  ;;  %v7520_v12 = vmov 1966171168  }
 0x6a1   :  { %7470 = vpow2.f32 %v6469_v54  ;;  %v6474_v60 = vmul.f32 -1.442695, %v5957_v61  ;;  %v6218_v25 = vunpack.c.l.s4 %v7520_v12 }
 0x6a2   :  { %7472 = vpow2.f32 %v6472_v24  ;;  %v6475_v47 = vmul.f32 -1.442695, %v5958_v43 }
 0x6a3   :  { %7474 = vpow2.f32 %v6474_v60  ;;  %v6219_v54 = vunpack.c.0.s8 %v6218_v25 }
 0x6a4   :  { %7476 = vpow2.f32 %v6475_v47 }
 0x6a9   :  { %v7467_v0 = vpop.eup %7466 }
 0x6aa   :  { %v7469_v63 = vpop.eup %7468  ;;  %v5825_v37 = vadd.f32 1.0, %v7467_v0 }
 0x6ab   :  { %v7471_v1 = vpop.eup %7470  ;;  %v5903_v36 = vadd.f32 1.0, %v7469_v63  ;;  %v6222_v63 = vsub.s32 %v6219_v54, %v11459_v7 }
 0x6ac   :  { %v7473_v52 = vpop.eup %7472  ;;  %7478 = vrcp.f32 %v5825_v37  ;;  %v5826_v32 = vadd.f32 1.0, %v7471_v1 }
 0x6ad   :  { %v7475_v30 = vpop.eup %7474  ;;  %7480 = vrcp.f32 %v5903_v36  ;;  %v5904_v28 = vadd.f32 1.0, %v7473_v52 }
 0x6ae   :  { %v7477_v15 = vpop.eup %7476  ;;  %7482 = vrcp.f32 %v5826_v32  ;;  %v5969_v22 = vadd.f32 1.0, %v7475_v30  ;;  %v11460_v30 = vlaneseq }
 0x6af   :  { %7484 = vrcp.f32 %v5904_v28  ;;  %v5970_v49 = vadd.f32 1.0, %v7477_v15 }
 0x6b0   :  { %7486 = vrcp.f32 %v5969_v22  ;;  %vm6242_vm13 = vcmp.lt.s32.totalorder %v11460_v30, 384 }
 0x6b1   :  { %7488 = vrcp.f32 %v5970_v49 }
 0x6b6   :  { %v7479_v5 = vpop.eup %7478 }
 0x6b7   :  { %v7481_v29 = vpop.eup %7480  ;;  %v5837_v16 = vrot.slane %v7479_v5, %v7964_v2 }
 0x6b8   :  { %v7483_v62 = vpop.eup %7482  ;;  %v5915_v42 = vrot.slane %v7481_v29, %v10801_v9 }
 0x6b9   :  { %v7485_v19 = vpop.eup %7484  ;;  %v5841_v26 = vrot.slane %v7483_v62, %v7964_v2  ;;  %v5846_v34 = vmul.f32 %v5837_v16, %v10760_v44 }
 0x6ba   :  { %v7487_v38 = vpop.eup %7486  ;;  %v5919_v20 = vrot.slane %v7485_v19, %v10801_v9  ;;  %v5924_v3 = vmul.f32 %v5915_v42, %v10754_v55 }
 0x6bb   :  { %v7489_v31 = vpop.eup %7488  ;;  %v5847_v58 = vmul.f32 %v5841_v26, %v10756_v51  ;;  %v5981_v48 = vrot.slane %v7487_v38, %v7958_v4  ;;  %v6100_v51 = vpop.f32.mrb[48].mxu0 }
 0x6bc   :  { %v5925_v11 = vmul.f32 %v5919_v20, %v10758_v39  ;;  %v5985_v13 = vrot.slane %v7489_v31, %v7958_v4  ;;  %v5927_v8 = vadd.f32 %v5924_v3, %v5846_v34  ;;  %v6059_v4 = vpop.f32.mrb[44].mxu1  ;;  %v6516_v39 = vpop.f32.mrb[49].mxu0 }
 0x6bd   :  { %v5990_v27 = vmul.f32 %v5981_v48, %v10768_v14  ;;  %v6061_v59 = vpop.f32.mrb[45].mxu1  ;;  %v6103_v14 = vpop.f32.mrb[50].mxu0 }
 0x6be   :  { %v5928_v40 = vadd.f32 %v5925_v11, %v5847_v58  ;;  %v5991_v44 = vmul.f32 %v5985_v13, %v10772_v10  ;;  %v6063_v41 = vpop.f32.mrb[46].mxu1  ;;  %v6517_v18 = vpop.f32.mrb[51].mxu0 }
 0x6bf   :  { %v5993_v45 = vadd.f32 %v5990_v27, %v5927_v8  ;;  %v6064_v10 = vpop.f32.mrb[47].mxu1 }
 0x6c0   :  { %v5994_v46 = vadd.f32 %v5991_v44, %v5928_v40 }
 0x6c1   :  { %v5997_v9 = vpack.c.bf16 %v5993_v45, %v5993_v45 }
 0x6c2   :  { %v5998_v57 = vpack.c.bf16 %v5994_v46, %v5994_v46 }
 0x6c3   :  { %v6111_v55 = vsel %vm183_vm1, %v5997_v9, 0 }
 0x6c4   :  { %6479 = vmatprep.subr.msk.bf16.mxu1 %vm183_vm1, %v5998_v57 }
 0x6c5   :  { %6120 = vmatpush1.bf16.msra.mxu1 %v6111_v55 }
 0x6c8   :  { %6480 = vmatmul.mubr.msk.bf16.vlgmr.msra.gmra.mrb[48].mxu1 %vm6106_vm12, %v10813_v6  ;;  %v6209_v6 = vrot.slane %v6204_v23, %v7964_v2 }
 0x735   :  { %v6194_v50 = vpop.f32.mrb[52].mxu0 }
 0x736   :  { %v6195_v35 = vadd.f32 %v6194_v50, %v6100_v51  ;;  %v6522_v21 = vpop.f32.mrb[53].mxu0 }
 0x737   :  { %v6197_v56 = vpop.f32.mrb[54].mxu0 }
 0x738   :  { %v6523_v33 = vpop.f32.mrb[55].mxu0  ;;  %v6212_v0 = vadd.f32 %v6209_v6, %v6195_v35 }
 0x73a   :  { %v6230_v36 = vrot.slane %v6212_v0, %v6222_v63 }
 0x79b   :  { %v6153_v24 = vpop.f32.mrb[48].mxu1 }
 0x79c   :  { %v6154_v53 = vadd.f32 %v6153_v24, %v6059_v4  ;;  %v6155_v17 = vpop.f32.mrb[49].mxu1 }
 0x79d   :  { %v6156_v61 = vadd.f32 %v6155_v17, %v6061_v59  ;;  %v6157_v43 = vpop.f32.mrb[50].mxu1 }
 0x79e   :  { %v6210_v60 = vadd.f32 %v6209_v6, %v6154_v53  ;;  %v6158_v47 = vpop.f32.mrb[51].mxu1 }
 0x79f   :  { %v6211_v37 = vadd.f32 %v6209_v6, %v6156_v61 }
 0x7a1   :  { %v6216_v1 = vcombine.low %v6210_v60, %v6211_v37 }
 0x7a3   :  { %v6223_v52 = vrot.slane %v6216_v1, %v6222_v63 }
 0x7a5   :  { %v6231_v32 = vcombine.low %v6223_v52, %v6230_v36 }
 0x7a7   :  { %v6238_v28 = vrot.slane %v6231_v32, %v6222_v63 }
 0x7a9   :  { %6244 = vst.msk [vmem:[#allocation4] sm:$0x7] %vm6242_vm13, %v6238_v28 }
 0x7aa   :  { %7501 = shalt.err (!%p7498_p4)
}
 0x7ab   :  { %s7502_s3 = scalar_lea.hbm %s10878_s14, 48 }
 0x7ac   :  { %p7503_p5 = scmp.ne.s32.totalorder %s10878_s14, %s7502_s3  ;;  %p7506_p6 = scmp.lt.u32.totalorder %s7502_s3, %s10878_s14 }
 0x7ae   :  { %p7508_p7 = pnand %p7506_p6, %p7503_p5 }
 0x7b0   :  { %7511 = shalt.err (!%p7508_p7)
}
 0x7b1   :  { %6254 = dma.vmem_to_hbm [thread:$0]  %s6252_s25, 48, %s10878_s14, [#allocation5]  }
 0x7b2   :  { %7512 = dma.done.wait [#allocation5], 48  }
 0x7b3   :  { %7513 = vsyncadd [#allocation5], 4294967248 }
 0x7b4   :  { %6258 = vsyncpa [#allocation5], 1 }

</bundles_post_ra>
